<compile_context>
chip_gen: v7x
topology: tpu7x:2x2x1
jax: 0.10.0
libtpu: 0.0.40
codegen_flags: <defaults>
</compile_context>

<pallas_src>
import functools

import jax
import jax.numpy as jnp
from jax.experimental import pallas as pl
from jax.experimental.pallas import tpu as pltpu


_VMEM_LIMIT = 32 * 1024 * 1024  # within v5e/v6e/v7x scoped-VMEM budgets at these shapes


def _round_up(x, m):
    return (x + m - 1) // m * m


# ---------------------------------------------------------------------------
# Pallas kernels
# ---------------------------------------------------------------------------
def _matmul_relu_kernel(a_ref, w_ref, o_ref):
    """(tm, K) x (K, C) tile: matmul (f32 acc) + fused ReLU, bf16 store."""
    acc = jnp.dot(a_ref[...], w_ref[...], preferred_element_type=jnp.float32)
    o_ref[...] = jnp.maximum(acc, 0.0).astype(o_ref.dtype)


def matmul_relu_tiled(a, w, *, tm=128):
    """M-tiled matmul + ReLU. Weight block is constant across the grid (VMEM-resident)."""
    M, K = a.shape
    K2, C = w.shape
    assert K == K2 and M % tm == 0 and C % 128 == 0
    return pl.pallas_call(
        _matmul_relu_kernel,
        out_shape=jax.ShapeDtypeStruct((M, C), jnp.bfloat16),
        grid=(M // tm,),
        in_specs=[
            pl.BlockSpec((tm, K), lambda i: (i, 0)),
            pl.BlockSpec((K, C), lambda i: (0, 0)),
        ],
        out_specs=pl.BlockSpec((tm, C), lambda i: (i, 0)),
        compiler_params=pltpu.CompilerParams(
            dimension_semantics=("parallel",),
            vmem_limit_bytes=_VMEM_LIMIT,
        ),
    )(a, w)


def _matmul_relu_bn_kernel(a_ref, w_ref, g_ref, b_ref, o_ref, *, m_true, eps):
    """matmul (f32 acc) + ReLU + training-mode BatchNorm fused in the epilogue.

    Zero-padded rows of `a` produce zero rows after ReLU and therefore contribute
    nothing to sum / sum-of-squares; dividing by the true row count keeps the
    batch statistics exact (biased variance, like PyTorch training-mode BN).
    """
    acc = jnp.dot(a_ref[...], w_ref[...], preferred_element_type=jnp.float32)
    acc = jnp.maximum(acc, 0.0)
    inv_m = 1.0 / m_true
    mean = jnp.sum(acc, axis=0, keepdims=True) * inv_m
    ex2 = jnp.sum(acc * acc, axis=0, keepdims=True) * inv_m
    var = ex2 - mean * mean
    scale = jax.lax.rsqrt(var + eps) * g_ref[...]
    o_ref[...] = ((acc - mean) * scale + b_ref[...]).astype(o_ref.dtype)


def matmul_relu_bn(a, w, gamma, beta, *, m_true, eps=1e-5):
    M, K = a.shape
    K2, C = w.shape
    assert K == K2
    kern = functools.partial(_matmul_relu_bn_kernel, m_true=float(m_true), eps=eps)
    return pl.pallas_call(
        kern,
        out_shape=jax.ShapeDtypeStruct((M, C), jnp.bfloat16),
        grid=(1,),
        in_specs=[
            pl.BlockSpec((M, K), lambda i: (0, 0)),
            pl.BlockSpec((K, C), lambda i: (0, 0)),
            pl.BlockSpec((1, C), lambda i: (0, 0)),
            pl.BlockSpec((1, C), lambda i: (0, 0)),
        ],
        out_specs=pl.BlockSpec((M, C), lambda i: (0, 0)),
        compiler_params=pltpu.CompilerParams(
            dimension_semantics=("arbitrary",),
            vmem_limit_bytes=_VMEM_LIMIT,
        ),
    )(a, w, gamma.reshape(1, C), beta.reshape(1, C))


def _matmul_sigmoid_kernel(a_ref, w_ref, o_ref):
    acc = jnp.dot(a_ref[...], w_ref[...], preferred_element_type=jnp.float32)
    o_ref[...] = jax.nn.sigmoid(acc)


def matmul_sigmoid(a, w):
    M, K = a.shape
    K2, C = w.shape
    assert K == K2
    return pl.pallas_call(
        _matmul_sigmoid_kernel,
        out_shape=jax.ShapeDtypeStruct((M, C), jnp.float32),
        grid=(1,),
        in_specs=[
            pl.BlockSpec((M, K), lambda i: (0, 0)),
            pl.BlockSpec((K, C), lambda i: (0, 0)),
        ],
        out_specs=pl.BlockSpec((M, C), lambda i: (0, 0)),
        compiler_params=pltpu.CompilerParams(
            dimension_semantics=("arbitrary",),
            vmem_limit_bytes=_VMEM_LIMIT,
        ),
    )(a, w)


# ---------------------------------------------------------------------------
# Plain-JAX glue: im2col + weight packing
# ---------------------------------------------------------------------------
def im2col(x_nhwc, kh, kw, stride, pad, row_align=8):
    """(N,H,W,C) -> padded (M_pad, KH*KW*C) patch matrix; column order (kh, kw, cin)."""
    N, H, W, C = x_nhwc.shape
    xp = jnp.pad(x_nhwc, ((0, 0), (pad, pad), (pad, pad), (0, 0)))
    OH = (H + 2 * pad - kh) // stride + 1
    OW = (W + 2 * pad - kw) // stride + 1
    cols = []
    for i in range(kh):
        for j in range(kw):
            cols.append(xp[:, i:i + stride * OH:stride, j:j + stride * OW:stride, :])
    patches = jnp.stack(cols, axis=3)                    # (N, OH, OW, KH*KW, C)
    a = patches.reshape(N * OH * OW, kh * kw * C)
    m_true = N * OH * OW
    m_pad = _round_up(m_true, row_align)
    if m_pad != m_true:
        a = jnp.pad(a, ((0, m_pad - m_true), (0, 0)))    # zero rows (BN-safe, sliced off)
    return a, (N, OH, OW, m_true)


def conv_weight_to_mat(w_oihw, pad_cin_to=None, pad_cout_to=None):
    """PyTorch (Cout, Cin, KH, KW) -> bf16 (KH*KW*Cin, Cout), matching im2col order."""
    co, ci, kh, kw = w_oihw.shape
    if pad_cin_to is not None and pad_cin_to != ci:
        w_oihw = jnp.pad(w_oihw, ((0, 0), (0, pad_cin_to - ci), (0, 0), (0, 0)))
        ci = pad_cin_to
    m = jnp.transpose(w_oihw, (2, 3, 1, 0)).reshape(kh * kw * ci, co)
    if pad_cout_to is not None and pad_cout_to != co:
        m = jnp.pad(m, ((0, 0), (0, pad_cout_to - co)))
    return m.astype(jnp.bfloat16)


# ---------------------------------------------------------------------------
# Parameter construction (deterministic, DCGAN-style init)
# ---------------------------------------------------------------------------
def init_params():
    k = jax.random.PRNGKey(42)
    k1, k2, k3, k4, k5 = jax.random.split(k, 5)

    def w(key, co, ci, kh, kw):
        return jax.random.normal(key, (co, ci, kh, kw), dtype=jnp.float32) * 0.02

    return {
        # conv1: output channels padded 64 -> 128 for lane-dense stores
        "w1": conv_weight_to_mat(w(k1, 64, 1, 4, 4), pad_cout_to=128),    # (16, 128)
        # conv2: input channels padded 64 -> 128 to match conv1's padded activation
        "w2": conv_weight_to_mat(w(k2, 128, 64, 4, 4), pad_cin_to=128),   # (2048, 128)
        "w3": conv_weight_to_mat(w(k3, 256, 128, 4, 4)),                  # (2048, 256)
        "w4": conv_weight_to_mat(w(k4, 512, 256, 3, 3)),                  # (2304, 512)
        # conv5: output channels padded 1 -> 128; only column 0 is real
        "w5": conv_weight_to_mat(w(k5, 1, 512, 3, 3), pad_cout_to=128),   # (4608, 128)
        "g2": jnp.ones((128,), jnp.float32), "b2": jnp.zeros((128,), jnp.float32),
        "g3": jnp.ones((256,), jnp.float32), "b3": jnp.zeros((256,), jnp.float32),
        "g4": jnp.ones((512,), jnp.float32), "b4": jnp.zeros((512,), jnp.float32),
    }


# ---------------------------------------------------------------------------
# Forward pass (mirrors discriminatorNet.forward)
# ---------------------------------------------------------------------------
def discriminator_forward(x_nchw, params):
    x = jnp.transpose(x_nchw, (0, 2, 3, 1)).astype(jnp.bfloat16)   # NCHW -> NHWC, bf16

    # conv1 (1->64 padded to 128, k4 s2 p1) + ReLU  -- M-tiled grid, parallel
    a, (n, oh, ow, m) = im2col(x, 4, 4, 2, 1, row_align=128)
    h = matmul_relu_tiled(a, params["w1"], tm=128)
    x = h[:m].reshape(n, oh, ow, 128)                  # channels 64..127 are zero

    # conv2 (64->128, k4 s2 p1) + ReLU + bn2 (fused)
    a, (n, oh, ow, m) = im2col(x, 4, 4, 2, 1)
    h = matmul_relu_bn(a, params["w2"], params["g2"], params["b2"], m_true=m)
    x = h[:m].reshape(n, oh, ow, 128)

    # conv3 (128->256, k4 s2 p1) + ReLU + bn3 (fused)
    a, (n, oh, ow, m) = im2col(x, 4, 4, 2, 1)
    h = matmul_relu_bn(a, params["w3"], params["g3"], params["b3"], m_true=m)
    x = h[:m].reshape(n, oh, ow, 256)

    # conv4 (256->512, k3 s1 p1) + ReLU + bn4 (fused)
    a, (n, oh, ow, m) = im2col(x, 3, 3, 1, 1)
    h = matmul_relu_bn(a, params["w4"], params["g4"], params["b4"], m_true=m)
    x = h[:m].reshape(n, oh, ow, 512)

    # conv5 (512->1 padded to 128, k3 s1 p0) + sigmoid, then view(-1, 1)
    a, (n, oh, ow, m) = im2col(x, 3, 3, 1, 0)
    h = matmul_sigmoid(a, params["w5"])                # (M_pad, 128); col 0 is real
    return h[:m, :1].reshape(-1, 1)


# ---------------------------------------------------------------------------
if __name__ == "__main__":
    params = init_params()
    # MNIST-sized input: batch=2, 1 channel, 28x28 (NCHW like the PyTorch module)
    x = jax.random.normal(jax.random.PRNGKey(0), (2, 1, 28, 28), dtype=jnp.float32)

    fwd = jax.jit(functools.partial(discriminator_forward, params=params))
    out = jax.block_until_ready(fwd(x))

    assert out.shape == (2, 1), out.shape
    assert bool(jnp.all(jnp.isfinite(out)))
    assert bool(jnp.all((out >= 0.0) & (out <= 1.0)))   # sigmoid range
    print("KERNEL_OK")
</pallas_src>

<mosaic_0001>
module attributes {stable_mosaic.version = 11 : i64} {
  func.func @_matmul_relu_kernel(%arg0: i32, %arg1: memref<128x16xbf16, #tpu.memory_space<vmem>>, %arg2: memref<16x128xbf16, #tpu.memory_space<vmem>>, %arg3: memref<128x128xbf16, #tpu.memory_space<vmem>>) attributes {dimension_semantics = [#tpu.dimension_semantics<parallel>], iteration_bounds = array<i64: 4>, scalar_prefetch = 0 : i64, scratch_operands = 0 : i64, tpu.core_type = #tpu.core_type<tc>, window_params = [{transform_indices = @transform_0, window_bounds = array<i64: 128, 16>}, {pipeline_mode = #tpu.pipeline_mode<synchronous>, transform_indices = @transform_1, window_bounds = array<i64: 16, 128>}, {transform_indices = @transform_2, window_bounds = array<i64: 128, 128>}]} {
    %c0 = arith.constant 0 : index
    %c0_0 = arith.constant 0 : index
    %0 = vector.load %arg1[%c0, %c0_0] : memref<128x16xbf16, #tpu.memory_space<vmem>>, vector<128x16xbf16>
    %c0_1 = arith.constant 0 : index
    %c0_2 = arith.constant 0 : index
    %1 = vector.load %arg2[%c0_1, %c0_2] : memref<16x128xbf16, #tpu.memory_space<vmem>>, vector<16x128xbf16>
    %cst = arith.constant dense<0.000000e+00> : vector<128x128xf32>
    %2 = tpu.matmul %0, %1, %cst {dimension_numbers = #tpu.dot_dimension_numbers<[1], [0], [0], [1], [0, 0, 1, 1], [], []>} : vector<128x16xbf16>, vector<16x128xbf16>, vector<128x128xf32> -> vector<128x128xf32>
    %cst_3 = arith.constant 0.000000e+00 : f32
    %3 = vector.broadcast %cst_3 : f32 to vector<128x128xf32>
    %4 = arith.maximumf %2, %3 : vector<128x128xf32>
    %5 = arith.truncf %4 : vector<128x128xf32> to vector<128x128xbf16>
    %c0_4 = arith.constant 0 : index
    %c0_5 = arith.constant 0 : index
    %6 = vector.load %arg3[%c0_4, %c0_5] : memref<128x128xbf16, #tpu.memory_space<vmem>>, vector<128x128xbf16>
    tpu.vector_store %arg3[%c0_4, %c0_5], %5 {strides = array<i32>} : memref<128x128xbf16, #tpu.memory_space<vmem>>, vector<128x128xbf16>,
    return
  }
  func.func @transform_0(%arg0: i32) -> (i32, i32) {
    %c0_i32 = arith.constant 0 : i32
    %c0_i32_0 = arith.constant 0 : i32
    return %arg0, %c0_i32 : i32, i32
  }
  func.func @transform_1(%arg0: i32) -> (i32, i32) {
    %c0_i32 = arith.constant 0 : i32
    %c0_i32_0 = arith.constant 0 : i32
    %c0_i32_1 = arith.constant 0 : i32
    return %c0_i32, %c0_i32_0 : i32, i32
  }
  func.func @transform_2(%arg0: i32) -> (i32, i32) {
    %c0_i32 = arith.constant 0 : i32
    %c0_i32_0 = arith.constant 0 : i32
    return %arg0, %c0_i32 : i32, i32
  }
}

module attributes {stable_mosaic.version = 11 : i64} {
  func.func @_matmul_relu_bn_kernel(%arg0: i32, %arg1: memref<104x2048xbf16, #tpu.memory_space<vmem>>, %arg2: memref<2048x128xbf16, #tpu.memory_space<vmem>>, %arg3: memref<1x128xf32, #tpu.memory_space<vmem>>, %arg4: memref<1x128xf32, #tpu.memory_space<vmem>>, %arg5: memref<104x128xbf16, #tpu.memory_space<vmem>>) attributes {dimension_semantics = [#tpu.dimension_semantics<arbitrary>], iteration_bounds = array<i64: 1>, scalar_prefetch = 0 : i64, scratch_operands = 0 : i64, tpu.core_type = #tpu.core_type<tc>, window_params = [{pipeline_mode = #tpu.pipeline_mode<synchronous>, transform_indices = @transform_0, window_bounds = array<i64: 104, 2048>}, {pipeline_mode = #tpu.pipeline_mode<synchronous>, transform_indices = @transform_1, window_bounds = array<i64: 2048, 128>}, {pipeline_mode = #tpu.pipeline_mode<synchronous>, transform_indices = @transform_2, window_bounds = array<i64: 1, 128>}, {pipeline_mode = #tpu.pipeline_mode<synchronous>, transform_indices = @transform_3, window_bounds = array<i64: 1, 128>}, {pipeline_mode = #tpu.pipeline_mode<synchronous>, transform_indices = @transform_4, window_bounds = array<i64: 104, 128>}]} {
    %c0 = arith.constant 0 : index
    %c0_0 = arith.constant 0 : index
    %0 = vector.load %arg1[%c0, %c0_0] : memref<104x2048xbf16, #tpu.memory_space<vmem>>, vector<104x2048xbf16>
    %c0_1 = arith.constant 0 : index
    %c0_2 = arith.constant 0 : index
    %1 = vector.load %arg2[%c0_1, %c0_2] : memref<2048x128xbf16, #tpu.memory_space<vmem>>, vector<2048x128xbf16>
    %cst = arith.constant dense<0.000000e+00> : vector<104x128xf32>
    %2 = tpu.matmul %0, %1, %cst {dimension_numbers = #tpu.dot_dimension_numbers<[1], [0], [0], [1], [0, 0, 1, 1], [], []>} : vector<104x2048xbf16>, vector<2048x128xbf16>, vector<104x128xf32> -> vector<104x128xf32>
    %cst_3 = arith.constant 0.000000e+00 : f32
    %3 = vector.broadcast %cst_3 : f32 to vector<104x128xf32>
    %4 = arith.maximumf %2, %3 : vector<104x128xf32>
    %cst_4 = arith.constant dense<0.000000e+00> : vector<128xf32>
    %5 = vector.multi_reduction <add>, %4, %cst_4 [0] : vector<104x128xf32> to vector<128xf32>
    %6 = vector.shape_cast %5 : vector<128xf32> to vector<1x128xf32>
    %cst_5 = arith.constant 0.0102040814 : f32
    %7 = vector.broadcast %cst_5 : f32 to vector<1x128xf32>
    %8 = arith.mulf %6, %7 : vector<1x128xf32>
    %9 = arith.mulf %4, %4 : vector<104x128xf32>
    %cst_6 = arith.constant dense<0.000000e+00> : vector<128xf32>
    %10 = vector.multi_reduction <add>, %9, %cst_6 [0] : vector<104x128xf32> to vector<128xf32>
    %11 = vector.shape_cast %10 : vector<128xf32> to vector<1x128xf32>
    %cst_7 = arith.constant 0.0102040814 : f32
    %12 = vector.broadcast %cst_7 : f32 to vector<1x128xf32>
    %13 = arith.mulf %11, %12 : vector<1x128xf32>
    %14 = arith.mulf %8, %8 : vector<1x128xf32>
    %15 = arith.subf %13, %14 : vector<1x128xf32>
    %cst_8 = arith.constant 9.99999974E-6 : f32
    %16 = vector.broadcast %cst_8 : f32 to vector<1x128xf32>
    %17 = arith.addf %15, %16 : vector<1x128xf32>
    %18 = math.rsqrt %17 : vector<1x128xf32>
    %c0_9 = arith.constant 0 : index
    %c0_10 = arith.constant 0 : index
    %19 = vector.load %arg3[%c0_9, %c0_10] : memref<1x128xf32, #tpu.memory_space<vmem>>, vector<1x128xf32>
    %20 = arith.mulf %18, %19 : vector<1x128xf32>
    %21 = vector.broadcast %8 : vector<1x128xf32> to vector<104x128xf32>
    %22 = arith.subf %4, %21 : vector<104x128xf32>
    %23 = vector.broadcast %20 : vector<1x128xf32> to vector<104x128xf32>
    %24 = arith.mulf %22, %23 : vector<104x128xf32>
    %c0_11 = arith.constant 0 : index
    %c0_12 = arith.constant 0 : index
    %25 = vector.load %arg4[%c0_11, %c0_12] : memref<1x128xf32, #tpu.memory_space<vmem>>, vector<1x128xf32>
    %26 = vector.broadcast %25 : vector<1x128xf32> to vector<104x128xf32>
    %27 = arith.addf %24, %26 : vector<104x128xf32>
    %28 = arith.truncf %27 : vector<104x128xf32> to vector<104x128xbf16>
    %c0_13 = arith.constant 0 : index
    %c0_14 = arith.constant 0 : index
    %29 = vector.load %arg5[%c0_13, %c0_14] : memref<104x128xbf16, #tpu.memory_space<vmem>>, vector<104x128xbf16>
    tpu.vector_store %arg5[%c0_13, %c0_14], %28 {strides = array<i32>} : memref<104x128xbf16, #tpu.memory_space<vmem>>, vector<104x128xbf16>,
    return
  }
  func.func @transform_0(%arg0: i32) -> (i32, i32) {
    %c0_i32 = arith.constant 0 : i32
    %c0_i32_0 = arith.constant 0 : i32
    %c0_i32_1 = arith.constant 0 : i32
    return %c0_i32, %c0_i32_0 : i32, i32
  }
  func.func @transform_1(%arg0: i32) -> (i32, i32) {
    %c0_i32 = arith.constant 0 : i32
    %c0_i32_0 = arith.constant 0 : i32
    %c0_i32_1 = arith.constant 0 : i32
    return %c0_i32, %c0_i32_0 : i32, i32
  }
  func.func @transform_2(%arg0: i32) -> (i32, i32) {
    %c0_i32 = arith.constant 0 : i32
    %c0_i32_0 = arith.constant 0 : i32
    %c0_i32_1 = arith.constant 0 : i32
    return %c0_i32, %c0_i32_0 : i32, i32
  }
  func.func @transform_3(%arg0: i32) -> (i32, i32) {
    %c0_i32 = arith.constant 0 : i32
    %c0_i32_0 = arith.constant 0 : i32
    %c0_i32_1 = arith.constant 0 : i32
    return %c0_i32, %c0_i32_0 : i32, i32
  }
  func.func @transform_4(%arg0: i32) -> (i32, i32) {
    %c0_i32 = arith.constant 0 : i32
    %c0_i32_0 = arith.constant 0 : i32
    %c0_i32_1 = arith.constant 0 : i32
    return %c0_i32, %c0_i32_0 : i32, i32
  }
}

module attributes {stable_mosaic.version = 11 : i64} {
  func.func @_matmul_relu_bn_kernel(%arg0: i32, %arg1: memref<24x2048xbf16, #tpu.memory_space<vmem>>, %arg2: memref<2048x256xbf16, #tpu.memory_space<vmem>>, %arg3: memref<1x256xf32, #tpu.memory_space<vmem>>, %arg4: memref<1x256xf32, #tpu.memory_space<vmem>>, %arg5: memref<24x256xbf16, #tpu.memory_space<vmem>>) attributes {dimension_semantics = [#tpu.dimension_semantics<arbitrary>], iteration_bounds = array<i64: 1>, scalar_prefetch = 0 : i64, scratch_operands = 0 : i64, tpu.core_type = #tpu.core_type<tc>, window_params = [{pipeline_mode = #tpu.pipeline_mode<synchronous>, transform_indices = @transform_0, window_bounds = array<i64: 24, 2048>}, {pipeline_mode = #tpu.pipeline_mode<synchronous>, transform_indices = @transform_1, window_bounds = array<i64: 2048, 256>}, {pipeline_mode = #tpu.pipeline_mode<synchronous>, transform_indices = @transform_2, window_bounds = array<i64: 1, 256>}, {pipeline_mode = #tpu.pipeline_mode<synchronous>, transform_indices = @transform_3, window_bounds = array<i64: 1, 256>}, {pipeline_mode = #tpu.pipeline_mode<synchronous>, transform_indices = @transform_4, window_bounds = array<i64: 24, 256>}]} {
    %c0 = arith.constant 0 : index
    %c0_0 = arith.constant 0 : index
    %0 = vector.load %arg1[%c0, %c0_0] : memref<24x2048xbf16, #tpu.memory_space<vmem>>, vector<24x2048xbf16>
    %c0_1 = arith.constant 0 : index
    %c0_2 = arith.constant 0 : index
    %1 = vector.load %arg2[%c0_1, %c0_2] : memref<2048x256xbf16, #tpu.memory_space<vmem>>, vector<2048x256xbf16>
    %cst = arith.constant dense<0.000000e+00> : vector<24x256xf32>
    %2 = tpu.matmul %0, %1, %cst {dimension_numbers = #tpu.dot_dimension_numbers<[1], [0], [0], [1], [0, 0, 1, 1], [], []>} : vector<24x2048xbf16>, vector<2048x256xbf16>, vector<24x256xf32> -> vector<24x256xf32>
    %cst_3 = arith.constant 0.000000e+00 : f32
    %3 = vector.broadcast %cst_3 : f32 to vector<24x256xf32>
    %4 = arith.maximumf %2, %3 : vector<24x256xf32>
    %cst_4 = arith.constant dense<0.000000e+00> : vector<256xf32>
    %5 = vector.multi_reduction <add>, %4, %cst_4 [0] : vector<24x256xf32> to vector<256xf32>
    %6 = vector.shape_cast %5 : vector<256xf32> to vector<1x256xf32>
    %cst_5 = arith.constant 0.055555556 : f32
    %7 = vector.broadcast %cst_5 : f32 to vector<1x256xf32>
    %8 = arith.mulf %6, %7 : vector<1x256xf32>
    %9 = arith.mulf %4, %4 : vector<24x256xf32>
    %cst_6 = arith.constant dense<0.000000e+00> : vector<256xf32>
    %10 = vector.multi_reduction <add>, %9, %cst_6 [0] : vector<24x256xf32> to vector<256xf32>
    %11 = vector.shape_cast %10 : vector<256xf32> to vector<1x256xf32>
    %cst_7 = arith.constant 0.055555556 : f32
    %12 = vector.broadcast %cst_7 : f32 to vector<1x256xf32>
    %13 = arith.mulf %11, %12 : vector<1x256xf32>
    %14 = arith.mulf %8, %8 : vector<1x256xf32>
    %15 = arith.subf %13, %14 : vector<1x256xf32>
    %cst_8 = arith.constant 9.99999974E-6 : f32
    %16 = vector.broadcast %cst_8 : f32 to vector<1x256xf32>
    %17 = arith.addf %15, %16 : vector<1x256xf32>
    %18 = math.rsqrt %17 : vector<1x256xf32>
    %c0_9 = arith.constant 0 : index
    %c0_10 = arith.constant 0 : index
    %19 = vector.load %arg3[%c0_9, %c0_10] : memref<1x256xf32, #tpu.memory_space<vmem>>, vector<1x256xf32>
    %20 = arith.mulf %18, %19 : vector<1x256xf32>
    %21 = vector.broadcast %8 : vector<1x256xf32> to vector<24x256xf32>
    %22 = arith.subf %4, %21 : vector<24x256xf32>
    %23 = vector.broadcast %20 : vector<1x256xf32> to vector<24x256xf32>
    %24 = arith.mulf %22, %23 : vector<24x256xf32>
    %c0_11 = arith.constant 0 : index
    %c0_12 = arith.constant 0 : index
    %25 = vector.load %arg4[%c0_11, %c0_12] : memref<1x256xf32, #tpu.memory_space<vmem>>, vector<1x256xf32>
    %26 = vector.broadcast %25 : vector<1x256xf32> to vector<24x256xf32>
    %27 = arith.addf %24, %26 : vector<24x256xf32>
    %28 = arith.truncf %27 : vector<24x256xf32> to vector<24x256xbf16>
    %c0_13 = arith.constant 0 : index
    %c0_14 = arith.constant 0 : index
    %29 = vector.load %arg5[%c0_13, %c0_14] : memref<24x256xbf16, #tpu.memory_space<vmem>>, vector<24x256xbf16>
    tpu.vector_store %arg5[%c0_13, %c0_14], %28 {strides = array<i32>} : memref<24x256xbf16, #tpu.memory_space<vmem>>, vector<24x256xbf16>,
    return
  }
  func.func @transform_0(%arg0: i32) -> (i32, i32) {
    %c0_i32 = arith.constant 0 : i32
    %c0_i32_0 = arith.constant 0 : i32
    %c0_i32_1 = arith.constant 0 : i32
    return %c0_i32, %c0_i32_0 : i32, i32
  }
  func.func @transform_1(%arg0: i32) -> (i32, i32) {
    %c0_i32 = arith.constant 0 : i32
    %c0_i32_0 = arith.constant 0 : i32
    %c0_i32_1 = arith.constant 0 : i32
    return %c0_i32, %c0_i32_0 : i32, i32
  }
  func.func @transform_2(%arg0: i32) -> (i32, i32) {
    %c0_i32 = arith.constant 0 : i32
    %c0_i32_0 = arith.constant 0 : i32
    %c0_i32_1 = arith.constant 0 : i32
    return %c0_i32, %c0_i32_0 : i32, i32
  }
  func.func @transform_3(%arg0: i32) -> (i32, i32) {
    %c0_i32 = arith.constant 0 : i32
    %c0_i32_0 = arith.constant 0 : i32
    %c0_i32_1 = arith.constant 0 : i32
    return %c0_i32, %c0_i32_0 : i32, i32
  }
  func.func @transform_4(%arg0: i32) -> (i32, i32) {
    %c0_i32 = arith.constant 0 : i32
    %c0_i32_0 = arith.constant 0 : i32
    %c0_i32_1 = arith.constant 0 : i32
    return %c0_i32, %c0_i32_0 : i32, i32
  }
}

module attributes {stable_mosaic.version = 11 : i64} {
  func.func @_matmul_relu_bn_kernel(%arg0: i32, %arg1: memref<24x2304xbf16, #tpu.memory_space<vmem>>, %arg2: memref<2304x512xbf16, #tpu.memory_space<vmem>>, %arg3: memref<1x512xf32, #tpu.memory_space<vmem>>, %arg4: memref<1x512xf32, #tpu.memory_space<vmem>>, %arg5: memref<24x512xbf16, #tpu.memory_space<vmem>>) attributes {dimension_semantics = [#tpu.dimension_semantics<arbitrary>], iteration_bounds = array<i64: 1>, scalar_prefetch = 0 : i64, scratch_operands = 0 : i64, tpu.core_type = #tpu.core_type<tc>, window_params = [{pipeline_mode = #tpu.pipeline_mode<synchronous>, transform_indices = @transform_0, window_bounds = array<i64: 24, 2304>}, {pipeline_mode = #tpu.pipeline_mode<synchronous>, transform_indices = @transform_1, window_bounds = array<i64: 2304, 512>}, {pipeline_mode = #tpu.pipeline_mode<synchronous>, transform_indices = @transform_2, window_bounds = array<i64: 1, 512>}, {pipeline_mode = #tpu.pipeline_mode<synchronous>, transform_indices = @transform_3, window_bounds = array<i64: 1, 512>}, {pipeline_mode = #tpu.pipeline_mode<synchronous>, transform_indices = @transform_4, window_bounds = array<i64: 24, 512>}]} {
    %c0 = arith.constant 0 : index
    %c0_0 = arith.constant 0 : index
    %0 = vector.load %arg1[%c0, %c0_0] : memref<24x2304xbf16, #tpu.memory_space<vmem>>, vector<24x2304xbf16>
    %c0_1 = arith.constant 0 : index
    %c0_2 = arith.constant 0 : index
    %1 = vector.load %arg2[%c0_1, %c0_2] : memref<2304x512xbf16, #tpu.memory_space<vmem>>, vector<2304x512xbf16>
    %cst = arith.constant dense<0.000000e+00> : vector<24x512xf32>
    %2 = tpu.matmul %0, %1, %cst {dimension_numbers = #tpu.dot_dimension_numbers<[1], [0], [0], [1], [0, 0, 1, 1], [], []>} : vector<24x2304xbf16>, vector<2304x512xbf16>, vector<24x512xf32> -> vector<24x512xf32>
    %cst_3 = arith.constant 0.000000e+00 : f32
    %3 = vector.broadcast %cst_3 : f32 to vector<24x512xf32>
    %4 = arith.maximumf %2, %3 : vector<24x512xf32>
    %cst_4 = arith.constant dense<0.000000e+00> : vector<512xf32>
    %5 = vector.multi_reduction <add>, %4, %cst_4 [0] : vector<24x512xf32> to vector<512xf32>
    %6 = vector.shape_cast %5 : vector<512xf32> to vector<1x512xf32>
    %cst_5 = arith.constant 0.055555556 : f32
    %7 = vector.broadcast %cst_5 : f32 to vector<1x512xf32>
    %8 = arith.mulf %6, %7 : vector<1x512xf32>
    %9 = arith.mulf %4, %4 : vector<24x512xf32>
    %cst_6 = arith.constant dense<0.000000e+00> : vector<512xf32>
    %10 = vector.multi_reduction <add>, %9, %cst_6 [0] : vector<24x512xf32> to vector<512xf32>
    %11 = vector.shape_cast %10 : vector<512xf32> to vector<1x512xf32>
    %cst_7 = arith.constant 0.055555556 : f32
    %12 = vector.broadcast %cst_7 : f32 to vector<1x512xf32>
    %13 = arith.mulf %11, %12 : vector<1x512xf32>
    %14 = arith.mulf %8, %8 : vector<1x512xf32>
    %15 = arith.subf %13, %14 : vector<1x512xf32>
    %cst_8 = arith.constant 9.99999974E-6 : f32
    %16 = vector.broadcast %cst_8 : f32 to vector<1x512xf32>
    %17 = arith.addf %15, %16 : vector<1x512xf32>
    %18 = math.rsqrt %17 : vector<1x512xf32>
    %c0_9 = arith.constant 0 : index
    %c0_10 = arith.constant 0 : index
    %19 = vector.load %arg3[%c0_9, %c0_10] : memref<1x512xf32, #tpu.memory_space<vmem>>, vector<1x512xf32>
    %20 = arith.mulf %18, %19 : vector<1x512xf32>
    %21 = vector.broadcast %8 : vector<1x512xf32> to vector<24x512xf32>
    %22 = arith.subf %4, %21 : vector<24x512xf32>
    %23 = vector.broadcast %20 : vector<1x512xf32> to vector<24x512xf32>
    %24 = arith.mulf %22, %23 : vector<24x512xf32>
    %c0_11 = arith.constant 0 : index
    %c0_12 = arith.constant 0 : index
    %25 = vector.load %arg4[%c0_11, %c0_12] : memref<1x512xf32, #tpu.memory_space<vmem>>, vector<1x512xf32>
    %26 = vector.broadcast %25 : vector<1x512xf32> to vector<24x512xf32>
    %27 = arith.addf %24, %26 : vector<24x512xf32>
    %28 = arith.truncf %27 : vector<24x512xf32> to vector<24x512xbf16>
    %c0_13 = arith.constant 0 : index
    %c0_14 = arith.constant 0 : index
    %29 = vector.load %arg5[%c0_13, %c0_14] : memref<24x512xbf16, #tpu.memory_space<vmem>>, vector<24x512xbf16>
    tpu.vector_store %arg5[%c0_13, %c0_14], %28 {strides = array<i32>} : memref<24x512xbf16, #tpu.memory_space<vmem>>, vector<24x512xbf16>,
    return
  }
  func.func @transform_0(%arg0: i32) -> (i32, i32) {
    %c0_i32 = arith.constant 0 : i32
    %c0_i32_0 = arith.constant 0 : i32
    %c0_i32_1 = arith.constant 0 : i32
    return %c0_i32, %c0_i32_0 : i32, i32
  }
  func.func @transform_1(%arg0: i32) -> (i32, i32) {
    %c0_i32 = arith.constant 0 : i32
    %c0_i32_0 = arith.constant 0 : i32
    %c0_i32_1 = arith.constant 0 : i32
    return %c0_i32, %c0_i32_0 : i32, i32
  }
  func.func @transform_2(%arg0: i32) -> (i32, i32) {
    %c0_i32 = arith.constant 0 : i32
    %c0_i32_0 = arith.constant 0 : i32
    %c0_i32_1 = arith.constant 0 : i32
    return %c0_i32, %c0_i32_0 : i32, i32
  }
  func.func @transform_3(%arg0: i32) -> (i32, i32) {
    %c0_i32 = arith.constant 0 : i32
    %c0_i32_0 = arith.constant 0 : i32
    %c0_i32_1 = arith.constant 0 : i32
    return %c0_i32, %c0_i32_0 : i32, i32
  }
  func.func @transform_4(%arg0: i32) -> (i32, i32) {
    %c0_i32 = arith.constant 0 : i32
    %c0_i32_0 = arith.constant 0 : i32
    %c0_i32_1 = arith.constant 0 : i32
    return %c0_i32, %c0_i32_0 : i32, i32
  }
}

module attributes {stable_mosaic.version = 11 : i64} {
  func.func @_matmul_sigmoid_kernel(%arg0: i32, %arg1: memref<8x4608xbf16, #tpu.memory_space<vmem>>, %arg2: memref<4608x128xbf16, #tpu.memory_space<vmem>>, %arg3: memref<8x128xf32, #tpu.memory_space<vmem>>) attributes {dimension_semantics = [#tpu.dimension_semantics<arbitrary>], iteration_bounds = array<i64: 1>, scalar_prefetch = 0 : i64, scratch_operands = 0 : i64, tpu.core_type = #tpu.core_type<tc>, window_params = [{pipeline_mode = #tpu.pipeline_mode<synchronous>, transform_indices = @transform_0, window_bounds = array<i64: 8, 4608>}, {pipeline_mode = #tpu.pipeline_mode<synchronous>, transform_indices = @transform_1, window_bounds = array<i64: 4608, 128>}, {pipeline_mode = #tpu.pipeline_mode<synchronous>, transform_indices = @transform_2, window_bounds = array<i64: 8, 128>}]} {
    %c0 = arith.constant 0 : index
    %c0_0 = arith.constant 0 : index
    %0 = vector.load %arg1[%c0, %c0_0] : memref<8x4608xbf16, #tpu.memory_space<vmem>>, vector<8x4608xbf16>
    %c0_1 = arith.constant 0 : index
    %c0_2 = arith.constant 0 : index
    %1 = vector.load %arg2[%c0_1, %c0_2] : memref<4608x128xbf16, #tpu.memory_space<vmem>>, vector<4608x128xbf16>
    %cst = arith.constant dense<0.000000e+00> : vector<8x128xf32>
    %2 = tpu.matmul %0, %1, %cst {dimension_numbers = #tpu.dot_dimension_numbers<[1], [0], [0], [1], [0, 0, 1, 1], [], []>} : vector<8x4608xbf16>, vector<4608x128xbf16>, vector<8x128xf32> -> vector<8x128xf32>
    %3 = arith.negf %2 : vector<8x128xf32>
    %4 = math.exp %3 : vector<8x128xf32>
    %cst_3 = arith.constant 1.000000e+00 : f32
    %5 = vector.broadcast %cst_3 : f32 to vector<8x128xf32>
    %6 = arith.addf %5, %4 : vector<8x128xf32>
    %7 = arith.divf %5, %6 : vector<8x128xf32>
    %c0_4 = arith.constant 0 : index
    %c0_5 = arith.constant 0 : index
    %8 = vector.load %arg3[%c0_4, %c0_5] : memref<8x128xf32, #tpu.memory_space<vmem>>, vector<8x128xf32>
    tpu.vector_store %arg3[%c0_4, %c0_5], %7 {strides = array<i32>} : memref<8x128xf32, #tpu.memory_space<vmem>>, vector<8x128xf32>,
    return
  }
  func.func @transform_0(%arg0: i32) -> (i32, i32) {
    %c0_i32 = arith.constant 0 : i32
    %c0_i32_0 = arith.constant 0 : i32
    %c0_i32_1 = arith.constant 0 : i32
    return %c0_i32, %c0_i32_0 : i32, i32
  }
  func.func @transform_1(%arg0: i32) -> (i32, i32) {
    %c0_i32 = arith.constant 0 : i32
    %c0_i32_0 = arith.constant 0 : i32
    %c0_i32_1 = arith.constant 0 : i32
    return %c0_i32, %c0_i32_0 : i32, i32
  }
  func.func @transform_2(%arg0: i32) -> (i32, i32) {
    %c0_i32 = arith.constant 0 : i32
    %c0_i32_0 = arith.constant 0 : i32
    %c0_i32_1 = arith.constant 0 : i32
    return %c0_i32, %c0_i32_0 : i32, i32
  }
}

</mosaic_0001>

<bundles_post_ra>
// kernel: discriminator_forward.5
= control target key start
LH: loop header
LB: loop body
LE: loop exit
PB: predicated region body
PF: predicated region fallthrough
CT: control target
= control target key end

     0   :  { %7 = vsyncpa [#allocation3], 0  ;;  %s739_s9 = smov 0   ;;  %s823_s0 = inlined_call_operand.vmem [shape: bf16[512,16], index: 0, kind: input, shape index: {}]   ;;  %s824_s1 = inlined_call_operand.hbm [shape: bf16[16,128], index: 1, kind: input, shape index: {}]   ;;  %s825_s2 = inlined_call_operand.vmem [shape: bf16[512,128], index: 2, kind: output, shape index: {}]  }
   0x1 LB: > { %s513_s10 = sadd.s32 4294967295, %s719_s9   ;;  %p515_p0 = scmp.ge.s32.totalorder %s719_s9, 1  ;;  %s719_s9 = sphi %s739_s9, %s13_s9  }
   0x2   : > { %p91_p1 = scmp.lt.s32.totalorder %s719_s9, 5  ;;  %s721_s11 = smov [#allocation2]  }
   0x3   : > { %s103_s12 = sshll.u32 %s721_s11, 4  ;;  %p753_p3 = scmp.eq.s32.totalorder %s513_s10, 0  ;;  %s104_s12 = int_to_ptr.vmem [resolvable:$true] %s103_s12 }
   0x4   : > { %p747_p2 = pnand %p515_p0, %p91_p1  ;;  %s681_s18 = scalar_lea.hbm %s824_s1, 128 }
   0x5   : > { %s830_s14 = scalar_select %p753_p3, 1, 0 }
   0x6   : > { %s829_s13 = scalar_select %p747_p2, 1, 0 }
   0x7   : > { %p655_p4 = pneg %p747_p2  ;;  %p682_p6 = scmp.ne.s32.totalorder %s824_s1, %s681_s18 }
   0x8   : > { %p688_p10 = scmp.lt.u32.totalorder %s681_s18, %s824_s1 }
   0x9   : > { %p761_p5 = pnand %p753_p3, %p655_p4 }
   0xb   : > { %p683_p7 = pneg %p761_p5 }
   0xd   : > { %p684_p8 = pnand %p683_p7, %p682_p6 }
   0xf   : > { %p685_p9 = pneg %p684_p8 }
  0x11   : > { %p690_p11 = pnand %p688_p10, %p685_p9 }
  0x13   : > { %693 = shalt.err (!%p690_p11)
}
  0x14   : > { %s694_s23 = scalar_lea.vmem %s104_s12, 128  ;;  %p702_p1 = scmp.lt.s32.totalorder %s104_s12, %s104_s12 }
  0x15   : > { %p695_p12 = scmp.ne.s32.totalorder %s104_s12, %s694_s23  ;;  %p703_p4 = scmp.lt.s32.totalorder %s694_s23, %s694_s23 }
  0x17   : > { %p697_p13 = pnand %p695_p12, %p683_p7  ;;  %p704_p3 = por %p703_p4, %p702_p1 }
  0x19   : > { %p698_p0 = pneg %p697_p13 }
  0x1b   : > { %p705_p2 = pnand %p704_p3, %p698_p0 }
  0x1d   : > { %708 = shalt.err (!%p705_p2)
}
  0x1e   : > { %s722_s24 = smov 64   ;;  %s723_s25 = smov 4  }
  0x1f   : > { %658 = dma.hbm_to_vmem [thread:$0]  (!%p761_p5), %s824_s1, 128, %s104_s12, [#allocation3], %s722_s24, %s722_s24, %s723_s25  }
  0x20   : > { %p832_p6 = scmp.ne.s32.totalorder %s829_s13, 0 }
  0x21   : > { %p833_p8 = scmp.ne.s32.totalorder (!%p832_p6), %s830_s14, 0 }
  0x22   : > { %128 = sbr.rel (%p832_p6) target bundleno = 279 (0x117), region = 28 }
  0x29   : > { %714 = dma.done.wait (%p833_p8), [#allocation3], 128  }
  0x2a   : > { %716 = vsyncadd (%p833_p8), [#allocation3], 4294967168  ;;  %s520_s28 = sshll.u32 %s513_s10, 4  ;;  %v672_v0 = vld [vmem:[#allocation2] sm:$0xff]   ;;  %vm227_vm0 = vcmask 130048  }
  0x2b   : > { %p151_p2 = scmp.lt.s32.totalorder %s520_s28, 63  ;;  %631 = vmatprep.subr.bf16.mxu0 %v672_v0  ;;  %649 = vmatprep.subr.bf16.mxu1 %v672_v0 }
  0x2c   : > { %632 = vmatpush3.bf16.msra.mxu0 %v672_v0  ;;  %650 = vmatpush3.bf16.msra.mxu1 %v672_v0 }
  0x2d   : > { %s835_s28 = smov (!%p151_p2, %s520_s28), 63 }
  0x2e   : > { %s521_s29 = sshll.u32 %s835_s28, 2 }
  0x2f   : > { %s154_s4 = scalar_lea.vmem %s823_s0, %s521_s29  ;;  %s810_s7 = scalar_lea.vmem %s825_s2, %s521_s29 }
  0x30   : > { %v673_v1 = vld [vmem:[%s154_s4] sm:$0xff]   ;;  %v675_v3 = vld [vmem:[%s154_s4 + $0x8] sm:$0xff]   ;;  %v677_v5 = vld [vmem:[%s154_s4 + $0x10] sm:$0xff]  }
  0x31   : > { %v674_v2 = vld [vmem:[%s154_s4 + $0x20] sm:$0xff]   ;;  %633 = vmatprep.mubr.msk.bf16.mxu0 %vm227_vm0, %v673_v1  ;;  %v676_v4 = vld [vmem:[%s154_s4 + $0x28] sm:$0xff]   ;;  %v678_v6 = vld [vmem:[%s154_s4 + $0x30] sm:$0xff]  }
  0x32   : > { %641 = vmatprep.mubr.msk.bf16.mxu1 %vm227_vm0, %v674_v2  ;;  %634 = vmatmul.mubr.msk.bf16.vlgmr.msra.gmra.mrb[0].mxu0 %vm227_vm0, %v675_v3  ;;  %v679_v7 = vld [vmem:[%s154_s4 + $0x18] sm:$0xff]  }
  0x33   : > { %642 = vmatmul.mubr.msk.bf16.vlgmr.msra.gmra.mrb[0].mxu1 %vm227_vm0, %v676_v4  ;;  %637 = vmatprep.mubr.msk.bf16.mxu0 %vm227_vm0, %v677_v5  ;;  %v680_v8 = vld [vmem:[%s154_s4 + $0x38] sm:$0xff]  }
  0x34   : > { %645 = vmatprep.mubr.msk.bf16.mxu1 %vm227_vm0, %v678_v6 }
  0x3a   : > { %638 = vmatmul.mubr.msk.bf16.gmra.mrb[4].mxu0 %vm227_vm0, %v679_v7 }
  0x3b   : > { %646 = vmatmul.mubr.msk.bf16.gmra.mrb[4].mxu1 %vm227_vm0, %v680_v8 }
 0x105   : > { %v635_v9 = vpop.f32.mrb[0].mxu0 }
 0x106   : > { %v643_v10 = vpop.f32.mrb[0].mxu1  ;;  %v286_v11 = vpop.f32.mrb[1].mxu0  ;;  %v351_v15 = vmax.f32 %v635_v9, 0.0 }
 0x107   : > { %v318_v12 = vpop.f32.mrb[1].mxu1  ;;  %v636_v13 = vpop.f32.mrb[2].mxu0  ;;  %v359_v16 = vmax.f32 %v643_v10, 0.0  ;;  %v349_v21 = vmax.f32 %v286_v11, 0.0 }
 0x108   : > { %v644_v14 = vpop.f32.mrb[2].mxu1  ;;  %v352_v17 = vmax.f32 %v636_v13, 0.0  ;;  %v289_v19 = vpop.f32.mrb[3].mxu0  ;;  %v357_v22 = vmax.f32 %v318_v12, 0.0 }
 0x109   : > { %v360_v18 = vmax.f32 %v644_v14, 0.0  ;;  %v321_v20 = vpop.f32.mrb[3].mxu1  ;;  %v350_v23 = vmax.f32 %v289_v19, 0.0 }
 0x10a   : > { %v358_v24 = vmax.f32 %v321_v20, 0.0  ;;  %v583_v25 = vpack.c.bf16 %v352_v17, %v351_v15 }
 0x10b   : > { %v603_v26 = vpack.c.bf16 %v360_v18, %v359_v16  ;;  %v578_v27 = vpack.c.bf16 %v350_v23, %v349_v21 }
 0x10c   : > { %v598_v28 = vpack.c.bf16 %v358_v24, %v357_v22  ;;  %615 = vst [vmem:[%s810_s7 + $0x8] sm:$0xff] %v583_v25  }
 0x10d   : > { %619 = vst [vmem:[%s810_s7 + $0x28] sm:$0xff] %v603_v26   ;;  %579 = vst [vmem:[%s810_s7] sm:$0xff] %v578_v27   ;;  %v639_v29 = vpop.f32.mrb[4].mxu0 }
 0x10e   : > { %618 = vst [vmem:[%s810_s7 + $0x20] sm:$0xff] %v598_v28   ;;  %v647_v30 = vpop.f32.mrb[4].mxu1  ;;  %v302_v31 = vpop.f32.mrb[5].mxu0  ;;  %v355_v35 = vmax.f32 %v639_v29, 0.0 }
 0x10f   : > { %v334_v32 = vpop.f32.mrb[5].mxu1  ;;  %v640_v33 = vpop.f32.mrb[6].mxu0  ;;  %v363_v36 = vmax.f32 %v647_v30, 0.0  ;;  %v353_v41 = vmax.f32 %v302_v31, 0.0 }
 0x110   : > { %v648_v34 = vpop.f32.mrb[6].mxu1  ;;  %v356_v37 = vmax.f32 %v640_v33, 0.0  ;;  %v305_v39 = vpop.f32.mrb[7].mxu0  ;;  %v361_v42 = vmax.f32 %v334_v32, 0.0 }
 0x111   : > { %v364_v38 = vmax.f32 %v648_v34, 0.0  ;;  %v337_v40 = vpop.f32.mrb[7].mxu1  ;;  %v354_v43 = vmax.f32 %v305_v39, 0.0 }
 0x112   : > { %v362_v44 = vmax.f32 %v337_v40, 0.0  ;;  %v593_v45 = vpack.c.bf16 %v356_v37, %v355_v35 }
 0x113   : > { %v613_v46 = vpack.c.bf16 %v364_v38, %v363_v36  ;;  %v588_v47 = vpack.c.bf16 %v354_v43, %v353_v41 }
 0x114   : > { %v608_v48 = vpack.c.bf16 %v362_v44, %v361_v42  ;;  %617 = vst [vmem:[%s810_s7 + $0x18] sm:$0xff] %v593_v45  }
 0x115   : > { %621 = vst [vmem:[%s810_s7 + $0x38] sm:$0xff] %v613_v46   ;;  %616 = vst [vmem:[%s810_s7 + $0x10] sm:$0xff] %v588_v47  }
 0x116   : > { %620 = vst [vmem:[%s810_s7 + $0x30] sm:$0xff] %v608_v48  }
 0x117 PF: > { %s13_s9 = sadd.s32 1, %s719_s9  }
 0x118   : > { %p10_p3 = scmp.ge.s32.totalorder %s13_s9, 6  }
 0x11a   :  { %12 = sbr.rel (!%p10_p3) target bundleno = 1 (0x1), region = 63 }
 0x121   :  { %467 = vsyncpa [#allocation3], 1 }
 0x122   :  { %469 = vsyncpa [#allocation3 + $0x1], 1 }

// kernel: discriminator_forward.6
= control target key start
LH: loop header
LB: loop body
LE: loop exit
PB: predicated region body
PF: predicated region fallthrough
CT: control target
= control target key end

     0   :  { %s4425_s1 = inlined_call_operand.vmem [shape: bf16[2048,128], index: 1, kind: input, shape index: {}]   ;;  %s4426_s0 = inlined_call_operand.vmem [shape: bf16[104,2048], index: 0, kind: input, shape index: {}]   ;;  %s4427_s2 = inlined_call_operand.vmem [shape: f32[1,128], index: 2, kind: input, shape index: {}]   ;;  %s4428_s3 = inlined_call_operand.vmem [shape: f32[1,128], index: 3, kind: input, shape index: {}]   ;;  %s4429_s4 = inlined_call_operand.vmem [shape: bf16[104,128], index: 4, kind: output, shape index: {}]  }
   0x1   :  { %v3342_v0 = vld [vmem:[%s4425_s1 + $0x40] sm:$0xff]   ;;  %v3346_v4 = vld [vmem:[%s4425_s1 + $0x48] sm:$0xff]   ;;  %v3350_v8 = vld [vmem:[%s4425_s1 + $0x50] sm:$0xff]  }
   0x2   :  { %v3343_v1 = vld [vmem:[%s4425_s1 + $0xc0] sm:$0xff]   ;;  %2878 = vmatprep.subr.bf16.mxu0 %v3342_v0  ;;  %v3347_v5 = vld [vmem:[%s4425_s1 + $0xc8] sm:$0xff]   ;;  %v3351_v9 = vld [vmem:[%s4425_s1 + $0xd0] sm:$0xff]  }
   0x3   :  { %v3344_v2 = vld [vmem:[%s4425_s1] sm:$0xff]   ;;  %2936 = vmatprep.subr.bf16.mxu1 %v3343_v1  ;;  %v3348_v6 = vld [vmem:[%s4425_s1 + $0x8] sm:$0xff]   ;;  %v3352_v10 = vld [vmem:[%s4425_s1 + $0x10] sm:$0xff]  }
   0x4   :  { %v3345_v3 = vld [vmem:[%s4425_s1 + $0x80] sm:$0xff]   ;;  %2879 = vmatpush3.bf16.msra.mxu0 %v3344_v2  ;;  %v3349_v7 = vld [vmem:[%s4425_s1 + $0x88] sm:$0xff]   ;;  %v3353_v11 = vld [vmem:[%s4425_s1 + $0x90] sm:$0xff]  }
   0x5   :  { %2937 = vmatpush3.bf16.msra.mxu1 %v3345_v3  ;;  %2880 = vmatprep.subr.bf16.mxu0 %v3346_v4  ;;  %v3354_v12 = vld [vmem:[%s4425_s1 + $0x58] sm:$0xff]   ;;  %v3358_v16 = vld [vmem:[%s4425_s1 + $0x60] sm:$0xff]   ;;  %v3362_v20 = vld [vmem:[%s4425_s1 + $0x68] sm:$0xff]  }
   0x6   :  { %2938 = vmatprep.subr.bf16.mxu1 %v3347_v5  ;;  %v3355_v13 = vld [vmem:[%s4425_s1 + $0xd8] sm:$0xff]   ;;  %v3359_v17 = vld [vmem:[%s4425_s1 + $0xe0] sm:$0xff]   ;;  %v3363_v21 = vld [vmem:[%s4425_s1 + $0xe8] sm:$0xff]  }
   0x7   :  { %v3356_v14 = vld [vmem:[%s4425_s1 + $0x18] sm:$0xff]   ;;  %v3360_v18 = vld [vmem:[%s4425_s1 + $0x20] sm:$0xff]   ;;  %v3364_v22 = vld [vmem:[%s4425_s1 + $0x28] sm:$0xff]  }
   0x8   :  { %2881 = vmatpush3.bf16.msra.mxu0 %v3348_v6  ;;  %v3357_v15 = vld [vmem:[%s4425_s1 + $0x98] sm:$0xff]   ;;  %v3361_v19 = vld [vmem:[%s4425_s1 + $0xa0] sm:$0xff]   ;;  %v3365_v23 = vld [vmem:[%s4425_s1 + $0xa8] sm:$0xff]  }
   0x9   :  { %2939 = vmatpush3.bf16.msra.mxu1 %v3349_v7  ;;  %2882 = vmatprep.subr.bf16.mxu0 %v3350_v8  ;;  %v3366_v24 = vld [vmem:[%s4425_s1 + $0x70] sm:$0xff]   ;;  %v3370_v28 = vld [vmem:[%s4425_s1 + $0x78] sm:$0xff]   ;;  %v18_v32 = vld [vmem:[%s4426_s0] sm:$0xff] }
   0xa   :  { %2940 = vmatprep.subr.bf16.mxu1 %v3351_v9  ;;  %v3367_v25 = vld [vmem:[%s4425_s1 + $0xf0] sm:$0xff]   ;;  %v3371_v29 = vld [vmem:[%s4425_s1 + $0xf8] sm:$0xff]   ;;  %v26_v33 = vld [vmem:[%s4426_s0 + $0x40] sm:$0xff] }
   0xb   :  { %v3368_v26 = vld [vmem:[%s4425_s1 + $0x30] sm:$0xff]   ;;  %v3372_v30 = vld [vmem:[%s4425_s1 + $0x38] sm:$0xff]   ;;  %v19_v34 = vld [vmem:[%s4426_s0 + $0x8] sm:$0xff]  ;;  %v2576_v35 = vcombine.low %v18_v32, %v26_v33  ;;  %v2577_v36 = vcombine.high %v18_v32, %v26_v33 }
   0xc   :  { %2883 = vmatpush3.bf16.msra.mxu0 %v3352_v10  ;;  %v3369_v27 = vld [vmem:[%s4425_s1 + $0xb0] sm:$0xff]   ;;  %v3373_v31 = vld [vmem:[%s4425_s1 + $0xb8] sm:$0xff]   ;;  %v27_v37 = vld [vmem:[%s4426_s0 + $0x48] sm:$0xff] }
   0xd   :  { %2941 = vmatpush3.bf16.msra.mxu1 %v3353_v11  ;;  %2884 = vmatprep.subr.bf16.mxu0 %v3354_v12  ;;  %v2578_v38 = vcombine.low %v19_v34, %v27_v37  ;;  %v2579_v39 = vcombine.high %v19_v34, %v27_v37  ;;  %v3374_v40 = vld [vmem:[%s4425_s1 + $0x140] sm:$0xff]   ;;  %v35_v47 = vld [vmem:[%s4426_s0 + $0x88] sm:$0xff]  ;;  %v3382_v56 = vld [vmem:[%s4425_s1 + $0x150] sm:$0xff]  }
   0xe   :  { %2942 = vmatprep.subr.bf16.mxu1 %v3355_v13  ;;  %1714 = vmatprep.mubr.bf16.mxu0 %v2577_v36  ;;  %v3375_v41 = vld [vmem:[%s4425_s1 + $0x100] sm:$0xff]   ;;  %v43_v48 = vld [vmem:[%s4426_s0 + $0xc8] sm:$0xff]  ;;  %v3383_v63 = vld [vmem:[%s4425_s1 + $0x110] sm:$0xff]  }
   0xf   :  { %1802 = vmatprep.mubr.bf16.mxu1 %v2579_v39  ;;  %v3376_v42 = vld [vmem:[%s4425_s1 + $0x1c0] sm:$0xff]   ;;  %v2595_v49 = vcombine.high %v35_v47, %v43_v48  ;;  %v3378_v50 = vld [vmem:[%s4425_s1 + $0x148] sm:$0xff]   ;;  %v2594_v53 = vcombine.low %v35_v47, %v43_v48  ;;  %v3384_v0 = vld [vmem:[%s4425_s1 + $0x1d0] sm:$0xff]  }
  0x10   :  { %2885 = vmatpush3.bf16.msra.mxu0 %v3356_v14  ;;  %v3377_v43 = vld [vmem:[%s4425_s1 + $0x180] sm:$0xff]   ;;  %v3379_v52 = vld [vmem:[%s4425_s1 + $0x108] sm:$0xff]   ;;  %v3385_v1 = vld [vmem:[%s4425_s1 + $0x190] sm:$0xff]  }
  0x11   :  { %2943 = vmatpush3.bf16.msra.mxu1 %v3357_v15  ;;  %2886 = vmatprep.subr.bf16.mxu0 %v3358_v16  ;;  %v34_v44 = vld [vmem:[%s4426_s0 + $0x80] sm:$0xff]  ;;  %v3380_v54 = vld [vmem:[%s4425_s1 + $0x1c8] sm:$0xff]   ;;  %v3386_v3 = vld [vmem:[%s4425_s1 + $0x158] sm:$0xff]  }
  0x12   :  { %2944 = vmatprep.subr.bf16.mxu1 %v3359_v17  ;;  %v42_v45 = vld [vmem:[%s4426_s0 + $0xc0] sm:$0xff]  ;;  %v3381_v55 = vld [vmem:[%s4425_s1 + $0x188] sm:$0xff]   ;;  %v3387_v5 = vld [vmem:[%s4425_s1 + $0x118] sm:$0xff]  }
  0x13   :  { %v2593_v46 = vcombine.high %v34_v44, %v42_v45  ;;  %v2592_v51 = vcombine.low %v34_v44, %v42_v45  ;;  %v50_v57 = vld [vmem:[%s4426_s0 + $0x100] sm:$0xff]  ;;  %v51_v59 = vld [vmem:[%s4426_s0 + $0x108] sm:$0xff]  ;;  %v3388_v12 = vld [vmem:[%s4425_s1 + $0x1d8] sm:$0xff]  }
  0x14   :  { %2887 = vmatpush3.bf16.msra.mxu0 %v3360_v18  ;;  %v58_v58 = vld [vmem:[%s4426_s0 + $0x140] sm:$0xff]  ;;  %v59_v60 = vld [vmem:[%s4426_s0 + $0x148] sm:$0xff]  ;;  %v3389_v13 = vld [vmem:[%s4425_s1 + $0x198] sm:$0xff]  }
  0x15   :  { %2945 = vmatpush3.bf16.msra.mxu1 %v3361_v19  ;;  %2888 = vmatprep.subr.bf16.mxu0 %v3362_v20  ;;  %v2609_v61 = vcombine.high %v50_v57, %v58_v58  ;;  %v2611_v62 = vcombine.high %v51_v59, %v59_v60  ;;  %v2608_v2 = vcombine.low %v50_v57, %v58_v58  ;;  %v66_v6 = vld [vmem:[%s4426_s0 + $0x180] sm:$0xff]  ;;  %v67_v8 = vld [vmem:[%s4426_s0 + $0x188] sm:$0xff]  ;;  %v3406_v44 = vld [vmem:[%s4425_s1 + $0x178] sm:$0xff]  }
  0x16   :  { %2946 = vmatprep.subr.bf16.mxu1 %v3363_v21  ;;  %v2610_v4 = vcombine.low %v51_v59, %v59_v60  ;;  %v74_v7 = vld [vmem:[%s4426_s0 + $0x1c0] sm:$0xff]  ;;  %v75_v10 = vld [vmem:[%s4426_s0 + $0x1c8] sm:$0xff]  ;;  %v3407_v45 = vld [vmem:[%s4425_s1 + $0x138] sm:$0xff]  }
  0x17   :  { %v2625_v9 = vcombine.high %v66_v6, %v74_v7  ;;  %v2627_v11 = vcombine.high %v67_v8, %v75_v10  ;;  %v3390_v14 = vld [vmem:[%s4425_s1 + $0x160] sm:$0xff]   ;;  %v2624_v16 = vcombine.low %v66_v6, %v74_v7  ;;  %v2626_v20 = vcombine.low %v67_v8, %v75_v10  ;;  %v99_v32 = vld [vmem:[%s4426_s0 + $0x288] sm:$0xff]  ;;  %v3409_v48 = vld [vmem:[%s4425_s1 + $0x1b8] sm:$0xff]  }
  0x18   :  { %2889 = vmatpush3.bf16.msra.mxu0 %v3364_v22  ;;  %v3391_v15 = vld [vmem:[%s4425_s1 + $0x120] sm:$0xff]   ;;  %v83_v22 = vld [vmem:[%s4426_s0 + $0x208] sm:$0xff]  ;;  %v29_v57 = vld [vmem:[%s4426_s0 + $0x58] sm:$0xff] }
  0x19   :  { %2947 = vmatpush3.bf16.msra.mxu1 %v3365_v23  ;;  %2890 = vmatprep.subr.bf16.mxu0 %v3366_v24  ;;  %v3392_v17 = vld [vmem:[%s4425_s1 + $0x1e0] sm:$0xff]   ;;  %v91_v23 = vld [vmem:[%s4426_s0 + $0x248] sm:$0xff] }
  0x1a   :  { %2948 = vmatprep.subr.bf16.mxu1 %v3367_v25  ;;  %v82_v18 = vld [vmem:[%s4426_s0 + $0x200] sm:$0xff]  ;;  %v2643_v24 = vcombine.high %v83_v22, %v91_v23  ;;  %v107_v33 = vld [vmem:[%s4426_s0 + $0x2c8] sm:$0xff]  ;;  %v2642_v36 = vcombine.low %v83_v22, %v91_v23  ;;  %v3421_v23 = vld [vmem:[%s4425_s1 + $0x290] sm:$0xff]  }
  0x1b   :  { %v90_v19 = vld [vmem:[%s4426_s0 + $0x240] sm:$0xff]  ;;  %v2659_v39 = vcombine.high %v99_v32, %v107_v33  ;;  %v3414_v8 = vld [vmem:[%s4425_s1 + $0x248] sm:$0xff]  }
  0x1c   :  { %2891 = vmatpush3.bf16.msra.mxu0 %v3368_v26  ;;  %v2641_v21 = vcombine.high %v82_v18, %v90_v19  ;;  %v3393_v25 = vld [vmem:[%s4425_s1 + $0x1a0] sm:$0xff]   ;;  %v3394_v26 = vld [vmem:[%s4425_s1 + $0x168] sm:$0xff]   ;;  %v2640_v34 = vcombine.low %v82_v18, %v90_v19 }
  0x1d   :  { %2949 = vmatpush3.bf16.msra.mxu1 %v3369_v27  ;;  %2892 = vmatprep.subr.bf16.mxu0 %v3370_v28  ;;  %v3395_v27 = vld [vmem:[%s4425_s1 + $0x128] sm:$0xff]  }
  0x1e   :  { %2950 = vmatprep.subr.bf16.mxu1 %v3371_v29  ;;  %v3396_v28 = vld [vmem:[%s4425_s1 + $0x1e8] sm:$0xff]  }
  0x1f   :  { %v3397_v29 = vld [vmem:[%s4425_s1 + $0x1a8] sm:$0xff]  }
  0x20   :  { %2893 = vmatpush3.bf16.msra.mxu0 %v3372_v30  ;;  %v98_v30 = vld [vmem:[%s4426_s0 + $0x280] sm:$0xff]  ;;  %v3416_v10 = vld [vmem:[%s4425_s1 + $0x2c8] sm:$0xff]  }
  0x21   :  { %2951 = vmatpush3.bf16.msra.mxu1 %v3373_v31  ;;  %2994 = vmatprep.subr.bf16.mxu0 %v3374_v40  ;;  %v106_v31 = vld [vmem:[%s4426_s0 + $0x2c0] sm:$0xff]  ;;  %v3400_v40 = vld [vmem:[%s4425_s1 + $0x1f0] sm:$0xff]  }
  0x22   :  { %3052 = vmatprep.subr.bf16.mxu1 %v3376_v42  ;;  %v2657_v37 = vcombine.high %v98_v30, %v106_v31  ;;  %v114_v42 = vld [vmem:[%s4426_s0 + $0x300] sm:$0xff]  ;;  %v2656_v47 = vcombine.low %v98_v30, %v106_v31  ;;  %v77_v30 = vld [vmem:[%s4426_s0 + $0x1d8] sm:$0xff] }
  0x23   :  { %1715 = vmatmul.mubr.bf16.vlgmr.msra.gmra.mrb[0].mxu0 %v2576_v35  ;;  %v3398_v35 = vld [vmem:[%s4425_s1 + $0x170] sm:$0xff]   ;;  %v2672_v58 = vcombine.low %v114_v42, %v114_v42  ;;  %v3425_v31 = vld [vmem:[%s4425_s1 + $0x298] sm:$0xff]  }
  0x24   :  { %1803 = vmatmul.mubr.bf16.vlgmr.msra.gmra.mrb[0].mxu1 %v2578_v38  ;;  %2995 = vmatpush3.bf16.msra.mxu0 %v3375_v41  ;;  %v3399_v38 = vld [vmem:[%s4425_s1 + $0x130] sm:$0xff]  }
  0x25   :  { %3053 = vmatpush3.bf16.msra.mxu1 %v3377_v43  ;;  %1722 = vmatprep.mubr.bf16.mxu0 %v2593_v46  ;;  %v3401_v41 = vld [vmem:[%s4425_s1 + $0x1b0] sm:$0xff]   ;;  %v115_v43 = vld [vmem:[%s4426_s0 + $0x308] sm:$0xff]  ;;  %v3408_v46 = vld [vmem:[%s4425_s1 + $0x1f8] sm:$0xff]  }
  0x26   :  { %1810 = vmatprep.mubr.bf16.mxu1 %v2595_v49  ;;  %2996 = vmatprep.subr.bf16.mxu0 %v3378_v50  ;;  %v2658_v49 = vcombine.low %v99_v32, %v107_v33  ;;  %v2673_v50 = vcombine.high %v114_v42, %v114_v42  ;;  %v2674_v59 = vcombine.low %v115_v43, %v115_v43  ;;  %v3426_v32 = vld [vmem:[%s4425_s1 + $0x260] sm:$0xff]   ;;  %v92_v42 = vld [vmem:[%s4426_s0 + $0x250] sm:$0xff] }
  0x27   :  { %3054 = vmatprep.subr.bf16.mxu1 %v3380_v54  ;;  %v20_v54 = vld [vmem:[%s4426_s0 + $0x10] sm:$0xff] }
  0x28   :  { %2997 = vmatpush3.bf16.msra.mxu0 %v3379_v52  ;;  %v3410_v52 = vld [vmem:[%s4425_s1 + $0x240] sm:$0xff]  }
  0x29   :  { %3055 = vmatpush3.bf16.msra.mxu1 %v3381_v55  ;;  %2998 = vmatprep.subr.bf16.mxu0 %v3382_v56  ;;  %v28_v55 = vld [vmem:[%s4426_s0 + $0x50] sm:$0xff]  ;;  %v21_v56 = vld [vmem:[%s4426_s0 + $0x18] sm:$0xff] }
  0x2a   :  { %3056 = vmatprep.subr.bf16.mxu1 %v3384_v0  ;;  %v2581_v60 = vcombine.high %v20_v54, %v28_v55  ;;  %v37_v0 = vld [vmem:[%s4426_s0 + $0x98] sm:$0xff] }
  0x2b   :  { %1723 = vmatmul.mubr.bf16.gmra.mrb[4].mxu0 %v2592_v51  ;;  %v2675_v51 = vcombine.high %v115_v43, %v115_v43  ;;  %v3432_v43 = vld [vmem:[%s4425_s1 + $0x2e8] sm:$0xff]  }
  0x2c   :  { %1811 = vmatmul.mubr.bf16.gmra.mrb[4].mxu1 %v2594_v53  ;;  %1730 = vmatprep.mubr.bf16.mxu0 %v2609_v61  ;;  %v3412_v53 = vld [vmem:[%s4425_s1 + $0x2c0] sm:$0xff]   ;;  %v2583_v61 = vcombine.high %v21_v56, %v29_v57 }
  0x2d   :  { %1818 = vmatprep.mubr.bf16.mxu1 %v2611_v62  ;;  %2999 = vmatpush3.bf16.msra.mxu0 %v3383_v63  ;;  %v36_v62 = vld [vmem:[%s4426_s0 + $0x90] sm:$0xff] }
  0x2e   :  { %3057 = vmatpush3.bf16.msra.mxu1 %v3385_v1  ;;  %3000 = vmatprep.subr.bf16.mxu0 %v3386_v3  ;;  %v44_v63 = vld [vmem:[%s4426_s0 + $0xd0] sm:$0xff]  ;;  %v2580_v1 = vcombine.low %v20_v54, %v28_v55  ;;  %v2582_v3 = vcombine.low %v21_v56, %v29_v57  ;;  %v3442_v56 = vld [vmem:[%s4425_s1 + $0x278] sm:$0xff]  }
  0x2f   :  { %3058 = vmatprep.subr.bf16.mxu1 %v3388_v12  ;;  %v2597_v6 = vcombine.high %v36_v62, %v44_v63  ;;  %v3418_v12 = vld [vmem:[%s4425_s1 + $0x250] sm:$0xff]   ;;  %v2596_v18 = vcombine.low %v36_v62, %v44_v63  ;;  %v109_v62 = vld [vmem:[%s4426_s0 + $0x2d8] sm:$0xff] }
  0x30   :  { %v3435_v54 = vld [vmem:[%s4425_s1 + $0x230] sm:$0xff]   ;;  %v3445_v63 = vld [vmem:[%s4425_s1 + $0x2b8] sm:$0xff]  }
  0x31   :  { %3001 = vmatpush3.bf16.msra.mxu0 %v3387_v5  ;;  %v3413_v5 = vld [vmem:[%s4425_s1 + $0x280] sm:$0xff]   ;;  %v3437_v55 = vld [vmem:[%s4425_s1 + $0x2b0] sm:$0xff]  }
  0x32   :  { %3059 = vmatpush3.bf16.msra.mxu1 %v3389_v13  ;;  %3002 = vmatprep.subr.bf16.mxu0 %v3390_v14  ;;  %v52_v13 = vld [vmem:[%s4426_s0 + $0x110] sm:$0xff] }
  0x33   :  { %1731 = vmatmul.mubr.bf16.gmra.mrb[8].mxu0 %v2608_v2  ;;  %3060 = vmatprep.subr.bf16.mxu1 %v3392_v17  ;;  %v45_v2 = vld [vmem:[%s4426_s0 + $0xd8] sm:$0xff]  ;;  %v60_v14 = vld [vmem:[%s4426_s0 + $0x150] sm:$0xff] }
  0x34   :  { %1819 = vmatmul.mubr.bf16.gmra.mrb[8].mxu1 %v2610_v4  ;;  %1738 = vmatprep.mubr.bf16.mxu0 %v2625_v9  ;;  %v3411_v4 = vld [vmem:[%s4425_s1 + $0x200] sm:$0xff]   ;;  %v2599_v7 = vcombine.high %v37_v0, %v45_v2  ;;  %v3415_v9 = vld [vmem:[%s4425_s1 + $0x208] sm:$0xff]   ;;  %v3420_v17 = vld [vmem:[%s4425_s1 + $0x2d0] sm:$0xff]   ;;  %v2598_v19 = vcombine.low %v37_v0, %v45_v2  ;;  %v2612_v33 = vcombine.low %v52_v13, %v60_v14 }
  0x35   :  { %1826 = vmatprep.mubr.bf16.mxu1 %v2627_v11  ;;  %3003 = vmatpush3.bf16.msra.mxu0 %v3391_v15  ;;  %v3417_v11 = vld [vmem:[%s4425_s1 + $0x288] sm:$0xff]   ;;  %v53_v15 = vld [vmem:[%s4426_s0 + $0x118] sm:$0xff]  ;;  %v100_v57 = vld [vmem:[%s4426_s0 + $0x290] sm:$0xff] }
  0x36   :  { %3061 = vmatpush3.bf16.msra.mxu1 %v3393_v25  ;;  %3004 = vmatprep.subr.bf16.mxu0 %v3394_v26  ;;  %v3423_v25 = vld [vmem:[%s4425_s1 + $0x218] sm:$0xff]   ;;  %v68_v26 = vld [vmem:[%s4426_s0 + $0x190] sm:$0xff]  ;;  %v3446_v0 = vld [vmem:[%s4425_s1 + $0x340] sm:$0xff]  }
  0x37   :  { %3062 = vmatprep.subr.bf16.mxu1 %v3396_v28  ;;  %v76_v28 = vld [vmem:[%s4426_s0 + $0x1d0] sm:$0xff]  ;;  %v3448_v2 = vld [vmem:[%s4425_s1 + $0x3c0] sm:$0xff]  }
  0x39   :  { %3005 = vmatpush3.bf16.msra.mxu0 %v3395_v27  ;;  %v3424_v27 = vld [vmem:[%s4425_s1 + $0x2d8] sm:$0xff]  }
  0x3a   :  { %3063 = vmatpush3.bf16.msra.mxu1 %v3397_v29  ;;  %3006 = vmatprep.subr.bf16.mxu0 %v3398_v35  ;;  %v69_v29 = vld [vmem:[%s4426_s0 + $0x198] sm:$0xff] }
  0x3b   :  { %1739 = vmatmul.mubr.bf16.gmra.mrb[12].mxu0 %v2624_v16  ;;  %3064 = vmatprep.subr.bf16.mxu1 %v3400_v40  ;;  %v61_v16 = vld [vmem:[%s4426_s0 + $0x158] sm:$0xff]  ;;  %v3430_v40 = vld [vmem:[%s4425_s1 + $0x268] sm:$0xff]  }
  0x3c   :  { %1827 = vmatmul.mubr.bf16.gmra.mrb[12].mxu1 %v2626_v20  ;;  %1746 = vmatprep.mubr.bf16.mxu0 %v2641_v21  ;;  %v2613_v20 = vcombine.high %v52_v13, %v60_v14  ;;  %v3419_v21 = vld [vmem:[%s4425_s1 + $0x210] sm:$0xff]   ;;  %v2615_v22 = vcombine.high %v53_v15, %v61_v16  ;;  %v2614_v35 = vcombine.low %v53_v15, %v61_v16  ;;  %v30_v13 = vld [vmem:[%s4426_s0 + $0x60] sm:$0xff]  ;;  %v23_v14 = vld [vmem:[%s4426_s0 + $0x28] sm:$0xff] }
  0x3d   :  { %1834 = vmatprep.mubr.bf16.mxu1 %v2643_v24  ;;  %3007 = vmatpush3.bf16.msra.mxu0 %v3399_v38  ;;  %v3422_v24 = vld [vmem:[%s4425_s1 + $0x258] sm:$0xff]   ;;  %v2631_v38 = vcombine.high %v69_v29, %v77_v30  ;;  %v31_v15 = vld [vmem:[%s4426_s0 + $0x68] sm:$0xff] }
  0x3e   :  { %3065 = vmatpush3.bf16.msra.mxu1 %v3401_v41  ;;  %3008 = vmatprep.subr.bf16.mxu0 %v3406_v44  ;;  %v84_v41 = vld [vmem:[%s4426_s0 + $0x210] sm:$0xff]  ;;  %v85_v44 = vld [vmem:[%s4426_s0 + $0x218] sm:$0xff] }
  0x3f   :  { %3066 = vmatprep.subr.bf16.mxu1 %v3408_v46  ;;  %v3431_v46 = vld [vmem:[%s4425_s1 + $0x228] sm:$0xff]  }
  0x41   :  { %3009 = vmatpush3.bf16.msra.mxu0 %v3407_v45  ;;  %v93_v45 = vld [vmem:[%s4426_s0 + $0x258] sm:$0xff] }
  0x42   :  { %3067 = vmatpush3.bf16.msra.mxu1 %v3409_v48  ;;  %3110 = vmatprep.subr.bf16.mxu0 %v3410_v52  ;;  %v3434_v48 = vld [vmem:[%s4425_s1 + $0x270] sm:$0xff]   ;;  %v2645_v52 = vcombine.high %v84_v41, %v92_v42 }
  0x43   :  { %1747 = vmatmul.mubr.bf16.gmra.mrb[16].mxu0 %v2640_v34  ;;  %3168 = vmatprep.subr.bf16.mxu1 %v3412_v53  ;;  %v3428_v34 = vld [vmem:[%s4425_s1 + $0x2e0] sm:$0xff]   ;;  %v2647_v53 = vcombine.high %v85_v44, %v93_v45 }
  0x44   :  { %1835 = vmatmul.mubr.bf16.gmra.mrb[16].mxu1 %v2642_v36  ;;  %1754 = vmatprep.mubr.bf16.mxu0 %v2657_v37  ;;  %v2629_v36 = vcombine.high %v68_v26, %v76_v28  ;;  %v3427_v37 = vld [vmem:[%s4425_s1 + $0x220] sm:$0xff]  }
  0x45   :  { %1842 = vmatprep.mubr.bf16.mxu1 %v2659_v39  ;;  %v3429_v39 = vld [vmem:[%s4425_s1 + $0x2a0] sm:$0xff]  }
  0x4b   :  { %1755 = vmatmul.mubr.bf16.gmra.mrb[20].mxu0 %v2656_v47  ;;  %v3433_v47 = vld [vmem:[%s4425_s1 + $0x2a8] sm:$0xff]  }
  0x4c   :  { %1843 = vmatmul.mubr.bf16.gmra.mrb[20].mxu1 %v2658_v49  ;;  %1762 = vmatprep.mubr.bf16.mxu0 %v2673_v50  ;;  %v2628_v49 = vcombine.low %v68_v26, %v76_v28  ;;  %v3436_v50 = vld [vmem:[%s4425_s1 + $0x2f0] sm:$0xff]   ;;  %v2586_v26 = vcombine.low %v23_v14, %v31_v15 }
  0x4d   :  { %1850 = vmatprep.mubr.bf16.mxu1 %v2675_v51  ;;  %v2630_v51 = vcombine.low %v69_v29, %v77_v30  ;;  %v3450_v29 = vld [vmem:[%s4425_s1 + $0x348] sm:$0xff]  }
  0x53   :  { %1763 = vmatmul.mubr.bf16.gmra.mrb[24].mxu0 %v2672_v58  ;;  %v3444_v58 = vld [vmem:[%s4425_s1 + $0x2f8] sm:$0xff]  }
  0x54   :  { %1851 = vmatmul.mubr.bf16.gmra.mrb[24].mxu1 %v2674_v59  ;;  %1890 = vmatprep.mubr.bf16.mxu0 %v2581_v60  ;;  %v108_v59 = vld [vmem:[%s4426_s0 + $0x2d0] sm:$0xff]  ;;  %v101_v60 = vld [vmem:[%s4426_s0 + $0x298] sm:$0xff] }
  0x55   :  { %1978 = vmatprep.mubr.bf16.mxu1 %v2583_v61  ;;  %v3443_v61 = vld [vmem:[%s4425_s1 + $0x238] sm:$0xff]  }
  0x5b   :  { %1891 = vmatmul.mubr.bf16.vlgmr.msra.gmra.mrb[28].mxu0 %v2580_v1  ;;  %v2644_v1 = vcombine.low %v84_v41, %v92_v42 }
  0x5c   :  { %1979 = vmatmul.mubr.bf16.vlgmr.msra.gmra.mrb[28].mxu1 %v2582_v3  ;;  %3111 = vmatpush3.bf16.msra.mxu0 %v3411_v4  ;;  %v2646_v3 = vcombine.low %v85_v44, %v93_v45  ;;  %v2661_v4 = vcombine.high %v100_v57, %v108_v59  ;;  %v3455_v44 = vld [vmem:[%s4425_s1 + $0x310] sm:$0xff]  }
  0x5d   :  { %3169 = vmatpush3.bf16.msra.mxu1 %v3413_v5  ;;  %1898 = vmatprep.mubr.bf16.mxu0 %v2597_v6  ;;  %v2663_v5 = vcombine.high %v101_v60, %v109_v62  ;;  %v116_v6 = vld [vmem:[%s4426_s0 + $0x310] sm:$0xff] }
  0x5e   :  { %1986 = vmatprep.mubr.bf16.mxu1 %v2599_v7  ;;  %3112 = vmatprep.subr.bf16.mxu0 %v3414_v8  ;;  %v117_v7 = vld [vmem:[%s4426_s0 + $0x318] sm:$0xff]  ;;  %v2660_v8 = vcombine.low %v100_v57, %v108_v59  ;;  %v2676_v16 = vcombine.low %v116_v6, %v116_v6  ;;  %v3457_v45 = vld [vmem:[%s4425_s1 + $0x390] sm:$0xff]  }
  0x5f   :  { %3170 = vmatprep.subr.bf16.mxu1 %v3416_v10  ;;  %v2677_v10 = vcombine.high %v116_v6, %v116_v6  ;;  %v3470_v6 = vld [vmem:[%s4425_s1 + $0x370] sm:$0xff]  }
  0x60   :  { %3113 = vmatpush3.bf16.msra.mxu0 %v3415_v9  ;;  %v2662_v9 = vcombine.low %v101_v60, %v109_v62  ;;  %v3463_v60 = vld [vmem:[%s4425_s1 + $0x320] sm:$0xff]   ;;  %v3466_v62 = vld [vmem:[%s4425_s1 + $0x368] sm:$0xff]  }
  0x61   :  { %3171 = vmatpush3.bf16.msra.mxu1 %v3417_v11  ;;  %3114 = vmatprep.subr.bf16.mxu0 %v3418_v12  ;;  %v2679_v11 = vcombine.high %v117_v7, %v117_v7  ;;  %v22_v12 = vld [vmem:[%s4426_s0 + $0x20] sm:$0xff] }
  0x62   :  { %3172 = vmatprep.subr.bf16.mxu1 %v3420_v17  ;;  %v2678_v17 = vcombine.low %v117_v7, %v117_v7 }
  0x63   :  { %1899 = vmatmul.mubr.bf16.gmra.mrb[32].mxu0 %v2596_v18  ;;  %v2585_v18 = vcombine.high %v22_v12, %v30_v13 }
  0x64   :  { %1987 = vmatmul.mubr.bf16.gmra.mrb[32].mxu1 %v2598_v19  ;;  %1906 = vmatprep.mubr.bf16.mxu0 %v2613_v20  ;;  %v2587_v19 = vcombine.high %v23_v14, %v31_v15  ;;  %v38_v20 = vld [vmem:[%s4426_s0 + $0xa0] sm:$0xff]  ;;  %v3478_v14 = vld [vmem:[%s4425_s1 + $0x378] sm:$0xff]  }
  0x65   :  { %1994 = vmatprep.mubr.bf16.mxu1 %v2615_v22  ;;  %3115 = vmatpush3.bf16.msra.mxu0 %v3419_v21  ;;  %v46_v21 = vld [vmem:[%s4426_s0 + $0xe0] sm:$0xff]  ;;  %v2584_v22 = vcombine.low %v22_v12, %v30_v13  ;;  %v3471_v12 = vld [vmem:[%s4425_s1 + $0x330] sm:$0xff]   ;;  %v3480_v15 = vld [vmem:[%s4425_s1 + $0x3f8] sm:$0xff]  }
  0x66   :  { %3173 = vmatpush3.bf16.msra.mxu1 %v3421_v23  ;;  %3116 = vmatprep.subr.bf16.mxu0 %v3422_v24  ;;  %v3447_v23 = vld [vmem:[%s4425_s1 + $0x300] sm:$0xff]   ;;  %v39_v24 = vld [vmem:[%s4426_s0 + $0xa8] sm:$0xff]  ;;  %v2601_v28 = vcombine.high %v38_v20, %v46_v21  ;;  %v3473_v13 = vld [vmem:[%s4425_s1 + $0x3b0] sm:$0xff]  }
  0x67   :  { %3174 = vmatprep.subr.bf16.mxu1 %v3424_v27  ;;  %v3449_v27 = vld [vmem:[%s4425_s1 + $0x380] sm:$0xff]  }
  0x69   :  { %3117 = vmatpush3.bf16.msra.mxu0 %v3423_v25  ;;  %v47_v25 = vld [vmem:[%s4426_s0 + $0xe8] sm:$0xff] }
  0x6a   :  { %3175 = vmatpush3.bf16.msra.mxu1 %v3425_v31  ;;  %3118 = vmatprep.subr.bf16.mxu0 %v3426_v32  ;;  %v2603_v30 = vcombine.high %v39_v24, %v47_v25  ;;  %v3451_v31 = vld [vmem:[%s4425_s1 + $0x308] sm:$0xff]   ;;  %v2602_v41 = vcombine.low %v39_v24, %v47_v25 }
  0x6b   :  { %1907 = vmatmul.mubr.bf16.gmra.mrb[36].mxu0 %v2612_v33  ;;  %3176 = vmatprep.subr.bf16.mxu1 %v3428_v34  ;;  %v3452_v32 = vld [vmem:[%s4425_s1 + $0x3c8] sm:$0xff]   ;;  %v3454_v34 = vld [vmem:[%s4425_s1 + $0x350] sm:$0xff]  }
  0x6c   :  { %1995 = vmatmul.mubr.bf16.gmra.mrb[36].mxu1 %v2614_v35  ;;  %1914 = vmatprep.mubr.bf16.mxu0 %v2629_v36  ;;  %v3453_v33 = vld [vmem:[%s4425_s1 + $0x388] sm:$0xff]   ;;  %v54_v35 = vld [vmem:[%s4426_s0 + $0x120] sm:$0xff] }
  0x6d   :  { %2002 = vmatprep.mubr.bf16.mxu1 %v2631_v38  ;;  %3119 = vmatpush3.bf16.msra.mxu0 %v3427_v37  ;;  %v62_v36 = vld [vmem:[%s4426_s0 + $0x160] sm:$0xff]  ;;  %v55_v37 = vld [vmem:[%s4426_s0 + $0x128] sm:$0xff] }
  0x6e   :  { %3177 = vmatpush3.bf16.msra.mxu1 %v3429_v39  ;;  %3120 = vmatprep.subr.bf16.mxu0 %v3430_v40  ;;  %v63_v38 = vld [vmem:[%s4426_s0 + $0x168] sm:$0xff]  ;;  %v3456_v39 = vld [vmem:[%s4425_s1 + $0x3d0] sm:$0xff]   ;;  %v2600_v40 = vcombine.low %v38_v20, %v46_v21  ;;  %v2617_v42 = vcombine.high %v54_v35, %v62_v36  ;;  %v3481_v21 = vld [vmem:[%s4425_s1 + $0x3b8] sm:$0xff]  }
  0x6f   :  { %3178 = vmatprep.subr.bf16.mxu1 %v3432_v43  ;;  %v2619_v43 = vcombine.high %v55_v37, %v63_v38  ;;  %v2618_v57 = vcombine.low %v55_v37, %v63_v38  ;;  %v111_v20 = vld [vmem:[%s4426_s0 + $0x2e8] sm:$0xff] }
  0x71   :  { %3121 = vmatpush3.bf16.msra.mxu0 %v3431_v46  ;;  %v3458_v46 = vld [vmem:[%s4425_s1 + $0x358] sm:$0xff]  }
  0x72   :  { %3179 = vmatpush3.bf16.msra.mxu1 %v3433_v47  ;;  %3122 = vmatprep.subr.bf16.mxu0 %v3434_v48  ;;  %v3460_v47 = vld [vmem:[%s4425_s1 + $0x3d8] sm:$0xff]  }
  0x73   :  { %1915 = vmatmul.mubr.bf16.gmra.mrb[40].mxu0 %v2628_v49  ;;  %3180 = vmatprep.subr.bf16.mxu1 %v3436_v50  ;;  %v3459_v48 = vld [vmem:[%s4425_s1 + $0x318] sm:$0xff]   ;;  %v70_v49 = vld [vmem:[%s4426_s0 + $0x1a0] sm:$0xff] }
  0x74   :  { %2003 = vmatmul.mubr.bf16.gmra.mrb[40].mxu1 %v2630_v51  ;;  %1922 = vmatprep.mubr.bf16.mxu0 %v2645_v52  ;;  %v78_v50 = vld [vmem:[%s4426_s0 + $0x1e0] sm:$0xff]  ;;  %v71_v51 = vld [vmem:[%s4426_s0 + $0x1a8] sm:$0xff] }
  0x75   :  { %2010 = vmatprep.mubr.bf16.mxu1 %v2647_v53  ;;  %3123 = vmatpush3.bf16.msra.mxu0 %v3435_v54  ;;  %v79_v52 = vld [vmem:[%s4426_s0 + $0x1e8] sm:$0xff]  ;;  %v3461_v53 = vld [vmem:[%s4425_s1 + $0x398] sm:$0xff]   ;;  %v3462_v54 = vld [vmem:[%s4425_s1 + $0x360] sm:$0xff]   ;;  %v2632_v7 = vcombine.low %v70_v49, %v78_v50 }
  0x76   :  { %3181 = vmatpush3.bf16.msra.mxu1 %v3437_v55  ;;  %3124 = vmatprep.subr.bf16.mxu0 %v3442_v56  ;;  %v2616_v55 = vcombine.low %v54_v35, %v62_v36  ;;  %v3464_v56 = vld [vmem:[%s4425_s1 + $0x3e0] sm:$0xff]   ;;  %v2635_v59 = vcombine.high %v71_v51, %v79_v52  ;;  %v33_v35 = vld [vmem:[%s4426_s0 + $0x78] sm:$0xff] }
  0x77   :  { %3182 = vmatprep.subr.bf16.mxu1 %v3444_v58  ;;  %v2633_v58 = vcombine.high %v70_v49, %v78_v50  ;;  %v64_v49 = vld [vmem:[%s4426_s0 + $0x170] sm:$0xff]  ;;  %v57_v50 = vld [vmem:[%s4426_s0 + $0x138] sm:$0xff] }
  0x79   :  { %3125 = vmatpush3.bf16.msra.mxu0 %v3443_v61  ;;  %v3465_v61 = vld [vmem:[%s4425_s1 + $0x3a0] sm:$0xff]  }
  0x7a   :  { %3183 = vmatpush3.bf16.msra.mxu1 %v3445_v63  ;;  %3226 = vmatprep.subr.bf16.mxu0 %v3446_v0  ;;  %v3468_v63 = vld [vmem:[%s4425_s1 + $0x3e8] sm:$0xff]   ;;  %v86_v0 = vld [vmem:[%s4426_s0 + $0x220] sm:$0xff] }
  0x7b   :  { %1923 = vmatmul.mubr.bf16.gmra.mrb[44].mxu0 %v2644_v1  ;;  %3284 = vmatprep.subr.bf16.mxu1 %v3448_v2  ;;  %v94_v1 = vld [vmem:[%s4426_s0 + $0x260] sm:$0xff]  ;;  %v87_v2 = vld [vmem:[%s4426_s0 + $0x228] sm:$0xff] }
  0x7c   :  { %2011 = vmatmul.mubr.bf16.gmra.mrb[44].mxu1 %v2646_v3  ;;  %1930 = vmatprep.mubr.bf16.mxu0 %v2661_v4  ;;  %v3467_v3 = vld [vmem:[%s4425_s1 + $0x328] sm:$0xff]  }
  0x7d   :  { %2018 = vmatprep.mubr.bf16.mxu1 %v2663_v5  ;;  %v95_v4 = vld [vmem:[%s4426_s0 + $0x268] sm:$0xff] }
  0x7e   :  { %v3469_v5 = vld [vmem:[%s4425_s1 + $0x3a8] sm:$0xff]  }
  0x83   :  { %1931 = vmatmul.mubr.bf16.gmra.mrb[48].mxu0 %v2660_v8  ;;  %v3472_v8 = vld [vmem:[%s4425_s1 + $0x3f0] sm:$0xff]  }
  0x84   :  { %2019 = vmatmul.mubr.bf16.gmra.mrb[48].mxu1 %v2662_v9  ;;  %1938 = vmatprep.mubr.bf16.mxu0 %v2677_v10  ;;  %v2634_v9 = vcombine.low %v71_v51, %v79_v52  ;;  %v2649_v10 = vcombine.high %v86_v0, %v94_v1  ;;  %v65_v51 = vld [vmem:[%s4426_s0 + $0x178] sm:$0xff] }
  0x85   :  { %2026 = vmatprep.mubr.bf16.mxu1 %v2679_v11  ;;  %v2651_v11 = vcombine.high %v87_v2, %v95_v4 }
  0x8b   :  { %1939 = vmatmul.mubr.bf16.gmra.mrb[52].mxu0 %v2676_v16  ;;  %v102_v16 = vld [vmem:[%s4426_s0 + $0x2a0] sm:$0xff] }
  0x8c   :  { %2027 = vmatmul.mubr.bf16.gmra.mrb[52].mxu1 %v2678_v17  ;;  %2066 = vmatprep.mubr.bf16.mxu0 %v2585_v18  ;;  %v110_v17 = vld [vmem:[%s4426_s0 + $0x2e0] sm:$0xff]  ;;  %v3479_v18 = vld [vmem:[%s4425_s1 + $0x338] sm:$0xff]  }
  0x8d   :  { %2154 = vmatprep.mubr.bf16.mxu1 %v2587_v19  ;;  %v103_v19 = vld [vmem:[%s4426_s0 + $0x2a8] sm:$0xff]  ;;  %v2665_v24 = vcombine.high %v102_v16, %v110_v17 }
  0x8e   :  { %v2667_v25 = vcombine.high %v103_v19, %v111_v20 }
  0x93   :  { %2067 = vmatmul.mubr.bf16.vlgmr.msra.gmra.mrb[56].mxu0 %v2584_v22  ;;  %v2648_v22 = vcombine.low %v86_v0, %v94_v1  ;;  %v88_v0 = vld [vmem:[%s4426_s0 + $0x230] sm:$0xff] }
  0x94   :  { %2155 = vmatmul.mubr.bf16.vlgmr.msra.gmra.mrb[56].mxu1 %v2586_v26  ;;  %3227 = vmatpush3.bf16.msra.mxu0 %v3447_v23  ;;  %v2650_v23 = vcombine.low %v87_v2, %v95_v4  ;;  %v118_v26 = vld [vmem:[%s4426_s0 + $0x320] sm:$0xff]  ;;  %v96_v1 = vld [vmem:[%s4426_s0 + $0x270] sm:$0xff]  ;;  %v89_v2 = vld [vmem:[%s4426_s0 + $0x238] sm:$0xff] }
  0x95   :  { %3285 = vmatpush3.bf16.msra.mxu1 %v3449_v27  ;;  %2074 = vmatprep.mubr.bf16.mxu0 %v2601_v28  ;;  %v119_v27 = vld [vmem:[%s4426_s0 + $0x328] sm:$0xff]  ;;  %v2664_v28 = vcombine.low %v102_v16, %v110_v17  ;;  %v2680_v36 = vcombine.low %v118_v26, %v118_v26  ;;  %v120_v16 = vld [vmem:[%s4426_s0 + $0x330] sm:$0xff]  ;;  %v121_v17 = vld [vmem:[%s4426_s0 + $0x338] sm:$0xff] }
  0x96   :  { %2162 = vmatprep.mubr.bf16.mxu1 %v2603_v30  ;;  %3228 = vmatprep.subr.bf16.mxu0 %v3450_v29  ;;  %v2666_v29 = vcombine.low %v103_v19, %v111_v20  ;;  %v2681_v30 = vcombine.high %v118_v26, %v118_v26  ;;  %v2682_v37 = vcombine.low %v119_v27, %v119_v27 }
  0x97   :  { %3286 = vmatprep.subr.bf16.mxu1 %v3452_v32  ;;  %v24_v32 = vld [vmem:[%s4426_s0 + $0x30] sm:$0xff]  ;;  %v2685_v20 = vcombine.high %v120_v16, %v120_v16 }
  0x98   :  { %3229 = vmatpush3.bf16.msra.mxu0 %v3451_v31  ;;  %v2683_v31 = vcombine.high %v119_v27, %v119_v27 }
  0x99   :  { %3287 = vmatpush3.bf16.msra.mxu1 %v3453_v33  ;;  %3230 = vmatprep.subr.bf16.mxu0 %v3454_v34  ;;  %v32_v33 = vld [vmem:[%s4426_s0 + $0x70] sm:$0xff]  ;;  %v25_v34 = vld [vmem:[%s4426_s0 + $0x38] sm:$0xff] }
  0x9a   :  { %3288 = vmatprep.subr.bf16.mxu1 %v3456_v39  ;;  %v2589_v38 = vcombine.high %v24_v32, %v32_v33  ;;  %v2591_v39 = vcombine.high %v25_v34, %v33_v35 }
  0x9b   :  { %2075 = vmatmul.mubr.bf16.gmra.mrb[60].mxu0 %v2600_v40  ;;  %v40_v40 = vld [vmem:[%s4426_s0 + $0xb0] sm:$0xff] }
  0x9c   :  { %2163 = vmatmul.mubr.bf16.gmra.mrb[60].mxu1 %v2602_v41  ;;  %2082 = vmatprep.mubr.bf16.mxu0 %v2617_v42  ;;  %v48_v41 = vld [vmem:[%s4426_s0 + $0xf0] sm:$0xff]  ;;  %v41_v42 = vld [vmem:[%s4426_s0 + $0xb8] sm:$0xff] }
  0x9d   :  { %2170 = vmatprep.mubr.bf16.mxu1 %v2619_v43  ;;  %3231 = vmatpush3.bf16.msra.mxu0 %v3455_v44  ;;  %v49_v43 = vld [vmem:[%s4426_s0 + $0xf8] sm:$0xff]  ;;  %v2588_v44 = vcombine.low %v24_v32, %v32_v33  ;;  %v2604_v52 = vcombine.low %v40_v40, %v48_v41 }
  0x9e   :  { %3289 = vmatpush3.bf16.msra.mxu1 %v3457_v45  ;;  %3232 = vmatprep.subr.bf16.mxu0 %v3458_v46  ;;  %v2590_v45 = vcombine.low %v25_v34, %v33_v35  ;;  %v2605_v46 = vcombine.high %v40_v40, %v48_v41 }
  0x9f   :  { %3290 = vmatprep.subr.bf16.mxu1 %v3460_v47  ;;  %v2607_v47 = vcombine.high %v41_v42, %v49_v43 }
  0xa1   :  { %3233 = vmatpush3.bf16.msra.mxu0 %v3459_v48  ;;  %v56_v48 = vld [vmem:[%s4426_s0 + $0x130] sm:$0xff] }
  0xa2   :  { %3291 = vmatpush3.bf16.msra.mxu1 %v3461_v53  ;;  %3234 = vmatprep.subr.bf16.mxu0 %v3462_v54  ;;  %v2606_v53 = vcombine.low %v41_v42, %v49_v43  ;;  %v2621_v54 = vcombine.high %v56_v48, %v64_v49 }
  0xa3   :  { %2083 = vmatmul.mubr.bf16.gmra.mrb[64].mxu0 %v2616_v55  ;;  %3292 = vmatprep.subr.bf16.mxu1 %v3464_v56  ;;  %v2623_v55 = vcombine.high %v57_v50, %v65_v51  ;;  %v72_v56 = vld [vmem:[%s4426_s0 + $0x1b0] sm:$0xff] }
  0xa4   :  { %2171 = vmatmul.mubr.bf16.gmra.mrb[64].mxu1 %v2618_v57  ;;  %2090 = vmatprep.mubr.bf16.mxu0 %v2633_v58  ;;  %v80_v57 = vld [vmem:[%s4426_s0 + $0x1f0] sm:$0xff]  ;;  %v73_v58 = vld [vmem:[%s4426_s0 + $0x1b8] sm:$0xff] }
  0xa5   :  { %2178 = vmatprep.mubr.bf16.mxu1 %v2635_v59  ;;  %3235 = vmatpush3.bf16.msra.mxu0 %v3463_v60  ;;  %v81_v59 = vld [vmem:[%s4426_s0 + $0x1f8] sm:$0xff]  ;;  %v2620_v60 = vcombine.low %v56_v48, %v64_v49  ;;  %v2636_v4 = vcombine.low %v72_v56, %v80_v57 }
  0xa6   :  { %3293 = vmatpush3.bf16.msra.mxu1 %v3465_v61  ;;  %3236 = vmatprep.subr.bf16.mxu0 %v3466_v62  ;;  %v2622_v61 = vcombine.low %v57_v50, %v65_v51  ;;  %v2637_v62 = vcombine.high %v72_v56, %v80_v57 }
  0xa7   :  { %3294 = vmatprep.subr.bf16.mxu1 %v3468_v63  ;;  %v2639_v63 = vcombine.high %v73_v58, %v81_v59 }
  0xa9   :  { %3237 = vmatpush3.bf16.msra.mxu0 %v3467_v3  ;;  %v97_v3 = vld [vmem:[%s4426_s0 + $0x278] sm:$0xff] }
  0xaa   :  { %3295 = vmatpush3.bf16.msra.mxu1 %v3469_v5  ;;  %3238 = vmatprep.subr.bf16.mxu0 %v3470_v6  ;;  %v2638_v5 = vcombine.low %v73_v58, %v81_v59  ;;  %v2653_v6 = vcombine.high %v88_v0, %v96_v1 }
  0xab   :  { %2091 = vmatmul.mubr.bf16.gmra.mrb[68].mxu0 %v2632_v7  ;;  %3296 = vmatprep.subr.bf16.mxu1 %v3472_v8  ;;  %v2655_v7 = vcombine.high %v89_v2, %v97_v3  ;;  %v104_v8 = vld [vmem:[%s4426_s0 + $0x2b0] sm:$0xff] }
  0xac   :  { %2179 = vmatmul.mubr.bf16.gmra.mrb[68].mxu1 %v2634_v9  ;;  %2098 = vmatprep.mubr.bf16.mxu0 %v2649_v10  ;;  %v112_v9 = vld [vmem:[%s4426_s0 + $0x2f0] sm:$0xff]  ;;  %v105_v10 = vld [vmem:[%s4426_s0 + $0x2b8] sm:$0xff] }
  0xad   :  { %2186 = vmatprep.mubr.bf16.mxu1 %v2651_v11  ;;  %3239 = vmatpush3.bf16.msra.mxu0 %v3471_v12  ;;  %v113_v11 = vld [vmem:[%s4426_s0 + $0x2f8] sm:$0xff]  ;;  %v2652_v12 = vcombine.low %v88_v0, %v96_v1 }
  0xae   :  { %3297 = vmatpush3.bf16.msra.mxu1 %v3473_v13  ;;  %3240 = vmatprep.subr.bf16.mxu0 %v3478_v14  ;;  %v2654_v13 = vcombine.low %v89_v2, %v97_v3  ;;  %v2669_v14 = vcombine.high %v104_v8, %v112_v9  ;;  %v2670_v19 = vcombine.low %v105_v10, %v113_v11 }
  0xaf   :  { %3298 = vmatprep.subr.bf16.mxu1 %v3480_v15  ;;  %v2671_v15 = vcombine.high %v105_v10, %v113_v11 }
  0xb1   :  { %3241 = vmatpush3.bf16.msra.mxu0 %v3479_v18  ;;  %v2668_v18 = vcombine.low %v104_v8, %v112_v9 }
  0xb2   :  { %3299 = vmatpush3.bf16.msra.mxu1 %v3481_v21  ;;  %v2687_v21 = vcombine.high %v121_v17, %v121_v17 }
  0xb3   :  { %2099 = vmatmul.mubr.bf16.gmra.mrb[72].mxu0 %v2648_v22 }
  0xb4   :  { %2187 = vmatmul.mubr.bf16.gmra.mrb[72].mxu1 %v2650_v23  ;;  %2106 = vmatprep.mubr.bf16.mxu0 %v2665_v24 }
  0xb5   :  { %2194 = vmatprep.mubr.bf16.mxu1 %v2667_v25  ;;  %v2684_v25 = vcombine.low %v120_v16, %v120_v16 }
  0xbb   :  { %2107 = vmatmul.mubr.bf16.gmra.mrb[76].mxu0 %v2664_v28 }
  0xbc   :  { %2195 = vmatmul.mubr.bf16.gmra.mrb[76].mxu1 %v2666_v29  ;;  %2114 = vmatprep.mubr.bf16.mxu0 %v2681_v30  ;;  %v2686_v29 = vcombine.low %v121_v17, %v121_v17 }
  0xbd   :  { %2202 = vmatprep.mubr.bf16.mxu1 %v2683_v31 }
  0xc3   :  { %2115 = vmatmul.mubr.bf16.gmra.mrb[80].mxu0 %v2680_v36 }
  0xc4   :  { %2203 = vmatmul.mubr.bf16.gmra.mrb[80].mxu1 %v2682_v37  ;;  %2242 = vmatprep.mubr.bf16.mxu0 %v2589_v38 }
  0xc5   :  { %2330 = vmatprep.mubr.bf16.mxu1 %v2591_v39 }
  0xcb   :  { %2243 = vmatmul.mubr.bf16.vlgmr.msra.gmra.mrb[84].mxu0 %v2588_v44 }
  0xcc   :  { %2331 = vmatmul.mubr.bf16.vlgmr.msra.gmra.mrb[84].mxu1 %v2590_v45  ;;  %2250 = vmatprep.mubr.bf16.mxu0 %v2605_v46 }
  0xcd   :  { %2338 = vmatprep.mubr.bf16.mxu1 %v2607_v47 }
  0xd3   :  { %2251 = vmatmul.mubr.bf16.gmra.mrb[88].mxu0 %v2604_v52 }
  0xd4   :  { %2339 = vmatmul.mubr.bf16.gmra.mrb[88].mxu1 %v2606_v53  ;;  %2258 = vmatprep.mubr.bf16.mxu0 %v2621_v54 }
  0xd5   :  { %2346 = vmatprep.mubr.bf16.mxu1 %v2623_v55 }
  0xdb   :  { %2259 = vmatmul.mubr.bf16.gmra.mrb[92].mxu0 %v2620_v60 }
  0xdc   :  { %2347 = vmatmul.mubr.bf16.gmra.mrb[92].mxu1 %v2622_v61  ;;  %2266 = vmatprep.mubr.bf16.mxu0 %v2637_v62 }
  0xdd   :  { %2354 = vmatprep.mubr.bf16.mxu1 %v2639_v63 }
  0xe3   :  { %2267 = vmatmul.mubr.bf16.gmra.mrb[96].mxu0 %v2636_v4 }
  0xe4   :  { %2355 = vmatmul.mubr.bf16.gmra.mrb[96].mxu1 %v2638_v5  ;;  %2274 = vmatprep.mubr.bf16.mxu0 %v2653_v6 }
  0xe5   :  { %2362 = vmatprep.mubr.bf16.mxu1 %v2655_v7 }
  0xeb   :  { %2275 = vmatmul.mubr.bf16.gmra.mrb[100].mxu0 %v2652_v12 }
  0xec   :  { %2363 = vmatmul.mubr.bf16.gmra.mrb[100].mxu1 %v2654_v13  ;;  %2282 = vmatprep.mubr.bf16.mxu0 %v2669_v14 }
  0xed   :  { %2370 = vmatprep.mubr.bf16.mxu1 %v2671_v15 }
  0xf3   :  { %2283 = vmatmul.mubr.bf16.gmra.mrb[104].mxu0 %v2668_v18 }
  0xf4   :  { %2371 = vmatmul.mubr.bf16.gmra.mrb[104].mxu1 %v2670_v19  ;;  %2290 = vmatprep.mubr.bf16.mxu0 %v2685_v20 }
  0xf5   :  { %2378 = vmatprep.mubr.bf16.mxu1 %v2687_v21 }
  0xf6   :  { %v2894_v22 = vpop.f32.mrb[0].mxu0 }
  0xf7   :  { %v2952_v23 = vpop.f32.mrb[0].mxu1  ;;  %v2895_v24 = vpop.f32.mrb[1].mxu0 }
  0xf8   :  { %v2896_v26 = vadd.f32 %v2895_v24, %v2894_v22  ;;  %v2953_v27 = vpop.f32.mrb[1].mxu1  ;;  %v2897_v28 = vpop.f32.mrb[2].mxu0 }
  0xf9   :  { %v2954_v30 = vadd.f32 %v2953_v27, %v2952_v23  ;;  %v2955_v31 = vpop.f32.mrb[2].mxu1  ;;  %v2898_v32 = vpop.f32.mrb[3].mxu0 }
  0xfa   :  { %v2899_v33 = vadd.f32 %v2898_v32, %v2897_v28  ;;  %v2956_v34 = vpop.f32.mrb[3].mxu1 }
  0xfb   :  { %v4209_v35 = vadd.f32 %v2954_v30, %v2896_v26  ;;  %v2957_v36 = vadd.f32 %v2956_v34, %v2955_v31  ;;  %2291 = vmatmul.mubr.bf16.gmra.mrb[108].mxu0 %v2684_v25 }
  0xfc   :  { %2379 = vmatmul.mubr.bf16.gmra.mrb[108].mxu1 %v2686_v29 }
  0xfd   :  { %v4211_v37 = vadd.f32 %v2957_v36, %v2899_v33 }
  0xfe   :  { %v2900_v38 = vpop.f32.mrb[4].mxu0 }
  0xff   :  { %v2958_v39 = vpop.f32.mrb[4].mxu1  ;;  %v2901_v40 = vpop.f32.mrb[5].mxu0 }
 0x100   :  { %v2902_v41 = vadd.f32 %v2901_v40, %v2900_v38  ;;  %v2959_v42 = vpop.f32.mrb[5].mxu1  ;;  %v2903_v43 = vpop.f32.mrb[6].mxu0 }
 0x101   :  { %v2960_v44 = vadd.f32 %v2959_v42, %v2958_v39  ;;  %v2961_v45 = vpop.f32.mrb[6].mxu1  ;;  %v2904_v46 = vpop.f32.mrb[7].mxu0 }
 0x102   :  { %v2905_v47 = vadd.f32 %v2904_v46, %v2903_v43  ;;  %v2962_v48 = vpop.f32.mrb[7].mxu1 }
 0x103   :  { %v4213_v49 = vadd.f32 %v2960_v44, %v2902_v41  ;;  %v2963_v50 = vadd.f32 %v2962_v48, %v2961_v45 }
 0x105   :  { %v4215_v51 = vadd.f32 %v2963_v50, %v2905_v47 }
 0x106   :  { %v2906_v52 = vpop.f32.mrb[8].mxu0 }
 0x107   :  { %v2964_v53 = vpop.f32.mrb[8].mxu1  ;;  %v2907_v54 = vpop.f32.mrb[9].mxu0 }
 0x108   :  { %v2908_v55 = vadd.f32 %v2907_v54, %v2906_v52  ;;  %v2965_v56 = vpop.f32.mrb[9].mxu1  ;;  %v2909_v57 = vpop.f32.mrb[10].mxu0 }
 0x109   :  { %v2966_v58 = vadd.f32 %v2965_v56, %v2964_v53  ;;  %v2967_v59 = vpop.f32.mrb[10].mxu1  ;;  %v2910_v60 = vpop.f32.mrb[11].mxu0 }
 0x10a   :  { %v2911_v61 = vadd.f32 %v2910_v60, %v2909_v57  ;;  %v2968_v62 = vpop.f32.mrb[11].mxu1 }
 0x10b   :  { %v4217_v63 = vadd.f32 %v2966_v58, %v2908_v55  ;;  %v2969_v0 = vadd.f32 %v2968_v62, %v2967_v59 }
 0x10d   :  { %v4219_v1 = vadd.f32 %v2969_v0, %v2911_v61 }
 0x10e   :  { %v2912_v2 = vpop.f32.mrb[12].mxu0 }
 0x10f   :  { %v2970_v3 = vpop.f32.mrb[12].mxu1  ;;  %v2913_v4 = vpop.f32.mrb[13].mxu0 }
 0x110   :  { %v2914_v5 = vadd.f32 %v2913_v4, %v2912_v2  ;;  %v2971_v6 = vpop.f32.mrb[13].mxu1  ;;  %v2915_v7 = vpop.f32.mrb[14].mxu0 }
 0x111   :  { %v2972_v8 = vadd.f32 %v2971_v6, %v2970_v3  ;;  %v2973_v9 = vpop.f32.mrb[14].mxu1  ;;  %v2916_v10 = vpop.f32.mrb[15].mxu0 }
 0x112   :  { %v2917_v11 = vadd.f32 %v2916_v10, %v2915_v7  ;;  %v2974_v12 = vpop.f32.mrb[15].mxu1 }
 0x113   :  { %v4221_v13 = vadd.f32 %v2972_v8, %v2914_v5  ;;  %v2975_v14 = vadd.f32 %v2974_v12, %v2973_v9 }
 0x115   :  { %v4223_v15 = vadd.f32 %v2975_v14, %v2917_v11 }
 0x116   :  { %v2918_v16 = vpop.f32.mrb[16].mxu0 }
 0x117   :  { %v2976_v17 = vpop.f32.mrb[16].mxu1  ;;  %v2919_v18 = vpop.f32.mrb[17].mxu0 }
 0x118   :  { %v2920_v19 = vadd.f32 %v2919_v18, %v2918_v16  ;;  %v2977_v20 = vpop.f32.mrb[17].mxu1  ;;  %v2921_v21 = vpop.f32.mrb[18].mxu0 }
 0x119   :  { %v2978_v22 = vadd.f32 %v2977_v20, %v2976_v17  ;;  %v2979_v23 = vpop.f32.mrb[18].mxu1  ;;  %v2922_v24 = vpop.f32.mrb[19].mxu0 }
 0x11a   :  { %v2923_v25 = vadd.f32 %v2922_v24, %v2921_v21  ;;  %v2980_v26 = vpop.f32.mrb[19].mxu1 }
 0x11b   :  { %v4225_v27 = vadd.f32 %v2978_v22, %v2920_v19  ;;  %v2981_v28 = vadd.f32 %v2980_v26, %v2979_v23 }
 0x11d   :  { %v4227_v29 = vadd.f32 %v2981_v28, %v2923_v25 }
 0x11e   :  { %v2924_v30 = vpop.f32.mrb[20].mxu0 }
 0x11f   :  { %v2982_v31 = vpop.f32.mrb[20].mxu1  ;;  %v2925_v32 = vpop.f32.mrb[21].mxu0 }
 0x120   :  { %v2926_v33 = vadd.f32 %v2925_v32, %v2924_v30  ;;  %v2983_v34 = vpop.f32.mrb[21].mxu1  ;;  %v2927_v36 = vpop.f32.mrb[22].mxu0 }
 0x121   :  { %v2984_v38 = vadd.f32 %v2983_v34, %v2982_v31  ;;  %v2985_v39 = vpop.f32.mrb[22].mxu1  ;;  %v2928_v40 = vpop.f32.mrb[23].mxu0 }
 0x122   :  { %v2929_v41 = vadd.f32 %v2928_v40, %v2927_v36  ;;  %v2986_v42 = vpop.f32.mrb[23].mxu1 }
 0x123   :  { %v4229_v43 = vadd.f32 %v2984_v38, %v2926_v33  ;;  %v2987_v44 = vadd.f32 %v2986_v42, %v2985_v39 }
 0x125   :  { %v4231_v45 = vadd.f32 %v2987_v44, %v2929_v41 }
 0x126   :  { %v2930_v46 = vpop.f32.mrb[24].mxu0 }
 0x127   :  { %v2988_v47 = vpop.f32.mrb[24].mxu1  ;;  %v2931_v48 = vpop.f32.mrb[25].mxu0 }
 0x128   :  { %v2932_v50 = vadd.f32 %v2931_v48, %v2930_v46  ;;  %v2989_v52 = vpop.f32.mrb[25].mxu1  ;;  %v2933_v53 = vpop.f32.mrb[26].mxu0 }
 0x129   :  { %v2990_v54 = vadd.f32 %v2989_v52, %v2988_v47  ;;  %v2991_v55 = vpop.f32.mrb[26].mxu1  ;;  %v2934_v56 = vpop.f32.mrb[27].mxu0 }
 0x12a   :  { %v2992_v57 = vpop.f32.mrb[27].mxu1 }
 0x12b   :  { %v4233_v58 = vadd.f32 %v2990_v54, %v2932_v50 }
 0x12e   :  { %v3010_v59 = vpop.f32.mrb[28].mxu0 }
 0x12f   :  { %v3068_v60 = vpop.f32.mrb[28].mxu1  ;;  %v3011_v61 = vpop.f32.mrb[29].mxu0 }
 0x130   :  { %v3012_v62 = vadd.f32 %v3011_v61, %v3010_v59  ;;  %v3069_v0 = vpop.f32.mrb[29].mxu1  ;;  %v3013_v2 = vpop.f32.mrb[30].mxu0 }
 0x131   :  { %v3070_v3 = vadd.f32 %v3069_v0, %v3068_v60  ;;  %v3071_v4 = vpop.f32.mrb[30].mxu1  ;;  %v3014_v5 = vpop.f32.mrb[31].mxu0 }
 0x132   :  { %v1893_v6 = vadd.f32 %v3012_v62, %v4209_v35  ;;  %v3015_v7 = vadd.f32 %v3014_v5, %v3013_v2  ;;  %v3072_v8 = vpop.f32.mrb[31].mxu1 }
 0x133   :  { %v3073_v9 = vadd.f32 %v3072_v8, %v3071_v4 }
 0x134   :  { %v4236_v10 = vadd.f32 %v3070_v3, %v1893_v6  ;;  %v1896_v11 = vadd.f32 %v3015_v7, %v4211_v37 }
 0x136   :  { %v4239_v12 = vadd.f32 %v3073_v9, %v1896_v11  ;;  %v3016_v14 = vpop.f32.mrb[32].mxu0 }
 0x137   :  { %v3074_v16 = vpop.f32.mrb[32].mxu1  ;;  %v3017_v17 = vpop.f32.mrb[33].mxu0 }
 0x138   :  { %v3018_v18 = vadd.f32 %v3017_v17, %v3016_v14  ;;  %v3075_v19 = vpop.f32.mrb[33].mxu1  ;;  %v3019_v20 = vpop.f32.mrb[34].mxu0 }
 0x139   :  { %v3076_v21 = vadd.f32 %v3075_v19, %v3074_v16  ;;  %v3077_v22 = vpop.f32.mrb[34].mxu1  ;;  %v3020_v23 = vpop.f32.mrb[35].mxu0 }
 0x13a   :  { %v1901_v35 = vadd.f32 %v3018_v18, %v4213_v49  ;;  %v3021_v24 = vadd.f32 %v3020_v23, %v3019_v20  ;;  %v3078_v25 = vpop.f32.mrb[35].mxu1 }
 0x13b   :  { %v3079_v26 = vadd.f32 %v3078_v25, %v3077_v22 }
 0x13c   :  { %v4242_v28 = vadd.f32 %v3076_v21, %v1901_v35  ;;  %v1904_v37 = vadd.f32 %v3021_v24, %v4215_v51 }
 0x13e   :  { %v4245_v30 = vadd.f32 %v3079_v26, %v1904_v37  ;;  %v3022_v31 = vpop.f32.mrb[36].mxu0 }
 0x13f   :  { %v3080_v32 = vpop.f32.mrb[36].mxu1  ;;  %v3023_v33 = vpop.f32.mrb[37].mxu0 }
 0x140   :  { %v3024_v34 = vadd.f32 %v3023_v33, %v3022_v31  ;;  %v3081_v36 = vpop.f32.mrb[37].mxu1  ;;  %v3025_v38 = vpop.f32.mrb[38].mxu0 }
 0x141   :  { %v3082_v39 = vadd.f32 %v3081_v36, %v3080_v32  ;;  %v3083_v40 = vpop.f32.mrb[38].mxu1  ;;  %v3026_v41 = vpop.f32.mrb[39].mxu0 }
 0x142   :  { %v1909_v49 = vadd.f32 %v3024_v34, %v4217_v63  ;;  %v3027_v42 = vadd.f32 %v3026_v41, %v3025_v38  ;;  %v3084_v44 = vpop.f32.mrb[39].mxu1 }
 0x143   :  { %v3085_v46 = vadd.f32 %v3084_v44, %v3083_v40 }
 0x144   :  { %v4248_v47 = vadd.f32 %v3082_v39, %v1909_v49  ;;  %v1912_v51 = vadd.f32 %v3027_v42, %v4219_v1 }
 0x146   :  { %v4251_v48 = vadd.f32 %v3085_v46, %v1912_v51  ;;  %v3028_v50 = vpop.f32.mrb[40].mxu0 }
 0x147   :  { %v3086_v52 = vpop.f32.mrb[40].mxu1  ;;  %v3029_v53 = vpop.f32.mrb[41].mxu0 }
 0x148   :  { %v3030_v54 = vadd.f32 %v3029_v53, %v3028_v50  ;;  %v3087_v55 = vpop.f32.mrb[41].mxu1  ;;  %v3031_v56 = vpop.f32.mrb[42].mxu0 }
 0x149   :  { %v3088_v57 = vadd.f32 %v3087_v55, %v3086_v52  ;;  %v3089_v59 = vpop.f32.mrb[42].mxu1  ;;  %v3032_v60 = vpop.f32.mrb[43].mxu0 }
 0x14a   :  { %v1917_v63 = vadd.f32 %v3030_v54, %v4221_v13  ;;  %v3033_v61 = vadd.f32 %v3032_v60, %v3031_v56  ;;  %v3090_v62 = vpop.f32.mrb[43].mxu1 }
 0x14b   :  { %v3091_v0 = vadd.f32 %v3090_v62, %v3089_v59 }
 0x14c   :  { %v4254_v2 = vadd.f32 %v3088_v57, %v1917_v63  ;;  %v1920_v1 = vadd.f32 %v3033_v61, %v4223_v15 }
 0x14e   :  { %v4257_v3 = vadd.f32 %v3091_v0, %v1920_v1  ;;  %v3034_v4 = vpop.f32.mrb[44].mxu0 }
 0x14f   :  { %v3092_v5 = vpop.f32.mrb[44].mxu1  ;;  %v3035_v6 = vpop.f32.mrb[45].mxu0 }
 0x150   :  { %v3036_v7 = vadd.f32 %v3035_v6, %v3034_v4  ;;  %v3093_v8 = vpop.f32.mrb[45].mxu1  ;;  %v3037_v9 = vpop.f32.mrb[46].mxu0 }
 0x151   :  { %v3094_v11 = vadd.f32 %v3093_v8, %v3092_v5  ;;  %v3095_v14 = vpop.f32.mrb[46].mxu1  ;;  %v3038_v16 = vpop.f32.mrb[47].mxu0 }
 0x152   :  { %v1925_v13 = vadd.f32 %v3036_v7, %v4225_v27  ;;  %v3039_v17 = vadd.f32 %v3038_v16, %v3037_v9  ;;  %v3096_v18 = vpop.f32.mrb[47].mxu1 }
 0x153   :  { %v3097_v19 = vadd.f32 %v3096_v18, %v3095_v14 }
 0x154   :  { %v4260_v20 = vadd.f32 %v3094_v11, %v1925_v13  ;;  %v1928_v15 = vadd.f32 %v3039_v17, %v4227_v29 }
 0x156   :  { %v4263_v21 = vadd.f32 %v3097_v19, %v1928_v15  ;;  %v3040_v22 = vpop.f32.mrb[48].mxu0 }
 0x157   :  { %v3098_v23 = vpop.f32.mrb[48].mxu1  ;;  %v3041_v35 = vpop.f32.mrb[49].mxu0 }
 0x158   :  { %v3042_v24 = vadd.f32 %v3041_v35, %v3040_v22  ;;  %v3099_v25 = vpop.f32.mrb[49].mxu1  ;;  %v3043_v26 = vpop.f32.mrb[50].mxu0 }
 0x159   :  { %v3100_v37 = vadd.f32 %v3099_v25, %v3098_v23  ;;  %v3101_v31 = vpop.f32.mrb[50].mxu1  ;;  %v3044_v32 = vpop.f32.mrb[51].mxu0 }
 0x15a   :  { %v1933_v27 = vadd.f32 %v3042_v24, %v4229_v43  ;;  %v3045_v33 = vadd.f32 %v3044_v32, %v3043_v26  ;;  %v3102_v34 = vpop.f32.mrb[51].mxu1 }
 0x15b   :  { %v3103_v36 = vadd.f32 %v3102_v34, %v3101_v31 }
 0x15c   :  { %v4266_v38 = vadd.f32 %v3100_v37, %v1933_v27  ;;  %v1936_v29 = vadd.f32 %v3045_v33, %v4231_v45 }
 0x15e   :  { %v4269_v39 = vadd.f32 %v3103_v36, %v1936_v29  ;;  %v3046_v40 = vpop.f32.mrb[52].mxu0 }
 0x15f   :  { %v3104_v41 = vpop.f32.mrb[52].mxu1  ;;  %v3047_v49 = vpop.f32.mrb[53].mxu0 }
 0x160   :  { %v3048_v42 = vadd.f32 %v3047_v49, %v3046_v40  ;;  %v3105_v44 = vpop.f32.mrb[53].mxu1  ;;  %v3049_v46 = vpop.f32.mrb[54].mxu0 }
 0x161   :  { %v3106_v51 = vadd.f32 %v3105_v44, %v3104_v41  ;;  %v3107_v50 = vpop.f32.mrb[54].mxu1  ;;  %v3050_v52 = vpop.f32.mrb[55].mxu0 }
 0x162   :  { %v1941_v43 = vadd.f32 %v3048_v42, %v4233_v58  ;;  %v3108_v53 = vpop.f32.mrb[55].mxu1 }
 0x164   :  { %v4272_v54 = vadd.f32 %v3106_v51, %v1941_v43 }
 0x166   :  { %v3126_v55 = vpop.f32.mrb[56].mxu0 }
 0x167   :  { %v3184_v56 = vpop.f32.mrb[56].mxu1  ;;  %v3127_v57 = vpop.f32.mrb[57].mxu0 }
 0x168   :  { %v3128_v45 = vadd.f32 %v3127_v57, %v3126_v55  ;;  %v3185_v59 = vpop.f32.mrb[57].mxu1  ;;  %v3129_v60 = vpop.f32.mrb[58].mxu0 }
 0x169   :  { %v3186_v63 = vadd.f32 %v3185_v59, %v3184_v56  ;;  %v3187_v61 = vpop.f32.mrb[58].mxu1  ;;  %v3130_v62 = vpop.f32.mrb[59].mxu0 }
 0x16a   :  { %v2069_v0 = vadd.f32 %v3128_v45, %v4236_v10  ;;  %v3131_v1 = vadd.f32 %v3130_v62, %v3129_v60  ;;  %v3188_v4 = vpop.f32.mrb[59].mxu1 }
 0x16b   :  { %v3189_v5 = vadd.f32 %v3188_v4, %v3187_v61 }
 0x16c   :  { %v4275_v6 = vadd.f32 %v3186_v63, %v2069_v0  ;;  %v2072_v58 = vadd.f32 %v3131_v1, %v4239_v12 }
 0x16e   :  { %v4278_v7 = vadd.f32 %v3189_v5, %v2072_v58  ;;  %v3132_v8 = vpop.f32.mrb[60].mxu0 }
 0x16f   :  { %v3190_v9 = vpop.f32.mrb[60].mxu1  ;;  %v3133_v11 = vpop.f32.mrb[61].mxu0 }
 0x170   :  { %v3134_v14 = vadd.f32 %v3133_v11, %v3132_v8  ;;  %v3191_v16 = vpop.f32.mrb[61].mxu1  ;;  %v3135_v13 = vpop.f32.mrb[62].mxu0 }
 0x171   :  { %v3192_v17 = vadd.f32 %v3191_v16, %v3190_v9  ;;  %v3193_v18 = vpop.f32.mrb[62].mxu1  ;;  %v3136_v19 = vpop.f32.mrb[63].mxu0 }
 0x172   :  { %v2077_v10 = vadd.f32 %v3134_v14, %v4242_v28  ;;  %v3137_v15 = vadd.f32 %v3136_v19, %v3135_v13  ;;  %v3194_v22 = vpop.f32.mrb[63].mxu1 }
 0x173   :  { %v3195_v23 = vadd.f32 %v3194_v22, %v3193_v18 }
 0x174   :  { %v4281_v35 = vadd.f32 %v3192_v17, %v2077_v10  ;;  %v2080_v12 = vadd.f32 %v3137_v15, %v4245_v30 }
 0x176   :  { %v4284_v24 = vadd.f32 %v3195_v23, %v2080_v12  ;;  %v3138_v25 = vpop.f32.mrb[64].mxu0 }
 0x177   :  { %v3196_v26 = vpop.f32.mrb[64].mxu1  ;;  %v3139_v37 = vpop.f32.mrb[65].mxu0 }
 0x178   :  { %v3140_v31 = vadd.f32 %v3139_v37, %v3138_v25  ;;  %v3197_v32 = vpop.f32.mrb[65].mxu1  ;;  %v3141_v27 = vpop.f32.mrb[66].mxu0 }
 0x179   :  { %v3198_v33 = vadd.f32 %v3197_v32, %v3196_v26  ;;  %v3199_v34 = vpop.f32.mrb[66].mxu1  ;;  %v3142_v36 = vpop.f32.mrb[67].mxu0 }
 0x17a   :  { %v2085_v28 = vadd.f32 %v3140_v31, %v4248_v47  ;;  %v3143_v29 = vadd.f32 %v3142_v36, %v3141_v27  ;;  %v3200_v40 = vpop.f32.mrb[67].mxu1 }
 0x17b   :  { %v3201_v41 = vadd.f32 %v3200_v40, %v3199_v34 }
 0x17c   :  { %v4287_v49 = vadd.f32 %v3198_v33, %v2085_v28  ;;  %v2088_v30 = vadd.f32 %v3143_v29, %v4251_v48 }
 0x17e   :  { %v4290_v42 = vadd.f32 %v3201_v41, %v2088_v30  ;;  %v3144_v44 = vpop.f32.mrb[68].mxu0 }
 0x17f   :  { %v3202_v46 = vpop.f32.mrb[68].mxu1  ;;  %v3145_v51 = vpop.f32.mrb[69].mxu0 }
 0x180   :  { %v3146_v50 = vadd.f32 %v3145_v51, %v3144_v44  ;;  %v3203_v52 = vpop.f32.mrb[69].mxu1  ;;  %v3147_v43 = vpop.f32.mrb[70].mxu0 }
 0x181   :  { %v3204_v53 = vadd.f32 %v3203_v52, %v3202_v46  ;;  %v3205_v55 = vpop.f32.mrb[70].mxu1  ;;  %v3148_v56 = vpop.f32.mrb[71].mxu0 }
 0x182   :  { %v2093_v47 = vadd.f32 %v3146_v50, %v4254_v2  ;;  %v3149_v57 = vadd.f32 %v3148_v56, %v3147_v43  ;;  %v3206_v45 = vpop.f32.mrb[71].mxu1 }
 0x183   :  { %v3207_v59 = vadd.f32 %v3206_v45, %v3205_v55 }
 0x184   :  { %v4293_v60 = vadd.f32 %v3204_v53, %v2093_v47  ;;  %v2096_v48 = vadd.f32 %v3149_v57, %v4257_v3 }
 0x186   :  { %v4296_v63 = vadd.f32 %v3207_v59, %v2096_v48  ;;  %v3150_v61 = vpop.f32.mrb[72].mxu0 }
 0x187   :  { %v3208_v62 = vpop.f32.mrb[72].mxu1  ;;  %v3151_v0 = vpop.f32.mrb[73].mxu0 }
 0x188   :  { %v3152_v1 = vadd.f32 %v3151_v0, %v3150_v61  ;;  %v3209_v4 = vpop.f32.mrb[73].mxu1  ;;  %v3153_v5 = vpop.f32.mrb[74].mxu0 }
 0x189   :  { %v3210_v58 = vadd.f32 %v3209_v4, %v3208_v62  ;;  %v3211_v8 = vpop.f32.mrb[74].mxu1  ;;  %v3154_v9 = vpop.f32.mrb[75].mxu0 }
 0x18a   :  { %v2101_v2 = vadd.f32 %v3152_v1, %v4260_v20  ;;  %v3155_v11 = vadd.f32 %v3154_v9, %v3153_v5  ;;  %v3212_v14 = vpop.f32.mrb[75].mxu1 }
 0x18b   :  { %v3213_v16 = vadd.f32 %v3212_v14, %v3211_v8 }
 0x18c   :  { %v4299_v13 = vadd.f32 %v3210_v58, %v2101_v2  ;;  %v2104_v3 = vadd.f32 %v3155_v11, %v4263_v21 }
 0x18e   :  { %v4302_v17 = vadd.f32 %v3213_v16, %v2104_v3  ;;  %v3156_v18 = vpop.f32.mrb[76].mxu0 }
 0x18f   :  { %v3214_v19 = vpop.f32.mrb[76].mxu1  ;;  %v3157_v10 = vpop.f32.mrb[77].mxu0 }
 0x190   :  { %v3158_v15 = vadd.f32 %v3157_v10, %v3156_v18  ;;  %v3215_v22 = vpop.f32.mrb[77].mxu1  ;;  %v3159_v23 = vpop.f32.mrb[78].mxu0 }
 0x191   :  { %v3216_v12 = vadd.f32 %v3215_v22, %v3214_v19  ;;  %v3217_v25 = vpop.f32.mrb[78].mxu1  ;;  %v3160_v26 = vpop.f32.mrb[79].mxu0 }
 0x192   :  { %v2109_v20 = vadd.f32 %v3158_v15, %v4266_v38  ;;  %v3161_v37 = vadd.f32 %v3160_v26, %v3159_v23  ;;  %v3218_v31 = vpop.f32.mrb[79].mxu1 }
 0x193   :  { %v3219_v32 = vadd.f32 %v3218_v31, %v3217_v25 }
 0x194   :  { %v4305_v27 = vadd.f32 %v3216_v12, %v2109_v20  ;;  %v2112_v21 = vadd.f32 %v3161_v37, %v4269_v39 }
 0x196   :  { %v4308_v33 = vadd.f32 %v3219_v32, %v2112_v21  ;;  %v3162_v34 = vpop.f32.mrb[80].mxu0 }
 0x197   :  { %v3220_v36 = vpop.f32.mrb[80].mxu1  ;;  %v3163_v28 = vpop.f32.mrb[81].mxu0 }
 0x198   :  { %v3164_v29 = vadd.f32 %v3163_v28, %v3162_v34  ;;  %v3221_v40 = vpop.f32.mrb[81].mxu1  ;;  %v3165_v41 = vpop.f32.mrb[82].mxu0 }
 0x199   :  { %v3222_v30 = vadd.f32 %v3221_v40, %v3220_v36  ;;  %v3223_v44 = vpop.f32.mrb[82].mxu1  ;;  %v3166_v46 = vpop.f32.mrb[83].mxu0 }
 0x19a   :  { %v2117_v38 = vadd.f32 %v3164_v29, %v4272_v54  ;;  %v3224_v51 = vpop.f32.mrb[83].mxu1 }
 0x19c   :  { %v4311_v50 = vadd.f32 %v3222_v30, %v2117_v38 }
 0x19e   :  { %v3242_v52 = vpop.f32.mrb[84].mxu0 }
 0x19f   :  { %v3300_v43 = vpop.f32.mrb[84].mxu1  ;;  %v3243_v53 = vpop.f32.mrb[85].mxu0 }
 0x1a0   :  { %v3244_v39 = vadd.f32 %v3243_v53, %v3242_v52  ;;  %v3301_v55 = vpop.f32.mrb[85].mxu1  ;;  %v3245_v56 = vpop.f32.mrb[86].mxu0 }
 0x1a1   :  { %v3302_v47 = vadd.f32 %v3301_v55, %v3300_v43  ;;  %v3303_v57 = vpop.f32.mrb[86].mxu1  ;;  %v3246_v45 = vpop.f32.mrb[87].mxu0 }
 0x1a2   :  { %v2245_v59 = vadd.f32 %v3244_v39, %v4275_v6  ;;  %v3247_v48 = vadd.f32 %v3246_v45, %v3245_v56  ;;  %v3304_v61 = vpop.f32.mrb[87].mxu1 }
 0x1a3   :  { %v3305_v62 = vadd.f32 %v3304_v61, %v3303_v57 }
 0x1a4   :  { %v2333_v0 = vadd.f32 %v3302_v47, %v2245_v59  ;;  %v2248_v54 = vadd.f32 %v3247_v48, %v4278_v7 }
 0x1a6   :  { %v4315_v1 = vmax.f32 %v2333_v0, 0.0  ;;  %v2336_v4 = vadd.f32 %v3305_v62, %v2248_v54  ;;  %v3248_v5 = vpop.f32.mrb[88].mxu0 }
 0x1a7   :  { %v3306_v58 = vpop.f32.mrb[88].mxu1  ;;  %v3249_v8 = vpop.f32.mrb[89].mxu0 }
 0x1a8   :  { %v4317_v9 = vmax.f32 %v2336_v4, 0.0  ;;  %v3250_v2 = vadd.f32 %v3249_v8, %v3248_v5  ;;  %v3307_v11 = vpop.f32.mrb[89].mxu1  ;;  %v3251_v14 = vpop.f32.mrb[90].mxu0  ;;  %v2418_v6 = vmul.f32 %v4315_v1, %v4315_v1 }
 0x1a9   :  { %v3308_v16 = vadd.f32 %v3307_v11, %v3306_v58  ;;  %v3309_v3 = vpop.f32.mrb[90].mxu1  ;;  %v3252_v18 = vpop.f32.mrb[91].mxu0 }
 0x1aa   :  { %v2399_v7 = vadd.f32 %v4317_v9, %v4315_v1  ;;  %v2419_v19 = vmul.f32 %v4317_v9, %v4317_v9  ;;  %v2253_v10 = vadd.f32 %v3250_v2, %v4281_v35  ;;  %v3253_v15 = vadd.f32 %v3252_v18, %v3251_v14  ;;  %v3310_v22 = vpop.f32.mrb[91].mxu1 }
 0x1ab   :  { %v3311_v23 = vadd.f32 %v3310_v22, %v3309_v3 }
 0x1ac   :  { %v2431_v12 = vadd.f32 %v2419_v19, %v2418_v6  ;;  %v2341_v25 = vadd.f32 %v3308_v16, %v2253_v10  ;;  %v2256_v26 = vadd.f32 %v3253_v15, %v4284_v24 }
 0x1ae   :  { %v4327_v20 = vmax.f32 %v2341_v25, 0.0  ;;  %v2344_v37 = vadd.f32 %v3311_v23, %v2256_v26  ;;  %v3254_v31 = vpop.f32.mrb[92].mxu0 }
 0x1af   :  { %v3312_v32 = vpop.f32.mrb[92].mxu1  ;;  %v3255_v21 = vpop.f32.mrb[93].mxu0 }
 0x1b0   :  { %v2400_v34 = vadd.f32 %v2399_v7, %v4327_v20  ;;  %v2420_v36 = vmul.f32 %v4327_v20, %v4327_v20  ;;  %v4332_v28 = vmax.f32 %v2344_v37, 0.0  ;;  %v3256_v35 = vadd.f32 %v3255_v21, %v3254_v31  ;;  %v3313_v29 = vpop.f32.mrb[93].mxu1  ;;  %v3257_v40 = vpop.f32.mrb[94].mxu0 }
 0x1b1   :  { %v3314_v41 = vadd.f32 %v3313_v29, %v3312_v32  ;;  %v3315_v30 = vpop.f32.mrb[94].mxu1  ;;  %v3258_v44 = vpop.f32.mrb[95].mxu0 }
 0x1b2   :  { %v2432_v24 = vadd.f32 %v2431_v12, %v2420_v36  ;;  %v2401_v46 = vadd.f32 %v2400_v34, %v4332_v28  ;;  %v2421_v38 = vmul.f32 %v4332_v28, %v4332_v28  ;;  %v2261_v51 = vadd.f32 %v3256_v35, %v4287_v49  ;;  %v3316_v52 = vpop.f32.mrb[95].mxu1 }
 0x1b3   :  { %v3259_v43 = vadd.f32 %v3258_v44, %v3257_v40  ;;  %v3317_v53 = vadd.f32 %v3316_v52, %v3315_v30 }
 0x1b4   :  { %v2433_v39 = vadd.f32 %v2432_v24, %v2421_v38  ;;  %v2349_v55 = vadd.f32 %v3314_v41, %v2261_v51 }
 0x1b5   :  { %v2264_v56 = vadd.f32 %v3259_v43, %v4290_v42 }
 0x1b6   :  { %v4339_v47 = vmax.f32 %v2349_v55, 0.0  ;;  %v3260_v57 = vpop.f32.mrb[96].mxu0 }
 0x1b7   :  { %v2352_v45 = vadd.f32 %v3317_v53, %v2264_v56  ;;  %v3318_v59 = vpop.f32.mrb[96].mxu1  ;;  %v3261_v48 = vpop.f32.mrb[97].mxu0 }
 0x1b8   :  { %v2402_v61 = vadd.f32 %v2401_v46, %v4339_v47  ;;  %v2422_v62 = vmul.f32 %v4339_v47, %v4339_v47  ;;  %v3262_v0 = vadd.f32 %v3261_v48, %v3260_v57  ;;  %v3319_v49 = vpop.f32.mrb[97].mxu1  ;;  %v3263_v54 = vpop.f32.mrb[98].mxu0 }
 0x1b9   :  { %v4344_v4 = vmax.f32 %v2352_v45, 0.0  ;;  %v3320_v5 = vadd.f32 %v3319_v49, %v3318_v59  ;;  %v3321_v58 = vpop.f32.mrb[98].mxu1  ;;  %v3264_v8 = vpop.f32.mrb[99].mxu0 }
 0x1ba   :  { %v2434_v42 = vadd.f32 %v2433_v39, %v2422_v62  ;;  %v2269_v2 = vadd.f32 %v3262_v0, %v4293_v60  ;;  %v3265_v11 = vadd.f32 %v3264_v8, %v3263_v54  ;;  %v3322_v14 = vpop.f32.mrb[99].mxu1 }
 0x1bb   :  { %v2403_v6 = vadd.f32 %v2402_v61, %v4344_v4  ;;  %v2423_v16 = vmul.f32 %v4344_v4, %v4344_v4  ;;  %v3323_v3 = vadd.f32 %v3322_v14, %v3321_v58 }
 0x1bc   :  { %v2357_v18 = vadd.f32 %v3320_v5, %v2269_v2  ;;  %v2272_v7 = vadd.f32 %v3265_v11, %v4296_v63 }
 0x1bd   :  { %v2435_v19 = vadd.f32 %v2434_v42, %v2423_v16 }
 0x1be   :  { %v4351_v10 = vmax.f32 %v2357_v18, 0.0  ;;  %v2360_v15 = vadd.f32 %v3323_v3, %v2272_v7  ;;  %v3266_v22 = vpop.f32.mrb[100].mxu0 }
 0x1bf   :  { %v3324_v23 = vpop.f32.mrb[100].mxu1  ;;  %v3267_v12 = vpop.f32.mrb[101].mxu0 }
 0x1c0   :  { %v2404_v60 = vadd.f32 %v2403_v6, %v4351_v10  ;;  %v2424_v25 = vmul.f32 %v4351_v10, %v4351_v10  ;;  %v4356_v26 = vmax.f32 %v2360_v15, 0.0  ;;  %v3268_v37 = vadd.f32 %v3267_v12, %v3266_v22  ;;  %v3325_v31 = vpop.f32.mrb[101].mxu1  ;;  %v3269_v32 = vpop.f32.mrb[102].mxu0 }
 0x1c1   :  { %v3326_v21 = vadd.f32 %v3325_v31, %v3324_v23  ;;  %v3327_v34 = vpop.f32.mrb[102].mxu1  ;;  %v3270_v63 = vpop.f32.mrb[103].mxu0 }
 0x1c2   :  { %v2436_v36 = vadd.f32 %v2435_v19, %v2424_v25  ;;  %v2405_v35 = vadd.f32 %v2404_v60, %v4356_v26  ;;  %v2425_v29 = vmul.f32 %v4356_v26, %v4356_v26  ;;  %v2277_v40 = vadd.f32 %v3268_v37, %v4299_v13  ;;  %v3328_v41 = vpop.f32.mrb[103].mxu1 }
 0x1c3   :  { %v3271_v30 = vadd.f32 %v3270_v63, %v3269_v32  ;;  %v3329_v44 = vadd.f32 %v3328_v41, %v3327_v34 }
 0x1c4   :  { %v2437_v24 = vadd.f32 %v2436_v36, %v2425_v29  ;;  %v2365_v46 = vadd.f32 %v3326_v21, %v2277_v40 }
 0x1c5   :  { %v2280_v38 = vadd.f32 %v3271_v30, %v4302_v17 }
 0x1c6   :  { %v4363_v51 = vmax.f32 %v2365_v46, 0.0  ;;  %v3272_v52 = vpop.f32.mrb[104].mxu0 }
 0x1c7   :  { %v2368_v43 = vadd.f32 %v3329_v44, %v2280_v38  ;;  %v3330_v53 = vpop.f32.mrb[104].mxu1  ;;  %v3273_v39 = vpop.f32.mrb[105].mxu0 }
 0x1c8   :  { %v2406_v55 = vadd.f32 %v2405_v35, %v4363_v51  ;;  %v2426_v56 = vmul.f32 %v4363_v51, %v4363_v51  ;;  %v3274_v57 = vadd.f32 %v3273_v39, %v3272_v52  ;;  %v3331_v13 = vpop.f32.mrb[105].mxu1  ;;  %v3275_v45 = vpop.f32.mrb[106].mxu0 }
 0x1c9   :  { %v4368_v59 = vmax.f32 %v2368_v43, 0.0  ;;  %v3332_v48 = vadd.f32 %v3331_v13, %v3330_v53  ;;  %v3333_v61 = vpop.f32.mrb[106].mxu1  ;;  %v3276_v62 = vpop.f32.mrb[107].mxu0 }
 0x1ca   :  { %v2438_v17 = vadd.f32 %v2437_v24, %v2426_v56  ;;  %v2285_v0 = vadd.f32 %v3274_v57, %v4305_v27  ;;  %v3277_v49 = vadd.f32 %v3276_v62, %v3275_v45  ;;  %v3334_v54 = vpop.f32.mrb[107].mxu1 }
 0x1cb   :  { %v2407_v5 = vadd.f32 %v2406_v55, %v4368_v59  ;;  %v2427_v58 = vmul.f32 %v4368_v59, %v4368_v59  ;;  %v3335_v8 = vadd.f32 %v3334_v54, %v3333_v61 }
 0x1cc   :  { %v2373_v42 = vadd.f32 %v3332_v48, %v2285_v0  ;;  %v2288_v2 = vadd.f32 %v3277_v49, %v4308_v33 }
 0x1cd   :  { %v2439_v11 = vadd.f32 %v2438_v17, %v2427_v58 }
 0x1ce   :  { %v4375_v14 = vmax.f32 %v2373_v42, 0.0  ;;  %v2376_v6 = vadd.f32 %v3335_v8, %v2288_v2  ;;  %v3278_v16 = vpop.f32.mrb[108].mxu0 }
 0x1cf   :  { %v3336_v3 = vpop.f32.mrb[108].mxu1  ;;  %v3279_v18 = vpop.f32.mrb[109].mxu0 }
 0x1d0   :  { %v2408_v27 = vadd.f32 %v2407_v5, %v4375_v14  ;;  %v2428_v7 = vmul.f32 %v4375_v14, %v4375_v14  ;;  %v4380_v19 = vmax.f32 %v2376_v6, 0.0  ;;  %v3280_v15 = vadd.f32 %v3279_v18, %v3278_v16  ;;  %v3337_v22 = vpop.f32.mrb[109].mxu1  ;;  %v3281_v23 = vpop.f32.mrb[110].mxu0 }
 0x1d1   :  { %v3338_v12 = vadd.f32 %v3337_v22, %v3336_v3  ;;  %v3339_v60 = vpop.f32.mrb[110].mxu1  ;;  %v3282_v33 = vpop.f32.mrb[111].mxu0 }
 0x1d2   :  { %v2440_v25 = vadd.f32 %v2439_v11, %v2428_v7  ;;  %v2409_v37 = vadd.f32 %v2408_v27, %v4380_v19  ;;  %v2429_v31 = vmul.f32 %v4380_v19, %v4380_v19  ;;  %v2293_v32 = vadd.f32 %v3280_v15, %v4311_v50  ;;  %v3340_v21 = vpop.f32.mrb[111].mxu1 }
 0x1d4   :  { %v2441_v34 = vadd.f32 %v2440_v25, %v2429_v31  ;;  %v2381_v63 = vadd.f32 %v3338_v12, %v2293_v32 }
 0x1d6   :  { %v2398_v36 = vmax.f32 %v2381_v63, 0.0 }
 0x1d8   :  { %v2410_v35 = vadd.f32 %v2409_v37, %v2398_v36  ;;  %v2430_v29 = vmul.f32 %v2398_v36, %v2398_v36 }
 0x1da   :  { %v2411_v40 = vrot.slane %v2410_v35, 4  ;;  %v2442_v41 = vadd.f32 %v2441_v34, %v2430_v29 }
 0x1dc   :  { %v2412_v30 = vadd.f32 %v2411_v40, %v2410_v35  ;;  %v2443_v44 = vrot.slane %v2442_v41, 4 }
 0x1de   :  { %v2413_v24 = vrot.slane %v2412_v30, 2  ;;  %v2444_v46 = vadd.f32 %v2443_v44, %v2442_v41 }
 0x1e0   :  { %v2414_v38 = vadd.f32 %v2413_v24, %v2412_v30  ;;  %v2445_v52 = vrot.slane %v2444_v46, 2 }
 0x1e2   :  { %v2415_v43 = vrot.slane %v2414_v38, 1  ;;  %v2446_v53 = vadd.f32 %v2445_v52, %v2444_v46 }
 0x1e4   :  { %v2416_v39 = vadd.f32 %v2415_v43, %v2414_v38  ;;  %v2447_v55 = vrot.slane %v2446_v53, 1 }
 0x1e6   :  { %v2417_v56 = vmul.f32 0.010204081, %v2416_v39  ;;  %v2448_v50 = vadd.f32 %v2447_v55, %v2446_v53 }
 0x1e8   :  { %v2449_v57 = vmul.f32 0.010204081, %v2448_v50  ;;  %v2450_v13 = vmul.f32 %v2417_v56, %v2417_v56  ;;  %v2456_v45 = vsub.f32 %v4315_v1, %v2417_v56  ;;  %v2457_v48 = vsub.f32 %v4317_v9, %v2417_v56 }
 0x1e9   :  { %v2458_v61 = vsub.f32 %v4327_v20, %v2417_v56  ;;  %v2459_v62 = vsub.f32 %v4332_v28, %v2417_v56  ;;  %v2460_v17 = vsub.f32 %v4339_v47, %v2417_v56  ;;  %v2461_v0 = vsub.f32 %v4344_v4, %v2417_v56  ;;  %v2454_v4 = vld [vmem:[%s4427_s2] sm:$0x1] }
 0x1ea   :  { %v2451_v49 = vsub.f32 %v2449_v57, %v2450_v13  ;;  %v2462_v54 = vsub.f32 %v4351_v10, %v2417_v56  ;;  %v2463_v5 = vsub.f32 %v4356_v26, %v2417_v56  ;;  %v2464_v58 = vsub.f32 %v4363_v51, %v2417_v56 }
 0x1eb   :  { %v2465_v8 = vsub.f32 %v4368_v59, %v2417_v56  ;;  %v2466_v1 = vsub.f32 %v4375_v14, %v2417_v56  ;;  %v2467_v9 = vsub.f32 %v4380_v19, %v2417_v56  ;;  %v2468_v20 = vsub.f32 %v2398_v36, %v2417_v56  ;;  %v2816_v14 = vld [vmem:[%s4428_s3] ss:$0 sm:$0xff] }
 0x1ec   :  { %v2452_v42 = vadd.f32 1e-05, %v2451_v49  ;;  %v2469_v28 = vlaneseq }
 0x1ee   :  { %3486 = vrsqrt.f32 %v2452_v42  ;;  %v2470_v47 = vshrl.u32 %v2469_v28, 7 }
 0x1f0   :  { %v2471_v10 = vsub.s32 0, %v2470_v47 }
 0x1f8   :  { %v3487_v2 = vpop.eup %3486 }
 0x1f9   :  { %v2455_v26 = vmul.f32 %v3487_v2, %v2454_v4 }
 0x1fb   :  { %v2472_v11 = vrot.slane %v2455_v26, %v2471_v10 }
 0x1fd   :  { %v2473_v51 = vmul.f32 %v2472_v11, %v2456_v45  ;;  %v2474_v6 = vmul.f32 %v2472_v11, %v2457_v48  ;;  %v2475_v59 = vmul.f32 %v2472_v11, %v2458_v61  ;;  %v2476_v16 = vmul.f32 %v2472_v11, %v2459_v62 }
 0x1fe   :  { %v2477_v3 = vmul.f32 %v2472_v11, %v2460_v17  ;;  %v2478_v18 = vmul.f32 %v2472_v11, %v2461_v0  ;;  %v2479_v27 = vmul.f32 %v2472_v11, %v2462_v54  ;;  %v2480_v7 = vmul.f32 %v2472_v11, %v2463_v5 }
 0x1ff   :  { %v2481_v19 = vmul.f32 %v2472_v11, %v2464_v58  ;;  %v2482_v15 = vmul.f32 %v2472_v11, %v2465_v8  ;;  %v2483_v22 = vmul.f32 %v2472_v11, %v2466_v1  ;;  %v2484_v23 = vmul.f32 %v2472_v11, %v2467_v9 }
 0x200   :  { %v2485_v12 = vmul.f32 %v2472_v11, %v2468_v20  ;;  %v2493_v60 = vadd.f32 %v2816_v14, %v2473_v51  ;;  %v2494_v33 = vadd.f32 %v2816_v14, %v2474_v6  ;;  %v2495_v25 = vadd.f32 %v2816_v14, %v2475_v59 }
 0x201   :  { %v2496_v37 = vadd.f32 %v2816_v14, %v2476_v16  ;;  %v2497_v31 = vadd.f32 %v2816_v14, %v2477_v3  ;;  %v2498_v32 = vadd.f32 %v2816_v14, %v2478_v18  ;;  %v2499_v21 = vadd.f32 %v2816_v14, %v2479_v27 }
 0x202   :  { %v2500_v34 = vadd.f32 %v2816_v14, %v2480_v7  ;;  %v2501_v63 = vadd.f32 %v2816_v14, %v2481_v19  ;;  %v2502_v36 = vadd.f32 %v2816_v14, %v2482_v15  ;;  %v2503_v35 = vadd.f32 %v2816_v14, %v2483_v22 }
 0x203   :  { %v2504_v29 = vadd.f32 %v2816_v14, %v2484_v23  ;;  %v2505_v40 = vadd.f32 %v2816_v14, %v2485_v12  ;;  %v2846_v41 = vpack.c.bf16 %v2494_v33, %v2493_v60  ;;  %v2851_v30 = vpack.c.bf16 %v2496_v37, %v2495_v25 }
 0x204   :  { %v2856_v44 = vpack.c.bf16 %v2498_v32, %v2497_v31  ;;  %v2861_v24 = vpack.c.bf16 %v2500_v34, %v2499_v21  ;;  %v2866_v46 = vpack.c.bf16 %v2502_v36, %v2501_v63 }
 0x205   :  { %v2842_v38 = vpack.c.bf16 %v2505_v40, %v2505_v40  ;;  %2847 = vst [vmem:[%s4429_s4] sm:$0xff] %v2846_v41   ;;  %2873 = vst [vmem:[%s4429_s4 + $0x8] sm:$0xff] %v2851_v30   ;;  %v2871_v52 = vpack.c.bf16 %v2504_v29, %v2503_v35 }
 0x206   :  { %2874 = vst [vmem:[%s4429_s4 + $0x10] sm:$0xff] %v2856_v44   ;;  %2875 = vst [vmem:[%s4429_s4 + $0x18] sm:$0xff] %v2861_v24  }
 0x207   :  { %2876 = vst [vmem:[%s4429_s4 + $0x20] sm:$0xff] %v2866_v46   ;;  %2877 = vst [vmem:[%s4429_s4 + $0x28] sm:$0xff] %v2871_v52  }
 0x208   :  { %2571 = vst [vmem:[%s4429_s4 + $0x30] sm:$0xf] %v2842_v38 }

// kernel: discriminator_forward.7
= control target key start
LH: loop header
LB: loop body
LE: loop exit
PB: predicated region body
PF: predicated region fallthrough
CT: control target
= control target key end

     0   :  { %s3972_s1 = inlined_call_operand.vmem [shape: bf16[2048,256], index: 1, kind: input, shape index: {}]   ;;  %s3973_s0 = inlined_call_operand.vmem [shape: bf16[24,2048], index: 0, kind: input, shape index: {}]   ;;  %s3974_s2 = inlined_call_operand.vmem [shape: f32[1,256], index: 2, kind: input, shape index: {}]   ;;  %s3975_s3 = inlined_call_operand.vmem [shape: f32[1,256], index: 3, kind: input, shape index: {}]   ;;  %s3976_s4 = inlined_call_operand.vmem [shape: bf16[24,256], index: 4, kind: output, shape index: {}]  }
   0x1   :  { %v2604_v0 = vld [vmem:[%s3972_s1 + $0x4] ss:$8 sps:$4 sm:$0xff]   ;;  %v2608_v2 = vld [vmem:[%s3972_s1] ss:$8 sps:$4 sm:$0xff]   ;;  %v2610_v4 = vld [vmem:[%s3972_s1 + $0x14] ss:$8 sps:$4 sm:$0xff]  }
   0x2   :  { %v2606_v1 = vld [vmem:[%s3972_s1 + $0x404] ss:$8 sps:$4 sm:$0xff]   ;;  %1713 = vmatprep.subr.bf16.mxu1 %v2604_v0  ;;  %v2609_v3 = vld [vmem:[%s3972_s1 + $0x400] ss:$8 sps:$4 sm:$0xff]   ;;  %v2612_v5 = vld [vmem:[%s3972_s1 + $0x414] ss:$8 sps:$4 sm:$0xff]  }
   0x3   :  { %1917 = vmatprep.subr.bf16.mxu0 %v2606_v1  ;;  %1714 = vmatpush1.bf16.msra.mxu1 %v2608_v2  ;;  %v2614_v6 = vld [vmem:[%s3972_s1 + $0x10] ss:$8 sps:$4 sm:$0xff]   ;;  %v2616_v8 = vld [vmem:[%s3972_s1 + $0x24] ss:$8 sps:$4 sm:$0xff]   ;;  %v2620_v10 = vld [vmem:[%s3972_s1 + $0x20] ss:$8 sps:$4 sm:$0xff]  }
   0x4   :  { %1918 = vmatpush1.bf16.msra.mxu0 %v2609_v3  ;;  %1715 = vmatprep.subr.bf16.mxu1 %v2610_v4  ;;  %v2615_v7 = vld [vmem:[%s3972_s1 + $0x410] ss:$8 sps:$4 sm:$0xff]   ;;  %v2618_v9 = vld [vmem:[%s3972_s1 + $0x424] ss:$8 sps:$4 sm:$0xff]   ;;  %v2621_v11 = vld [vmem:[%s3972_s1 + $0x420] ss:$8 sps:$4 sm:$0xff]  }
   0x5   :  { %1919 = vmatprep.subr.bf16.mxu0 %v2612_v5  ;;  %v2622_v12 = vld [vmem:[%s3972_s1 + $0x34] ss:$8 sps:$4 sm:$0xff]   ;;  %v2626_v14 = vld [vmem:[%s3972_s1 + $0x30] ss:$8 sps:$4 sm:$0xff]   ;;  %v2628_v16 = vld [vmem:[%s3972_s1 + $0x44] ss:$8 sps:$4 sm:$0xff]  }
   0x6   :  { %v2624_v13 = vld [vmem:[%s3972_s1 + $0x434] ss:$8 sps:$4 sm:$0xff]   ;;  %v2627_v15 = vld [vmem:[%s3972_s1 + $0x430] ss:$8 sps:$4 sm:$0xff]   ;;  %v2630_v17 = vld [vmem:[%s3972_s1 + $0x444] ss:$8 sps:$4 sm:$0xff]  }
   0x7   :  { %1716 = vmatpush1.bf16.msra.mxu1 %v2614_v6  ;;  %v2632_v18 = vld [vmem:[%s3972_s1 + $0x40] ss:$8 sps:$4 sm:$0xff]   ;;  %v2634_v20 = vld [vmem:[%s3972_s1 + $0x54] ss:$8 sps:$4 sm:$0xff]   ;;  %v2638_v22 = vld [vmem:[%s3972_s1 + $0x50] ss:$8 sps:$4 sm:$0xff]  }
   0x8   :  { %1920 = vmatpush1.bf16.msra.mxu0 %v2615_v7  ;;  %1717 = vmatprep.subr.bf16.mxu1 %v2616_v8  ;;  %v2633_v19 = vld [vmem:[%s3972_s1 + $0x440] ss:$8 sps:$4 sm:$0xff]   ;;  %v2636_v21 = vld [vmem:[%s3972_s1 + $0x454] ss:$8 sps:$4 sm:$0xff]   ;;  %v2639_v23 = vld [vmem:[%s3972_s1 + $0x450] ss:$8 sps:$4 sm:$0xff]  }
   0x9   :  { %1921 = vmatprep.subr.bf16.mxu0 %v2618_v9  ;;  %v2640_v24 = vld [vmem:[%s3972_s1 + $0x64] ss:$8 sps:$4 sm:$0xff]   ;;  %v2644_v26 = vld [vmem:[%s3972_s1 + $0x60] ss:$8 sps:$4 sm:$0xff]   ;;  %v2646_v28 = vld [vmem:[%s3972_s1 + $0x74] ss:$8 sps:$4 sm:$0xff]  }
   0xa   :  { %v2642_v25 = vld [vmem:[%s3972_s1 + $0x464] ss:$8 sps:$4 sm:$0xff]   ;;  %v2645_v27 = vld [vmem:[%s3972_s1 + $0x460] ss:$8 sps:$4 sm:$0xff]   ;;  %v2648_v29 = vld [vmem:[%s3972_s1 + $0x474] ss:$8 sps:$4 sm:$0xff]  }
   0xb   :  { %1718 = vmatpush1.bf16.msra.mxu1 %v2620_v10  ;;  %v2650_v30 = vld [vmem:[%s3972_s1 + $0x70] ss:$8 sps:$4 sm:$0xff]   ;;  %v2652_v32 = vld [vmem:[%s3972_s1 + $0x84] ss:$8 sps:$4 sm:$0xff]   ;;  %v2656_v34 = vld [vmem:[%s3972_s1 + $0x80] ss:$8 sps:$4 sm:$0xff]  }
   0xc   :  { %1922 = vmatpush1.bf16.msra.mxu0 %v2621_v11  ;;  %1719 = vmatprep.subr.bf16.mxu1 %v2622_v12  ;;  %v2651_v31 = vld [vmem:[%s3972_s1 + $0x470] ss:$8 sps:$4 sm:$0xff]   ;;  %v2654_v33 = vld [vmem:[%s3972_s1 + $0x484] ss:$8 sps:$4 sm:$0xff]   ;;  %v2657_v35 = vld [vmem:[%s3972_s1 + $0x480] ss:$8 sps:$4 sm:$0xff]  }
   0xd   :  { %1923 = vmatprep.subr.bf16.mxu0 %v2624_v13  ;;  %v2658_v36 = vld [vmem:[%s3972_s1 + $0x94] ss:$8 sps:$4 sm:$0xff]   ;;  %v2662_v38 = vld [vmem:[%s3972_s1 + $0x90] ss:$8 sps:$4 sm:$0xff]   ;;  %v2664_v40 = vld [vmem:[%s3972_s1 + $0xa4] ss:$8 sps:$4 sm:$0xff]  }
   0xe   :  { %v2660_v37 = vld [vmem:[%s3972_s1 + $0x494] ss:$8 sps:$4 sm:$0xff]   ;;  %v2663_v39 = vld [vmem:[%s3972_s1 + $0x490] ss:$8 sps:$4 sm:$0xff]   ;;  %v2666_v41 = vld [vmem:[%s3972_s1 + $0x4a4] ss:$8 sps:$4 sm:$0xff]  }
   0xf   :  { %1720 = vmatpush1.bf16.msra.mxu1 %v2626_v14  ;;  %v2668_v42 = vld [vmem:[%s3972_s1 + $0xa0] ss:$8 sps:$4 sm:$0xff]   ;;  %v2670_v44 = vld [vmem:[%s3972_s1 + $0xb4] ss:$8 sps:$4 sm:$0xff]   ;;  %v2674_v46 = vld [vmem:[%s3972_s1 + $0xb0] ss:$8 sps:$4 sm:$0xff]  }
  0x10   :  { %1924 = vmatpush1.bf16.msra.mxu0 %v2627_v15  ;;  %1721 = vmatprep.subr.bf16.mxu1 %v2628_v16  ;;  %v2669_v43 = vld [vmem:[%s3972_s1 + $0x4a0] ss:$8 sps:$4 sm:$0xff]   ;;  %v2672_v45 = vld [vmem:[%s3972_s1 + $0x4b4] ss:$8 sps:$4 sm:$0xff]   ;;  %v2675_v47 = vld [vmem:[%s3972_s1 + $0x4b0] ss:$8 sps:$4 sm:$0xff]  }
  0x11   :  { %1925 = vmatprep.subr.bf16.mxu0 %v2630_v17  ;;  %v17_v48 = vld [vmem:[%s3973_s0] sm:$0xff]  ;;  %v2682_v58 = vld [vmem:[%s3972_s1 + $0xd4] ss:$8 sps:$4 sm:$0xff]   ;;  %v2686_v60 = vld [vmem:[%s3972_s1 + $0xd0] ss:$8 sps:$4 sm:$0xff]  }
  0x12   :  { %v25_v49 = vld [vmem:[%s3973_s0 + $0x40] sm:$0xff]  ;;  %v2684_v59 = vld [vmem:[%s3972_s1 + $0x4d4] ss:$8 sps:$4 sm:$0xff]   ;;  %v2687_v61 = vld [vmem:[%s3972_s1 + $0x4d0] ss:$8 sps:$4 sm:$0xff]  }
  0x13   :  { %1722 = vmatpush1.bf16.msra.mxu1 %v2632_v18  ;;  %v2676_v50 = vld [vmem:[%s3972_s1 + $0xc4] ss:$8 sps:$4 sm:$0xff]   ;;  %v2257_v52 = vcombine.high %v17_v48, %v25_v49  ;;  %v2680_v56 = vld [vmem:[%s3972_s1 + $0xc0] ss:$8 sps:$4 sm:$0xff]   ;;  %v2694_v2 = vld [vmem:[%s3972_s1 + $0xf4] ss:$8 sps:$4 sm:$0xff]   ;;  %v2256_v8 = vcombine.low %v17_v48, %v25_v49 }
  0x14   :  { %1926 = vmatpush1.bf16.msra.mxu0 %v2633_v19  ;;  %1723 = vmatprep.subr.bf16.mxu1 %v2634_v20  ;;  %v2678_v51 = vld [vmem:[%s3972_s1 + $0x4c4] ss:$8 sps:$4 sm:$0xff]   ;;  %v2681_v57 = vld [vmem:[%s3972_s1 + $0x4c0] ss:$8 sps:$4 sm:$0xff]   ;;  %v2696_v3 = vld [vmem:[%s3972_s1 + $0x4f4] ss:$8 sps:$4 sm:$0xff]  }
  0x15   :  { %1927 = vmatprep.subr.bf16.mxu0 %v2636_v21  ;;  %v21_v53 = vld [vmem:[%s3973_s0 + $0x20] sm:$0xff]  ;;  %1745 = vmatprep.mubr.bf16.mxu1 %v2257_v52  ;;  %v2698_v4 = vld [vmem:[%s3972_s1 + $0xf0] ss:$8 sps:$4 sm:$0xff]   ;;  %v2708_v12 = vld [vmem:[%s3972_s1 + $0x114] ss:$8 sps:$4 sm:$0xff]  }
  0x16   :  { %v29_v54 = vld [vmem:[%s3973_s0 + $0x60] sm:$0xff]  ;;  %v2699_v5 = vld [vmem:[%s3972_s1 + $0x4f0] ss:$8 sps:$4 sm:$0xff]   ;;  %v2711_v13 = vld [vmem:[%s3972_s1 + $0x514] ss:$8 sps:$4 sm:$0xff]  }
  0x17   :  { %1724 = vmatpush1.bf16.msra.mxu1 %v2638_v22  ;;  %v2265_v55 = vcombine.high %v21_v53, %v29_v54  ;;  %v2688_v62 = vld [vmem:[%s3972_s1 + $0xe4] ss:$8 sps:$4 sm:$0xff]   ;;  %v2692_v0 = vld [vmem:[%s3972_s1 + $0xe0] ss:$8 sps:$4 sm:$0xff]   ;;  %v2264_v10 = vcombine.low %v21_v53, %v29_v54  ;;  %v2706_v14 = vld [vmem:[%s3972_s1 + $0x110] ss:$8 sps:$4 sm:$0xff]  }
  0x18   :  { %1928 = vmatpush1.bf16.msra.mxu0 %v2639_v23  ;;  %1725 = vmatprep.subr.bf16.mxu1 %v2640_v24  ;;  %v2690_v63 = vld [vmem:[%s3972_s1 + $0x4e4] ss:$8 sps:$4 sm:$0xff]   ;;  %v2693_v1 = vld [vmem:[%s3972_s1 + $0x4e0] ss:$8 sps:$4 sm:$0xff]   ;;  %v2709_v15 = vld [vmem:[%s3972_s1 + $0x510] ss:$8 sps:$4 sm:$0xff]  }
  0x19   :  { %1929 = vmatprep.subr.bf16.mxu0 %v2642_v25  ;;  %1949 = vmatprep.mubr.bf16.mxu0 %v2265_v55  ;;  %v2702_v6 = vld [vmem:[%s3972_s1 + $0x104] ss:$8 sps:$4 sm:$0xff]   ;;  %v2700_v9 = vld [vmem:[%s3972_s1 + $0x100] ss:$8 sps:$4 sm:$0xff]   ;;  %v2720_v20 = vld [vmem:[%s3972_s1 + $0x134] ss:$8 sps:$4 sm:$0xff]  }
  0x1a   :  { %v2705_v7 = vld [vmem:[%s3972_s1 + $0x504] ss:$8 sps:$4 sm:$0xff]   ;;  %v2703_v11 = vld [vmem:[%s3972_s1 + $0x500] ss:$8 sps:$4 sm:$0xff]   ;;  %v2723_v21 = vld [vmem:[%s3972_s1 + $0x534] ss:$8 sps:$4 sm:$0xff]  }
  0x1b   :  { %1726 = vmatpush1.bf16.msra.mxu1 %v2644_v26  ;;  %v2714_v16 = vld [vmem:[%s3972_s1 + $0x124] ss:$8 sps:$4 sm:$0xff]   ;;  %v2712_v18 = vld [vmem:[%s3972_s1 + $0x120] ss:$8 sps:$4 sm:$0xff]   ;;  %v2718_v22 = vld [vmem:[%s3972_s1 + $0x130] ss:$8 sps:$4 sm:$0xff]  }
  0x1c   :  { %1930 = vmatpush1.bf16.msra.mxu0 %v2645_v27  ;;  %1727 = vmatprep.subr.bf16.mxu1 %v2646_v28  ;;  %v2717_v17 = vld [vmem:[%s3972_s1 + $0x524] ss:$8 sps:$4 sm:$0xff]   ;;  %v2715_v19 = vld [vmem:[%s3972_s1 + $0x520] ss:$8 sps:$4 sm:$0xff]   ;;  %v2721_v23 = vld [vmem:[%s3972_s1 + $0x530] ss:$8 sps:$4 sm:$0xff]  }
  0x1d   :  { %1931 = vmatprep.subr.bf16.mxu0 %v2648_v29  ;;  %v2726_v24 = vld [vmem:[%s3972_s1 + $0x144] ss:$8 sps:$4 sm:$0xff]   ;;  %v2724_v26 = vld [vmem:[%s3972_s1 + $0x140] ss:$8 sps:$4 sm:$0xff]   ;;  %v2732_v28 = vld [vmem:[%s3972_s1 + $0x154] ss:$8 sps:$4 sm:$0xff]  }
  0x1e   :  { %v2729_v25 = vld [vmem:[%s3972_s1 + $0x544] ss:$8 sps:$4 sm:$0xff]   ;;  %v2727_v27 = vld [vmem:[%s3972_s1 + $0x540] ss:$8 sps:$4 sm:$0xff]   ;;  %v2735_v29 = vld [vmem:[%s3972_s1 + $0x554] ss:$8 sps:$4 sm:$0xff]  }
  0x1f   :  { %1728 = vmatpush1.bf16.msra.mxu1 %v2650_v30  ;;  %v33_v30 = vld [vmem:[%s3973_s0 + $0x80] sm:$0xff]  ;;  %v3353_v48 = vld [vmem:[%s3973_s0 + $0x68] sm:$0xff] }
  0x20   :  { %1932 = vmatpush1.bf16.msra.mxu0 %v2651_v31  ;;  %1729 = vmatprep.subr.bf16.mxu1 %v2652_v32  ;;  %v2273_v31 = vcombine.high %v33_v30, %v33_v30  ;;  %v37_v32 = vld [vmem:[%s3973_s0 + $0xa0] sm:$0xff] }
  0x21   :  { %1933 = vmatprep.subr.bf16.mxu0 %v2654_v33  ;;  %v2272_v33 = vcombine.low %v33_v30, %v33_v30  ;;  %v2750_v52 = vld [vmem:[%s3972_s1 + $0x184] ss:$8 sps:$4 sm:$0xff]   ;;  %v2748_v54 = vld [vmem:[%s3972_s1 + $0x180] ss:$8 sps:$4 sm:$0xff]  }
  0x22   :  { %v2753_v53 = vld [vmem:[%s3972_s1 + $0x584] ss:$8 sps:$4 sm:$0xff]   ;;  %v2751_v55 = vld [vmem:[%s3972_s1 + $0x580] ss:$8 sps:$4 sm:$0xff]  }
  0x23   :  { %1730 = vmatpush1.bf16.msra.mxu1 %v2656_v34  ;;  %v2730_v34 = vld [vmem:[%s3972_s1 + $0x150] ss:$8 sps:$4 sm:$0xff]  }
  0x24   :  { %1934 = vmatpush1.bf16.msra.mxu0 %v2657_v35  ;;  %1731 = vmatprep.subr.bf16.mxu1 %v2658_v36  ;;  %v2733_v35 = vld [vmem:[%s3972_s1 + $0x550] ss:$8 sps:$4 sm:$0xff]   ;;  %v2281_v36 = vcombine.high %v37_v32, %v37_v32 }
  0x25   :  { %1935 = vmatprep.subr.bf16.mxu0 %v2660_v37  ;;  %v2280_v37 = vcombine.low %v37_v32, %v37_v32  ;;  %v2806_v32 = vld [vmem:[%s3972_s1 + $0x210] ss:$8 sps:$4 sm:$0xff]  }
  0x27   :  { %1732 = vmatpush1.bf16.msra.mxu1 %v2662_v38  ;;  %v2738_v38 = vld [vmem:[%s3972_s1 + $0x164] ss:$8 sps:$4 sm:$0xff]  }
  0x28   :  { %1936 = vmatpush1.bf16.msra.mxu0 %v2663_v39  ;;  %1733 = vmatprep.subr.bf16.mxu1 %v2664_v40  ;;  %v2741_v39 = vld [vmem:[%s3972_s1 + $0x564] ss:$8 sps:$4 sm:$0xff]   ;;  %v2736_v40 = vld [vmem:[%s3972_s1 + $0x160] ss:$8 sps:$4 sm:$0xff]  }
  0x29   :  { %1937 = vmatprep.subr.bf16.mxu0 %v2666_v41  ;;  %v2739_v41 = vld [vmem:[%s3972_s1 + $0x560] ss:$8 sps:$4 sm:$0xff]  }
  0x2b   :  { %1734 = vmatpush1.bf16.msra.mxu1 %v2668_v42  ;;  %v3330_v42 = vld [vmem:[%s3973_s0 + $0x8] sm:$0xff] }
  0x2c   :  { %1938 = vmatpush1.bf16.msra.mxu0 %v2669_v43  ;;  %1735 = vmatprep.subr.bf16.mxu1 %v2670_v44  ;;  %v3335_v43 = vld [vmem:[%s3973_s0 + $0x48] sm:$0xff]  ;;  %v2744_v44 = vld [vmem:[%s3972_s1 + $0x174] ss:$8 sps:$4 sm:$0xff]  }
  0x2d   :  { %1939 = vmatprep.subr.bf16.mxu0 %v2672_v45  ;;  %v2259_v45 = vcombine.high %v3330_v42, %v3335_v43 }
  0x2f   :  { %1736 = vmatpush1.bf16.msra.mxu1 %v2674_v46  ;;  %v2747_v46 = vld [vmem:[%s3972_s1 + $0x574] ss:$8 sps:$4 sm:$0xff]  }
  0x30   :  { %1940 = vmatpush1.bf16.msra.mxu0 %v2675_v47  ;;  %1737 = vmatprep.subr.bf16.mxu1 %v2676_v50  ;;  %v3348_v47 = vld [vmem:[%s3973_s0 + $0x28] sm:$0xff]  ;;  %v2742_v50 = vld [vmem:[%s3972_s1 + $0x170] ss:$8 sps:$4 sm:$0xff]  }
  0x31   :  { %1941 = vmatprep.subr.bf16.mxu0 %v2678_v51  ;;  %v2267_v49 = vcombine.high %v3348_v47, %v3353_v48  ;;  %v2745_v51 = vld [vmem:[%s3972_s1 + $0x570] ss:$8 sps:$4 sm:$0xff]  }
  0x33   :  { %1738 = vmatpush1.bf16.msra.mxu1 %v2680_v56  ;;  %v2756_v56 = vld [vmem:[%s3972_s1 + $0x194] ss:$8 sps:$4 sm:$0xff]  }
  0x34   :  { %1942 = vmatpush1.bf16.msra.mxu0 %v2681_v57  ;;  %1739 = vmatprep.subr.bf16.mxu1 %v2682_v58  ;;  %v2759_v57 = vld [vmem:[%s3972_s1 + $0x594] ss:$8 sps:$4 sm:$0xff]   ;;  %v2754_v58 = vld [vmem:[%s3972_s1 + $0x190] ss:$8 sps:$4 sm:$0xff]  }
  0x35   :  { %1943 = vmatprep.subr.bf16.mxu0 %v2684_v59  ;;  %v2757_v59 = vld [vmem:[%s3972_s1 + $0x590] ss:$8 sps:$4 sm:$0xff]  }
  0x37   :  { %1740 = vmatpush1.bf16.msra.mxu1 %v2686_v60  ;;  %v2762_v60 = vld [vmem:[%s3972_s1 + $0x1a4] ss:$8 sps:$4 sm:$0xff]  }
  0x38   :  { %1944 = vmatpush1.bf16.msra.mxu0 %v2687_v61  ;;  %1741 = vmatprep.subr.bf16.mxu1 %v2688_v62  ;;  %v2765_v61 = vld [vmem:[%s3972_s1 + $0x5a4] ss:$8 sps:$4 sm:$0xff]   ;;  %v2760_v62 = vld [vmem:[%s3972_s1 + $0x1a0] ss:$8 sps:$4 sm:$0xff]  }
  0x39   :  { %1945 = vmatprep.subr.bf16.mxu0 %v2690_v63  ;;  %v2763_v63 = vld [vmem:[%s3972_s1 + $0x5a0] ss:$8 sps:$4 sm:$0xff]  }
  0x3b   :  { %1742 = vmatpush1.bf16.msra.mxu1 %v2692_v0  ;;  %v2768_v0 = vld [vmem:[%s3972_s1 + $0x1b4] ss:$8 sps:$4 sm:$0xff]  }
  0x3c   :  { %1946 = vmatpush1.bf16.msra.mxu0 %v2693_v1  ;;  %1743 = vmatprep.subr.bf16.mxu1 %v2694_v2  ;;  %v2771_v1 = vld [vmem:[%s3972_s1 + $0x5b4] ss:$8 sps:$4 sm:$0xff]   ;;  %v2766_v2 = vld [vmem:[%s3972_s1 + $0x1b0] ss:$8 sps:$4 sm:$0xff]  }
  0x3d   :  { %1947 = vmatprep.subr.bf16.mxu0 %v2696_v3  ;;  %v2769_v3 = vld [vmem:[%s3972_s1 + $0x5b0] ss:$8 sps:$4 sm:$0xff]  }
  0x3f   :  { %1744 = vmatpush1.bf16.msra.mxu1 %v2698_v4  ;;  %v2774_v4 = vld [vmem:[%s3972_s1 + $0x1c4] ss:$8 sps:$4 sm:$0xff]  }
  0x40   :  { %1948 = vmatpush1.bf16.msra.mxu0 %v2699_v5  ;;  %1764 = vmatprep.subr.bf16.mxu1 %v2702_v6  ;;  %v2777_v5 = vld [vmem:[%s3972_s1 + $0x5c4] ss:$8 sps:$4 sm:$0xff]   ;;  %v2772_v6 = vld [vmem:[%s3972_s1 + $0x1c0] ss:$8 sps:$4 sm:$0xff]  }
  0x41   :  { %1968 = vmatprep.subr.bf16.mxu0 %v2705_v7  ;;  %v2775_v7 = vld [vmem:[%s3972_s1 + $0x5c0] ss:$8 sps:$4 sm:$0xff]  }
  0x42   :  { %1746 = vmatmul.mubr.bf16.vlgmr.msra.gmra.mrb[0].mxu1 %v2256_v8  ;;  %v2780_v8 = vld [vmem:[%s3972_s1 + $0x1d4] ss:$8 sps:$4 sm:$0xff]  }
  0x43   :  { %1950 = vmatmul.mubr.bf16.vlgmr.msra.gmra.mrb[0].mxu0 %v2264_v10  ;;  %1765 = vmatpush1.bf16.msra.mxu1 %v2700_v9  ;;  %v2783_v9 = vld [vmem:[%s3972_s1 + $0x5d4] ss:$8 sps:$4 sm:$0xff]   ;;  %v2778_v10 = vld [vmem:[%s3972_s1 + $0x1d0] ss:$8 sps:$4 sm:$0xff]  }
  0x44   :  { %1969 = vmatpush1.bf16.msra.mxu0 %v2703_v11  ;;  %1766 = vmatprep.subr.bf16.mxu1 %v2708_v12  ;;  %v2781_v11 = vld [vmem:[%s3972_s1 + $0x5d0] ss:$8 sps:$4 sm:$0xff]   ;;  %v2787_v12 = vld [vmem:[%s3972_s1 + $0x1e4] ss:$8 sps:$4 sm:$0xff]  }
  0x45   :  { %1970 = vmatprep.subr.bf16.mxu0 %v2711_v13  ;;  %1755 = vmatprep.mubr.bf16.mxu1 %v2273_v31  ;;  %v2791_v13 = vld [vmem:[%s3972_s1 + $0x5e4] ss:$8 sps:$4 sm:$0xff]  }
  0x46   :  { %1959 = vmatprep.mubr.bf16.mxu0 %v2281_v36  ;;  %v2812_v36 = vld [vmem:[%s3972_s1 + $0x220] ss:$8 sps:$4 sm:$0xff]  }
  0x47   :  { %1767 = vmatpush1.bf16.msra.mxu1 %v2706_v14  ;;  %v2785_v14 = vld [vmem:[%s3972_s1 + $0x1e0] ss:$8 sps:$4 sm:$0xff]  }
  0x48   :  { %1971 = vmatpush1.bf16.msra.mxu0 %v2709_v15  ;;  %1768 = vmatprep.subr.bf16.mxu1 %v2714_v16  ;;  %v2789_v15 = vld [vmem:[%s3972_s1 + $0x5e0] ss:$8 sps:$4 sm:$0xff]   ;;  %v2796_v16 = vld [vmem:[%s3972_s1 + $0x1f4] ss:$8 sps:$4 sm:$0xff]  }
  0x49   :  { %1972 = vmatprep.subr.bf16.mxu0 %v2717_v17  ;;  %v2799_v17 = vld [vmem:[%s3972_s1 + $0x5f4] ss:$8 sps:$4 sm:$0xff]  }
  0x4a   :  { %1756 = vmatmul.mubr.bf16.gmra.mrb[4].mxu1 %v2272_v33  ;;  %v2809_v33 = vld [vmem:[%s3972_s1 + $0x610] ss:$8 sps:$4 sm:$0xff]  }
  0x4b   :  { %1769 = vmatpush1.bf16.msra.mxu1 %v2712_v18  ;;  %1960 = vmatmul.mubr.bf16.gmra.mrb[4].mxu0 %v2280_v37  ;;  %v2794_v18 = vld [vmem:[%s3972_s1 + $0x1f0] ss:$8 sps:$4 sm:$0xff]   ;;  %v2815_v37 = vld [vmem:[%s3972_s1 + $0x620] ss:$8 sps:$4 sm:$0xff]  }
  0x4c   :  { %1973 = vmatpush1.bf16.msra.mxu0 %v2715_v19  ;;  %1770 = vmatprep.subr.bf16.mxu1 %v2720_v20  ;;  %v2797_v19 = vld [vmem:[%s3972_s1 + $0x5f0] ss:$8 sps:$4 sm:$0xff]   ;;  %v2802_v20 = vld [vmem:[%s3972_s1 + $0x204] ss:$8 sps:$4 sm:$0xff]  }
  0x4d   :  { %1974 = vmatprep.subr.bf16.mxu0 %v2723_v21  ;;  %1796 = vmatprep.mubr.bf16.mxu1 %v2259_v45  ;;  %v2805_v21 = vld [vmem:[%s3972_s1 + $0x604] ss:$8 sps:$4 sm:$0xff]   ;;  %v2823_v45 = vld [vmem:[%s3972_s1 + $0x634] ss:$8 sps:$4 sm:$0xff]  }
  0x4e   :  { %2000 = vmatprep.mubr.bf16.mxu0 %v2267_v49  ;;  %v2821_v49 = vld [vmem:[%s3972_s1 + $0x630] ss:$8 sps:$4 sm:$0xff]  }
  0x4f   :  { %1771 = vmatpush1.bf16.msra.mxu1 %v2718_v22  ;;  %v2800_v22 = vld [vmem:[%s3972_s1 + $0x200] ss:$8 sps:$4 sm:$0xff]  }
  0x50   :  { %1975 = vmatpush1.bf16.msra.mxu0 %v2721_v23  ;;  %1772 = vmatprep.subr.bf16.mxu1 %v2726_v24  ;;  %v2258_v23 = vcombine.low %v3330_v42, %v3335_v43  ;;  %v2266_v24 = vcombine.low %v3348_v47, %v3353_v48  ;;  %v3518_v42 = vld [vmem:[%s3973_s0 + $0x30] sm:$0xff] }
  0x51   :  { %1976 = vmatprep.subr.bf16.mxu0 %v2729_v25  ;;  %v2803_v25 = vld [vmem:[%s3972_s1 + $0x600] ss:$8 sps:$4 sm:$0xff]   ;;  %v3523_v43 = vld [vmem:[%s3973_s0 + $0x70] sm:$0xff] }
  0x52   :  { %v2269_v47 = vcombine.high %v3518_v42, %v3523_v43  ;;  %v2818_v48 = vld [vmem:[%s3972_s1 + $0x230] ss:$8 sps:$4 sm:$0xff]  }
  0x53   :  { %1773 = vmatpush1.bf16.msra.mxu1 %v2724_v26  ;;  %v34_v26 = vld [vmem:[%s3973_s0 + $0x88] sm:$0xff] }
  0x54   :  { %1977 = vmatpush1.bf16.msra.mxu0 %v2727_v27  ;;  %1774 = vmatprep.subr.bf16.mxu1 %v2732_v28  ;;  %v38_v27 = vld [vmem:[%s3973_s0 + $0xa8] sm:$0xff]  ;;  %v2808_v28 = vld [vmem:[%s3972_s1 + $0x214] ss:$8 sps:$4 sm:$0xff]   ;;  %v2275_v30 = vcombine.high %v34_v26, %v34_v26 }
  0x55   :  { %1978 = vmatprep.subr.bf16.mxu0 %v2735_v29  ;;  %v2811_v29 = vld [vmem:[%s3972_s1 + $0x614] ss:$8 sps:$4 sm:$0xff]   ;;  %v2283_v31 = vcombine.high %v38_v27, %v38_v27 }
  0x57   :  { %1775 = vmatpush1.bf16.msra.mxu1 %v2730_v34  ;;  %v2814_v34 = vld [vmem:[%s3972_s1 + $0x224] ss:$8 sps:$4 sm:$0xff]  }
  0x58   :  { %1979 = vmatpush1.bf16.msra.mxu0 %v2733_v35  ;;  %1776 = vmatprep.subr.bf16.mxu1 %v2738_v38  ;;  %v2817_v35 = vld [vmem:[%s3972_s1 + $0x624] ss:$8 sps:$4 sm:$0xff]   ;;  %v3508_v38 = vld [vmem:[%s3973_s0 + $0x10] sm:$0xff] }
  0x59   :  { %1980 = vmatprep.subr.bf16.mxu0 %v2741_v39  ;;  %v3513_v39 = vld [vmem:[%s3973_s0 + $0x50] sm:$0xff] }
  0x5b   :  { %1777 = vmatpush1.bf16.msra.mxu1 %v2736_v40  ;;  %v2274_v40 = vcombine.low %v34_v26, %v34_v26  ;;  %v2887_v26 = vld [vmem:[%s3972_s1 + $0x2e4] ss:$8 sps:$4 sm:$0xff]  }
  0x5c   :  { %1981 = vmatpush1.bf16.msra.mxu0 %v2739_v41  ;;  %1778 = vmatprep.subr.bf16.mxu1 %v2744_v44  ;;  %v2282_v41 = vcombine.low %v38_v27, %v38_v27  ;;  %v2820_v44 = vld [vmem:[%s3972_s1 + $0x234] ss:$8 sps:$4 sm:$0xff]   ;;  %v2891_v27 = vld [vmem:[%s3972_s1 + $0x6e4] ss:$8 sps:$4 sm:$0xff]  }
  0x5d   :  { %1982 = vmatprep.subr.bf16.mxu0 %v2747_v46  ;;  %v2261_v46 = vcombine.high %v3508_v38, %v3513_v39 }
  0x5f   :  { %1779 = vmatpush1.bf16.msra.mxu1 %v2742_v50  ;;  %v2826_v50 = vld [vmem:[%s3972_s1 + $0x244] ss:$8 sps:$4 sm:$0xff]  }
  0x60   :  { %1983 = vmatpush1.bf16.msra.mxu0 %v2745_v51  ;;  %1780 = vmatprep.subr.bf16.mxu1 %v2750_v52  ;;  %v2829_v51 = vld [vmem:[%s3972_s1 + $0x644] ss:$8 sps:$4 sm:$0xff]   ;;  %v2824_v52 = vld [vmem:[%s3972_s1 + $0x240] ss:$8 sps:$4 sm:$0xff]  }
  0x61   :  { %1984 = vmatprep.subr.bf16.mxu0 %v2753_v53  ;;  %v2827_v53 = vld [vmem:[%s3972_s1 + $0x640] ss:$8 sps:$4 sm:$0xff]  }
  0x63   :  { %1781 = vmatpush1.bf16.msra.mxu1 %v2748_v54  ;;  %v2832_v54 = vld [vmem:[%s3972_s1 + $0x254] ss:$8 sps:$4 sm:$0xff]  }
  0x64   :  { %1985 = vmatpush1.bf16.msra.mxu0 %v2751_v55  ;;  %1782 = vmatprep.subr.bf16.mxu1 %v2756_v56  ;;  %v2835_v55 = vld [vmem:[%s3972_s1 + $0x654] ss:$8 sps:$4 sm:$0xff]   ;;  %v2830_v56 = vld [vmem:[%s3972_s1 + $0x250] ss:$8 sps:$4 sm:$0xff]  }
  0x65   :  { %1986 = vmatprep.subr.bf16.mxu0 %v2759_v57  ;;  %v2833_v57 = vld [vmem:[%s3972_s1 + $0x650] ss:$8 sps:$4 sm:$0xff]  }
  0x67   :  { %1783 = vmatpush1.bf16.msra.mxu1 %v2754_v58  ;;  %v2838_v58 = vld [vmem:[%s3972_s1 + $0x264] ss:$8 sps:$4 sm:$0xff]  }
  0x68   :  { %1987 = vmatpush1.bf16.msra.mxu0 %v2757_v59  ;;  %1784 = vmatprep.subr.bf16.mxu1 %v2762_v60  ;;  %v2841_v59 = vld [vmem:[%s3972_s1 + $0x664] ss:$8 sps:$4 sm:$0xff]   ;;  %v2836_v60 = vld [vmem:[%s3972_s1 + $0x260] ss:$8 sps:$4 sm:$0xff]  }
  0x69   :  { %1988 = vmatprep.subr.bf16.mxu0 %v2765_v61  ;;  %v2839_v61 = vld [vmem:[%s3972_s1 + $0x660] ss:$8 sps:$4 sm:$0xff]  }
  0x6b   :  { %1785 = vmatpush1.bf16.msra.mxu1 %v2760_v62  ;;  %v2844_v62 = vld [vmem:[%s3972_s1 + $0x274] ss:$8 sps:$4 sm:$0xff]  }
  0x6c   :  { %1989 = vmatpush1.bf16.msra.mxu0 %v2763_v63  ;;  %1786 = vmatprep.subr.bf16.mxu1 %v2768_v0  ;;  %v2847_v63 = vld [vmem:[%s3972_s1 + $0x674] ss:$8 sps:$4 sm:$0xff]   ;;  %v2842_v0 = vld [vmem:[%s3972_s1 + $0x270] ss:$8 sps:$4 sm:$0xff]  }
  0x6d   :  { %1990 = vmatprep.subr.bf16.mxu0 %v2771_v1  ;;  %v2845_v1 = vld [vmem:[%s3972_s1 + $0x670] ss:$8 sps:$4 sm:$0xff]  }
  0x6f   :  { %1787 = vmatpush1.bf16.msra.mxu1 %v2766_v2  ;;  %v2850_v2 = vld [vmem:[%s3972_s1 + $0x284] ss:$8 sps:$4 sm:$0xff]  }
  0x70   :  { %1991 = vmatpush1.bf16.msra.mxu0 %v2769_v3  ;;  %1788 = vmatprep.subr.bf16.mxu1 %v2774_v4  ;;  %v2853_v3 = vld [vmem:[%s3972_s1 + $0x684] ss:$8 sps:$4 sm:$0xff]   ;;  %v2848_v4 = vld [vmem:[%s3972_s1 + $0x280] ss:$8 sps:$4 sm:$0xff]  }
  0x71   :  { %1992 = vmatprep.subr.bf16.mxu0 %v2777_v5  ;;  %v2851_v5 = vld [vmem:[%s3972_s1 + $0x680] ss:$8 sps:$4 sm:$0xff]  }
  0x73   :  { %1789 = vmatpush1.bf16.msra.mxu1 %v2772_v6  ;;  %v2856_v6 = vld [vmem:[%s3972_s1 + $0x294] ss:$8 sps:$4 sm:$0xff]  }
  0x74   :  { %1993 = vmatpush1.bf16.msra.mxu0 %v2775_v7  ;;  %1790 = vmatprep.subr.bf16.mxu1 %v2780_v8  ;;  %v2859_v7 = vld [vmem:[%s3972_s1 + $0x694] ss:$8 sps:$4 sm:$0xff]   ;;  %v2854_v8 = vld [vmem:[%s3972_s1 + $0x290] ss:$8 sps:$4 sm:$0xff]  }
  0x75   :  { %1994 = vmatprep.subr.bf16.mxu0 %v2783_v9  ;;  %v2857_v9 = vld [vmem:[%s3972_s1 + $0x690] ss:$8 sps:$4 sm:$0xff]  }
  0x77   :  { %1791 = vmatpush1.bf16.msra.mxu1 %v2778_v10  ;;  %v2862_v10 = vld [vmem:[%s3972_s1 + $0x2a4] ss:$8 sps:$4 sm:$0xff]  }
  0x78   :  { %1995 = vmatpush1.bf16.msra.mxu0 %v2781_v11  ;;  %1792 = vmatprep.subr.bf16.mxu1 %v2787_v12  ;;  %v2865_v11 = vld [vmem:[%s3972_s1 + $0x6a4] ss:$8 sps:$4 sm:$0xff]   ;;  %v2860_v12 = vld [vmem:[%s3972_s1 + $0x2a0] ss:$8 sps:$4 sm:$0xff]  }
  0x79   :  { %1996 = vmatprep.subr.bf16.mxu0 %v2791_v13  ;;  %v2863_v13 = vld [vmem:[%s3972_s1 + $0x6a0] ss:$8 sps:$4 sm:$0xff]  }
  0x7b   :  { %1793 = vmatpush1.bf16.msra.mxu1 %v2785_v14  ;;  %v2868_v14 = vld [vmem:[%s3972_s1 + $0x2b4] ss:$8 sps:$4 sm:$0xff]  }
  0x7c   :  { %1997 = vmatpush1.bf16.msra.mxu0 %v2789_v15  ;;  %1794 = vmatprep.subr.bf16.mxu1 %v2796_v16  ;;  %v2871_v15 = vld [vmem:[%s3972_s1 + $0x6b4] ss:$8 sps:$4 sm:$0xff]   ;;  %v2866_v16 = vld [vmem:[%s3972_s1 + $0x2b0] ss:$8 sps:$4 sm:$0xff]  }
  0x7d   :  { %1998 = vmatprep.subr.bf16.mxu0 %v2799_v17  ;;  %v2869_v17 = vld [vmem:[%s3972_s1 + $0x6b0] ss:$8 sps:$4 sm:$0xff]  }
  0x7f   :  { %1795 = vmatpush1.bf16.msra.mxu1 %v2794_v18  ;;  %v2874_v18 = vld [vmem:[%s3972_s1 + $0x2c4] ss:$8 sps:$4 sm:$0xff]  }
  0x80   :  { %1999 = vmatpush1.bf16.msra.mxu0 %v2797_v19  ;;  %1815 = vmatprep.subr.bf16.mxu1 %v2802_v20  ;;  %v2877_v19 = vld [vmem:[%s3972_s1 + $0x6c4] ss:$8 sps:$4 sm:$0xff]   ;;  %v2872_v20 = vld [vmem:[%s3972_s1 + $0x2c0] ss:$8 sps:$4 sm:$0xff]  }
  0x81   :  { %2019 = vmatprep.subr.bf16.mxu0 %v2805_v21  ;;  %v2875_v21 = vld [vmem:[%s3972_s1 + $0x6c0] ss:$8 sps:$4 sm:$0xff]  }
  0x82   :  { %1797 = vmatmul.mubr.bf16.vlgmr.msra.gmra.mrb[0].mxu1 %v2258_v23  ;;  %v2883_v23 = vld [vmem:[%s3972_s1 + $0x6d4] ss:$8 sps:$4 sm:$0xff]  }
  0x83   :  { %2001 = vmatmul.mubr.bf16.vlgmr.msra.gmra.mrb[0].mxu0 %v2266_v24  ;;  %1816 = vmatpush1.bf16.msra.mxu1 %v2800_v22  ;;  %v2880_v22 = vld [vmem:[%s3972_s1 + $0x2d4] ss:$8 sps:$4 sm:$0xff]   ;;  %v2878_v24 = vld [vmem:[%s3972_s1 + $0x2d0] ss:$8 sps:$4 sm:$0xff]  }
  0x84   :  { %2020 = vmatpush1.bf16.msra.mxu0 %v2803_v25  ;;  %1817 = vmatprep.subr.bf16.mxu1 %v2808_v28  ;;  %v2881_v25 = vld [vmem:[%s3972_s1 + $0x6d0] ss:$8 sps:$4 sm:$0xff]   ;;  %v2885_v28 = vld [vmem:[%s3972_s1 + $0x2e0] ss:$8 sps:$4 sm:$0xff]  }
  0x85   :  { %2021 = vmatprep.subr.bf16.mxu0 %v2811_v29  ;;  %1806 = vmatprep.mubr.bf16.mxu1 %v2275_v30  ;;  %v2889_v29 = vld [vmem:[%s3972_s1 + $0x6e0] ss:$8 sps:$4 sm:$0xff]   ;;  %v2896_v30 = vld [vmem:[%s3972_s1 + $0x2f4] ss:$8 sps:$4 sm:$0xff]  }
  0x86   :  { %2010 = vmatprep.mubr.bf16.mxu0 %v2283_v31  ;;  %v2899_v31 = vld [vmem:[%s3972_s1 + $0x6f4] ss:$8 sps:$4 sm:$0xff]  }
  0x87   :  { %1818 = vmatpush1.bf16.msra.mxu1 %v2806_v32  ;;  %v2894_v32 = vld [vmem:[%s3972_s1 + $0x2f0] ss:$8 sps:$4 sm:$0xff]  }
  0x88   :  { %2022 = vmatpush1.bf16.msra.mxu0 %v2809_v33  ;;  %1819 = vmatprep.subr.bf16.mxu1 %v2814_v34  ;;  %v2897_v33 = vld [vmem:[%s3972_s1 + $0x6f0] ss:$8 sps:$4 sm:$0xff]   ;;  %v2902_v34 = vld [vmem:[%s3972_s1 + $0x304] ss:$8 sps:$4 sm:$0xff]  }
  0x89   :  { %2023 = vmatprep.subr.bf16.mxu0 %v2817_v35  ;;  %v2905_v35 = vld [vmem:[%s3972_s1 + $0x704] ss:$8 sps:$4 sm:$0xff]  }
  0x8a   :  { %1807 = vmatmul.mubr.bf16.gmra.mrb[4].mxu1 %v2274_v40  ;;  %v35_v40 = vld [vmem:[%s3973_s0 + $0x90] sm:$0xff] }
  0x8b   :  { %2011 = vmatmul.mubr.bf16.gmra.mrb[4].mxu0 %v2282_v41  ;;  %1820 = vmatpush1.bf16.msra.mxu1 %v2812_v36  ;;  %v2260_v36 = vcombine.low %v3508_v38, %v3513_v39  ;;  %v39_v41 = vld [vmem:[%s3973_s0 + $0xb0] sm:$0xff]  ;;  %v2903_v38 = vld [vmem:[%s3972_s1 + $0x700] ss:$8 sps:$4 sm:$0xff]  }
  0x8c   :  { %2024 = vmatpush1.bf16.msra.mxu0 %v2815_v37  ;;  %1821 = vmatprep.subr.bf16.mxu1 %v2820_v44  ;;  %v2268_v37 = vcombine.low %v3518_v42, %v3523_v43  ;;  %v2900_v44 = vld [vmem:[%s3972_s1 + $0x300] ss:$8 sps:$4 sm:$0xff]   ;;  %v2908_v39 = vld [vmem:[%s3972_s1 + $0x314] ss:$8 sps:$4 sm:$0xff]   ;;  %v2277_v43 = vcombine.high %v35_v40, %v35_v40 }
  0x8d   :  { %2025 = vmatprep.subr.bf16.mxu0 %v2823_v45  ;;  %1847 = vmatprep.mubr.bf16.mxu1 %v2261_v46  ;;  %v2911_v42 = vld [vmem:[%s3972_s1 + $0x714] ss:$8 sps:$4 sm:$0xff]   ;;  %v2285_v45 = vcombine.high %v39_v41, %v39_v41  ;;  %v2906_v46 = vld [vmem:[%s3972_s1 + $0x310] ss:$8 sps:$4 sm:$0xff]  }
  0x8e   :  { %2051 = vmatprep.mubr.bf16.mxu0 %v2269_v47  ;;  %v2909_v47 = vld [vmem:[%s3972_s1 + $0x710] ss:$8 sps:$4 sm:$0xff]  }
  0x8f   :  { %1822 = vmatpush1.bf16.msra.mxu1 %v2818_v48  ;;  %v2914_v48 = vld [vmem:[%s3972_s1 + $0x324] ss:$8 sps:$4 sm:$0xff]  }
  0x90   :  { %2026 = vmatpush1.bf16.msra.mxu0 %v2821_v49  ;;  %1823 = vmatprep.subr.bf16.mxu1 %v2826_v50  ;;  %v2917_v49 = vld [vmem:[%s3972_s1 + $0x724] ss:$8 sps:$4 sm:$0xff]   ;;  %v3728_v50 = vld [vmem:[%s3973_s0 + $0x18] sm:$0xff] }
  0x91   :  { %2027 = vmatprep.subr.bf16.mxu0 %v2829_v51  ;;  %v2276_v51 = vcombine.low %v35_v40, %v35_v40  ;;  %v2978_v40 = vld [vmem:[%s3972_s1 + $0x3d0] ss:$8 sps:$4 sm:$0xff]  }
  0x93   :  { %1824 = vmatpush1.bf16.msra.mxu1 %v2824_v52  ;;  %v2284_v52 = vcombine.low %v39_v41, %v39_v41  ;;  %v2981_v41 = vld [vmem:[%s3972_s1 + $0x7d0] ss:$8 sps:$4 sm:$0xff]  }
  0x94   :  { %2028 = vmatpush1.bf16.msra.mxu0 %v2827_v53  ;;  %1825 = vmatprep.subr.bf16.mxu1 %v2832_v54  ;;  %v3733_v53 = vld [vmem:[%s3973_s0 + $0x58] sm:$0xff] }
  0x95   :  { %2029 = vmatprep.subr.bf16.mxu0 %v2835_v55  ;;  %v3738_v54 = vld [vmem:[%s3973_s0 + $0x38] sm:$0xff] }
  0x96   :  { %v3743_v55 = vld [vmem:[%s3973_s0 + $0x78] sm:$0xff] }
  0x97   :  { %1826 = vmatpush1.bf16.msra.mxu1 %v2830_v56  ;;  %v2912_v56 = vld [vmem:[%s3972_s1 + $0x320] ss:$8 sps:$4 sm:$0xff]  }
  0x98   :  { %2030 = vmatpush1.bf16.msra.mxu0 %v2833_v57  ;;  %1827 = vmatprep.subr.bf16.mxu1 %v2838_v58  ;;  %v2915_v57 = vld [vmem:[%s3972_s1 + $0x720] ss:$8 sps:$4 sm:$0xff]   ;;  %v2920_v58 = vld [vmem:[%s3972_s1 + $0x334] ss:$8 sps:$4 sm:$0xff]  }
  0x99   :  { %2031 = vmatprep.subr.bf16.mxu0 %v2841_v59  ;;  %v2923_v59 = vld [vmem:[%s3972_s1 + $0x734] ss:$8 sps:$4 sm:$0xff]  }
  0x9b   :  { %1828 = vmatpush1.bf16.msra.mxu1 %v2836_v60  ;;  %v2263_v60 = vcombine.high %v3728_v50, %v3733_v53 }
  0x9c   :  { %2032 = vmatpush1.bf16.msra.mxu0 %v2839_v61  ;;  %1829 = vmatprep.subr.bf16.mxu1 %v2844_v62  ;;  %v2271_v61 = vcombine.high %v3738_v54, %v3743_v55  ;;  %v2918_v62 = vld [vmem:[%s3972_s1 + $0x330] ss:$8 sps:$4 sm:$0xff]  }
  0x9d   :  { %2033 = vmatprep.subr.bf16.mxu0 %v2847_v63  ;;  %v2921_v63 = vld [vmem:[%s3972_s1 + $0x730] ss:$8 sps:$4 sm:$0xff]  }
  0x9f   :  { %1830 = vmatpush1.bf16.msra.mxu1 %v2842_v0  ;;  %v2926_v0 = vld [vmem:[%s3972_s1 + $0x344] ss:$8 sps:$4 sm:$0xff]  }
  0xa0   :  { %2034 = vmatpush1.bf16.msra.mxu0 %v2845_v1  ;;  %1831 = vmatprep.subr.bf16.mxu1 %v2850_v2  ;;  %v2929_v1 = vld [vmem:[%s3972_s1 + $0x744] ss:$8 sps:$4 sm:$0xff]   ;;  %v2924_v2 = vld [vmem:[%s3972_s1 + $0x340] ss:$8 sps:$4 sm:$0xff]  }
  0xa1   :  { %2035 = vmatprep.subr.bf16.mxu0 %v2853_v3  ;;  %v2927_v3 = vld [vmem:[%s3972_s1 + $0x740] ss:$8 sps:$4 sm:$0xff]  }
  0xa3   :  { %1832 = vmatpush1.bf16.msra.mxu1 %v2848_v4  ;;  %v2932_v4 = vld [vmem:[%s3972_s1 + $0x354] ss:$8 sps:$4 sm:$0xff]  }
  0xa4   :  { %2036 = vmatpush1.bf16.msra.mxu0 %v2851_v5  ;;  %1833 = vmatprep.subr.bf16.mxu1 %v2856_v6  ;;  %v2935_v5 = vld [vmem:[%s3972_s1 + $0x754] ss:$8 sps:$4 sm:$0xff]   ;;  %v2930_v6 = vld [vmem:[%s3972_s1 + $0x350] ss:$8 sps:$4 sm:$0xff]  }
  0xa5   :  { %2037 = vmatprep.subr.bf16.mxu0 %v2859_v7  ;;  %v2933_v7 = vld [vmem:[%s3972_s1 + $0x750] ss:$8 sps:$4 sm:$0xff]  }
  0xa7   :  { %1834 = vmatpush1.bf16.msra.mxu1 %v2854_v8  ;;  %v2938_v8 = vld [vmem:[%s3972_s1 + $0x364] ss:$8 sps:$4 sm:$0xff]  }
  0xa8   :  { %2038 = vmatpush1.bf16.msra.mxu0 %v2857_v9  ;;  %1835 = vmatprep.subr.bf16.mxu1 %v2862_v10  ;;  %v2941_v9 = vld [vmem:[%s3972_s1 + $0x764] ss:$8 sps:$4 sm:$0xff]   ;;  %v2936_v10 = vld [vmem:[%s3972_s1 + $0x360] ss:$8 sps:$4 sm:$0xff]  }
  0xa9   :  { %2039 = vmatprep.subr.bf16.mxu0 %v2865_v11  ;;  %v2939_v11 = vld [vmem:[%s3972_s1 + $0x760] ss:$8 sps:$4 sm:$0xff]  }
  0xab   :  { %1836 = vmatpush1.bf16.msra.mxu1 %v2860_v12  ;;  %v2944_v12 = vld [vmem:[%s3972_s1 + $0x374] ss:$8 sps:$4 sm:$0xff]  }
  0xac   :  { %2040 = vmatpush1.bf16.msra.mxu0 %v2863_v13  ;;  %1837 = vmatprep.subr.bf16.mxu1 %v2868_v14  ;;  %v2947_v13 = vld [vmem:[%s3972_s1 + $0x774] ss:$8 sps:$4 sm:$0xff]   ;;  %v2942_v14 = vld [vmem:[%s3972_s1 + $0x370] ss:$8 sps:$4 sm:$0xff]  }
  0xad   :  { %2041 = vmatprep.subr.bf16.mxu0 %v2871_v15  ;;  %v2945_v15 = vld [vmem:[%s3972_s1 + $0x770] ss:$8 sps:$4 sm:$0xff]  }
  0xaf   :  { %1838 = vmatpush1.bf16.msra.mxu1 %v2866_v16  ;;  %v2950_v16 = vld [vmem:[%s3972_s1 + $0x384] ss:$8 sps:$4 sm:$0xff]  }
  0xb0   :  { %2042 = vmatpush1.bf16.msra.mxu0 %v2869_v17  ;;  %1839 = vmatprep.subr.bf16.mxu1 %v2874_v18  ;;  %v2953_v17 = vld [vmem:[%s3972_s1 + $0x784] ss:$8 sps:$4 sm:$0xff]   ;;  %v2948_v18 = vld [vmem:[%s3972_s1 + $0x380] ss:$8 sps:$4 sm:$0xff]  }
  0xb1   :  { %2043 = vmatprep.subr.bf16.mxu0 %v2877_v19  ;;  %v2951_v19 = vld [vmem:[%s3972_s1 + $0x780] ss:$8 sps:$4 sm:$0xff]  }
  0xb3   :  { %1840 = vmatpush1.bf16.msra.mxu1 %v2872_v20  ;;  %v2956_v20 = vld [vmem:[%s3972_s1 + $0x394] ss:$8 sps:$4 sm:$0xff]  }
  0xb4   :  { %2044 = vmatpush1.bf16.msra.mxu0 %v2875_v21  ;;  %1841 = vmatprep.subr.bf16.mxu1 %v2880_v22  ;;  %v2959_v21 = vld [vmem:[%s3972_s1 + $0x794] ss:$8 sps:$4 sm:$0xff]   ;;  %v2954_v22 = vld [vmem:[%s3972_s1 + $0x390] ss:$8 sps:$4 sm:$0xff]  }
  0xb5   :  { %2045 = vmatprep.subr.bf16.mxu0 %v2883_v23  ;;  %v2957_v23 = vld [vmem:[%s3972_s1 + $0x790] ss:$8 sps:$4 sm:$0xff]  }
  0xb7   :  { %1842 = vmatpush1.bf16.msra.mxu1 %v2878_v24  ;;  %v2962_v24 = vld [vmem:[%s3972_s1 + $0x3a4] ss:$8 sps:$4 sm:$0xff]  }
  0xb8   :  { %2046 = vmatpush1.bf16.msra.mxu0 %v2881_v25  ;;  %1843 = vmatprep.subr.bf16.mxu1 %v2887_v26  ;;  %v2965_v25 = vld [vmem:[%s3972_s1 + $0x7a4] ss:$8 sps:$4 sm:$0xff]   ;;  %v2960_v26 = vld [vmem:[%s3972_s1 + $0x3a0] ss:$8 sps:$4 sm:$0xff]  }
  0xb9   :  { %2047 = vmatprep.subr.bf16.mxu0 %v2891_v27  ;;  %v2963_v27 = vld [vmem:[%s3972_s1 + $0x7a0] ss:$8 sps:$4 sm:$0xff]  }
  0xbb   :  { %1844 = vmatpush1.bf16.msra.mxu1 %v2885_v28  ;;  %v2968_v28 = vld [vmem:[%s3972_s1 + $0x3b4] ss:$8 sps:$4 sm:$0xff]  }
  0xbc   :  { %2048 = vmatpush1.bf16.msra.mxu0 %v2889_v29  ;;  %1845 = vmatprep.subr.bf16.mxu1 %v2896_v30  ;;  %v2971_v29 = vld [vmem:[%s3972_s1 + $0x7b4] ss:$8 sps:$4 sm:$0xff]   ;;  %v2966_v30 = vld [vmem:[%s3972_s1 + $0x3b0] ss:$8 sps:$4 sm:$0xff]  }
  0xbd   :  { %2049 = vmatprep.subr.bf16.mxu0 %v2899_v31  ;;  %v2969_v31 = vld [vmem:[%s3972_s1 + $0x7b0] ss:$8 sps:$4 sm:$0xff]  }
  0xbf   :  { %1846 = vmatpush1.bf16.msra.mxu1 %v2894_v32  ;;  %v2974_v32 = vld [vmem:[%s3972_s1 + $0x3c4] ss:$8 sps:$4 sm:$0xff]  }
  0xc0   :  { %2050 = vmatpush1.bf16.msra.mxu0 %v2897_v33  ;;  %1866 = vmatprep.subr.bf16.mxu1 %v2902_v34  ;;  %v2977_v33 = vld [vmem:[%s3972_s1 + $0x7c4] ss:$8 sps:$4 sm:$0xff]   ;;  %v2972_v34 = vld [vmem:[%s3972_s1 + $0x3c0] ss:$8 sps:$4 sm:$0xff]  }
  0xc1   :  { %2070 = vmatprep.subr.bf16.mxu0 %v2905_v35  ;;  %v2975_v35 = vld [vmem:[%s3972_s1 + $0x7c0] ss:$8 sps:$4 sm:$0xff]  }
  0xc2   :  { %1848 = vmatmul.mubr.bf16.vlgmr.msra.gmra.mrb[0].mxu1 %v2260_v36  ;;  %v2980_v36 = vld [vmem:[%s3972_s1 + $0x3d4] ss:$8 sps:$4 sm:$0xff]  }
  0xc3   :  { %2052 = vmatmul.mubr.bf16.vlgmr.msra.gmra.mrb[0].mxu0 %v2268_v37  ;;  %1867 = vmatpush1.bf16.msra.mxu1 %v2900_v44  ;;  %v2983_v37 = vld [vmem:[%s3972_s1 + $0x7d4] ss:$8 sps:$4 sm:$0xff]   ;;  %v2989_v44 = vld [vmem:[%s3972_s1 + $0x3e4] ss:$8 sps:$4 sm:$0xff]  }
  0xc4   :  { %2071 = vmatpush1.bf16.msra.mxu0 %v2903_v38  ;;  %1868 = vmatprep.subr.bf16.mxu1 %v2908_v39  ;;  %v2993_v38 = vld [vmem:[%s3972_s1 + $0x7e4] ss:$8 sps:$4 sm:$0xff]   ;;  %v2987_v39 = vld [vmem:[%s3972_s1 + $0x3e0] ss:$8 sps:$4 sm:$0xff]  }
  0xc5   :  { %2072 = vmatprep.subr.bf16.mxu0 %v2911_v42  ;;  %1857 = vmatprep.mubr.bf16.mxu1 %v2277_v43  ;;  %v2991_v42 = vld [vmem:[%s3972_s1 + $0x7e0] ss:$8 sps:$4 sm:$0xff]   ;;  %v2996_v43 = vld [vmem:[%s3972_s1 + $0x3f4] ss:$8 sps:$4 sm:$0xff]  }
  0xc6   :  { %2061 = vmatprep.mubr.bf16.mxu0 %v2285_v45  ;;  %v2999_v45 = vld [vmem:[%s3972_s1 + $0x7f4] ss:$8 sps:$4 sm:$0xff]  }
  0xc7   :  { %1869 = vmatpush1.bf16.msra.mxu1 %v2906_v46  ;;  %v2994_v46 = vld [vmem:[%s3972_s1 + $0x3f0] ss:$8 sps:$4 sm:$0xff]  }
  0xc8   :  { %2073 = vmatpush1.bf16.msra.mxu0 %v2909_v47  ;;  %1870 = vmatprep.subr.bf16.mxu1 %v2914_v48  ;;  %v2997_v47 = vld [vmem:[%s3972_s1 + $0x7f0] ss:$8 sps:$4 sm:$0xff]  }
  0xc9   :  { %2074 = vmatprep.subr.bf16.mxu0 %v2917_v49  ;;  %v36_v48 = vld [vmem:[%s3973_s0 + $0x98] sm:$0xff] }
  0xca   :  { %1858 = vmatmul.mubr.bf16.gmra.mrb[4].mxu1 %v2276_v51  ;;  %v40_v49 = vld [vmem:[%s3973_s0 + $0xb8] sm:$0xff]  ;;  %v2262_v51 = vcombine.low %v3728_v50, %v3733_v53 }
  0xcb   :  { %2062 = vmatmul.mubr.bf16.gmra.mrb[4].mxu0 %v2284_v52  ;;  %1871 = vmatpush1.bf16.msra.mxu1 %v2912_v56  ;;  %v2270_v52 = vcombine.low %v3738_v54, %v3743_v55  ;;  %v2279_v56 = vcombine.high %v36_v48, %v36_v48 }
  0xcc   :  { %2075 = vmatpush1.bf16.msra.mxu0 %v2915_v57  ;;  %1872 = vmatprep.subr.bf16.mxu1 %v2920_v58  ;;  %v2287_v57 = vcombine.high %v40_v49, %v40_v49  ;;  %v2278_v58 = vcombine.low %v36_v48, %v36_v48 }
  0xcd   :  { %2076 = vmatprep.subr.bf16.mxu0 %v2923_v59  ;;  %1898 = vmatprep.mubr.bf16.mxu1 %v2263_v60  ;;  %v2286_v59 = vcombine.low %v40_v49, %v40_v49 }
  0xce   :  { %2102 = vmatprep.mubr.bf16.mxu0 %v2271_v61 }
  0xcf   :  { %1873 = vmatpush1.bf16.msra.mxu1 %v2918_v62 }
  0xd0   :  { %2077 = vmatpush1.bf16.msra.mxu0 %v2921_v63  ;;  %1874 = vmatprep.subr.bf16.mxu1 %v2926_v0 }
  0xd1   :  { %2078 = vmatprep.subr.bf16.mxu0 %v2929_v1 }
  0xd3   :  { %1875 = vmatpush1.bf16.msra.mxu1 %v2924_v2 }
  0xd4   :  { %2079 = vmatpush1.bf16.msra.mxu0 %v2927_v3  ;;  %1876 = vmatprep.subr.bf16.mxu1 %v2932_v4 }
  0xd5   :  { %2080 = vmatprep.subr.bf16.mxu0 %v2935_v5 }
  0xd7   :  { %1877 = vmatpush1.bf16.msra.mxu1 %v2930_v6 }
  0xd8   :  { %2081 = vmatpush1.bf16.msra.mxu0 %v2933_v7  ;;  %1878 = vmatprep.subr.bf16.mxu1 %v2938_v8 }
  0xd9   :  { %2082 = vmatprep.subr.bf16.mxu0 %v2941_v9 }
  0xdb   :  { %1879 = vmatpush1.bf16.msra.mxu1 %v2936_v10 }
  0xdc   :  { %2083 = vmatpush1.bf16.msra.mxu0 %v2939_v11  ;;  %1880 = vmatprep.subr.bf16.mxu1 %v2944_v12 }
  0xdd   :  { %2084 = vmatprep.subr.bf16.mxu0 %v2947_v13 }
  0xdf   :  { %1881 = vmatpush1.bf16.msra.mxu1 %v2942_v14 }
  0xe0   :  { %2085 = vmatpush1.bf16.msra.mxu0 %v2945_v15  ;;  %1882 = vmatprep.subr.bf16.mxu1 %v2950_v16 }
  0xe1   :  { %2086 = vmatprep.subr.bf16.mxu0 %v2953_v17 }
  0xe3   :  { %1883 = vmatpush1.bf16.msra.mxu1 %v2948_v18 }
  0xe4   :  { %2087 = vmatpush1.bf16.msra.mxu0 %v2951_v19  ;;  %1884 = vmatprep.subr.bf16.mxu1 %v2956_v20 }
  0xe5   :  { %2088 = vmatprep.subr.bf16.mxu0 %v2959_v21 }
  0xe7   :  { %1885 = vmatpush1.bf16.msra.mxu1 %v2954_v22 }
  0xe8   :  { %2089 = vmatpush1.bf16.msra.mxu0 %v2957_v23  ;;  %1886 = vmatprep.subr.bf16.mxu1 %v2962_v24 }
  0xe9   :  { %2090 = vmatprep.subr.bf16.mxu0 %v2965_v25 }
  0xeb   :  { %1887 = vmatpush1.bf16.msra.mxu1 %v2960_v26 }
  0xec   :  { %2091 = vmatpush1.bf16.msra.mxu0 %v2963_v27  ;;  %1888 = vmatprep.subr.bf16.mxu1 %v2968_v28 }
  0xed   :  { %2092 = vmatprep.subr.bf16.mxu0 %v2971_v29 }
  0xef   :  { %1889 = vmatpush1.bf16.msra.mxu1 %v2966_v30 }
  0xf0   :  { %2093 = vmatpush1.bf16.msra.mxu0 %v2969_v31  ;;  %1890 = vmatprep.subr.bf16.mxu1 %v2974_v32 }
  0xf1   :  { %2094 = vmatprep.subr.bf16.mxu0 %v2977_v33 }
  0xf3   :  { %1891 = vmatpush1.bf16.msra.mxu1 %v2972_v34 }
  0xf4   :  { %2095 = vmatpush1.bf16.msra.mxu0 %v2975_v35  ;;  %1892 = vmatprep.subr.bf16.mxu1 %v2980_v36 }
  0xf5   :  { %2096 = vmatprep.subr.bf16.mxu0 %v2983_v37 }
  0xf7   :  { %1893 = vmatpush1.bf16.msra.mxu1 %v2978_v40 }
  0xf8   :  { %2097 = vmatpush1.bf16.msra.mxu0 %v2981_v41  ;;  %1894 = vmatprep.subr.bf16.mxu1 %v2989_v44 }
  0xf9   :  { %2098 = vmatprep.subr.bf16.mxu0 %v2993_v38 }
  0xfb   :  { %1895 = vmatpush1.bf16.msra.mxu1 %v2987_v39 }
  0xfc   :  { %2099 = vmatpush1.bf16.msra.mxu0 %v2991_v42  ;;  %1896 = vmatprep.subr.bf16.mxu1 %v2996_v43 }
  0xfd   :  { %2100 = vmatprep.subr.bf16.mxu0 %v2999_v45 }
  0xff   :  { %1897 = vmatpush1.bf16.msra.mxu1 %v2994_v46 }
 0x100   :  { %2101 = vmatpush1.bf16.msra.mxu0 %v2997_v47 }
 0x102   :  { %1899 = vmatmul.mubr.bf16.vlgmr.msra.gmra.mrb[0].mxu1 %v2262_v51 }
 0x103   :  { %2103 = vmatmul.mubr.bf16.vlgmr.msra.gmra.mrb[0].mxu0 %v2270_v52  ;;  %1908 = vmatprep.mubr.bf16.mxu1 %v2279_v56 }
 0x104   :  { %2112 = vmatprep.mubr.bf16.mxu0 %v2287_v57 }
 0x10a   :  { %1909 = vmatmul.mubr.bf16.gmra.mrb[4].mxu1 %v2278_v58 }
 0x10b   :  { %2113 = vmatmul.mubr.bf16.gmra.mrb[4].mxu0 %v2286_v59 }
 0x1d5   :  { %v1900_v60 = vpop.f32.mrb[0].mxu1 }
 0x1d6   :  { %v2104_v61 = vpop.f32.mrb[0].mxu0  ;;  %v1902_v63 = vpop.f32.mrb[1].mxu1 }
 0x1d7   :  { %v2550_v62 = vadd.f32 %v2104_v61, %v1900_v60  ;;  %v2106_v50 = vpop.f32.mrb[1].mxu0  ;;  %v1904_v0 = vpop.f32.mrb[2].mxu1 }
 0x1d8   :  { %v2551_v53 = vadd.f32 %v2106_v50, %v1902_v63  ;;  %v2108_v54 = vpop.f32.mrb[2].mxu0  ;;  %v1906_v2 = vpop.f32.mrb[3].mxu1 }
 0x1d9   :  { %v3921_v55 = vmax.f32 %v2550_v62, 0.0  ;;  %v2552_v1 = vadd.f32 %v2108_v54, %v1904_v0  ;;  %v2110_v3 = vpop.f32.mrb[3].mxu0  ;;  %v2179_v62 = vlaneseq }
 0x1da   :  { %v3923_v4 = vmax.f32 %v2551_v53, 0.0  ;;  %v2553_v5 = vadd.f32 %v2110_v3, %v1906_v2 }
 0x1db   :  { %v3925_v6 = vmax.f32 %v2552_v1, 0.0  ;;  %v2145_v8 = vmul.f32 %v3921_v55, %v3921_v55 }
 0x1dc   :  { %v3927_v7 = vmax.f32 %v2553_v5, 0.0  ;;  %v2146_v11 = vmul.f32 %v3923_v4, %v3923_v4 }
 0x1dd   :  { %v2127_v9 = vadd.f32 %v3925_v6, %v3921_v55  ;;  %v2147_v10 = vmul.f32 %v3925_v6, %v3925_v6  ;;  %v1910_v14 = vpop.f32.mrb[4].mxu1 }
 0x1de   :  { %v2135_v12 = vadd.f32 %v3927_v7, %v3923_v4  ;;  %v2148_v13 = vmul.f32 %v3927_v7, %v3927_v7  ;;  %v2114_v15 = vpop.f32.mrb[4].mxu0  ;;  %v1912_v18 = vpop.f32.mrb[5].mxu1 }
 0x1df   :  { %v2151_v16 = vadd.f32 %v2147_v10, %v2145_v8  ;;  %v2554_v17 = vadd.f32 %v2114_v15, %v1910_v14  ;;  %v2116_v19 = vpop.f32.mrb[5].mxu0  ;;  %v1914_v22 = vpop.f32.mrb[6].mxu1  ;;  %v2180_v14 = vshrl.u32 %v2179_v62, 7 }
 0x1e0   :  { %v2159_v20 = vadd.f32 %v2148_v13, %v2146_v11  ;;  %v2555_v21 = vadd.f32 %v2116_v19, %v1912_v18  ;;  %v2118_v23 = vpop.f32.mrb[6].mxu0  ;;  %v1915_v25 = vpop.f32.mrb[7].mxu1 }
 0x1e1   :  { %v3941_v24 = vmax.f32 %v2554_v17, 0.0  ;;  %v2119_v26 = vpop.f32.mrb[7].mxu0 }
 0x1e2   :  { %v3943_v27 = vmax.f32 %v2555_v21, 0.0 }
 0x1e3   :  { %v2128_v28 = vadd.f32 %v2127_v9, %v3941_v24  ;;  %v2149_v29 = vmul.f32 %v3941_v24, %v3941_v24 }
 0x1e4   :  { %v2136_v30 = vadd.f32 %v2135_v12, %v3943_v27  ;;  %v2150_v31 = vmul.f32 %v3943_v27, %v3943_v27 }
 0x1e5   :  { %v2129_v32 = vrot.slane %v2128_v28, 4  ;;  %v2152_v33 = vadd.f32 %v2151_v16, %v2149_v29  ;;  %v2185_v16 = vsub.s32 1, %v2180_v14 }
 0x1e6   :  { %v2137_v34 = vrot.slane %v2136_v30, 4  ;;  %v2160_v35 = vadd.f32 %v2159_v20, %v2150_v31 }
 0x1e7   :  { %v2130_v36 = vadd.f32 %v2129_v32, %v2128_v28  ;;  %v2153_v37 = vrot.slane %v2152_v33, 4 }
 0x1e8   :  { %v2138_v40 = vadd.f32 %v2137_v34, %v2136_v30  ;;  %v2161_v41 = vrot.slane %v2160_v35, 4 }
 0x1e9   :  { %v2131_v44 = vrot.slane %v2130_v36, 2  ;;  %v2154_v38 = vadd.f32 %v2153_v37, %v2152_v33 }
 0x1ea   :  { %v2139_v39 = vrot.slane %v2138_v40, 2  ;;  %v2162_v42 = vadd.f32 %v2161_v41, %v2160_v35 }
 0x1eb   :  { %v2132_v43 = vadd.f32 %v2131_v44, %v2130_v36  ;;  %v2155_v45 = vrot.slane %v2154_v38, 2 }
 0x1ec   :  { %v2140_v46 = vadd.f32 %v2139_v39, %v2138_v40  ;;  %v2163_v47 = vrot.slane %v2162_v42, 2 }
 0x1ed   :  { %v2133_v48 = vrot.slane %v2132_v43, 1  ;;  %v2156_v49 = vadd.f32 %v2155_v45, %v2154_v38 }
 0x1ee   :  { %v2141_v51 = vrot.slane %v2140_v46, 1  ;;  %v2164_v52 = vadd.f32 %v2163_v47, %v2162_v42 }
 0x1ef   :  { %v2134_v56 = vadd.f32 %v2133_v48, %v2132_v43  ;;  %v2157_v57 = vrot.slane %v2156_v49, 1 }
 0x1f0   :  { %v2142_v58 = vadd.f32 %v2141_v51, %v2140_v46  ;;  %v2165_v59 = vrot.slane %v2164_v52, 1 }
 0x1f1   :  { %v2143_v60 = vmul.f32 0.055555556, %v2134_v56  ;;  %v2158_v61 = vadd.f32 %v2157_v57, %v2156_v49 }
 0x1f2   :  { %v2144_v63 = vmul.f32 0.055555556, %v2142_v58  ;;  %v2166_v50 = vadd.f32 %v2165_v59, %v2164_v52 }
 0x1f3   :  { %v2167_v53 = vmul.f32 0.055555556, %v2158_v61  ;;  %v2169_v0 = vmul.f32 %v2143_v60, %v2143_v60  ;;  %v2191_v54 = vsub.f32 %v3921_v55, %v2143_v60  ;;  %v2193_v1 = vsub.f32 %v3925_v6, %v2143_v60  ;;  %v2177_v6 = vld [vmem:[%s3974_s2] sm:$0x3] }
 0x1f4   :  { %v2195_v2 = vsub.f32 %v3941_v24, %v2143_v60  ;;  %v2168_v3 = vmul.f32 0.055555556, %v2166_v50  ;;  %v2170_v5 = vmul.f32 %v2144_v63, %v2144_v63  ;;  %v2192_v8 = vsub.f32 %v3923_v4, %v2144_v63 }
 0x1f5   :  { %v2171_v9 = vsub.f32 %v2167_v53, %v2169_v0  ;;  %v2194_v10 = vsub.f32 %v3927_v7, %v2144_v63  ;;  %v2196_v11 = vsub.f32 %v3943_v27, %v2144_v63  ;;  %v2181_v55 = vsub.s32 0, %v2180_v14  ;;  %v2211_v7 = vld [vmem:[%s3975_s3] sm:$0x3] }
 0x1f6   :  { %v2172_v12 = vsub.f32 %v2168_v3, %v2170_v5  ;;  %v2186_v18 = vrot.slane %v2177_v6, %v2185_v16  ;;  %v2220_v25 = vrot.slane %v2211_v7, %v2185_v16 }
 0x1f7   :  { %v2173_v13 = vadd.f32 1e-05, %v2171_v9  ;;  %v2182_v17 = vrot.slane %v2177_v6, %v2181_v55  ;;  %v2216_v23 = vrot.slane %v2211_v7, %v2181_v55 }
 0x1f8   :  { %v2174_v15 = vadd.f32 1e-05, %v2172_v12 }
 0x1f9   :  { %3004 = vrsqrt.f32 %v2173_v13 }
 0x1fa   :  { %3006 = vrsqrt.f32 %v2174_v15 }
 0x203   :  { %v3005_v4 = vpop.eup %3004 }
 0x204   :  { %v3007_v19 = vpop.eup %3006  ;;  %v2189_v20 = vmul.f32 %v3005_v4, %v2182_v17 }
 0x205   :  { %v2190_v21 = vmul.f32 %v3007_v19, %v2186_v18 }
 0x206   :  { %v2200_v22 = vrot.slane %v2189_v20, %v2181_v55 }
 0x207   :  { %v2204_v24 = vrot.slane %v2190_v21, %v2181_v55 }
 0x208   :  { %v2205_v26 = vmul.f32 %v2200_v22, %v2191_v54  ;;  %v2207_v27 = vmul.f32 %v2200_v22, %v2193_v1  ;;  %v2209_v28 = vmul.f32 %v2200_v22, %v2195_v2 }
 0x209   :  { %v2206_v29 = vmul.f32 %v2204_v24, %v2192_v8  ;;  %v2208_v30 = vmul.f32 %v2204_v24, %v2194_v10  ;;  %v2210_v31 = vmul.f32 %v2204_v24, %v2196_v11 }
 0x20a   :  { %v2223_v32 = vadd.f32 %v2216_v23, %v2205_v26  ;;  %v2225_v33 = vadd.f32 %v2216_v23, %v2207_v27  ;;  %v2227_v34 = vadd.f32 %v2216_v23, %v2209_v28 }
 0x20b   :  { %v2224_v35 = vadd.f32 %v2220_v25, %v2206_v29  ;;  %v2226_v36 = vadd.f32 %v2220_v25, %v2208_v30  ;;  %v2228_v37 = vadd.f32 %v2220_v25, %v2210_v31 }
 0x20d   :  { %v2547_v40 = vpack.c.bf16 %v2224_v35, %v2223_v32  ;;  %v2548_v41 = vpack.c.bf16 %v2226_v36, %v2225_v33  ;;  %v2549_v44 = vpack.c.bf16 %v2228_v37, %v2227_v34 }
 0x20f   :  { %2249 = vst [vmem:[%s3976_s4] sm:$0xff] %v2547_v40  ;;  %2250 = vst [vmem:[%s3976_s4 + $0x8] sm:$0xff] %v2548_v41 }
 0x210   :  { %2251 = vst [vmem:[%s3976_s4 + $0x10] sm:$0xff] %v2549_v44 }

// kernel: discriminator_forward.8
= control target key start
LH: loop header
LB: loop body
LE: loop exit
PB: predicated region body
PF: predicated region fallthrough
CT: control target
= control target key end

     0   :  { %s8466_s1 = inlined_call_operand.vmem [shape: bf16[2304,512], index: 1, kind: input, shape index: {}]   ;;  %s8467_s0 = inlined_call_operand.vmem [shape: bf16[24,2304], index: 0, kind: input, shape index: {}]   ;;  %s8468_s2 = inlined_call_operand.vmem [shape: f32[1,512], index: 2, kind: input, shape index: {}]   ;;  %s8469_s3 = inlined_call_operand.vmem [shape: f32[1,512], index: 3, kind: input, shape index: {}]   ;;  %s8470_s4 = inlined_call_operand.vmem [shape: bf16[24,512], index: 4, kind: output, shape index: {}]  }
   0x1   :  { %v5585_v0 = vld [vmem:[%s8466_s1 + $0x4] ss:$16 sps:$4 sm:$0xff]   ;;  %v5587_v1 = vld [vmem:[%s8466_s1 + $0xc] ss:$16 sps:$4 sm:$0xff]   ;;  %v5589_v2 = vld [vmem:[%s8466_s1] ss:$16 sps:$4 sm:$0xff]  }
   0x2   :  { %3653 = vmatprep.subr.bf16.mxu0 %v5585_v0  ;;  %v5590_v3 = vld [vmem:[%s8466_s1 + $0x8] ss:$16 sps:$4 sm:$0xff]   ;;  %4112 = vmatprep.subr.bf16.mxu1 %v5587_v1  ;;  %v5591_v4 = vld [vmem:[%s8466_s1 + $0x24] ss:$16 sps:$4 sm:$0xff]   ;;  %v5593_v5 = vld [vmem:[%s8466_s1 + $0x2c] ss:$16 sps:$4 sm:$0xff]  }
   0x3   :  { %3654 = vmatpush1.bf16.msra.mxu0 %v5589_v2  ;;  %4113 = vmatpush1.bf16.msra.mxu1 %v5590_v3  ;;  %v5595_v6 = vld [vmem:[%s8466_s1 + $0x20] ss:$16 sps:$4 sm:$0xff]   ;;  %v5596_v7 = vld [vmem:[%s8466_s1 + $0x28] ss:$16 sps:$4 sm:$0xff]   ;;  %v5597_v8 = vld [vmem:[%s8466_s1 + $0x44] ss:$16 sps:$4 sm:$0xff]  }
   0x4   :  { %3655 = vmatprep.subr.bf16.mxu0 %v5591_v4  ;;  %4114 = vmatprep.subr.bf16.mxu1 %v5593_v5  ;;  %v5599_v9 = vld [vmem:[%s8466_s1 + $0x4c] ss:$16 sps:$4 sm:$0xff]   ;;  %v5601_v10 = vld [vmem:[%s8466_s1 + $0x40] ss:$16 sps:$4 sm:$0xff]   ;;  %v5602_v11 = vld [vmem:[%s8466_s1 + $0x48] ss:$16 sps:$4 sm:$0xff]  }
   0x5   :  { %v5603_v12 = vld [vmem:[%s8466_s1 + $0x64] ss:$16 sps:$4 sm:$0xff]   ;;  %v5605_v13 = vld [vmem:[%s8466_s1 + $0x6c] ss:$16 sps:$4 sm:$0xff]   ;;  %v5607_v14 = vld [vmem:[%s8466_s1 + $0x60] ss:$16 sps:$4 sm:$0xff]  }
   0x6   :  { %v5608_v15 = vld [vmem:[%s8466_s1 + $0x68] ss:$16 sps:$4 sm:$0xff]   ;;  %v5609_v16 = vld [vmem:[%s8466_s1 + $0x84] ss:$16 sps:$4 sm:$0xff]   ;;  %v5611_v17 = vld [vmem:[%s8466_s1 + $0x8c] ss:$16 sps:$4 sm:$0xff]  }
   0x7   :  { %3656 = vmatpush1.bf16.msra.mxu0 %v5595_v6  ;;  %4115 = vmatpush1.bf16.msra.mxu1 %v5596_v7  ;;  %v5613_v18 = vld [vmem:[%s8466_s1 + $0x80] ss:$16 sps:$4 sm:$0xff]   ;;  %v5614_v19 = vld [vmem:[%s8466_s1 + $0x88] ss:$16 sps:$4 sm:$0xff]   ;;  %v5615_v20 = vld [vmem:[%s8466_s1 + $0xa4] ss:$16 sps:$4 sm:$0xff]  }
   0x8   :  { %3657 = vmatprep.subr.bf16.mxu0 %v5597_v8  ;;  %4116 = vmatprep.subr.bf16.mxu1 %v5599_v9  ;;  %v5617_v21 = vld [vmem:[%s8466_s1 + $0xac] ss:$16 sps:$4 sm:$0xff]   ;;  %v5619_v22 = vld [vmem:[%s8466_s1 + $0xa0] ss:$16 sps:$4 sm:$0xff]   ;;  %v5620_v23 = vld [vmem:[%s8466_s1 + $0xa8] ss:$16 sps:$4 sm:$0xff]  }
   0x9   :  { %v5621_v24 = vld [vmem:[%s8466_s1 + $0xc4] ss:$16 sps:$4 sm:$0xff]   ;;  %v5623_v25 = vld [vmem:[%s8466_s1 + $0xcc] ss:$16 sps:$4 sm:$0xff]   ;;  %v5625_v26 = vld [vmem:[%s8466_s1 + $0xc0] ss:$16 sps:$4 sm:$0xff]  }
   0xa   :  { %v5626_v27 = vld [vmem:[%s8466_s1 + $0xc8] ss:$16 sps:$4 sm:$0xff]   ;;  %v5627_v28 = vld [vmem:[%s8466_s1 + $0xe4] ss:$16 sps:$4 sm:$0xff]   ;;  %v5629_v29 = vld [vmem:[%s8466_s1 + $0xec] ss:$16 sps:$4 sm:$0xff]  }
   0xb   :  { %3658 = vmatpush1.bf16.msra.mxu0 %v5601_v10  ;;  %4117 = vmatpush1.bf16.msra.mxu1 %v5602_v11  ;;  %v5631_v30 = vld [vmem:[%s8466_s1 + $0xe0] ss:$16 sps:$4 sm:$0xff]   ;;  %v5632_v31 = vld [vmem:[%s8466_s1 + $0xe8] ss:$16 sps:$4 sm:$0xff]   ;;  %v5633_v32 = vld [vmem:[%s8466_s1 + $0x104] ss:$16 sps:$4 sm:$0xff]  }
   0xc   :  { %3659 = vmatprep.subr.bf16.mxu0 %v5603_v12  ;;  %4118 = vmatprep.subr.bf16.mxu1 %v5605_v13  ;;  %v5635_v33 = vld [vmem:[%s8466_s1 + $0x10c] ss:$16 sps:$4 sm:$0xff]   ;;  %v5637_v34 = vld [vmem:[%s8466_s1 + $0x100] ss:$16 sps:$4 sm:$0xff]   ;;  %v5638_v35 = vld [vmem:[%s8466_s1 + $0x108] ss:$16 sps:$4 sm:$0xff]  }
   0xd   :  { %v5639_v36 = vld [vmem:[%s8466_s1 + $0x124] ss:$16 sps:$4 sm:$0xff]   ;;  %v5641_v37 = vld [vmem:[%s8466_s1 + $0x12c] ss:$16 sps:$4 sm:$0xff]   ;;  %v5643_v38 = vld [vmem:[%s8466_s1 + $0x120] ss:$16 sps:$4 sm:$0xff]  }
   0xe   :  { %v5644_v39 = vld [vmem:[%s8466_s1 + $0x128] ss:$16 sps:$4 sm:$0xff]   ;;  %v5645_v40 = vld [vmem:[%s8466_s1 + $0x144] ss:$16 sps:$4 sm:$0xff]   ;;  %v5647_v41 = vld [vmem:[%s8466_s1 + $0x14c] ss:$16 sps:$4 sm:$0xff]  }
   0xf   :  { %3660 = vmatpush1.bf16.msra.mxu0 %v5607_v14  ;;  %4119 = vmatpush1.bf16.msra.mxu1 %v5608_v15  ;;  %v5649_v42 = vld [vmem:[%s8466_s1 + $0x140] ss:$16 sps:$4 sm:$0xff]   ;;  %v5650_v43 = vld [vmem:[%s8466_s1 + $0x148] ss:$16 sps:$4 sm:$0xff]   ;;  %v5651_v44 = vld [vmem:[%s8466_s1 + $0x164] ss:$16 sps:$4 sm:$0xff]  }
  0x10   :  { %3661 = vmatprep.subr.bf16.mxu0 %v5609_v16  ;;  %4120 = vmatprep.subr.bf16.mxu1 %v5611_v17  ;;  %v5653_v45 = vld [vmem:[%s8466_s1 + $0x16c] ss:$16 sps:$4 sm:$0xff]   ;;  %v5655_v46 = vld [vmem:[%s8466_s1 + $0x160] ss:$16 sps:$4 sm:$0xff]   ;;  %v5656_v47 = vld [vmem:[%s8466_s1 + $0x168] ss:$16 sps:$4 sm:$0xff]  }
  0x11   :  { %v5683_v48 = vld [vmem:[%s8467_s0 + $0x4] ss:$72 sps:$4 sm:$0xff]   ;;  %v5661_v51 = vld [vmem:[%s8466_s1 + $0x180] ss:$16 sps:$4 sm:$0xff]   ;;  %v5662_v52 = vld [vmem:[%s8466_s1 + $0x188] ss:$16 sps:$4 sm:$0xff]  }
  0x12   :  { %v5657_v49 = vld [vmem:[%s8466_s1 + $0x184] ss:$16 sps:$4 sm:$0xff]   ;;  %v5659_v50 = vld [vmem:[%s8466_s1 + $0x18c] ss:$16 sps:$4 sm:$0xff]   ;;  %3685 = vmatprep.mubr.bf16.mxu0 %v5683_v48  ;;  %4144 = vmatprep.mubr.bf16.mxu1 %v5683_v48  ;;  %v5667_v55 = vld [vmem:[%s8466_s1 + $0x1a0] ss:$16 sps:$4 sm:$0xff]  }
  0x13   :  { %3662 = vmatpush1.bf16.msra.mxu0 %v5613_v18  ;;  %4121 = vmatpush1.bf16.msra.mxu1 %v5614_v19  ;;  %v5663_v53 = vld [vmem:[%s8466_s1 + $0x1a4] ss:$16 sps:$4 sm:$0xff]   ;;  %v5665_v54 = vld [vmem:[%s8466_s1 + $0x1ac] ss:$16 sps:$4 sm:$0xff]   ;;  %v5668_v56 = vld [vmem:[%s8466_s1 + $0x1a8] ss:$16 sps:$4 sm:$0xff]  }
  0x14   :  { %3663 = vmatprep.subr.bf16.mxu0 %v5615_v20  ;;  %4122 = vmatprep.subr.bf16.mxu1 %v5617_v21  ;;  %v5669_v57 = vld [vmem:[%s8466_s1 + $0x1c4] ss:$16 sps:$4 sm:$0xff]   ;;  %v5671_v58 = vld [vmem:[%s8466_s1 + $0x1cc] ss:$16 sps:$4 sm:$0xff]   ;;  %v5673_v59 = vld [vmem:[%s8466_s1 + $0x1c0] ss:$16 sps:$4 sm:$0xff]  }
  0x15   :  { %v5674_v60 = vld [vmem:[%s8466_s1 + $0x1c8] ss:$16 sps:$4 sm:$0xff]   ;;  %v5675_v61 = vld [vmem:[%s8466_s1 + $0x1e4] ss:$16 sps:$4 sm:$0xff]   ;;  %v5677_v62 = vld [vmem:[%s8466_s1 + $0x1ec] ss:$16 sps:$4 sm:$0xff]  }
  0x16   :  { %v5679_v63 = vld [vmem:[%s8466_s1 + $0x1e0] ss:$16 sps:$4 sm:$0xff]   ;;  %v5680_v0 = vld [vmem:[%s8466_s1 + $0x1e8] ss:$16 sps:$4 sm:$0xff]   ;;  %v5686_v1 = vld [vmem:[%s8466_s1 + $0x204] ss:$16 sps:$4 sm:$0xff]  }
  0x17   :  { %3664 = vmatpush1.bf16.msra.mxu0 %v5619_v22  ;;  %4123 = vmatpush1.bf16.msra.mxu1 %v5620_v23  ;;  %v5689_v2 = vld [vmem:[%s8466_s1 + $0x20c] ss:$16 sps:$4 sm:$0xff]   ;;  %v5681_v3 = vld [vmem:[%s8467_s0] ss:$72 sps:$4 sm:$0xff]   ;;  %v5692_v6 = vld [vmem:[%s8466_s1 + $0x224] ss:$16 sps:$4 sm:$0xff]  }
  0x18   :  { %3665 = vmatprep.subr.bf16.mxu0 %v5621_v24  ;;  %4124 = vmatprep.subr.bf16.mxu1 %v5623_v25  ;;  %v5684_v4 = vld [vmem:[%s8466_s1 + $0x200] ss:$16 sps:$4 sm:$0xff]   ;;  %v5687_v5 = vld [vmem:[%s8466_s1 + $0x208] ss:$16 sps:$4 sm:$0xff]   ;;  %v5695_v7 = vld [vmem:[%s8466_s1 + $0x22c] ss:$16 sps:$4 sm:$0xff]  }
  0x19   :  { %v5690_v8 = vld [vmem:[%s8466_s1 + $0x220] ss:$16 sps:$4 sm:$0xff]   ;;  %v5693_v9 = vld [vmem:[%s8466_s1 + $0x228] ss:$16 sps:$4 sm:$0xff]   ;;  %v5698_v10 = vld [vmem:[%s8466_s1 + $0x244] ss:$16 sps:$4 sm:$0xff]  }
  0x1a   :  { %v5701_v11 = vld [vmem:[%s8466_s1 + $0x24c] ss:$16 sps:$4 sm:$0xff]   ;;  %v5696_v12 = vld [vmem:[%s8466_s1 + $0x240] ss:$16 sps:$4 sm:$0xff]   ;;  %v5699_v13 = vld [vmem:[%s8466_s1 + $0x248] ss:$16 sps:$4 sm:$0xff]  }
  0x1b   :  { %3666 = vmatpush1.bf16.msra.mxu0 %v5625_v26  ;;  %4125 = vmatpush1.bf16.msra.mxu1 %v5626_v27  ;;  %v5704_v14 = vld [vmem:[%s8466_s1 + $0x264] ss:$16 sps:$4 sm:$0xff]   ;;  %v5707_v15 = vld [vmem:[%s8466_s1 + $0x26c] ss:$16 sps:$4 sm:$0xff]   ;;  %v5702_v16 = vld [vmem:[%s8466_s1 + $0x260] ss:$16 sps:$4 sm:$0xff]  }
  0x1c   :  { %3667 = vmatprep.subr.bf16.mxu0 %v5627_v28  ;;  %4126 = vmatprep.subr.bf16.mxu1 %v5629_v29  ;;  %v5705_v17 = vld [vmem:[%s8466_s1 + $0x268] ss:$16 sps:$4 sm:$0xff]   ;;  %v5710_v18 = vld [vmem:[%s8466_s1 + $0x284] ss:$16 sps:$4 sm:$0xff]   ;;  %v5713_v19 = vld [vmem:[%s8466_s1 + $0x28c] ss:$16 sps:$4 sm:$0xff]  }
  0x1d   :  { %v5708_v20 = vld [vmem:[%s8466_s1 + $0x280] ss:$16 sps:$4 sm:$0xff]   ;;  %v5711_v21 = vld [vmem:[%s8466_s1 + $0x288] ss:$16 sps:$4 sm:$0xff]   ;;  %v5716_v22 = vld [vmem:[%s8466_s1 + $0x2a4] ss:$16 sps:$4 sm:$0xff]  }
  0x1e   :  { %v5719_v23 = vld [vmem:[%s8466_s1 + $0x2ac] ss:$16 sps:$4 sm:$0xff]   ;;  %v35_v24 = vld [vmem:[%s8467_s0 + $0x90] sm:$0xff]  ;;  %v5717_v28 = vld [vmem:[%s8466_s1 + $0x2a8] ss:$16 sps:$4 sm:$0xff]  }
  0x1f   :  { %3668 = vmatpush1.bf16.msra.mxu0 %v5631_v30  ;;  %4127 = vmatpush1.bf16.msra.mxu1 %v5632_v31  ;;  %v4852_v25 = vcombine.high %v35_v24, %v35_v24  ;;  %v5714_v26 = vld [vmem:[%s8466_s1 + $0x2a0] ss:$16 sps:$4 sm:$0xff]   ;;  %v4851_v27 = vcombine.low %v35_v24, %v35_v24  ;;  %v5722_v29 = vld [vmem:[%s8466_s1 + $0x2c4] ss:$16 sps:$4 sm:$0xff]   ;;  %v5725_v30 = vld [vmem:[%s8466_s1 + $0x2cc] ss:$16 sps:$4 sm:$0xff]  }
  0x20   :  { %3669 = vmatprep.subr.bf16.mxu0 %v5633_v32  ;;  %4128 = vmatprep.subr.bf16.mxu1 %v5635_v33  ;;  %v5720_v31 = vld [vmem:[%s8466_s1 + $0x2c0] ss:$16 sps:$4 sm:$0xff]   ;;  %v5723_v32 = vld [vmem:[%s8466_s1 + $0x2c8] ss:$16 sps:$4 sm:$0xff]   ;;  %v5784_v33 = vld [vmem:[%s8467_s0 + $0xc] ss:$72 sps:$4 sm:$0xff]  }
  0x21   :  { %v5744_v48 = vld [vmem:[%s8466_s1 + $0x340] ss:$16 sps:$4 sm:$0xff]   ;;  %v5885_v24 = vld [vmem:[%s8467_s0 + $0x14] ss:$72 sps:$4 sm:$0xff]  }
  0x23   :  { %3670 = vmatpush1.bf16.msra.mxu0 %v5637_v34  ;;  %4129 = vmatpush1.bf16.msra.mxu1 %v5638_v35  ;;  %v5728_v34 = vld [vmem:[%s8466_s1 + $0x2e4] ss:$16 sps:$4 sm:$0xff]   ;;  %v5731_v35 = vld [vmem:[%s8466_s1 + $0x2ec] ss:$16 sps:$4 sm:$0xff]  }
  0x24   :  { %3671 = vmatprep.subr.bf16.mxu0 %v5639_v36  ;;  %4130 = vmatprep.subr.bf16.mxu1 %v5641_v37  ;;  %v5726_v36 = vld [vmem:[%s8466_s1 + $0x2e0] ss:$16 sps:$4 sm:$0xff]   ;;  %v5729_v37 = vld [vmem:[%s8466_s1 + $0x2e8] ss:$16 sps:$4 sm:$0xff]  }
  0x27   :  { %3672 = vmatpush1.bf16.msra.mxu0 %v5643_v38  ;;  %4131 = vmatpush1.bf16.msra.mxu1 %v5644_v39  ;;  %v5734_v38 = vld [vmem:[%s8466_s1 + $0x304] ss:$16 sps:$4 sm:$0xff]   ;;  %v5737_v39 = vld [vmem:[%s8466_s1 + $0x30c] ss:$16 sps:$4 sm:$0xff]  }
  0x28   :  { %3673 = vmatprep.subr.bf16.mxu0 %v5645_v40  ;;  %4132 = vmatprep.subr.bf16.mxu1 %v5647_v41  ;;  %v5732_v40 = vld [vmem:[%s8466_s1 + $0x300] ss:$16 sps:$4 sm:$0xff]   ;;  %v5735_v41 = vld [vmem:[%s8466_s1 + $0x308] ss:$16 sps:$4 sm:$0xff]  }
  0x2b   :  { %3674 = vmatpush1.bf16.msra.mxu0 %v5649_v42  ;;  %4133 = vmatpush1.bf16.msra.mxu1 %v5650_v43  ;;  %v5740_v42 = vld [vmem:[%s8466_s1 + $0x324] ss:$16 sps:$4 sm:$0xff]   ;;  %v5743_v43 = vld [vmem:[%s8466_s1 + $0x32c] ss:$16 sps:$4 sm:$0xff]  }
  0x2c   :  { %3675 = vmatprep.subr.bf16.mxu0 %v5651_v44  ;;  %4134 = vmatprep.subr.bf16.mxu1 %v5653_v45  ;;  %v5738_v44 = vld [vmem:[%s8466_s1 + $0x320] ss:$16 sps:$4 sm:$0xff]   ;;  %v5741_v45 = vld [vmem:[%s8466_s1 + $0x328] ss:$16 sps:$4 sm:$0xff]  }
  0x2f   :  { %3676 = vmatpush1.bf16.msra.mxu0 %v5655_v46  ;;  %4135 = vmatpush1.bf16.msra.mxu1 %v5656_v47  ;;  %v5746_v46 = vld [vmem:[%s8466_s1 + $0x344] ss:$16 sps:$4 sm:$0xff]   ;;  %v5749_v47 = vld [vmem:[%s8466_s1 + $0x34c] ss:$16 sps:$4 sm:$0xff]  }
  0x30   :  { %3677 = vmatprep.subr.bf16.mxu0 %v5657_v49  ;;  %4136 = vmatprep.subr.bf16.mxu1 %v5659_v50  ;;  %v5747_v49 = vld [vmem:[%s8466_s1 + $0x348] ss:$16 sps:$4 sm:$0xff]   ;;  %v5752_v50 = vld [vmem:[%s8466_s1 + $0x364] ss:$16 sps:$4 sm:$0xff]  }
  0x33   :  { %3678 = vmatpush1.bf16.msra.mxu0 %v5661_v51  ;;  %4137 = vmatpush1.bf16.msra.mxu1 %v5662_v52  ;;  %v5755_v51 = vld [vmem:[%s8466_s1 + $0x36c] ss:$16 sps:$4 sm:$0xff]   ;;  %v5750_v52 = vld [vmem:[%s8466_s1 + $0x360] ss:$16 sps:$4 sm:$0xff]  }
  0x34   :  { %3679 = vmatprep.subr.bf16.mxu0 %v5663_v53  ;;  %4138 = vmatprep.subr.bf16.mxu1 %v5665_v54  ;;  %v5753_v53 = vld [vmem:[%s8466_s1 + $0x368] ss:$16 sps:$4 sm:$0xff]   ;;  %v5758_v54 = vld [vmem:[%s8466_s1 + $0x384] ss:$16 sps:$4 sm:$0xff]  }
  0x37   :  { %3680 = vmatpush1.bf16.msra.mxu0 %v5667_v55  ;;  %4139 = vmatpush1.bf16.msra.mxu1 %v5668_v56  ;;  %v5761_v55 = vld [vmem:[%s8466_s1 + $0x38c] ss:$16 sps:$4 sm:$0xff]   ;;  %v5756_v56 = vld [vmem:[%s8466_s1 + $0x380] ss:$16 sps:$4 sm:$0xff]  }
  0x38   :  { %3681 = vmatprep.subr.bf16.mxu0 %v5669_v57  ;;  %4140 = vmatprep.subr.bf16.mxu1 %v5671_v58  ;;  %v5759_v57 = vld [vmem:[%s8466_s1 + $0x388] ss:$16 sps:$4 sm:$0xff]   ;;  %v5764_v58 = vld [vmem:[%s8466_s1 + $0x3a4] ss:$16 sps:$4 sm:$0xff]  }
  0x3b   :  { %3682 = vmatpush1.bf16.msra.mxu0 %v5673_v59  ;;  %4141 = vmatpush1.bf16.msra.mxu1 %v5674_v60  ;;  %v5767_v59 = vld [vmem:[%s8466_s1 + $0x3ac] ss:$16 sps:$4 sm:$0xff]   ;;  %v5762_v60 = vld [vmem:[%s8466_s1 + $0x3a0] ss:$16 sps:$4 sm:$0xff]  }
  0x3c   :  { %3683 = vmatprep.subr.bf16.mxu0 %v5675_v61  ;;  %4142 = vmatprep.subr.bf16.mxu1 %v5677_v62  ;;  %v5765_v61 = vld [vmem:[%s8466_s1 + $0x3a8] ss:$16 sps:$4 sm:$0xff]   ;;  %v5771_v62 = vld [vmem:[%s8466_s1 + $0x3c4] ss:$16 sps:$4 sm:$0xff]  }
  0x3f   :  { %3684 = vmatpush1.bf16.msra.mxu0 %v5679_v63  ;;  %4143 = vmatpush1.bf16.msra.mxu1 %v5680_v0  ;;  %v5774_v63 = vld [vmem:[%s8466_s1 + $0x3cc] ss:$16 sps:$4 sm:$0xff]   ;;  %v5769_v0 = vld [vmem:[%s8466_s1 + $0x3c0] ss:$16 sps:$4 sm:$0xff]  }
  0x40   :  { %3704 = vmatprep.subr.bf16.mxu0 %v5686_v1  ;;  %4163 = vmatprep.subr.bf16.mxu1 %v5689_v2  ;;  %v5772_v1 = vld [vmem:[%s8466_s1 + $0x3c8] ss:$16 sps:$4 sm:$0xff]   ;;  %v5778_v2 = vld [vmem:[%s8466_s1 + $0x3e4] ss:$16 sps:$4 sm:$0xff]  }
  0x42   :  { %3686 = vmatmul.mubr.bf16.vlgmr.msra.gmra.mrb[0].mxu0 %v5681_v3  ;;  %4145 = vmatmul.mubr.bf16.vlgmr.msra.gmra.mrb[0].mxu1 %v5681_v3  ;;  %v5781_v3 = vld [vmem:[%s8466_s1 + $0x3ec] ss:$16 sps:$4 sm:$0xff]  }
  0x43   :  { %3705 = vmatpush1.bf16.msra.mxu0 %v5684_v4  ;;  %4164 = vmatpush1.bf16.msra.mxu1 %v5687_v5  ;;  %v5776_v4 = vld [vmem:[%s8466_s1 + $0x3e0] ss:$16 sps:$4 sm:$0xff]   ;;  %v5779_v5 = vld [vmem:[%s8466_s1 + $0x3e8] ss:$16 sps:$4 sm:$0xff]  }
  0x44   :  { %3706 = vmatprep.subr.bf16.mxu0 %v5692_v6  ;;  %4165 = vmatprep.subr.bf16.mxu1 %v5695_v7  ;;  %v5787_v6 = vld [vmem:[%s8466_s1 + $0x404] ss:$16 sps:$4 sm:$0xff]   ;;  %v5790_v7 = vld [vmem:[%s8466_s1 + $0x40c] ss:$16 sps:$4 sm:$0xff]  }
  0x45   :  { %3695 = vmatprep.mubr.bf16.mxu0 %v4852_v25  ;;  %4154 = vmatprep.mubr.bf16.mxu1 %v4852_v25  ;;  %v5803_v25 = vld [vmem:[%s8466_s1 + $0x460] ss:$16 sps:$4 sm:$0xff]  }
  0x47   :  { %3707 = vmatpush1.bf16.msra.mxu0 %v5690_v8  ;;  %4166 = vmatpush1.bf16.msra.mxu1 %v5693_v9  ;;  %v5782_v8 = vld [vmem:[%s8467_s0 + $0x8] ss:$72 sps:$4 sm:$0xff]   ;;  %v36_v9 = vld [vmem:[%s8467_s0 + $0x98] sm:$0xff] }
  0x48   :  { %3708 = vmatprep.subr.bf16.mxu0 %v5698_v10  ;;  %4167 = vmatprep.subr.bf16.mxu1 %v5701_v11  ;;  %v5785_v10 = vld [vmem:[%s8466_s1 + $0x400] ss:$16 sps:$4 sm:$0xff]   ;;  %v5788_v11 = vld [vmem:[%s8466_s1 + $0x408] ss:$16 sps:$4 sm:$0xff]  }
  0x4a   :  { %3696 = vmatmul.mubr.bf16.gmra.mrb[4].mxu0 %v4851_v27  ;;  %4155 = vmatmul.mubr.bf16.gmra.mrb[4].mxu1 %v4851_v27  ;;  %v5811_v27 = vld [vmem:[%s8466_s1 + $0x484] ss:$16 sps:$4 sm:$0xff]  }
  0x4b   :  { %3709 = vmatpush1.bf16.msra.mxu0 %v5696_v12  ;;  %4168 = vmatpush1.bf16.msra.mxu1 %v5699_v13  ;;  %v5793_v12 = vld [vmem:[%s8466_s1 + $0x424] ss:$16 sps:$4 sm:$0xff]   ;;  %v5796_v13 = vld [vmem:[%s8466_s1 + $0x42c] ss:$16 sps:$4 sm:$0xff]  }
  0x4c   :  { %3710 = vmatprep.subr.bf16.mxu0 %v5704_v14  ;;  %4169 = vmatprep.subr.bf16.mxu1 %v5707_v15  ;;  %v4854_v14 = vcombine.high %v36_v9, %v36_v9  ;;  %v5791_v15 = vld [vmem:[%s8466_s1 + $0x420] ss:$16 sps:$4 sm:$0xff]  }
  0x4d   :  { %3736 = vmatprep.mubr.bf16.mxu0 %v5784_v33  ;;  %4195 = vmatprep.mubr.bf16.mxu1 %v5784_v33  ;;  %v5815_v33 = vld [vmem:[%s8466_s1 + $0x4a0] ss:$16 sps:$4 sm:$0xff]  }
  0x4f   :  { %3711 = vmatpush1.bf16.msra.mxu0 %v5702_v16  ;;  %4170 = vmatpush1.bf16.msra.mxu1 %v5705_v17  ;;  %v5794_v16 = vld [vmem:[%s8466_s1 + $0x428] ss:$16 sps:$4 sm:$0xff]   ;;  %v5799_v17 = vld [vmem:[%s8466_s1 + $0x444] ss:$16 sps:$4 sm:$0xff]  }
  0x50   :  { %3712 = vmatprep.subr.bf16.mxu0 %v5710_v18  ;;  %4171 = vmatprep.subr.bf16.mxu1 %v5713_v19  ;;  %v5802_v18 = vld [vmem:[%s8466_s1 + $0x44c] ss:$16 sps:$4 sm:$0xff]   ;;  %v4853_v19 = vcombine.low %v36_v9, %v36_v9  ;;  %v5877_v9 = vld [vmem:[%s8466_s1 + $0x5e0] ss:$16 sps:$4 sm:$0xff]  }
  0x53   :  { %3713 = vmatpush1.bf16.msra.mxu0 %v5708_v20  ;;  %4172 = vmatpush1.bf16.msra.mxu1 %v5711_v21  ;;  %v5797_v20 = vld [vmem:[%s8466_s1 + $0x440] ss:$16 sps:$4 sm:$0xff]   ;;  %v5800_v21 = vld [vmem:[%s8466_s1 + $0x448] ss:$16 sps:$4 sm:$0xff]  }
  0x54   :  { %3714 = vmatprep.subr.bf16.mxu0 %v5716_v22  ;;  %4173 = vmatprep.subr.bf16.mxu1 %v5719_v23  ;;  %v5805_v22 = vld [vmem:[%s8466_s1 + $0x464] ss:$16 sps:$4 sm:$0xff]   ;;  %v5808_v23 = vld [vmem:[%s8466_s1 + $0x46c] ss:$16 sps:$4 sm:$0xff]  }
  0x57   :  { %3715 = vmatpush1.bf16.msra.mxu0 %v5714_v26  ;;  %4174 = vmatpush1.bf16.msra.mxu1 %v5717_v28  ;;  %v5806_v26 = vld [vmem:[%s8466_s1 + $0x468] ss:$16 sps:$4 sm:$0xff]   ;;  %v5814_v28 = vld [vmem:[%s8466_s1 + $0x48c] ss:$16 sps:$4 sm:$0xff]  }
  0x58   :  { %3716 = vmatprep.subr.bf16.mxu0 %v5722_v29  ;;  %4175 = vmatprep.subr.bf16.mxu1 %v5725_v30  ;;  %v5809_v29 = vld [vmem:[%s8466_s1 + $0x480] ss:$16 sps:$4 sm:$0xff]   ;;  %v5812_v30 = vld [vmem:[%s8466_s1 + $0x488] ss:$16 sps:$4 sm:$0xff]  }
  0x5b   :  { %3717 = vmatpush1.bf16.msra.mxu0 %v5720_v31  ;;  %4176 = vmatpush1.bf16.msra.mxu1 %v5723_v32  ;;  %v5817_v31 = vld [vmem:[%s8466_s1 + $0x4a4] ss:$16 sps:$4 sm:$0xff]   ;;  %v5820_v32 = vld [vmem:[%s8466_s1 + $0x4ac] ss:$16 sps:$4 sm:$0xff]  }
  0x5c   :  { %3718 = vmatprep.subr.bf16.mxu0 %v5728_v34  ;;  %4177 = vmatprep.subr.bf16.mxu1 %v5731_v35  ;;  %v5818_v34 = vld [vmem:[%s8466_s1 + $0x4a8] ss:$16 sps:$4 sm:$0xff]   ;;  %v5823_v35 = vld [vmem:[%s8466_s1 + $0x4c4] ss:$16 sps:$4 sm:$0xff]  }
  0x5f   :  { %3719 = vmatpush1.bf16.msra.mxu0 %v5726_v36  ;;  %4178 = vmatpush1.bf16.msra.mxu1 %v5729_v37  ;;  %v5826_v36 = vld [vmem:[%s8466_s1 + $0x4cc] ss:$16 sps:$4 sm:$0xff]   ;;  %v5821_v37 = vld [vmem:[%s8466_s1 + $0x4c0] ss:$16 sps:$4 sm:$0xff]  }
  0x60   :  { %3720 = vmatprep.subr.bf16.mxu0 %v5734_v38  ;;  %4179 = vmatprep.subr.bf16.mxu1 %v5737_v39  ;;  %v5824_v38 = vld [vmem:[%s8466_s1 + $0x4c8] ss:$16 sps:$4 sm:$0xff]   ;;  %v5829_v39 = vld [vmem:[%s8466_s1 + $0x4e4] ss:$16 sps:$4 sm:$0xff]  }
  0x63   :  { %3721 = vmatpush1.bf16.msra.mxu0 %v5732_v40  ;;  %4180 = vmatpush1.bf16.msra.mxu1 %v5735_v41  ;;  %v5832_v40 = vld [vmem:[%s8466_s1 + $0x4ec] ss:$16 sps:$4 sm:$0xff]   ;;  %v5827_v41 = vld [vmem:[%s8466_s1 + $0x4e0] ss:$16 sps:$4 sm:$0xff]  }
  0x64   :  { %3722 = vmatprep.subr.bf16.mxu0 %v5740_v42  ;;  %4181 = vmatprep.subr.bf16.mxu1 %v5743_v43  ;;  %v5830_v42 = vld [vmem:[%s8466_s1 + $0x4e8] ss:$16 sps:$4 sm:$0xff]   ;;  %v5835_v43 = vld [vmem:[%s8466_s1 + $0x504] ss:$16 sps:$4 sm:$0xff]  }
  0x67   :  { %3723 = vmatpush1.bf16.msra.mxu0 %v5738_v44  ;;  %4182 = vmatpush1.bf16.msra.mxu1 %v5741_v45  ;;  %v5838_v44 = vld [vmem:[%s8466_s1 + $0x50c] ss:$16 sps:$4 sm:$0xff]   ;;  %v5833_v45 = vld [vmem:[%s8466_s1 + $0x500] ss:$16 sps:$4 sm:$0xff]  }
  0x68   :  { %3724 = vmatprep.subr.bf16.mxu0 %v5746_v46  ;;  %4183 = vmatprep.subr.bf16.mxu1 %v5749_v47  ;;  %v5836_v46 = vld [vmem:[%s8466_s1 + $0x508] ss:$16 sps:$4 sm:$0xff]   ;;  %v5841_v47 = vld [vmem:[%s8466_s1 + $0x524] ss:$16 sps:$4 sm:$0xff]  }
  0x6b   :  { %3725 = vmatpush1.bf16.msra.mxu0 %v5744_v48  ;;  %4184 = vmatpush1.bf16.msra.mxu1 %v5747_v49  ;;  %v5844_v48 = vld [vmem:[%s8466_s1 + $0x52c] ss:$16 sps:$4 sm:$0xff]   ;;  %v5839_v49 = vld [vmem:[%s8466_s1 + $0x520] ss:$16 sps:$4 sm:$0xff]  }
  0x6c   :  { %3726 = vmatprep.subr.bf16.mxu0 %v5752_v50  ;;  %4185 = vmatprep.subr.bf16.mxu1 %v5755_v51  ;;  %v5842_v50 = vld [vmem:[%s8466_s1 + $0x528] ss:$16 sps:$4 sm:$0xff]   ;;  %v5847_v51 = vld [vmem:[%s8466_s1 + $0x544] ss:$16 sps:$4 sm:$0xff]  }
  0x6f   :  { %3727 = vmatpush1.bf16.msra.mxu0 %v5750_v52  ;;  %4186 = vmatpush1.bf16.msra.mxu1 %v5753_v53  ;;  %v5850_v52 = vld [vmem:[%s8466_s1 + $0x54c] ss:$16 sps:$4 sm:$0xff]   ;;  %v5845_v53 = vld [vmem:[%s8466_s1 + $0x540] ss:$16 sps:$4 sm:$0xff]  }
  0x70   :  { %3728 = vmatprep.subr.bf16.mxu0 %v5758_v54  ;;  %4187 = vmatprep.subr.bf16.mxu1 %v5761_v55  ;;  %v5848_v54 = vld [vmem:[%s8466_s1 + $0x548] ss:$16 sps:$4 sm:$0xff]   ;;  %v5853_v55 = vld [vmem:[%s8466_s1 + $0x564] ss:$16 sps:$4 sm:$0xff]  }
  0x73   :  { %3729 = vmatpush1.bf16.msra.mxu0 %v5756_v56  ;;  %4188 = vmatpush1.bf16.msra.mxu1 %v5759_v57  ;;  %v5856_v56 = vld [vmem:[%s8466_s1 + $0x56c] ss:$16 sps:$4 sm:$0xff]   ;;  %v5851_v57 = vld [vmem:[%s8466_s1 + $0x560] ss:$16 sps:$4 sm:$0xff]  }
  0x74   :  { %3730 = vmatprep.subr.bf16.mxu0 %v5764_v58  ;;  %4189 = vmatprep.subr.bf16.mxu1 %v5767_v59  ;;  %v5854_v58 = vld [vmem:[%s8466_s1 + $0x568] ss:$16 sps:$4 sm:$0xff]   ;;  %v5859_v59 = vld [vmem:[%s8466_s1 + $0x584] ss:$16 sps:$4 sm:$0xff]  }
  0x77   :  { %3731 = vmatpush1.bf16.msra.mxu0 %v5762_v60  ;;  %4190 = vmatpush1.bf16.msra.mxu1 %v5765_v61  ;;  %v5862_v60 = vld [vmem:[%s8466_s1 + $0x58c] ss:$16 sps:$4 sm:$0xff]   ;;  %v5857_v61 = vld [vmem:[%s8466_s1 + $0x580] ss:$16 sps:$4 sm:$0xff]  }
  0x78   :  { %3732 = vmatprep.subr.bf16.mxu0 %v5771_v62  ;;  %4191 = vmatprep.subr.bf16.mxu1 %v5774_v63  ;;  %v5860_v62 = vld [vmem:[%s8466_s1 + $0x588] ss:$16 sps:$4 sm:$0xff]   ;;  %v5865_v63 = vld [vmem:[%s8466_s1 + $0x5a4] ss:$16 sps:$4 sm:$0xff]  }
  0x7b   :  { %3733 = vmatpush1.bf16.msra.mxu0 %v5769_v0  ;;  %4192 = vmatpush1.bf16.msra.mxu1 %v5772_v1  ;;  %v5868_v0 = vld [vmem:[%s8466_s1 + $0x5ac] ss:$16 sps:$4 sm:$0xff]   ;;  %v5863_v1 = vld [vmem:[%s8466_s1 + $0x5a0] ss:$16 sps:$4 sm:$0xff]  }
  0x7c   :  { %3734 = vmatprep.subr.bf16.mxu0 %v5778_v2  ;;  %4193 = vmatprep.subr.bf16.mxu1 %v5781_v3  ;;  %v5866_v2 = vld [vmem:[%s8466_s1 + $0x5a8] ss:$16 sps:$4 sm:$0xff]   ;;  %v5872_v3 = vld [vmem:[%s8466_s1 + $0x5c4] ss:$16 sps:$4 sm:$0xff]  }
  0x7f   :  { %3735 = vmatpush1.bf16.msra.mxu0 %v5776_v4  ;;  %4194 = vmatpush1.bf16.msra.mxu1 %v5779_v5  ;;  %v5875_v4 = vld [vmem:[%s8466_s1 + $0x5cc] ss:$16 sps:$4 sm:$0xff]   ;;  %v5870_v5 = vld [vmem:[%s8466_s1 + $0x5c0] ss:$16 sps:$4 sm:$0xff]  }
  0x80   :  { %3755 = vmatprep.subr.bf16.mxu0 %v5787_v6  ;;  %4214 = vmatprep.subr.bf16.mxu1 %v5790_v7  ;;  %v5873_v6 = vld [vmem:[%s8466_s1 + $0x5c8] ss:$16 sps:$4 sm:$0xff]   ;;  %v5879_v7 = vld [vmem:[%s8466_s1 + $0x5e4] ss:$16 sps:$4 sm:$0xff]  }
  0x82   :  { %3737 = vmatmul.mubr.bf16.vlgmr.msra.gmra.mrb[0].mxu0 %v5782_v8  ;;  %4196 = vmatmul.mubr.bf16.vlgmr.msra.gmra.mrb[0].mxu1 %v5782_v8  ;;  %v5882_v8 = vld [vmem:[%s8466_s1 + $0x5ec] ss:$16 sps:$4 sm:$0xff]  }
  0x83   :  { %3756 = vmatpush1.bf16.msra.mxu0 %v5785_v10  ;;  %4215 = vmatpush1.bf16.msra.mxu1 %v5788_v11  ;;  %v5880_v10 = vld [vmem:[%s8466_s1 + $0x5e8] ss:$16 sps:$4 sm:$0xff]   ;;  %v5888_v11 = vld [vmem:[%s8466_s1 + $0x604] ss:$16 sps:$4 sm:$0xff]  }
  0x84   :  { %3757 = vmatprep.subr.bf16.mxu0 %v5793_v12  ;;  %4216 = vmatprep.subr.bf16.mxu1 %v5796_v13  ;;  %v5891_v12 = vld [vmem:[%s8466_s1 + $0x60c] ss:$16 sps:$4 sm:$0xff]   ;;  %v5883_v13 = vld [vmem:[%s8467_s0 + $0x10] ss:$72 sps:$4 sm:$0xff]  }
  0x85   :  { %3746 = vmatprep.mubr.bf16.mxu0 %v4854_v14  ;;  %4205 = vmatprep.mubr.bf16.mxu1 %v4854_v14  ;;  %v5886_v14 = vld [vmem:[%s8466_s1 + $0x600] ss:$16 sps:$4 sm:$0xff]  }
  0x87   :  { %3758 = vmatpush1.bf16.msra.mxu0 %v5791_v15  ;;  %4217 = vmatpush1.bf16.msra.mxu1 %v5794_v16  ;;  %v37_v15 = vld [vmem:[%s8467_s0 + $0xa0] sm:$0xff]  ;;  %v5889_v16 = vld [vmem:[%s8466_s1 + $0x608] ss:$16 sps:$4 sm:$0xff]  }
  0x88   :  { %3759 = vmatprep.subr.bf16.mxu0 %v5799_v17  ;;  %4218 = vmatprep.subr.bf16.mxu1 %v5802_v18  ;;  %v5894_v17 = vld [vmem:[%s8466_s1 + $0x624] ss:$16 sps:$4 sm:$0xff]   ;;  %v5897_v18 = vld [vmem:[%s8466_s1 + $0x62c] ss:$16 sps:$4 sm:$0xff]  }
  0x8a   :  { %3747 = vmatmul.mubr.bf16.gmra.mrb[4].mxu0 %v4853_v19  ;;  %4206 = vmatmul.mubr.bf16.gmra.mrb[4].mxu1 %v4853_v19  ;;  %v4856_v19 = vcombine.high %v37_v15, %v37_v15 }
  0x8b   :  { %3760 = vmatpush1.bf16.msra.mxu0 %v5797_v20  ;;  %4219 = vmatpush1.bf16.msra.mxu1 %v5800_v21  ;;  %v5892_v20 = vld [vmem:[%s8466_s1 + $0x620] ss:$16 sps:$4 sm:$0xff]   ;;  %v5895_v21 = vld [vmem:[%s8466_s1 + $0x628] ss:$16 sps:$4 sm:$0xff]  }
  0x8c   :  { %3761 = vmatprep.subr.bf16.mxu0 %v5805_v22  ;;  %4220 = vmatprep.subr.bf16.mxu1 %v5808_v23  ;;  %v5900_v22 = vld [vmem:[%s8466_s1 + $0x644] ss:$16 sps:$4 sm:$0xff]   ;;  %v5903_v23 = vld [vmem:[%s8466_s1 + $0x64c] ss:$16 sps:$4 sm:$0xff]  }
  0x8d   :  { %3787 = vmatprep.mubr.bf16.mxu0 %v5885_v24  ;;  %4246 = vmatprep.mubr.bf16.mxu1 %v5885_v24  ;;  %v5898_v24 = vld [vmem:[%s8466_s1 + $0x640] ss:$16 sps:$4 sm:$0xff]  }
  0x8f   :  { %3762 = vmatpush1.bf16.msra.mxu0 %v5803_v25  ;;  %4221 = vmatpush1.bf16.msra.mxu1 %v5806_v26  ;;  %v4855_v25 = vcombine.low %v37_v15, %v37_v15  ;;  %v5901_v26 = vld [vmem:[%s8466_s1 + $0x648] ss:$16 sps:$4 sm:$0xff]  }
  0x90   :  { %3763 = vmatprep.subr.bf16.mxu0 %v5811_v27  ;;  %4222 = vmatprep.subr.bf16.mxu1 %v5814_v28  ;;  %v5906_v27 = vld [vmem:[%s8466_s1 + $0x664] ss:$16 sps:$4 sm:$0xff]   ;;  %v5909_v28 = vld [vmem:[%s8466_s1 + $0x66c] ss:$16 sps:$4 sm:$0xff]   ;;  %v5981_v15 = vld [vmem:[%s8466_s1 + $0x7e8] ss:$16 sps:$4 sm:$0xff]  }
  0x93   :  { %3764 = vmatpush1.bf16.msra.mxu0 %v5809_v29  ;;  %4223 = vmatpush1.bf16.msra.mxu1 %v5812_v30  ;;  %v5986_v29 = vld [vmem:[%s8467_s0 + $0x1c] ss:$72 sps:$4 sm:$0xff]   ;;  %v5904_v30 = vld [vmem:[%s8466_s1 + $0x660] ss:$16 sps:$4 sm:$0xff]  }
  0x94   :  { %3765 = vmatprep.subr.bf16.mxu0 %v5817_v31  ;;  %4224 = vmatprep.subr.bf16.mxu1 %v5820_v32  ;;  %v5907_v31 = vld [vmem:[%s8466_s1 + $0x668] ss:$16 sps:$4 sm:$0xff]   ;;  %v5912_v32 = vld [vmem:[%s8466_s1 + $0x684] ss:$16 sps:$4 sm:$0xff]  }
  0x97   :  { %3766 = vmatpush1.bf16.msra.mxu0 %v5815_v33  ;;  %4225 = vmatpush1.bf16.msra.mxu1 %v5818_v34  ;;  %v5915_v33 = vld [vmem:[%s8466_s1 + $0x68c] ss:$16 sps:$4 sm:$0xff]   ;;  %v5910_v34 = vld [vmem:[%s8466_s1 + $0x680] ss:$16 sps:$4 sm:$0xff]  }
  0x98   :  { %3767 = vmatprep.subr.bf16.mxu0 %v5823_v35  ;;  %4226 = vmatprep.subr.bf16.mxu1 %v5826_v36  ;;  %v5913_v35 = vld [vmem:[%s8466_s1 + $0x688] ss:$16 sps:$4 sm:$0xff]   ;;  %v5918_v36 = vld [vmem:[%s8466_s1 + $0x6a4] ss:$16 sps:$4 sm:$0xff]  }
  0x9b   :  { %3768 = vmatpush1.bf16.msra.mxu0 %v5821_v37  ;;  %4227 = vmatpush1.bf16.msra.mxu1 %v5824_v38  ;;  %v5921_v37 = vld [vmem:[%s8466_s1 + $0x6ac] ss:$16 sps:$4 sm:$0xff]   ;;  %v5916_v38 = vld [vmem:[%s8466_s1 + $0x6a0] ss:$16 sps:$4 sm:$0xff]  }
  0x9c   :  { %3769 = vmatprep.subr.bf16.mxu0 %v5829_v39  ;;  %4228 = vmatprep.subr.bf16.mxu1 %v5832_v40  ;;  %v5919_v39 = vld [vmem:[%s8466_s1 + $0x6a8] ss:$16 sps:$4 sm:$0xff]   ;;  %v5924_v40 = vld [vmem:[%s8466_s1 + $0x6c4] ss:$16 sps:$4 sm:$0xff]  }
  0x9f   :  { %3770 = vmatpush1.bf16.msra.mxu0 %v5827_v41  ;;  %4229 = vmatpush1.bf16.msra.mxu1 %v5830_v42  ;;  %v5927_v41 = vld [vmem:[%s8466_s1 + $0x6cc] ss:$16 sps:$4 sm:$0xff]   ;;  %v5922_v42 = vld [vmem:[%s8466_s1 + $0x6c0] ss:$16 sps:$4 sm:$0xff]  }
  0xa0   :  { %3771 = vmatprep.subr.bf16.mxu0 %v5835_v43  ;;  %4230 = vmatprep.subr.bf16.mxu1 %v5838_v44  ;;  %v5925_v43 = vld [vmem:[%s8466_s1 + $0x6c8] ss:$16 sps:$4 sm:$0xff]   ;;  %v5930_v44 = vld [vmem:[%s8466_s1 + $0x6e4] ss:$16 sps:$4 sm:$0xff]  }
  0xa3   :  { %3772 = vmatpush1.bf16.msra.mxu0 %v5833_v45  ;;  %4231 = vmatpush1.bf16.msra.mxu1 %v5836_v46  ;;  %v5933_v45 = vld [vmem:[%s8466_s1 + $0x6ec] ss:$16 sps:$4 sm:$0xff]   ;;  %v5928_v46 = vld [vmem:[%s8466_s1 + $0x6e0] ss:$16 sps:$4 sm:$0xff]  }
  0xa4   :  { %3773 = vmatprep.subr.bf16.mxu0 %v5841_v47  ;;  %4232 = vmatprep.subr.bf16.mxu1 %v5844_v48  ;;  %v5931_v47 = vld [vmem:[%s8466_s1 + $0x6e8] ss:$16 sps:$4 sm:$0xff]   ;;  %v5936_v48 = vld [vmem:[%s8466_s1 + $0x704] ss:$16 sps:$4 sm:$0xff]  }
  0xa7   :  { %3774 = vmatpush1.bf16.msra.mxu0 %v5839_v49  ;;  %4233 = vmatpush1.bf16.msra.mxu1 %v5842_v50  ;;  %v5939_v49 = vld [vmem:[%s8466_s1 + $0x70c] ss:$16 sps:$4 sm:$0xff]   ;;  %v5934_v50 = vld [vmem:[%s8466_s1 + $0x700] ss:$16 sps:$4 sm:$0xff]  }
  0xa8   :  { %3775 = vmatprep.subr.bf16.mxu0 %v5847_v51  ;;  %4234 = vmatprep.subr.bf16.mxu1 %v5850_v52  ;;  %v5937_v51 = vld [vmem:[%s8466_s1 + $0x708] ss:$16 sps:$4 sm:$0xff]   ;;  %v5942_v52 = vld [vmem:[%s8466_s1 + $0x724] ss:$16 sps:$4 sm:$0xff]  }
  0xab   :  { %3776 = vmatpush1.bf16.msra.mxu0 %v5845_v53  ;;  %4235 = vmatpush1.bf16.msra.mxu1 %v5848_v54  ;;  %v5945_v53 = vld [vmem:[%s8466_s1 + $0x72c] ss:$16 sps:$4 sm:$0xff]   ;;  %v5940_v54 = vld [vmem:[%s8466_s1 + $0x720] ss:$16 sps:$4 sm:$0xff]  }
  0xac   :  { %3777 = vmatprep.subr.bf16.mxu0 %v5853_v55  ;;  %4236 = vmatprep.subr.bf16.mxu1 %v5856_v56  ;;  %v5943_v55 = vld [vmem:[%s8466_s1 + $0x728] ss:$16 sps:$4 sm:$0xff]   ;;  %v5948_v56 = vld [vmem:[%s8466_s1 + $0x744] ss:$16 sps:$4 sm:$0xff]  }
  0xaf   :  { %3778 = vmatpush1.bf16.msra.mxu0 %v5851_v57  ;;  %4237 = vmatpush1.bf16.msra.mxu1 %v5854_v58  ;;  %v5951_v57 = vld [vmem:[%s8466_s1 + $0x74c] ss:$16 sps:$4 sm:$0xff]   ;;  %v5946_v58 = vld [vmem:[%s8466_s1 + $0x740] ss:$16 sps:$4 sm:$0xff]  }
  0xb0   :  { %3779 = vmatprep.subr.bf16.mxu0 %v5859_v59  ;;  %4238 = vmatprep.subr.bf16.mxu1 %v5862_v60  ;;  %v5949_v59 = vld [vmem:[%s8466_s1 + $0x748] ss:$16 sps:$4 sm:$0xff]   ;;  %v5954_v60 = vld [vmem:[%s8466_s1 + $0x764] ss:$16 sps:$4 sm:$0xff]  }
  0xb3   :  { %3780 = vmatpush1.bf16.msra.mxu0 %v5857_v61  ;;  %4239 = vmatpush1.bf16.msra.mxu1 %v5860_v62  ;;  %v5957_v61 = vld [vmem:[%s8466_s1 + $0x76c] ss:$16 sps:$4 sm:$0xff]   ;;  %v5952_v62 = vld [vmem:[%s8466_s1 + $0x760] ss:$16 sps:$4 sm:$0xff]  }
  0xb4   :  { %3781 = vmatprep.subr.bf16.mxu0 %v5865_v63  ;;  %4240 = vmatprep.subr.bf16.mxu1 %v5868_v0  ;;  %v5955_v63 = vld [vmem:[%s8466_s1 + $0x768] ss:$16 sps:$4 sm:$0xff]   ;;  %v5960_v0 = vld [vmem:[%s8466_s1 + $0x784] ss:$16 sps:$4 sm:$0xff]  }
  0xb7   :  { %3782 = vmatpush1.bf16.msra.mxu0 %v5863_v1  ;;  %4241 = vmatpush1.bf16.msra.mxu1 %v5866_v2  ;;  %v5963_v1 = vld [vmem:[%s8466_s1 + $0x78c] ss:$16 sps:$4 sm:$0xff]   ;;  %v5958_v2 = vld [vmem:[%s8466_s1 + $0x780] ss:$16 sps:$4 sm:$0xff]  }
  0xb8   :  { %3783 = vmatprep.subr.bf16.mxu0 %v5872_v3  ;;  %4242 = vmatprep.subr.bf16.mxu1 %v5875_v4  ;;  %v5961_v3 = vld [vmem:[%s8466_s1 + $0x788] ss:$16 sps:$4 sm:$0xff]   ;;  %v5966_v4 = vld [vmem:[%s8466_s1 + $0x7a4] ss:$16 sps:$4 sm:$0xff]  }
  0xbb   :  { %3784 = vmatpush1.bf16.msra.mxu0 %v5870_v5  ;;  %4243 = vmatpush1.bf16.msra.mxu1 %v5873_v6  ;;  %v5969_v5 = vld [vmem:[%s8466_s1 + $0x7ac] ss:$16 sps:$4 sm:$0xff]   ;;  %v5964_v6 = vld [vmem:[%s8466_s1 + $0x7a0] ss:$16 sps:$4 sm:$0xff]  }
  0xbc   :  { %3785 = vmatprep.subr.bf16.mxu0 %v5879_v7  ;;  %4244 = vmatprep.subr.bf16.mxu1 %v5882_v8  ;;  %v5967_v7 = vld [vmem:[%s8466_s1 + $0x7a8] ss:$16 sps:$4 sm:$0xff]   ;;  %v5973_v8 = vld [vmem:[%s8466_s1 + $0x7c4] ss:$16 sps:$4 sm:$0xff]  }
  0xbf   :  { %3786 = vmatpush1.bf16.msra.mxu0 %v5877_v9  ;;  %4245 = vmatpush1.bf16.msra.mxu1 %v5880_v10  ;;  %v5976_v9 = vld [vmem:[%s8466_s1 + $0x7cc] ss:$16 sps:$4 sm:$0xff]   ;;  %v5971_v10 = vld [vmem:[%s8466_s1 + $0x7c0] ss:$16 sps:$4 sm:$0xff]  }
  0xc0   :  { %3806 = vmatprep.subr.bf16.mxu0 %v5888_v11  ;;  %4265 = vmatprep.subr.bf16.mxu1 %v5891_v12  ;;  %v5974_v11 = vld [vmem:[%s8466_s1 + $0x7c8] ss:$16 sps:$4 sm:$0xff]   ;;  %v5980_v12 = vld [vmem:[%s8466_s1 + $0x7e4] ss:$16 sps:$4 sm:$0xff]  }
  0xc2   :  { %3788 = vmatmul.mubr.bf16.vlgmr.msra.gmra.mrb[0].mxu0 %v5883_v13  ;;  %4247 = vmatmul.mubr.bf16.vlgmr.msra.gmra.mrb[0].mxu1 %v5883_v13  ;;  %v5983_v13 = vld [vmem:[%s8466_s1 + $0x7ec] ss:$16 sps:$4 sm:$0xff]  }
  0xc3   :  { %3807 = vmatpush1.bf16.msra.mxu0 %v5886_v14  ;;  %4266 = vmatpush1.bf16.msra.mxu1 %v5889_v16  ;;  %v5978_v14 = vld [vmem:[%s8466_s1 + $0x7e0] ss:$16 sps:$4 sm:$0xff]   ;;  %v5989_v16 = vld [vmem:[%s8466_s1 + $0x804] ss:$16 sps:$4 sm:$0xff]  }
  0xc4   :  { %3808 = vmatprep.subr.bf16.mxu0 %v5894_v17  ;;  %4267 = vmatprep.subr.bf16.mxu1 %v5897_v18  ;;  %v5992_v17 = vld [vmem:[%s8466_s1 + $0x80c] ss:$16 sps:$4 sm:$0xff]   ;;  %v5984_v18 = vld [vmem:[%s8467_s0 + $0x18] ss:$72 sps:$4 sm:$0xff]  }
  0xc5   :  { %3797 = vmatprep.mubr.bf16.mxu0 %v4856_v19  ;;  %4256 = vmatprep.mubr.bf16.mxu1 %v4856_v19  ;;  %v5987_v19 = vld [vmem:[%s8466_s1 + $0x800] ss:$16 sps:$4 sm:$0xff]  }
  0xc7   :  { %3809 = vmatpush1.bf16.msra.mxu0 %v5892_v20  ;;  %4268 = vmatpush1.bf16.msra.mxu1 %v5895_v21  ;;  %v5990_v20 = vld [vmem:[%s8466_s1 + $0x808] ss:$16 sps:$4 sm:$0xff]  }
  0xc8   :  { %3810 = vmatprep.subr.bf16.mxu0 %v5900_v22  ;;  %4269 = vmatprep.subr.bf16.mxu1 %v5903_v23  ;;  %v38_v21 = vld [vmem:[%s8467_s0 + $0xa8] sm:$0xff]  ;;  %v5995_v22 = vld [vmem:[%s8466_s1 + $0x824] ss:$16 sps:$4 sm:$0xff]  }
  0xc9   :  { %v5998_v23 = vld [vmem:[%s8466_s1 + $0x82c] ss:$16 sps:$4 sm:$0xff]  }
  0xca   :  { %3798 = vmatmul.mubr.bf16.gmra.mrb[4].mxu0 %v4855_v25  ;;  %4257 = vmatmul.mubr.bf16.gmra.mrb[4].mxu1 %v4855_v25  ;;  %v5993_v25 = vld [vmem:[%s8466_s1 + $0x820] ss:$16 sps:$4 sm:$0xff]  }
  0xcb   :  { %3811 = vmatpush1.bf16.msra.mxu0 %v5898_v24  ;;  %4270 = vmatpush1.bf16.msra.mxu1 %v5901_v26  ;;  %v4858_v24 = vcombine.high %v38_v21, %v38_v21  ;;  %v5996_v26 = vld [vmem:[%s8466_s1 + $0x828] ss:$16 sps:$4 sm:$0xff]  }
  0xcc   :  { %3812 = vmatprep.subr.bf16.mxu0 %v5906_v27  ;;  %4271 = vmatprep.subr.bf16.mxu1 %v5909_v28  ;;  %v6001_v27 = vld [vmem:[%s8466_s1 + $0x844] ss:$16 sps:$4 sm:$0xff]   ;;  %v6004_v28 = vld [vmem:[%s8466_s1 + $0x84c] ss:$16 sps:$4 sm:$0xff]  }
  0xcd   :  { %3838 = vmatprep.mubr.bf16.mxu0 %v5986_v29  ;;  %4297 = vmatprep.mubr.bf16.mxu1 %v5986_v29  ;;  %v5999_v29 = vld [vmem:[%s8466_s1 + $0x840] ss:$16 sps:$4 sm:$0xff]  }
  0xcf   :  { %3813 = vmatpush1.bf16.msra.mxu0 %v5904_v30  ;;  %4272 = vmatpush1.bf16.msra.mxu1 %v5907_v31  ;;  %v4857_v30 = vcombine.low %v38_v21, %v38_v21  ;;  %v6002_v31 = vld [vmem:[%s8466_s1 + $0x848] ss:$16 sps:$4 sm:$0xff]   ;;  %v6090_v21 = vld [vmem:[%s8466_s1 + $0xa04] ss:$16 sps:$4 sm:$0xff]  }
  0xd0   :  { %3814 = vmatprep.subr.bf16.mxu0 %v5912_v32  ;;  %4273 = vmatprep.subr.bf16.mxu1 %v5915_v33  ;;  %v6007_v32 = vld [vmem:[%s8466_s1 + $0x864] ss:$16 sps:$4 sm:$0xff]   ;;  %v6010_v33 = vld [vmem:[%s8466_s1 + $0x86c] ss:$16 sps:$4 sm:$0xff]  }
  0xd3   :  { %3815 = vmatpush1.bf16.msra.mxu0 %v5910_v34  ;;  %4274 = vmatpush1.bf16.msra.mxu1 %v5913_v35  ;;  %v6087_v34 = vld [vmem:[%s8467_s0 + $0x24] ss:$72 sps:$4 sm:$0xff]   ;;  %v6005_v35 = vld [vmem:[%s8466_s1 + $0x860] ss:$16 sps:$4 sm:$0xff]  }
  0xd4   :  { %3816 = vmatprep.subr.bf16.mxu0 %v5918_v36  ;;  %4275 = vmatprep.subr.bf16.mxu1 %v5921_v37  ;;  %v6008_v36 = vld [vmem:[%s8466_s1 + $0x868] ss:$16 sps:$4 sm:$0xff]   ;;  %v6013_v37 = vld [vmem:[%s8466_s1 + $0x884] ss:$16 sps:$4 sm:$0xff]  }
  0xd7   :  { %3817 = vmatpush1.bf16.msra.mxu0 %v5916_v38  ;;  %4276 = vmatpush1.bf16.msra.mxu1 %v5919_v39  ;;  %v6016_v38 = vld [vmem:[%s8466_s1 + $0x88c] ss:$16 sps:$4 sm:$0xff]   ;;  %v6011_v39 = vld [vmem:[%s8466_s1 + $0x880] ss:$16 sps:$4 sm:$0xff]  }
  0xd8   :  { %3818 = vmatprep.subr.bf16.mxu0 %v5924_v40  ;;  %4277 = vmatprep.subr.bf16.mxu1 %v5927_v41  ;;  %v6014_v40 = vld [vmem:[%s8466_s1 + $0x888] ss:$16 sps:$4 sm:$0xff]   ;;  %v6019_v41 = vld [vmem:[%s8466_s1 + $0x8a4] ss:$16 sps:$4 sm:$0xff]  }
  0xdb   :  { %3819 = vmatpush1.bf16.msra.mxu0 %v5922_v42  ;;  %4278 = vmatpush1.bf16.msra.mxu1 %v5925_v43  ;;  %v6022_v42 = vld [vmem:[%s8466_s1 + $0x8ac] ss:$16 sps:$4 sm:$0xff]   ;;  %v6017_v43 = vld [vmem:[%s8466_s1 + $0x8a0] ss:$16 sps:$4 sm:$0xff]  }
  0xdc   :  { %3820 = vmatprep.subr.bf16.mxu0 %v5930_v44  ;;  %4279 = vmatprep.subr.bf16.mxu1 %v5933_v45  ;;  %v6020_v44 = vld [vmem:[%s8466_s1 + $0x8a8] ss:$16 sps:$4 sm:$0xff]   ;;  %v6025_v45 = vld [vmem:[%s8466_s1 + $0x8c4] ss:$16 sps:$4 sm:$0xff]  }
  0xdf   :  { %3821 = vmatpush1.bf16.msra.mxu0 %v5928_v46  ;;  %4280 = vmatpush1.bf16.msra.mxu1 %v5931_v47  ;;  %v6028_v46 = vld [vmem:[%s8466_s1 + $0x8cc] ss:$16 sps:$4 sm:$0xff]   ;;  %v6023_v47 = vld [vmem:[%s8466_s1 + $0x8c0] ss:$16 sps:$4 sm:$0xff]  }
  0xe0   :  { %3822 = vmatprep.subr.bf16.mxu0 %v5936_v48  ;;  %4281 = vmatprep.subr.bf16.mxu1 %v5939_v49  ;;  %v6026_v48 = vld [vmem:[%s8466_s1 + $0x8c8] ss:$16 sps:$4 sm:$0xff]   ;;  %v6031_v49 = vld [vmem:[%s8466_s1 + $0x8e4] ss:$16 sps:$4 sm:$0xff]  }
  0xe3   :  { %3823 = vmatpush1.bf16.msra.mxu0 %v5934_v50  ;;  %4282 = vmatpush1.bf16.msra.mxu1 %v5937_v51  ;;  %v6034_v50 = vld [vmem:[%s8466_s1 + $0x8ec] ss:$16 sps:$4 sm:$0xff]   ;;  %v6029_v51 = vld [vmem:[%s8466_s1 + $0x8e0] ss:$16 sps:$4 sm:$0xff]  }
  0xe4   :  { %3824 = vmatprep.subr.bf16.mxu0 %v5942_v52  ;;  %4283 = vmatprep.subr.bf16.mxu1 %v5945_v53  ;;  %v6032_v52 = vld [vmem:[%s8466_s1 + $0x8e8] ss:$16 sps:$4 sm:$0xff]   ;;  %v6037_v53 = vld [vmem:[%s8466_s1 + $0x904] ss:$16 sps:$4 sm:$0xff]  }
  0xe7   :  { %3825 = vmatpush1.bf16.msra.mxu0 %v5940_v54  ;;  %4284 = vmatpush1.bf16.msra.mxu1 %v5943_v55  ;;  %v6040_v54 = vld [vmem:[%s8466_s1 + $0x90c] ss:$16 sps:$4 sm:$0xff]   ;;  %v6035_v55 = vld [vmem:[%s8466_s1 + $0x900] ss:$16 sps:$4 sm:$0xff]  }
  0xe8   :  { %3826 = vmatprep.subr.bf16.mxu0 %v5948_v56  ;;  %4285 = vmatprep.subr.bf16.mxu1 %v5951_v57  ;;  %v6038_v56 = vld [vmem:[%s8466_s1 + $0x908] ss:$16 sps:$4 sm:$0xff]   ;;  %v6043_v57 = vld [vmem:[%s8466_s1 + $0x924] ss:$16 sps:$4 sm:$0xff]  }
  0xeb   :  { %3827 = vmatpush1.bf16.msra.mxu0 %v5946_v58  ;;  %4286 = vmatpush1.bf16.msra.mxu1 %v5949_v59  ;;  %v6046_v58 = vld [vmem:[%s8466_s1 + $0x92c] ss:$16 sps:$4 sm:$0xff]   ;;  %v6041_v59 = vld [vmem:[%s8466_s1 + $0x920] ss:$16 sps:$4 sm:$0xff]  }
  0xec   :  { %3828 = vmatprep.subr.bf16.mxu0 %v5954_v60  ;;  %4287 = vmatprep.subr.bf16.mxu1 %v5957_v61  ;;  %v6044_v60 = vld [vmem:[%s8466_s1 + $0x928] ss:$16 sps:$4 sm:$0xff]   ;;  %v6049_v61 = vld [vmem:[%s8466_s1 + $0x944] ss:$16 sps:$4 sm:$0xff]  }
  0xef   :  { %3829 = vmatpush1.bf16.msra.mxu0 %v5952_v62  ;;  %4288 = vmatpush1.bf16.msra.mxu1 %v5955_v63  ;;  %v6052_v62 = vld [vmem:[%s8466_s1 + $0x94c] ss:$16 sps:$4 sm:$0xff]   ;;  %v6047_v63 = vld [vmem:[%s8466_s1 + $0x940] ss:$16 sps:$4 sm:$0xff]  }
  0xf0   :  { %3830 = vmatprep.subr.bf16.mxu0 %v5960_v0  ;;  %4289 = vmatprep.subr.bf16.mxu1 %v5963_v1  ;;  %v6050_v0 = vld [vmem:[%s8466_s1 + $0x948] ss:$16 sps:$4 sm:$0xff]   ;;  %v6055_v1 = vld [vmem:[%s8466_s1 + $0x964] ss:$16 sps:$4 sm:$0xff]  }
  0xf3   :  { %3831 = vmatpush1.bf16.msra.mxu0 %v5958_v2  ;;  %4290 = vmatpush1.bf16.msra.mxu1 %v5961_v3  ;;  %v6058_v2 = vld [vmem:[%s8466_s1 + $0x96c] ss:$16 sps:$4 sm:$0xff]   ;;  %v6053_v3 = vld [vmem:[%s8466_s1 + $0x960] ss:$16 sps:$4 sm:$0xff]  }
  0xf4   :  { %3832 = vmatprep.subr.bf16.mxu0 %v5966_v4  ;;  %4291 = vmatprep.subr.bf16.mxu1 %v5969_v5  ;;  %v6056_v4 = vld [vmem:[%s8466_s1 + $0x968] ss:$16 sps:$4 sm:$0xff]   ;;  %v6061_v5 = vld [vmem:[%s8466_s1 + $0x984] ss:$16 sps:$4 sm:$0xff]  }
  0xf7   :  { %3833 = vmatpush1.bf16.msra.mxu0 %v5964_v6  ;;  %4292 = vmatpush1.bf16.msra.mxu1 %v5967_v7  ;;  %v6064_v6 = vld [vmem:[%s8466_s1 + $0x98c] ss:$16 sps:$4 sm:$0xff]   ;;  %v6059_v7 = vld [vmem:[%s8466_s1 + $0x980] ss:$16 sps:$4 sm:$0xff]  }
  0xf8   :  { %3834 = vmatprep.subr.bf16.mxu0 %v5973_v8  ;;  %4293 = vmatprep.subr.bf16.mxu1 %v5976_v9  ;;  %v6062_v8 = vld [vmem:[%s8466_s1 + $0x988] ss:$16 sps:$4 sm:$0xff]   ;;  %v6067_v9 = vld [vmem:[%s8466_s1 + $0x9a4] ss:$16 sps:$4 sm:$0xff]  }
  0xfb   :  { %3835 = vmatpush1.bf16.msra.mxu0 %v5971_v10  ;;  %4294 = vmatpush1.bf16.msra.mxu1 %v5974_v11  ;;  %v6070_v10 = vld [vmem:[%s8466_s1 + $0x9ac] ss:$16 sps:$4 sm:$0xff]   ;;  %v6065_v11 = vld [vmem:[%s8466_s1 + $0x9a0] ss:$16 sps:$4 sm:$0xff]  }
  0xfc   :  { %3836 = vmatprep.subr.bf16.mxu0 %v5980_v12  ;;  %4295 = vmatprep.subr.bf16.mxu1 %v5983_v13  ;;  %v6068_v12 = vld [vmem:[%s8466_s1 + $0x9a8] ss:$16 sps:$4 sm:$0xff]   ;;  %v6074_v13 = vld [vmem:[%s8466_s1 + $0x9c4] ss:$16 sps:$4 sm:$0xff]  }
  0xff   :  { %3837 = vmatpush1.bf16.msra.mxu0 %v5978_v14  ;;  %4296 = vmatpush1.bf16.msra.mxu1 %v5981_v15  ;;  %v6077_v14 = vld [vmem:[%s8466_s1 + $0x9cc] ss:$16 sps:$4 sm:$0xff]   ;;  %v6072_v15 = vld [vmem:[%s8466_s1 + $0x9c0] ss:$16 sps:$4 sm:$0xff]  }
 0x100   :  { %3857 = vmatprep.subr.bf16.mxu0 %v5989_v16  ;;  %4316 = vmatprep.subr.bf16.mxu1 %v5992_v17  ;;  %v6075_v16 = vld [vmem:[%s8466_s1 + $0x9c8] ss:$16 sps:$4 sm:$0xff]   ;;  %v6081_v17 = vld [vmem:[%s8466_s1 + $0x9e4] ss:$16 sps:$4 sm:$0xff]  }
 0x102   :  { %3839 = vmatmul.mubr.bf16.vlgmr.msra.gmra.mrb[0].mxu0 %v5984_v18  ;;  %4298 = vmatmul.mubr.bf16.vlgmr.msra.gmra.mrb[0].mxu1 %v5984_v18  ;;  %v6084_v18 = vld [vmem:[%s8466_s1 + $0x9ec] ss:$16 sps:$4 sm:$0xff]  }
 0x103   :  { %3858 = vmatpush1.bf16.msra.mxu0 %v5987_v19  ;;  %4317 = vmatpush1.bf16.msra.mxu1 %v5990_v20  ;;  %v6079_v19 = vld [vmem:[%s8466_s1 + $0x9e0] ss:$16 sps:$4 sm:$0xff]   ;;  %v6082_v20 = vld [vmem:[%s8466_s1 + $0x9e8] ss:$16 sps:$4 sm:$0xff]  }
 0x104   :  { %3859 = vmatprep.subr.bf16.mxu0 %v5995_v22  ;;  %4318 = vmatprep.subr.bf16.mxu1 %v5998_v23  ;;  %v6085_v22 = vld [vmem:[%s8467_s0 + $0x20] ss:$72 sps:$4 sm:$0xff]   ;;  %v6093_v23 = vld [vmem:[%s8466_s1 + $0xa0c] ss:$16 sps:$4 sm:$0xff]  }
 0x105   :  { %3848 = vmatprep.mubr.bf16.mxu0 %v4858_v24  ;;  %4307 = vmatprep.mubr.bf16.mxu1 %v4858_v24  ;;  %v39_v24 = vld [vmem:[%s8467_s0 + $0xb0] sm:$0xff] }
 0x107   :  { %3860 = vmatpush1.bf16.msra.mxu0 %v5993_v25  ;;  %4319 = vmatpush1.bf16.msra.mxu1 %v5996_v26  ;;  %v6088_v25 = vld [vmem:[%s8466_s1 + $0xa00] ss:$16 sps:$4 sm:$0xff]   ;;  %v6091_v26 = vld [vmem:[%s8466_s1 + $0xa08] ss:$16 sps:$4 sm:$0xff]  }
 0x108   :  { %3861 = vmatprep.subr.bf16.mxu0 %v6001_v27  ;;  %4320 = vmatprep.subr.bf16.mxu1 %v6004_v28  ;;  %v6096_v27 = vld [vmem:[%s8466_s1 + $0xa24] ss:$16 sps:$4 sm:$0xff]   ;;  %v6099_v28 = vld [vmem:[%s8466_s1 + $0xa2c] ss:$16 sps:$4 sm:$0xff]  }
 0x10a   :  { %3849 = vmatmul.mubr.bf16.gmra.mrb[4].mxu0 %v4857_v30  ;;  %4308 = vmatmul.mubr.bf16.gmra.mrb[4].mxu1 %v4857_v30  ;;  %v6094_v30 = vld [vmem:[%s8466_s1 + $0xa20] ss:$16 sps:$4 sm:$0xff]  }
 0x10b   :  { %3862 = vmatpush1.bf16.msra.mxu0 %v5999_v29  ;;  %4321 = vmatpush1.bf16.msra.mxu1 %v6002_v31  ;;  %v4860_v29 = vcombine.high %v39_v24, %v39_v24  ;;  %v6097_v31 = vld [vmem:[%s8466_s1 + $0xa28] ss:$16 sps:$4 sm:$0xff]  }
 0x10c   :  { %3863 = vmatprep.subr.bf16.mxu0 %v6007_v32  ;;  %4322 = vmatprep.subr.bf16.mxu1 %v6010_v33  ;;  %v6102_v32 = vld [vmem:[%s8466_s1 + $0xa44] ss:$16 sps:$4 sm:$0xff]   ;;  %v6105_v33 = vld [vmem:[%s8466_s1 + $0xa4c] ss:$16 sps:$4 sm:$0xff]  }
 0x10d   :  { %3889 = vmatprep.mubr.bf16.mxu0 %v6087_v34  ;;  %4348 = vmatprep.mubr.bf16.mxu1 %v6087_v34  ;;  %v6100_v34 = vld [vmem:[%s8466_s1 + $0xa40] ss:$16 sps:$4 sm:$0xff]  }
 0x10f   :  { %3864 = vmatpush1.bf16.msra.mxu0 %v6005_v35  ;;  %4323 = vmatpush1.bf16.msra.mxu1 %v6008_v36  ;;  %v4859_v35 = vcombine.low %v39_v24, %v39_v24  ;;  %v6103_v36 = vld [vmem:[%s8466_s1 + $0xa48] ss:$16 sps:$4 sm:$0xff]   ;;  %v6180_v24 = vld [vmem:[%s8466_s1 + $0xbe0] ss:$16 sps:$4 sm:$0xff]  }
 0x110   :  { %3865 = vmatprep.subr.bf16.mxu0 %v6013_v37  ;;  %4324 = vmatprep.subr.bf16.mxu1 %v6016_v38  ;;  %v6108_v37 = vld [vmem:[%s8466_s1 + $0xa64] ss:$16 sps:$4 sm:$0xff]   ;;  %v6111_v38 = vld [vmem:[%s8466_s1 + $0xa6c] ss:$16 sps:$4 sm:$0xff]  }
 0x113   :  { %3866 = vmatpush1.bf16.msra.mxu0 %v6011_v39  ;;  %4325 = vmatpush1.bf16.msra.mxu1 %v6014_v40  ;;  %v6188_v39 = vld [vmem:[%s8467_s0 + $0x2c] ss:$72 sps:$4 sm:$0xff]   ;;  %v6106_v40 = vld [vmem:[%s8466_s1 + $0xa60] ss:$16 sps:$4 sm:$0xff]  }
 0x114   :  { %3867 = vmatprep.subr.bf16.mxu0 %v6019_v41  ;;  %4326 = vmatprep.subr.bf16.mxu1 %v6022_v42  ;;  %v6109_v41 = vld [vmem:[%s8466_s1 + $0xa68] ss:$16 sps:$4 sm:$0xff]   ;;  %v6114_v42 = vld [vmem:[%s8466_s1 + $0xa84] ss:$16 sps:$4 sm:$0xff]  }
 0x117   :  { %3868 = vmatpush1.bf16.msra.mxu0 %v6017_v43  ;;  %4327 = vmatpush1.bf16.msra.mxu1 %v6020_v44  ;;  %v6117_v43 = vld [vmem:[%s8466_s1 + $0xa8c] ss:$16 sps:$4 sm:$0xff]   ;;  %v6112_v44 = vld [vmem:[%s8466_s1 + $0xa80] ss:$16 sps:$4 sm:$0xff]  }
 0x118   :  { %3869 = vmatprep.subr.bf16.mxu0 %v6025_v45  ;;  %4328 = vmatprep.subr.bf16.mxu1 %v6028_v46  ;;  %v6115_v45 = vld [vmem:[%s8466_s1 + $0xa88] ss:$16 sps:$4 sm:$0xff]   ;;  %v6120_v46 = vld [vmem:[%s8466_s1 + $0xaa4] ss:$16 sps:$4 sm:$0xff]  }
 0x11b   :  { %3870 = vmatpush1.bf16.msra.mxu0 %v6023_v47  ;;  %4329 = vmatpush1.bf16.msra.mxu1 %v6026_v48  ;;  %v6123_v47 = vld [vmem:[%s8466_s1 + $0xaac] ss:$16 sps:$4 sm:$0xff]   ;;  %v6118_v48 = vld [vmem:[%s8466_s1 + $0xaa0] ss:$16 sps:$4 sm:$0xff]  }
 0x11c   :  { %3871 = vmatprep.subr.bf16.mxu0 %v6031_v49  ;;  %4330 = vmatprep.subr.bf16.mxu1 %v6034_v50  ;;  %v6121_v49 = vld [vmem:[%s8466_s1 + $0xaa8] ss:$16 sps:$4 sm:$0xff]   ;;  %v6126_v50 = vld [vmem:[%s8466_s1 + $0xac4] ss:$16 sps:$4 sm:$0xff]  }
 0x11f   :  { %3872 = vmatpush1.bf16.msra.mxu0 %v6029_v51  ;;  %4331 = vmatpush1.bf16.msra.mxu1 %v6032_v52  ;;  %v6129_v51 = vld [vmem:[%s8466_s1 + $0xacc] ss:$16 sps:$4 sm:$0xff]   ;;  %v6124_v52 = vld [vmem:[%s8466_s1 + $0xac0] ss:$16 sps:$4 sm:$0xff]  }
 0x120   :  { %3873 = vmatprep.subr.bf16.mxu0 %v6037_v53  ;;  %4332 = vmatprep.subr.bf16.mxu1 %v6040_v54  ;;  %v6127_v53 = vld [vmem:[%s8466_s1 + $0xac8] ss:$16 sps:$4 sm:$0xff]   ;;  %v6132_v54 = vld [vmem:[%s8466_s1 + $0xae4] ss:$16 sps:$4 sm:$0xff]  }
 0x123   :  { %3874 = vmatpush1.bf16.msra.mxu0 %v6035_v55  ;;  %4333 = vmatpush1.bf16.msra.mxu1 %v6038_v56  ;;  %v6135_v55 = vld [vmem:[%s8466_s1 + $0xaec] ss:$16 sps:$4 sm:$0xff]   ;;  %v6130_v56 = vld [vmem:[%s8466_s1 + $0xae0] ss:$16 sps:$4 sm:$0xff]  }
 0x124   :  { %3875 = vmatprep.subr.bf16.mxu0 %v6043_v57  ;;  %4334 = vmatprep.subr.bf16.mxu1 %v6046_v58  ;;  %v6133_v57 = vld [vmem:[%s8466_s1 + $0xae8] ss:$16 sps:$4 sm:$0xff]   ;;  %v6138_v58 = vld [vmem:[%s8466_s1 + $0xb04] ss:$16 sps:$4 sm:$0xff]  }
 0x127   :  { %3876 = vmatpush1.bf16.msra.mxu0 %v6041_v59  ;;  %4335 = vmatpush1.bf16.msra.mxu1 %v6044_v60  ;;  %v6141_v59 = vld [vmem:[%s8466_s1 + $0xb0c] ss:$16 sps:$4 sm:$0xff]   ;;  %v6136_v60 = vld [vmem:[%s8466_s1 + $0xb00] ss:$16 sps:$4 sm:$0xff]  }
 0x128   :  { %3877 = vmatprep.subr.bf16.mxu0 %v6049_v61  ;;  %4336 = vmatprep.subr.bf16.mxu1 %v6052_v62  ;;  %v6139_v61 = vld [vmem:[%s8466_s1 + $0xb08] ss:$16 sps:$4 sm:$0xff]   ;;  %v6144_v62 = vld [vmem:[%s8466_s1 + $0xb24] ss:$16 sps:$4 sm:$0xff]  }
 0x12b   :  { %3878 = vmatpush1.bf16.msra.mxu0 %v6047_v63  ;;  %4337 = vmatpush1.bf16.msra.mxu1 %v6050_v0  ;;  %v6147_v63 = vld [vmem:[%s8466_s1 + $0xb2c] ss:$16 sps:$4 sm:$0xff]   ;;  %v6142_v0 = vld [vmem:[%s8466_s1 + $0xb20] ss:$16 sps:$4 sm:$0xff]  }
 0x12c   :  { %3879 = vmatprep.subr.bf16.mxu0 %v6055_v1  ;;  %4338 = vmatprep.subr.bf16.mxu1 %v6058_v2  ;;  %v6145_v1 = vld [vmem:[%s8466_s1 + $0xb28] ss:$16 sps:$4 sm:$0xff]   ;;  %v6150_v2 = vld [vmem:[%s8466_s1 + $0xb44] ss:$16 sps:$4 sm:$0xff]  }
 0x12f   :  { %3880 = vmatpush1.bf16.msra.mxu0 %v6053_v3  ;;  %4339 = vmatpush1.bf16.msra.mxu1 %v6056_v4  ;;  %v6153_v3 = vld [vmem:[%s8466_s1 + $0xb4c] ss:$16 sps:$4 sm:$0xff]   ;;  %v6148_v4 = vld [vmem:[%s8466_s1 + $0xb40] ss:$16 sps:$4 sm:$0xff]  }
 0x130   :  { %3881 = vmatprep.subr.bf16.mxu0 %v6061_v5  ;;  %4340 = vmatprep.subr.bf16.mxu1 %v6064_v6  ;;  %v6151_v5 = vld [vmem:[%s8466_s1 + $0xb48] ss:$16 sps:$4 sm:$0xff]   ;;  %v6156_v6 = vld [vmem:[%s8466_s1 + $0xb64] ss:$16 sps:$4 sm:$0xff]  }
 0x133   :  { %3882 = vmatpush1.bf16.msra.mxu0 %v6059_v7  ;;  %4341 = vmatpush1.bf16.msra.mxu1 %v6062_v8  ;;  %v6159_v7 = vld [vmem:[%s8466_s1 + $0xb6c] ss:$16 sps:$4 sm:$0xff]   ;;  %v6154_v8 = vld [vmem:[%s8466_s1 + $0xb60] ss:$16 sps:$4 sm:$0xff]  }
 0x134   :  { %3883 = vmatprep.subr.bf16.mxu0 %v6067_v9  ;;  %4342 = vmatprep.subr.bf16.mxu1 %v6070_v10  ;;  %v6157_v9 = vld [vmem:[%s8466_s1 + $0xb68] ss:$16 sps:$4 sm:$0xff]   ;;  %v6162_v10 = vld [vmem:[%s8466_s1 + $0xb84] ss:$16 sps:$4 sm:$0xff]  }
 0x137   :  { %3884 = vmatpush1.bf16.msra.mxu0 %v6065_v11  ;;  %4343 = vmatpush1.bf16.msra.mxu1 %v6068_v12  ;;  %v6165_v11 = vld [vmem:[%s8466_s1 + $0xb8c] ss:$16 sps:$4 sm:$0xff]   ;;  %v6160_v12 = vld [vmem:[%s8466_s1 + $0xb80] ss:$16 sps:$4 sm:$0xff]  }
 0x138   :  { %3885 = vmatprep.subr.bf16.mxu0 %v6074_v13  ;;  %4344 = vmatprep.subr.bf16.mxu1 %v6077_v14  ;;  %v6163_v13 = vld [vmem:[%s8466_s1 + $0xb88] ss:$16 sps:$4 sm:$0xff]   ;;  %v6168_v14 = vld [vmem:[%s8466_s1 + $0xba4] ss:$16 sps:$4 sm:$0xff]  }
 0x13b   :  { %3886 = vmatpush1.bf16.msra.mxu0 %v6072_v15  ;;  %4345 = vmatpush1.bf16.msra.mxu1 %v6075_v16  ;;  %v6171_v15 = vld [vmem:[%s8466_s1 + $0xbac] ss:$16 sps:$4 sm:$0xff]   ;;  %v6166_v16 = vld [vmem:[%s8466_s1 + $0xba0] ss:$16 sps:$4 sm:$0xff]  }
 0x13c   :  { %3887 = vmatprep.subr.bf16.mxu0 %v6081_v17  ;;  %4346 = vmatprep.subr.bf16.mxu1 %v6084_v18  ;;  %v6169_v17 = vld [vmem:[%s8466_s1 + $0xba8] ss:$16 sps:$4 sm:$0xff]   ;;  %v6175_v18 = vld [vmem:[%s8466_s1 + $0xbc4] ss:$16 sps:$4 sm:$0xff]  }
 0x13f   :  { %3888 = vmatpush1.bf16.msra.mxu0 %v6079_v19  ;;  %4347 = vmatpush1.bf16.msra.mxu1 %v6082_v20  ;;  %v6178_v19 = vld [vmem:[%s8466_s1 + $0xbcc] ss:$16 sps:$4 sm:$0xff]   ;;  %v6173_v20 = vld [vmem:[%s8466_s1 + $0xbc0] ss:$16 sps:$4 sm:$0xff]  }
 0x140   :  { %3908 = vmatprep.subr.bf16.mxu0 %v6090_v21  ;;  %4367 = vmatprep.subr.bf16.mxu1 %v6093_v23  ;;  %v6176_v21 = vld [vmem:[%s8466_s1 + $0xbc8] ss:$16 sps:$4 sm:$0xff]   ;;  %v6185_v23 = vld [vmem:[%s8466_s1 + $0xbec] ss:$16 sps:$4 sm:$0xff]  }
 0x142   :  { %3890 = vmatmul.mubr.bf16.vlgmr.msra.gmra.mrb[0].mxu0 %v6085_v22  ;;  %4349 = vmatmul.mubr.bf16.vlgmr.msra.gmra.mrb[0].mxu1 %v6085_v22  ;;  %v6182_v22 = vld [vmem:[%s8466_s1 + $0xbe4] ss:$16 sps:$4 sm:$0xff]  }
 0x143   :  { %3909 = vmatpush1.bf16.msra.mxu0 %v6088_v25  ;;  %4368 = vmatpush1.bf16.msra.mxu1 %v6091_v26  ;;  %v6183_v25 = vld [vmem:[%s8466_s1 + $0xbe8] ss:$16 sps:$4 sm:$0xff]   ;;  %v6191_v26 = vld [vmem:[%s8466_s1 + $0xc04] ss:$16 sps:$4 sm:$0xff]  }
 0x144   :  { %3910 = vmatprep.subr.bf16.mxu0 %v6096_v27  ;;  %4369 = vmatprep.subr.bf16.mxu1 %v6099_v28  ;;  %v6194_v27 = vld [vmem:[%s8466_s1 + $0xc0c] ss:$16 sps:$4 sm:$0xff]   ;;  %v6186_v28 = vld [vmem:[%s8467_s0 + $0x28] ss:$72 sps:$4 sm:$0xff]  }
 0x145   :  { %3899 = vmatprep.mubr.bf16.mxu0 %v4860_v29  ;;  %4358 = vmatprep.mubr.bf16.mxu1 %v4860_v29  ;;  %v40_v29 = vld [vmem:[%s8467_s0 + $0xb8] sm:$0xff] }
 0x147   :  { %3911 = vmatpush1.bf16.msra.mxu0 %v6094_v30  ;;  %4370 = vmatpush1.bf16.msra.mxu1 %v6097_v31  ;;  %v6189_v30 = vld [vmem:[%s8466_s1 + $0xc00] ss:$16 sps:$4 sm:$0xff]   ;;  %v6192_v31 = vld [vmem:[%s8466_s1 + $0xc08] ss:$16 sps:$4 sm:$0xff]  }
 0x148   :  { %3912 = vmatprep.subr.bf16.mxu0 %v6102_v32  ;;  %4371 = vmatprep.subr.bf16.mxu1 %v6105_v33  ;;  %v6197_v32 = vld [vmem:[%s8466_s1 + $0xc24] ss:$16 sps:$4 sm:$0xff]   ;;  %v6200_v33 = vld [vmem:[%s8466_s1 + $0xc2c] ss:$16 sps:$4 sm:$0xff]  }
 0x14a   :  { %3900 = vmatmul.mubr.bf16.gmra.mrb[4].mxu0 %v4859_v35  ;;  %4359 = vmatmul.mubr.bf16.gmra.mrb[4].mxu1 %v4859_v35  ;;  %v6195_v35 = vld [vmem:[%s8466_s1 + $0xc20] ss:$16 sps:$4 sm:$0xff]  }
 0x14b   :  { %3913 = vmatpush1.bf16.msra.mxu0 %v6100_v34  ;;  %4372 = vmatpush1.bf16.msra.mxu1 %v6103_v36  ;;  %v4862_v34 = vcombine.high %v40_v29, %v40_v29  ;;  %v6198_v36 = vld [vmem:[%s8466_s1 + $0xc28] ss:$16 sps:$4 sm:$0xff]  }
 0x14c   :  { %3914 = vmatprep.subr.bf16.mxu0 %v6108_v37  ;;  %4373 = vmatprep.subr.bf16.mxu1 %v6111_v38  ;;  %v6203_v37 = vld [vmem:[%s8466_s1 + $0xc44] ss:$16 sps:$4 sm:$0xff]   ;;  %v6206_v38 = vld [vmem:[%s8466_s1 + $0xc4c] ss:$16 sps:$4 sm:$0xff]  }
 0x14d   :  { %3940 = vmatprep.mubr.bf16.mxu0 %v6188_v39  ;;  %4399 = vmatprep.mubr.bf16.mxu1 %v6188_v39  ;;  %v4861_v39 = vcombine.low %v40_v29, %v40_v29  ;;  %v6281_v29 = vld [vmem:[%s8466_s1 + $0xde0] ss:$16 sps:$4 sm:$0xff]  }
 0x14f   :  { %3915 = vmatpush1.bf16.msra.mxu0 %v6106_v40  ;;  %4374 = vmatpush1.bf16.msra.mxu1 %v6109_v41  ;;  %v6201_v40 = vld [vmem:[%s8466_s1 + $0xc40] ss:$16 sps:$4 sm:$0xff]   ;;  %v6204_v41 = vld [vmem:[%s8466_s1 + $0xc48] ss:$16 sps:$4 sm:$0xff]  }
 0x150   :  { %3916 = vmatprep.subr.bf16.mxu0 %v6114_v42  ;;  %4375 = vmatprep.subr.bf16.mxu1 %v6117_v43  ;;  %v6209_v42 = vld [vmem:[%s8466_s1 + $0xc64] ss:$16 sps:$4 sm:$0xff]   ;;  %v6212_v43 = vld [vmem:[%s8466_s1 + $0xc6c] ss:$16 sps:$4 sm:$0xff]  }
 0x153   :  { %3917 = vmatpush1.bf16.msra.mxu0 %v6112_v44  ;;  %4376 = vmatpush1.bf16.msra.mxu1 %v6115_v45  ;;  %v6289_v44 = vld [vmem:[%s8467_s0 + $0x34] ss:$72 sps:$4 sm:$0xff]   ;;  %v6207_v45 = vld [vmem:[%s8466_s1 + $0xc60] ss:$16 sps:$4 sm:$0xff]  }
 0x154   :  { %3918 = vmatprep.subr.bf16.mxu0 %v6120_v46  ;;  %4377 = vmatprep.subr.bf16.mxu1 %v6123_v47  ;;  %v6210_v46 = vld [vmem:[%s8466_s1 + $0xc68] ss:$16 sps:$4 sm:$0xff]   ;;  %v6215_v47 = vld [vmem:[%s8466_s1 + $0xc84] ss:$16 sps:$4 sm:$0xff]  }
 0x157   :  { %3919 = vmatpush1.bf16.msra.mxu0 %v6118_v48  ;;  %4378 = vmatpush1.bf16.msra.mxu1 %v6121_v49  ;;  %v6218_v48 = vld [vmem:[%s8466_s1 + $0xc8c] ss:$16 sps:$4 sm:$0xff]   ;;  %v6213_v49 = vld [vmem:[%s8466_s1 + $0xc80] ss:$16 sps:$4 sm:$0xff]  }
 0x158   :  { %3920 = vmatprep.subr.bf16.mxu0 %v6126_v50  ;;  %4379 = vmatprep.subr.bf16.mxu1 %v6129_v51  ;;  %v6216_v50 = vld [vmem:[%s8466_s1 + $0xc88] ss:$16 sps:$4 sm:$0xff]   ;;  %v6221_v51 = vld [vmem:[%s8466_s1 + $0xca4] ss:$16 sps:$4 sm:$0xff]  }
 0x15b   :  { %3921 = vmatpush1.bf16.msra.mxu0 %v6124_v52  ;;  %4380 = vmatpush1.bf16.msra.mxu1 %v6127_v53  ;;  %v6224_v52 = vld [vmem:[%s8466_s1 + $0xcac] ss:$16 sps:$4 sm:$0xff]   ;;  %v6219_v53 = vld [vmem:[%s8466_s1 + $0xca0] ss:$16 sps:$4 sm:$0xff]  }
 0x15c   :  { %3922 = vmatprep.subr.bf16.mxu0 %v6132_v54  ;;  %4381 = vmatprep.subr.bf16.mxu1 %v6135_v55  ;;  %v6222_v54 = vld [vmem:[%s8466_s1 + $0xca8] ss:$16 sps:$4 sm:$0xff]   ;;  %v6227_v55 = vld [vmem:[%s8466_s1 + $0xcc4] ss:$16 sps:$4 sm:$0xff]  }
 0x15f   :  { %3923 = vmatpush1.bf16.msra.mxu0 %v6130_v56  ;;  %4382 = vmatpush1.bf16.msra.mxu1 %v6133_v57  ;;  %v6230_v56 = vld [vmem:[%s8466_s1 + $0xccc] ss:$16 sps:$4 sm:$0xff]   ;;  %v6225_v57 = vld [vmem:[%s8466_s1 + $0xcc0] ss:$16 sps:$4 sm:$0xff]  }
 0x160   :  { %3924 = vmatprep.subr.bf16.mxu0 %v6138_v58  ;;  %4383 = vmatprep.subr.bf16.mxu1 %v6141_v59  ;;  %v6228_v58 = vld [vmem:[%s8466_s1 + $0xcc8] ss:$16 sps:$4 sm:$0xff]   ;;  %v6233_v59 = vld [vmem:[%s8466_s1 + $0xce4] ss:$16 sps:$4 sm:$0xff]  }
 0x163   :  { %3925 = vmatpush1.bf16.msra.mxu0 %v6136_v60  ;;  %4384 = vmatpush1.bf16.msra.mxu1 %v6139_v61  ;;  %v6236_v60 = vld [vmem:[%s8466_s1 + $0xcec] ss:$16 sps:$4 sm:$0xff]   ;;  %v6231_v61 = vld [vmem:[%s8466_s1 + $0xce0] ss:$16 sps:$4 sm:$0xff]  }
 0x164   :  { %3926 = vmatprep.subr.bf16.mxu0 %v6144_v62  ;;  %4385 = vmatprep.subr.bf16.mxu1 %v6147_v63  ;;  %v6234_v62 = vld [vmem:[%s8466_s1 + $0xce8] ss:$16 sps:$4 sm:$0xff]   ;;  %v6239_v63 = vld [vmem:[%s8466_s1 + $0xd04] ss:$16 sps:$4 sm:$0xff]  }
 0x167   :  { %3927 = vmatpush1.bf16.msra.mxu0 %v6142_v0  ;;  %4386 = vmatpush1.bf16.msra.mxu1 %v6145_v1  ;;  %v6242_v0 = vld [vmem:[%s8466_s1 + $0xd0c] ss:$16 sps:$4 sm:$0xff]   ;;  %v6237_v1 = vld [vmem:[%s8466_s1 + $0xd00] ss:$16 sps:$4 sm:$0xff]  }
 0x168   :  { %3928 = vmatprep.subr.bf16.mxu0 %v6150_v2  ;;  %4387 = vmatprep.subr.bf16.mxu1 %v6153_v3  ;;  %v6240_v2 = vld [vmem:[%s8466_s1 + $0xd08] ss:$16 sps:$4 sm:$0xff]   ;;  %v6245_v3 = vld [vmem:[%s8466_s1 + $0xd24] ss:$16 sps:$4 sm:$0xff]  }
 0x16b   :  { %3929 = vmatpush1.bf16.msra.mxu0 %v6148_v4  ;;  %4388 = vmatpush1.bf16.msra.mxu1 %v6151_v5  ;;  %v6248_v4 = vld [vmem:[%s8466_s1 + $0xd2c] ss:$16 sps:$4 sm:$0xff]   ;;  %v6243_v5 = vld [vmem:[%s8466_s1 + $0xd20] ss:$16 sps:$4 sm:$0xff]  }
 0x16c   :  { %3930 = vmatprep.subr.bf16.mxu0 %v6156_v6  ;;  %4389 = vmatprep.subr.bf16.mxu1 %v6159_v7  ;;  %v6246_v6 = vld [vmem:[%s8466_s1 + $0xd28] ss:$16 sps:$4 sm:$0xff]   ;;  %v6251_v7 = vld [vmem:[%s8466_s1 + $0xd44] ss:$16 sps:$4 sm:$0xff]  }
 0x16f   :  { %3931 = vmatpush1.bf16.msra.mxu0 %v6154_v8  ;;  %4390 = vmatpush1.bf16.msra.mxu1 %v6157_v9  ;;  %v6254_v8 = vld [vmem:[%s8466_s1 + $0xd4c] ss:$16 sps:$4 sm:$0xff]   ;;  %v6249_v9 = vld [vmem:[%s8466_s1 + $0xd40] ss:$16 sps:$4 sm:$0xff]  }
 0x170   :  { %3932 = vmatprep.subr.bf16.mxu0 %v6162_v10  ;;  %4391 = vmatprep.subr.bf16.mxu1 %v6165_v11  ;;  %v6252_v10 = vld [vmem:[%s8466_s1 + $0xd48] ss:$16 sps:$4 sm:$0xff]   ;;  %v6257_v11 = vld [vmem:[%s8466_s1 + $0xd64] ss:$16 sps:$4 sm:$0xff]  }
 0x173   :  { %3933 = vmatpush1.bf16.msra.mxu0 %v6160_v12  ;;  %4392 = vmatpush1.bf16.msra.mxu1 %v6163_v13  ;;  %v6260_v12 = vld [vmem:[%s8466_s1 + $0xd6c] ss:$16 sps:$4 sm:$0xff]   ;;  %v6255_v13 = vld [vmem:[%s8466_s1 + $0xd60] ss:$16 sps:$4 sm:$0xff]  }
 0x174   :  { %3934 = vmatprep.subr.bf16.mxu0 %v6168_v14  ;;  %4393 = vmatprep.subr.bf16.mxu1 %v6171_v15  ;;  %v6258_v14 = vld [vmem:[%s8466_s1 + $0xd68] ss:$16 sps:$4 sm:$0xff]   ;;  %v6263_v15 = vld [vmem:[%s8466_s1 + $0xd84] ss:$16 sps:$4 sm:$0xff]  }
 0x177   :  { %3935 = vmatpush1.bf16.msra.mxu0 %v6166_v16  ;;  %4394 = vmatpush1.bf16.msra.mxu1 %v6169_v17  ;;  %v6266_v16 = vld [vmem:[%s8466_s1 + $0xd8c] ss:$16 sps:$4 sm:$0xff]   ;;  %v6261_v17 = vld [vmem:[%s8466_s1 + $0xd80] ss:$16 sps:$4 sm:$0xff]  }
 0x178   :  { %3936 = vmatprep.subr.bf16.mxu0 %v6175_v18  ;;  %4395 = vmatprep.subr.bf16.mxu1 %v6178_v19  ;;  %v6264_v18 = vld [vmem:[%s8466_s1 + $0xd88] ss:$16 sps:$4 sm:$0xff]   ;;  %v6269_v19 = vld [vmem:[%s8466_s1 + $0xda4] ss:$16 sps:$4 sm:$0xff]  }
 0x17b   :  { %3937 = vmatpush1.bf16.msra.mxu0 %v6173_v20  ;;  %4396 = vmatpush1.bf16.msra.mxu1 %v6176_v21  ;;  %v6272_v20 = vld [vmem:[%s8466_s1 + $0xdac] ss:$16 sps:$4 sm:$0xff]   ;;  %v6267_v21 = vld [vmem:[%s8466_s1 + $0xda0] ss:$16 sps:$4 sm:$0xff]  }
 0x17c   :  { %3938 = vmatprep.subr.bf16.mxu0 %v6182_v22  ;;  %4397 = vmatprep.subr.bf16.mxu1 %v6185_v23  ;;  %v6270_v22 = vld [vmem:[%s8466_s1 + $0xda8] ss:$16 sps:$4 sm:$0xff]   ;;  %v6276_v23 = vld [vmem:[%s8466_s1 + $0xdc4] ss:$16 sps:$4 sm:$0xff]  }
 0x17f   :  { %3939 = vmatpush1.bf16.msra.mxu0 %v6180_v24  ;;  %4398 = vmatpush1.bf16.msra.mxu1 %v6183_v25  ;;  %v6279_v24 = vld [vmem:[%s8466_s1 + $0xdcc] ss:$16 sps:$4 sm:$0xff]   ;;  %v6274_v25 = vld [vmem:[%s8466_s1 + $0xdc0] ss:$16 sps:$4 sm:$0xff]  }
 0x180   :  { %3959 = vmatprep.subr.bf16.mxu0 %v6191_v26  ;;  %4418 = vmatprep.subr.bf16.mxu1 %v6194_v27  ;;  %v6277_v26 = vld [vmem:[%s8466_s1 + $0xdc8] ss:$16 sps:$4 sm:$0xff]   ;;  %v6283_v27 = vld [vmem:[%s8466_s1 + $0xde4] ss:$16 sps:$4 sm:$0xff]  }
 0x182   :  { %3941 = vmatmul.mubr.bf16.vlgmr.msra.gmra.mrb[0].mxu0 %v6186_v28  ;;  %4400 = vmatmul.mubr.bf16.vlgmr.msra.gmra.mrb[0].mxu1 %v6186_v28  ;;  %v6286_v28 = vld [vmem:[%s8466_s1 + $0xdec] ss:$16 sps:$4 sm:$0xff]  }
 0x183   :  { %3960 = vmatpush1.bf16.msra.mxu0 %v6189_v30  ;;  %4419 = vmatpush1.bf16.msra.mxu1 %v6192_v31  ;;  %v6284_v30 = vld [vmem:[%s8466_s1 + $0xde8] ss:$16 sps:$4 sm:$0xff]   ;;  %v6292_v31 = vld [vmem:[%s8466_s1 + $0xe04] ss:$16 sps:$4 sm:$0xff]  }
 0x184   :  { %3961 = vmatprep.subr.bf16.mxu0 %v6197_v32  ;;  %4420 = vmatprep.subr.bf16.mxu1 %v6200_v33  ;;  %v6295_v32 = vld [vmem:[%s8466_s1 + $0xe0c] ss:$16 sps:$4 sm:$0xff]   ;;  %v6287_v33 = vld [vmem:[%s8467_s0 + $0x30] ss:$72 sps:$4 sm:$0xff]  }
 0x185   :  { %3950 = vmatprep.mubr.bf16.mxu0 %v4862_v34  ;;  %4409 = vmatprep.mubr.bf16.mxu1 %v4862_v34  ;;  %v41_v34 = vld [vmem:[%s8467_s0 + $0xc0] sm:$0xff] }
 0x187   :  { %3962 = vmatpush1.bf16.msra.mxu0 %v6195_v35  ;;  %4421 = vmatpush1.bf16.msra.mxu1 %v6198_v36  ;;  %v6290_v35 = vld [vmem:[%s8466_s1 + $0xe00] ss:$16 sps:$4 sm:$0xff]   ;;  %v6293_v36 = vld [vmem:[%s8466_s1 + $0xe08] ss:$16 sps:$4 sm:$0xff]  }
 0x188   :  { %3963 = vmatprep.subr.bf16.mxu0 %v6203_v37  ;;  %4422 = vmatprep.subr.bf16.mxu1 %v6206_v38  ;;  %v6298_v37 = vld [vmem:[%s8466_s1 + $0xe24] ss:$16 sps:$4 sm:$0xff]   ;;  %v6301_v38 = vld [vmem:[%s8466_s1 + $0xe2c] ss:$16 sps:$4 sm:$0xff]  }
 0x18a   :  { %3951 = vmatmul.mubr.bf16.gmra.mrb[4].mxu0 %v4861_v39  ;;  %4410 = vmatmul.mubr.bf16.gmra.mrb[4].mxu1 %v4861_v39  ;;  %v4864_v39 = vcombine.high %v41_v34, %v41_v34 }
 0x18b   :  { %3964 = vmatpush1.bf16.msra.mxu0 %v6201_v40  ;;  %4423 = vmatpush1.bf16.msra.mxu1 %v6204_v41  ;;  %v6296_v40 = vld [vmem:[%s8466_s1 + $0xe20] ss:$16 sps:$4 sm:$0xff]   ;;  %v6299_v41 = vld [vmem:[%s8466_s1 + $0xe28] ss:$16 sps:$4 sm:$0xff]  }
 0x18c   :  { %3965 = vmatprep.subr.bf16.mxu0 %v6209_v42  ;;  %4424 = vmatprep.subr.bf16.mxu1 %v6212_v43  ;;  %v6304_v42 = vld [vmem:[%s8466_s1 + $0xe44] ss:$16 sps:$4 sm:$0xff]   ;;  %v6307_v43 = vld [vmem:[%s8466_s1 + $0xe4c] ss:$16 sps:$4 sm:$0xff]  }
 0x18d   :  { %3991 = vmatprep.mubr.bf16.mxu0 %v6289_v44  ;;  %4450 = vmatprep.mubr.bf16.mxu1 %v6289_v44  ;;  %v4863_v44 = vcombine.low %v41_v34, %v41_v34  ;;  %v6382_v34 = vld [vmem:[%s8466_s1 + $0xfe0] ss:$16 sps:$4 sm:$0xff]  }
 0x18f   :  { %3966 = vmatpush1.bf16.msra.mxu0 %v6207_v45  ;;  %4425 = vmatpush1.bf16.msra.mxu1 %v6210_v46  ;;  %v6302_v45 = vld [vmem:[%s8466_s1 + $0xe40] ss:$16 sps:$4 sm:$0xff]   ;;  %v6305_v46 = vld [vmem:[%s8466_s1 + $0xe48] ss:$16 sps:$4 sm:$0xff]  }
 0x190   :  { %3967 = vmatprep.subr.bf16.mxu0 %v6215_v47  ;;  %4426 = vmatprep.subr.bf16.mxu1 %v6218_v48  ;;  %v6310_v47 = vld [vmem:[%s8466_s1 + $0xe64] ss:$16 sps:$4 sm:$0xff]   ;;  %v6313_v48 = vld [vmem:[%s8466_s1 + $0xe6c] ss:$16 sps:$4 sm:$0xff]  }
 0x193   :  { %3968 = vmatpush1.bf16.msra.mxu0 %v6213_v49  ;;  %4427 = vmatpush1.bf16.msra.mxu1 %v6216_v50  ;;  %v6390_v49 = vld [vmem:[%s8467_s0 + $0x3c] ss:$72 sps:$4 sm:$0xff]   ;;  %v6308_v50 = vld [vmem:[%s8466_s1 + $0xe60] ss:$16 sps:$4 sm:$0xff]  }
 0x194   :  { %3969 = vmatprep.subr.bf16.mxu0 %v6221_v51  ;;  %4428 = vmatprep.subr.bf16.mxu1 %v6224_v52  ;;  %v6311_v51 = vld [vmem:[%s8466_s1 + $0xe68] ss:$16 sps:$4 sm:$0xff]   ;;  %v6316_v52 = vld [vmem:[%s8466_s1 + $0xe84] ss:$16 sps:$4 sm:$0xff]  }
 0x197   :  { %3970 = vmatpush1.bf16.msra.mxu0 %v6219_v53  ;;  %4429 = vmatpush1.bf16.msra.mxu1 %v6222_v54  ;;  %v6319_v53 = vld [vmem:[%s8466_s1 + $0xe8c] ss:$16 sps:$4 sm:$0xff]   ;;  %v6314_v54 = vld [vmem:[%s8466_s1 + $0xe80] ss:$16 sps:$4 sm:$0xff]  }
 0x198   :  { %3971 = vmatprep.subr.bf16.mxu0 %v6227_v55  ;;  %4430 = vmatprep.subr.bf16.mxu1 %v6230_v56  ;;  %v6317_v55 = vld [vmem:[%s8466_s1 + $0xe88] ss:$16 sps:$4 sm:$0xff]   ;;  %v6322_v56 = vld [vmem:[%s8466_s1 + $0xea4] ss:$16 sps:$4 sm:$0xff]  }
 0x19b   :  { %3972 = vmatpush1.bf16.msra.mxu0 %v6225_v57  ;;  %4431 = vmatpush1.bf16.msra.mxu1 %v6228_v58  ;;  %v6325_v57 = vld [vmem:[%s8466_s1 + $0xeac] ss:$16 sps:$4 sm:$0xff]   ;;  %v6320_v58 = vld [vmem:[%s8466_s1 + $0xea0] ss:$16 sps:$4 sm:$0xff]  }
 0x19c   :  { %3973 = vmatprep.subr.bf16.mxu0 %v6233_v59  ;;  %4432 = vmatprep.subr.bf16.mxu1 %v6236_v60  ;;  %v6323_v59 = vld [vmem:[%s8466_s1 + $0xea8] ss:$16 sps:$4 sm:$0xff]   ;;  %v6328_v60 = vld [vmem:[%s8466_s1 + $0xec4] ss:$16 sps:$4 sm:$0xff]  }
 0x19f   :  { %3974 = vmatpush1.bf16.msra.mxu0 %v6231_v61  ;;  %4433 = vmatpush1.bf16.msra.mxu1 %v6234_v62  ;;  %v6331_v61 = vld [vmem:[%s8466_s1 + $0xecc] ss:$16 sps:$4 sm:$0xff]   ;;  %v6326_v62 = vld [vmem:[%s8466_s1 + $0xec0] ss:$16 sps:$4 sm:$0xff]  }
 0x1a0   :  { %3975 = vmatprep.subr.bf16.mxu0 %v6239_v63  ;;  %4434 = vmatprep.subr.bf16.mxu1 %v6242_v0  ;;  %v6329_v63 = vld [vmem:[%s8466_s1 + $0xec8] ss:$16 sps:$4 sm:$0xff]   ;;  %v6334_v0 = vld [vmem:[%s8466_s1 + $0xee4] ss:$16 sps:$4 sm:$0xff]  }
 0x1a3   :  { %3976 = vmatpush1.bf16.msra.mxu0 %v6237_v1  ;;  %4435 = vmatpush1.bf16.msra.mxu1 %v6240_v2  ;;  %v6337_v1 = vld [vmem:[%s8466_s1 + $0xeec] ss:$16 sps:$4 sm:$0xff]   ;;  %v6332_v2 = vld [vmem:[%s8466_s1 + $0xee0] ss:$16 sps:$4 sm:$0xff]  }
 0x1a4   :  { %3977 = vmatprep.subr.bf16.mxu0 %v6245_v3  ;;  %4436 = vmatprep.subr.bf16.mxu1 %v6248_v4  ;;  %v6335_v3 = vld [vmem:[%s8466_s1 + $0xee8] ss:$16 sps:$4 sm:$0xff]   ;;  %v6340_v4 = vld [vmem:[%s8466_s1 + $0xf04] ss:$16 sps:$4 sm:$0xff]  }
 0x1a7   :  { %3978 = vmatpush1.bf16.msra.mxu0 %v6243_v5  ;;  %4437 = vmatpush1.bf16.msra.mxu1 %v6246_v6  ;;  %v6343_v5 = vld [vmem:[%s8466_s1 + $0xf0c] ss:$16 sps:$4 sm:$0xff]   ;;  %v6338_v6 = vld [vmem:[%s8466_s1 + $0xf00] ss:$16 sps:$4 sm:$0xff]  }
 0x1a8   :  { %3979 = vmatprep.subr.bf16.mxu0 %v6251_v7  ;;  %4438 = vmatprep.subr.bf16.mxu1 %v6254_v8  ;;  %v6341_v7 = vld [vmem:[%s8466_s1 + $0xf08] ss:$16 sps:$4 sm:$0xff]   ;;  %v6346_v8 = vld [vmem:[%s8466_s1 + $0xf24] ss:$16 sps:$4 sm:$0xff]  }
 0x1ab   :  { %3980 = vmatpush1.bf16.msra.mxu0 %v6249_v9  ;;  %4439 = vmatpush1.bf16.msra.mxu1 %v6252_v10  ;;  %v6349_v9 = vld [vmem:[%s8466_s1 + $0xf2c] ss:$16 sps:$4 sm:$0xff]   ;;  %v6344_v10 = vld [vmem:[%s8466_s1 + $0xf20] ss:$16 sps:$4 sm:$0xff]  }
 0x1ac   :  { %3981 = vmatprep.subr.bf16.mxu0 %v6257_v11  ;;  %4440 = vmatprep.subr.bf16.mxu1 %v6260_v12  ;;  %v6347_v11 = vld [vmem:[%s8466_s1 + $0xf28] ss:$16 sps:$4 sm:$0xff]   ;;  %v6352_v12 = vld [vmem:[%s8466_s1 + $0xf44] ss:$16 sps:$4 sm:$0xff]  }
 0x1af   :  { %3982 = vmatpush1.bf16.msra.mxu0 %v6255_v13  ;;  %4441 = vmatpush1.bf16.msra.mxu1 %v6258_v14  ;;  %v6355_v13 = vld [vmem:[%s8466_s1 + $0xf4c] ss:$16 sps:$4 sm:$0xff]   ;;  %v6350_v14 = vld [vmem:[%s8466_s1 + $0xf40] ss:$16 sps:$4 sm:$0xff]  }
 0x1b0   :  { %3983 = vmatprep.subr.bf16.mxu0 %v6263_v15  ;;  %4442 = vmatprep.subr.bf16.mxu1 %v6266_v16  ;;  %v6353_v15 = vld [vmem:[%s8466_s1 + $0xf48] ss:$16 sps:$4 sm:$0xff]   ;;  %v6358_v16 = vld [vmem:[%s8466_s1 + $0xf64] ss:$16 sps:$4 sm:$0xff]  }
 0x1b3   :  { %3984 = vmatpush1.bf16.msra.mxu0 %v6261_v17  ;;  %4443 = vmatpush1.bf16.msra.mxu1 %v6264_v18  ;;  %v6361_v17 = vld [vmem:[%s8466_s1 + $0xf6c] ss:$16 sps:$4 sm:$0xff]   ;;  %v6356_v18 = vld [vmem:[%s8466_s1 + $0xf60] ss:$16 sps:$4 sm:$0xff]  }
 0x1b4   :  { %3985 = vmatprep.subr.bf16.mxu0 %v6269_v19  ;;  %4444 = vmatprep.subr.bf16.mxu1 %v6272_v20  ;;  %v6359_v19 = vld [vmem:[%s8466_s1 + $0xf68] ss:$16 sps:$4 sm:$0xff]   ;;  %v6364_v20 = vld [vmem:[%s8466_s1 + $0xf84] ss:$16 sps:$4 sm:$0xff]  }
 0x1b7   :  { %3986 = vmatpush1.bf16.msra.mxu0 %v6267_v21  ;;  %4445 = vmatpush1.bf16.msra.mxu1 %v6270_v22  ;;  %v6367_v21 = vld [vmem:[%s8466_s1 + $0xf8c] ss:$16 sps:$4 sm:$0xff]   ;;  %v6362_v22 = vld [vmem:[%s8466_s1 + $0xf80] ss:$16 sps:$4 sm:$0xff]  }
 0x1b8   :  { %3987 = vmatprep.subr.bf16.mxu0 %v6276_v23  ;;  %4446 = vmatprep.subr.bf16.mxu1 %v6279_v24  ;;  %v6365_v23 = vld [vmem:[%s8466_s1 + $0xf88] ss:$16 sps:$4 sm:$0xff]   ;;  %v6370_v24 = vld [vmem:[%s8466_s1 + $0xfa4] ss:$16 sps:$4 sm:$0xff]  }
 0x1bb   :  { %3988 = vmatpush1.bf16.msra.mxu0 %v6274_v25  ;;  %4447 = vmatpush1.bf16.msra.mxu1 %v6277_v26  ;;  %v6373_v25 = vld [vmem:[%s8466_s1 + $0xfac] ss:$16 sps:$4 sm:$0xff]   ;;  %v6368_v26 = vld [vmem:[%s8466_s1 + $0xfa0] ss:$16 sps:$4 sm:$0xff]  }
 0x1bc   :  { %3989 = vmatprep.subr.bf16.mxu0 %v6283_v27  ;;  %4448 = vmatprep.subr.bf16.mxu1 %v6286_v28  ;;  %v6371_v27 = vld [vmem:[%s8466_s1 + $0xfa8] ss:$16 sps:$4 sm:$0xff]   ;;  %v6377_v28 = vld [vmem:[%s8466_s1 + $0xfc4] ss:$16 sps:$4 sm:$0xff]  }
 0x1bf   :  { %3990 = vmatpush1.bf16.msra.mxu0 %v6281_v29  ;;  %4449 = vmatpush1.bf16.msra.mxu1 %v6284_v30  ;;  %v6380_v29 = vld [vmem:[%s8466_s1 + $0xfcc] ss:$16 sps:$4 sm:$0xff]   ;;  %v6375_v30 = vld [vmem:[%s8466_s1 + $0xfc0] ss:$16 sps:$4 sm:$0xff]  }
 0x1c0   :  { %4010 = vmatprep.subr.bf16.mxu0 %v6292_v31  ;;  %4469 = vmatprep.subr.bf16.mxu1 %v6295_v32  ;;  %v6378_v31 = vld [vmem:[%s8466_s1 + $0xfc8] ss:$16 sps:$4 sm:$0xff]   ;;  %v6384_v32 = vld [vmem:[%s8466_s1 + $0xfe4] ss:$16 sps:$4 sm:$0xff]  }
 0x1c2   :  { %3992 = vmatmul.mubr.bf16.vlgmr.msra.gmra.mrb[0].mxu0 %v6287_v33  ;;  %4451 = vmatmul.mubr.bf16.vlgmr.msra.gmra.mrb[0].mxu1 %v6287_v33  ;;  %v6387_v33 = vld [vmem:[%s8466_s1 + $0xfec] ss:$16 sps:$4 sm:$0xff]  }
 0x1c3   :  { %4011 = vmatpush1.bf16.msra.mxu0 %v6290_v35  ;;  %4470 = vmatpush1.bf16.msra.mxu1 %v6293_v36  ;;  %v6385_v35 = vld [vmem:[%s8466_s1 + $0xfe8] ss:$16 sps:$4 sm:$0xff]   ;;  %v6393_v36 = vld [vmem:[%s8466_s1 + $0x1004] ss:$16 sps:$4 sm:$0xff]  }
 0x1c4   :  { %4012 = vmatprep.subr.bf16.mxu0 %v6298_v37  ;;  %4471 = vmatprep.subr.bf16.mxu1 %v6301_v38  ;;  %v6396_v37 = vld [vmem:[%s8466_s1 + $0x100c] ss:$16 sps:$4 sm:$0xff]   ;;  %v6388_v38 = vld [vmem:[%s8467_s0 + $0x38] ss:$72 sps:$4 sm:$0xff]  }
 0x1c5   :  { %4001 = vmatprep.mubr.bf16.mxu0 %v4864_v39  ;;  %4460 = vmatprep.mubr.bf16.mxu1 %v4864_v39  ;;  %v42_v39 = vld [vmem:[%s8467_s0 + $0xc8] sm:$0xff] }
 0x1c7   :  { %4013 = vmatpush1.bf16.msra.mxu0 %v6296_v40  ;;  %4472 = vmatpush1.bf16.msra.mxu1 %v6299_v41  ;;  %v6391_v40 = vld [vmem:[%s8466_s1 + $0x1000] ss:$16 sps:$4 sm:$0xff]   ;;  %v6394_v41 = vld [vmem:[%s8466_s1 + $0x1008] ss:$16 sps:$4 sm:$0xff]  }
 0x1c8   :  { %4014 = vmatprep.subr.bf16.mxu0 %v6304_v42  ;;  %4473 = vmatprep.subr.bf16.mxu1 %v6307_v43  ;;  %v6399_v42 = vld [vmem:[%s8466_s1 + $0x1024] ss:$16 sps:$4 sm:$0xff]   ;;  %v6402_v43 = vld [vmem:[%s8466_s1 + $0x102c] ss:$16 sps:$4 sm:$0xff]  }
 0x1ca   :  { %4002 = vmatmul.mubr.bf16.gmra.mrb[4].mxu0 %v4863_v44  ;;  %4461 = vmatmul.mubr.bf16.gmra.mrb[4].mxu1 %v4863_v44  ;;  %v4866_v44 = vcombine.high %v42_v39, %v42_v39 }
 0x1cb   :  { %4015 = vmatpush1.bf16.msra.mxu0 %v6302_v45  ;;  %4474 = vmatpush1.bf16.msra.mxu1 %v6305_v46  ;;  %v6397_v45 = vld [vmem:[%s8466_s1 + $0x1020] ss:$16 sps:$4 sm:$0xff]   ;;  %v6400_v46 = vld [vmem:[%s8466_s1 + $0x1028] ss:$16 sps:$4 sm:$0xff]  }
 0x1cc   :  { %4016 = vmatprep.subr.bf16.mxu0 %v6310_v47  ;;  %4475 = vmatprep.subr.bf16.mxu1 %v6313_v48  ;;  %v6405_v47 = vld [vmem:[%s8466_s1 + $0x1044] ss:$16 sps:$4 sm:$0xff]   ;;  %v6408_v48 = vld [vmem:[%s8466_s1 + $0x104c] ss:$16 sps:$4 sm:$0xff]  }
 0x1cd   :  { %4042 = vmatprep.mubr.bf16.mxu0 %v6390_v49  ;;  %4501 = vmatprep.mubr.bf16.mxu1 %v6390_v49  ;;  %v4865_v49 = vcombine.low %v42_v39, %v42_v39  ;;  %v6483_v39 = vld [vmem:[%s8466_s1 + $0x11e0] ss:$16 sps:$4 sm:$0xff]  }
 0x1cf   :  { %4017 = vmatpush1.bf16.msra.mxu0 %v6308_v50  ;;  %4476 = vmatpush1.bf16.msra.mxu1 %v6311_v51  ;;  %v6403_v50 = vld [vmem:[%s8466_s1 + $0x1040] ss:$16 sps:$4 sm:$0xff]   ;;  %v6406_v51 = vld [vmem:[%s8466_s1 + $0x1048] ss:$16 sps:$4 sm:$0xff]  }
 0x1d0   :  { %4018 = vmatprep.subr.bf16.mxu0 %v6316_v52  ;;  %4477 = vmatprep.subr.bf16.mxu1 %v6319_v53  ;;  %v6411_v52 = vld [vmem:[%s8466_s1 + $0x1064] ss:$16 sps:$4 sm:$0xff]   ;;  %v6414_v53 = vld [vmem:[%s8466_s1 + $0x106c] ss:$16 sps:$4 sm:$0xff]  }
 0x1d3   :  { %4019 = vmatpush1.bf16.msra.mxu0 %v6314_v54  ;;  %4478 = vmatpush1.bf16.msra.mxu1 %v6317_v55  ;;  %v6491_v54 = vld [vmem:[%s8467_s0 + $0x44] ss:$72 sps:$4 sm:$0xff]   ;;  %v6409_v55 = vld [vmem:[%s8466_s1 + $0x1060] ss:$16 sps:$4 sm:$0xff]  }
 0x1d4   :  { %4020 = vmatprep.subr.bf16.mxu0 %v6322_v56  ;;  %4479 = vmatprep.subr.bf16.mxu1 %v6325_v57  ;;  %v6412_v56 = vld [vmem:[%s8466_s1 + $0x1068] ss:$16 sps:$4 sm:$0xff]   ;;  %v6417_v57 = vld [vmem:[%s8466_s1 + $0x1084] ss:$16 sps:$4 sm:$0xff]  }
 0x1d7   :  { %4021 = vmatpush1.bf16.msra.mxu0 %v6320_v58  ;;  %4480 = vmatpush1.bf16.msra.mxu1 %v6323_v59  ;;  %v6420_v58 = vld [vmem:[%s8466_s1 + $0x108c] ss:$16 sps:$4 sm:$0xff]   ;;  %v6415_v59 = vld [vmem:[%s8466_s1 + $0x1080] ss:$16 sps:$4 sm:$0xff]  }
 0x1d8   :  { %4022 = vmatprep.subr.bf16.mxu0 %v6328_v60  ;;  %4481 = vmatprep.subr.bf16.mxu1 %v6331_v61  ;;  %v6418_v60 = vld [vmem:[%s8466_s1 + $0x1088] ss:$16 sps:$4 sm:$0xff]   ;;  %v6423_v61 = vld [vmem:[%s8466_s1 + $0x10a4] ss:$16 sps:$4 sm:$0xff]  }
 0x1db   :  { %4023 = vmatpush1.bf16.msra.mxu0 %v6326_v62  ;;  %4482 = vmatpush1.bf16.msra.mxu1 %v6329_v63  ;;  %v6426_v62 = vld [vmem:[%s8466_s1 + $0x10ac] ss:$16 sps:$4 sm:$0xff]   ;;  %v6421_v63 = vld [vmem:[%s8466_s1 + $0x10a0] ss:$16 sps:$4 sm:$0xff]  }
 0x1dc   :  { %4024 = vmatprep.subr.bf16.mxu0 %v6334_v0  ;;  %4483 = vmatprep.subr.bf16.mxu1 %v6337_v1  ;;  %v6424_v0 = vld [vmem:[%s8466_s1 + $0x10a8] ss:$16 sps:$4 sm:$0xff]   ;;  %v6429_v1 = vld [vmem:[%s8466_s1 + $0x10c4] ss:$16 sps:$4 sm:$0xff]  }
 0x1df   :  { %4025 = vmatpush1.bf16.msra.mxu0 %v6332_v2  ;;  %4484 = vmatpush1.bf16.msra.mxu1 %v6335_v3  ;;  %v6432_v2 = vld [vmem:[%s8466_s1 + $0x10cc] ss:$16 sps:$4 sm:$0xff]   ;;  %v6427_v3 = vld [vmem:[%s8466_s1 + $0x10c0] ss:$16 sps:$4 sm:$0xff]  }
 0x1e0   :  { %4026 = vmatprep.subr.bf16.mxu0 %v6340_v4  ;;  %4485 = vmatprep.subr.bf16.mxu1 %v6343_v5  ;;  %v6430_v4 = vld [vmem:[%s8466_s1 + $0x10c8] ss:$16 sps:$4 sm:$0xff]   ;;  %v6435_v5 = vld [vmem:[%s8466_s1 + $0x10e4] ss:$16 sps:$4 sm:$0xff]  }
 0x1e3   :  { %4027 = vmatpush1.bf16.msra.mxu0 %v6338_v6  ;;  %4486 = vmatpush1.bf16.msra.mxu1 %v6341_v7  ;;  %v6438_v6 = vld [vmem:[%s8466_s1 + $0x10ec] ss:$16 sps:$4 sm:$0xff]   ;;  %v6433_v7 = vld [vmem:[%s8466_s1 + $0x10e0] ss:$16 sps:$4 sm:$0xff]  }
 0x1e4   :  { %4028 = vmatprep.subr.bf16.mxu0 %v6346_v8  ;;  %4487 = vmatprep.subr.bf16.mxu1 %v6349_v9  ;;  %v6436_v8 = vld [vmem:[%s8466_s1 + $0x10e8] ss:$16 sps:$4 sm:$0xff]   ;;  %v6441_v9 = vld [vmem:[%s8466_s1 + $0x1104] ss:$16 sps:$4 sm:$0xff]  }
 0x1e7   :  { %4029 = vmatpush1.bf16.msra.mxu0 %v6344_v10  ;;  %4488 = vmatpush1.bf16.msra.mxu1 %v6347_v11  ;;  %v6444_v10 = vld [vmem:[%s8466_s1 + $0x110c] ss:$16 sps:$4 sm:$0xff]   ;;  %v6439_v11 = vld [vmem:[%s8466_s1 + $0x1100] ss:$16 sps:$4 sm:$0xff]  }
 0x1e8   :  { %4030 = vmatprep.subr.bf16.mxu0 %v6352_v12  ;;  %4489 = vmatprep.subr.bf16.mxu1 %v6355_v13  ;;  %v6442_v12 = vld [vmem:[%s8466_s1 + $0x1108] ss:$16 sps:$4 sm:$0xff]   ;;  %v6447_v13 = vld [vmem:[%s8466_s1 + $0x1124] ss:$16 sps:$4 sm:$0xff]  }
 0x1eb   :  { %4031 = vmatpush1.bf16.msra.mxu0 %v6350_v14  ;;  %4490 = vmatpush1.bf16.msra.mxu1 %v6353_v15  ;;  %v6450_v14 = vld [vmem:[%s8466_s1 + $0x112c] ss:$16 sps:$4 sm:$0xff]   ;;  %v6445_v15 = vld [vmem:[%s8466_s1 + $0x1120] ss:$16 sps:$4 sm:$0xff]  }
 0x1ec   :  { %4032 = vmatprep.subr.bf16.mxu0 %v6358_v16  ;;  %4491 = vmatprep.subr.bf16.mxu1 %v6361_v17  ;;  %v6448_v16 = vld [vmem:[%s8466_s1 + $0x1128] ss:$16 sps:$4 sm:$0xff]   ;;  %v6453_v17 = vld [vmem:[%s8466_s1 + $0x1144] ss:$16 sps:$4 sm:$0xff]  }
 0x1ef   :  { %4033 = vmatpush1.bf16.msra.mxu0 %v6356_v18  ;;  %4492 = vmatpush1.bf16.msra.mxu1 %v6359_v19  ;;  %v6456_v18 = vld [vmem:[%s8466_s1 + $0x114c] ss:$16 sps:$4 sm:$0xff]   ;;  %v6451_v19 = vld [vmem:[%s8466_s1 + $0x1140] ss:$16 sps:$4 sm:$0xff]  }
 0x1f0   :  { %4034 = vmatprep.subr.bf16.mxu0 %v6364_v20  ;;  %4493 = vmatprep.subr.bf16.mxu1 %v6367_v21  ;;  %v6454_v20 = vld [vmem:[%s8466_s1 + $0x1148] ss:$16 sps:$4 sm:$0xff]   ;;  %v6459_v21 = vld [vmem:[%s8466_s1 + $0x1164] ss:$16 sps:$4 sm:$0xff]  }
 0x1f3   :  { %4035 = vmatpush1.bf16.msra.mxu0 %v6362_v22  ;;  %4494 = vmatpush1.bf16.msra.mxu1 %v6365_v23  ;;  %v6462_v22 = vld [vmem:[%s8466_s1 + $0x116c] ss:$16 sps:$4 sm:$0xff]   ;;  %v6457_v23 = vld [vmem:[%s8466_s1 + $0x1160] ss:$16 sps:$4 sm:$0xff]  }
 0x1f4   :  { %4036 = vmatprep.subr.bf16.mxu0 %v6370_v24  ;;  %4495 = vmatprep.subr.bf16.mxu1 %v6373_v25  ;;  %v6460_v24 = vld [vmem:[%s8466_s1 + $0x1168] ss:$16 sps:$4 sm:$0xff]   ;;  %v6465_v25 = vld [vmem:[%s8466_s1 + $0x1184] ss:$16 sps:$4 sm:$0xff]  }
 0x1f7   :  { %4037 = vmatpush1.bf16.msra.mxu0 %v6368_v26  ;;  %4496 = vmatpush1.bf16.msra.mxu1 %v6371_v27  ;;  %v6468_v26 = vld [vmem:[%s8466_s1 + $0x118c] ss:$16 sps:$4 sm:$0xff]   ;;  %v6463_v27 = vld [vmem:[%s8466_s1 + $0x1180] ss:$16 sps:$4 sm:$0xff]  }
 0x1f8   :  { %4038 = vmatprep.subr.bf16.mxu0 %v6377_v28  ;;  %4497 = vmatprep.subr.bf16.mxu1 %v6380_v29  ;;  %v6466_v28 = vld [vmem:[%s8466_s1 + $0x1188] ss:$16 sps:$4 sm:$0xff]   ;;  %v6471_v29 = vld [vmem:[%s8466_s1 + $0x11a4] ss:$16 sps:$4 sm:$0xff]  }
 0x1fb   :  { %4039 = vmatpush1.bf16.msra.mxu0 %v6375_v30  ;;  %4498 = vmatpush1.bf16.msra.mxu1 %v6378_v31  ;;  %v6474_v30 = vld [vmem:[%s8466_s1 + $0x11ac] ss:$16 sps:$4 sm:$0xff]   ;;  %v6469_v31 = vld [vmem:[%s8466_s1 + $0x11a0] ss:$16 sps:$4 sm:$0xff]  }
 0x1fc   :  { %4040 = vmatprep.subr.bf16.mxu0 %v6384_v32  ;;  %4499 = vmatprep.subr.bf16.mxu1 %v6387_v33  ;;  %v6472_v32 = vld [vmem:[%s8466_s1 + $0x11a8] ss:$16 sps:$4 sm:$0xff]   ;;  %v6479_v33 = vld [vmem:[%s8466_s1 + $0x11c4] ss:$16 sps:$4 sm:$0xff]  }
 0x1ff   :  { %4041 = vmatpush1.bf16.msra.mxu0 %v6382_v34  ;;  %4500 = vmatpush1.bf16.msra.mxu1 %v6385_v35  ;;  %v6482_v34 = vld [vmem:[%s8466_s1 + $0x11cc] ss:$16 sps:$4 sm:$0xff]   ;;  %v6477_v35 = vld [vmem:[%s8466_s1 + $0x11c0] ss:$16 sps:$4 sm:$0xff]  }
 0x200   :  { %4061 = vmatprep.subr.bf16.mxu0 %v6393_v36  ;;  %4520 = vmatprep.subr.bf16.mxu1 %v6396_v37  ;;  %v6480_v36 = vld [vmem:[%s8466_s1 + $0x11c8] ss:$16 sps:$4 sm:$0xff]   ;;  %v6485_v37 = vld [vmem:[%s8466_s1 + $0x11e4] ss:$16 sps:$4 sm:$0xff]  }
 0x202   :  { %4043 = vmatmul.mubr.bf16.vlgmr.msra.gmra.mrb[0].mxu0 %v6388_v38  ;;  %4502 = vmatmul.mubr.bf16.vlgmr.msra.gmra.mrb[0].mxu1 %v6388_v38  ;;  %v6488_v38 = vld [vmem:[%s8466_s1 + $0x11ec] ss:$16 sps:$4 sm:$0xff]  }
 0x203   :  { %4062 = vmatpush1.bf16.msra.mxu0 %v6391_v40  ;;  %4521 = vmatpush1.bf16.msra.mxu1 %v6394_v41  ;;  %v6486_v40 = vld [vmem:[%s8466_s1 + $0x11e8] ss:$16 sps:$4 sm:$0xff]   ;;  %v43_v41 = vld [vmem:[%s8467_s0 + $0xd0] sm:$0xff] }
 0x204   :  { %4063 = vmatprep.subr.bf16.mxu0 %v6399_v42  ;;  %4522 = vmatprep.subr.bf16.mxu1 %v6402_v43  ;;  %v6489_v42 = vld [vmem:[%s8467_s0 + $0x40] ss:$72 sps:$4 sm:$0xff]   ;;  %v4868_v43 = vcombine.high %v43_v41, %v43_v41 }
 0x205   :  { %4052 = vmatprep.mubr.bf16.mxu0 %v4866_v44  ;;  %4511 = vmatprep.mubr.bf16.mxu1 %v4866_v44  ;;  %v4867_v44 = vcombine.low %v43_v41, %v43_v41 }
 0x207   :  { %4064 = vmatpush1.bf16.msra.mxu0 %v6397_v45  ;;  %4523 = vmatpush1.bf16.msra.mxu1 %v6400_v46 }
 0x208   :  { %4065 = vmatprep.subr.bf16.mxu0 %v6405_v47  ;;  %4524 = vmatprep.subr.bf16.mxu1 %v6408_v48 }
 0x20a   :  { %4053 = vmatmul.mubr.bf16.gmra.mrb[4].mxu0 %v4865_v49  ;;  %4512 = vmatmul.mubr.bf16.gmra.mrb[4].mxu1 %v4865_v49 }
 0x20b   :  { %4066 = vmatpush1.bf16.msra.mxu0 %v6403_v50  ;;  %4525 = vmatpush1.bf16.msra.mxu1 %v6406_v51 }
 0x20c   :  { %4067 = vmatprep.subr.bf16.mxu0 %v6411_v52  ;;  %4526 = vmatprep.subr.bf16.mxu1 %v6414_v53 }
 0x20d   :  { %4093 = vmatprep.mubr.bf16.mxu0 %v6491_v54  ;;  %4552 = vmatprep.mubr.bf16.mxu1 %v6491_v54 }
 0x20f   :  { %4068 = vmatpush1.bf16.msra.mxu0 %v6409_v55  ;;  %4527 = vmatpush1.bf16.msra.mxu1 %v6412_v56  ;;  %v4685_v55 = vlaneseq }
 0x210   :  { %4069 = vmatprep.subr.bf16.mxu0 %v6417_v57  ;;  %4528 = vmatprep.subr.bf16.mxu1 %v6420_v58 }
 0x213   :  { %4070 = vmatpush1.bf16.msra.mxu0 %v6415_v59  ;;  %4529 = vmatpush1.bf16.msra.mxu1 %v6418_v60 }
 0x214   :  { %4071 = vmatprep.subr.bf16.mxu0 %v6423_v61  ;;  %4530 = vmatprep.subr.bf16.mxu1 %v6426_v62 }
 0x217   :  { %4072 = vmatpush1.bf16.msra.mxu0 %v6421_v63  ;;  %4531 = vmatpush1.bf16.msra.mxu1 %v6424_v0 }
 0x218   :  { %4073 = vmatprep.subr.bf16.mxu0 %v6429_v1  ;;  %4532 = vmatprep.subr.bf16.mxu1 %v6432_v2 }
 0x21b   :  { %4074 = vmatpush1.bf16.msra.mxu0 %v6427_v3  ;;  %4533 = vmatpush1.bf16.msra.mxu1 %v6430_v4 }
 0x21c   :  { %4075 = vmatprep.subr.bf16.mxu0 %v6435_v5  ;;  %4534 = vmatprep.subr.bf16.mxu1 %v6438_v6 }
 0x21f   :  { %4076 = vmatpush1.bf16.msra.mxu0 %v6433_v7  ;;  %4535 = vmatpush1.bf16.msra.mxu1 %v6436_v8 }
 0x220   :  { %4077 = vmatprep.subr.bf16.mxu0 %v6441_v9  ;;  %4536 = vmatprep.subr.bf16.mxu1 %v6444_v10 }
 0x223   :  { %4078 = vmatpush1.bf16.msra.mxu0 %v6439_v11  ;;  %4537 = vmatpush1.bf16.msra.mxu1 %v6442_v12 }
 0x224   :  { %4079 = vmatprep.subr.bf16.mxu0 %v6447_v13  ;;  %4538 = vmatprep.subr.bf16.mxu1 %v6450_v14 }
 0x227   :  { %4080 = vmatpush1.bf16.msra.mxu0 %v6445_v15  ;;  %4539 = vmatpush1.bf16.msra.mxu1 %v6448_v16 }
 0x228   :  { %4081 = vmatprep.subr.bf16.mxu0 %v6453_v17  ;;  %4540 = vmatprep.subr.bf16.mxu1 %v6456_v18 }
 0x22b   :  { %4082 = vmatpush1.bf16.msra.mxu0 %v6451_v19  ;;  %4541 = vmatpush1.bf16.msra.mxu1 %v6454_v20  ;;  %v8380_v20 = vshrl.u32 %v4685_v55, 7 }
 0x22c   :  { %4083 = vmatprep.subr.bf16.mxu0 %v6459_v21  ;;  %4542 = vmatprep.subr.bf16.mxu1 %v6462_v22 }
 0x22f   :  { %4084 = vmatpush1.bf16.msra.mxu0 %v6457_v23  ;;  %4543 = vmatpush1.bf16.msra.mxu1 %v6460_v24 }
 0x230   :  { %4085 = vmatprep.subr.bf16.mxu0 %v6465_v25  ;;  %4544 = vmatprep.subr.bf16.mxu1 %v6468_v26 }
 0x233   :  { %4086 = vmatpush1.bf16.msra.mxu0 %v6463_v27  ;;  %4545 = vmatpush1.bf16.msra.mxu1 %v6466_v28 }
 0x234   :  { %4087 = vmatprep.subr.bf16.mxu0 %v6471_v29  ;;  %4546 = vmatprep.subr.bf16.mxu1 %v6474_v30 }
 0x237   :  { %4088 = vmatpush1.bf16.msra.mxu0 %v6469_v31  ;;  %4547 = vmatpush1.bf16.msra.mxu1 %v6472_v32 }
 0x238   :  { %4089 = vmatprep.subr.bf16.mxu0 %v6479_v33  ;;  %4548 = vmatprep.subr.bf16.mxu1 %v6482_v34 }
 0x23b   :  { %4090 = vmatpush1.bf16.msra.mxu0 %v6477_v35  ;;  %4549 = vmatpush1.bf16.msra.mxu1 %v6480_v36 }
 0x23c   :  { %4091 = vmatprep.subr.bf16.mxu0 %v6485_v37  ;;  %4550 = vmatprep.subr.bf16.mxu1 %v6488_v38 }
 0x23f   :  { %4092 = vmatpush1.bf16.msra.mxu0 %v6483_v39  ;;  %4551 = vmatpush1.bf16.msra.mxu1 %v6486_v40 }
 0x242   :  { %4094 = vmatmul.mubr.bf16.vlgmr.msra.gmra.mrb[0].mxu0 %v6489_v42  ;;  %4553 = vmatmul.mubr.bf16.vlgmr.msra.gmra.mrb[0].mxu1 %v6489_v42 }
 0x243   :  { %4103 = vmatprep.mubr.bf16.mxu0 %v4868_v43  ;;  %4562 = vmatprep.mubr.bf16.mxu1 %v4868_v43 }
 0x24a   :  { %4104 = vmatmul.mubr.bf16.gmra.mrb[4].mxu0 %v4867_v44  ;;  %4563 = vmatmul.mubr.bf16.gmra.mrb[4].mxu1 %v4867_v44 }
 0x315   :  { %v4095_v45 = vpop.f32.mrb[0].mxu0  ;;  %v4554_v46 = vpop.f32.mrb[0].mxu1 }
 0x316   :  { %v8336_v47 = vmax.f32 %v4095_v45, 0.0  ;;  %v8338_v48 = vmax.f32 %v4554_v46, 0.0  ;;  %v4097_v49 = vpop.f32.mrb[1].mxu0  ;;  %v4556_v50 = vpop.f32.mrb[1].mxu1 }
 0x317   :  { %v8340_v51 = vmax.f32 %v4097_v49, 0.0  ;;  %v8342_v52 = vmax.f32 %v4556_v50, 0.0  ;;  %v4099_v53 = vpop.f32.mrb[2].mxu0  ;;  %v4558_v54 = vpop.f32.mrb[2].mxu1 }
 0x318   :  { %v4619_v56 = vmul.f32 %v8336_v47, %v8336_v47  ;;  %v4621_v57 = vmul.f32 %v8338_v48, %v8338_v48  ;;  %v8348_v58 = vmax.f32 %v4099_v53, 0.0  ;;  %v8350_v59 = vmax.f32 %v4558_v54, 0.0  ;;  %v4101_v60 = vpop.f32.mrb[3].mxu0  ;;  %v4560_v61 = vpop.f32.mrb[3].mxu1 }
 0x319   :  { %v4620_v62 = vmul.f32 %v8340_v51, %v8340_v51  ;;  %v4622_v63 = vmul.f32 %v8342_v52, %v8342_v52  ;;  %v8356_v0 = vmax.f32 %v4101_v60, 0.0  ;;  %v8358_v1 = vmax.f32 %v4560_v61, 0.0 }
 0x31a   :  { %v4583_v2 = vadd.f32 %v8348_v58, %v8336_v47  ;;  %v4623_v3 = vmul.f32 %v8348_v58, %v8348_v58  ;;  %v4599_v4 = vadd.f32 %v8350_v59, %v8338_v48  ;;  %v4625_v5 = vmul.f32 %v8350_v59, %v8350_v59 }
 0x31b   :  { %v4591_v6 = vadd.f32 %v8356_v0, %v8340_v51  ;;  %v4624_v7 = vmul.f32 %v8356_v0, %v8356_v0  ;;  %v4607_v8 = vadd.f32 %v8358_v1, %v8342_v52  ;;  %v4626_v9 = vmul.f32 %v8358_v1, %v8358_v1 }
 0x31c   :  { %v4631_v10 = vadd.f32 %v4623_v3, %v4619_v56  ;;  %v4647_v11 = vadd.f32 %v4625_v5, %v4621_v57 }
 0x31d   :  { %v4639_v12 = vadd.f32 %v4624_v7, %v4620_v62  ;;  %v4655_v13 = vadd.f32 %v4626_v9, %v4622_v63  ;;  %v4105_v14 = vpop.f32.mrb[4].mxu0  ;;  %v4564_v15 = vpop.f32.mrb[4].mxu1 }
 0x31e   :  { %v8376_v16 = vmax.f32 %v4105_v14, 0.0  ;;  %v8378_v17 = vmax.f32 %v4564_v15, 0.0  ;;  %v4107_v18 = vpop.f32.mrb[5].mxu0  ;;  %v4566_v19 = vpop.f32.mrb[5].mxu1 }
 0x31f   :  { %v8382_v21 = vmax.f32 %v4107_v18, 0.0  ;;  %v8384_v22 = vmax.f32 %v4566_v19, 0.0  ;;  %v4109_v23 = vpop.f32.mrb[6].mxu0  ;;  %v4568_v24 = vpop.f32.mrb[6].mxu1 }
 0x320   :  { %v4584_v25 = vadd.f32 %v4583_v2, %v8376_v16  ;;  %v4627_v26 = vmul.f32 %v8376_v16, %v8376_v16  ;;  %v4600_v27 = vadd.f32 %v4599_v4, %v8378_v17  ;;  %v4629_v28 = vmul.f32 %v8378_v17, %v8378_v17  ;;  %v4110_v29 = vpop.f32.mrb[7].mxu0  ;;  %v4569_v30 = vpop.f32.mrb[7].mxu1 }
 0x321   :  { %v4592_v31 = vadd.f32 %v4591_v6, %v8382_v21  ;;  %v4628_v32 = vmul.f32 %v8382_v21, %v8382_v21  ;;  %v4608_v33 = vadd.f32 %v4607_v8, %v8384_v22  ;;  %v4630_v34 = vmul.f32 %v8384_v22, %v8384_v22 }
 0x322   :  { %v4585_v35 = vrot.slane %v4584_v25, 4  ;;  %v4632_v36 = vadd.f32 %v4631_v10, %v4627_v26  ;;  %v4601_v37 = vrot.slane %v4600_v27, 4  ;;  %v4648_v38 = vadd.f32 %v4647_v11, %v4629_v28 }
 0x323   :  { %v4593_v39 = vrot.slane %v4592_v31, 4  ;;  %v4640_v40 = vadd.f32 %v4639_v12, %v4628_v32  ;;  %v4609_v41 = vrot.slane %v4608_v33, 4  ;;  %v4656_v42 = vadd.f32 %v4655_v13, %v4630_v34 }
 0x324   :  { %v4586_v43 = vadd.f32 %v4585_v35, %v4584_v25  ;;  %v4633_v44 = vrot.slane %v4632_v36, 4  ;;  %v4602_v45 = vadd.f32 %v4601_v37, %v4600_v27  ;;  %v4649_v46 = vrot.slane %v4648_v38, 4 }
 0x325   :  { %v4594_v49 = vadd.f32 %v4593_v39, %v4592_v31  ;;  %v4641_v50 = vrot.slane %v4640_v40, 4  ;;  %v4610_v53 = vadd.f32 %v4609_v41, %v4608_v33  ;;  %v4657_v54 = vrot.slane %v4656_v42, 4 }
 0x326   :  { %v4587_v55 = vrot.slane %v4586_v43, 2  ;;  %v4634_v56 = vadd.f32 %v4633_v44, %v4632_v36  ;;  %v4603_v57 = vrot.slane %v4602_v45, 2  ;;  %v4650_v60 = vadd.f32 %v4649_v46, %v4648_v38 }
 0x327   :  { %v4595_v61 = vrot.slane %v4594_v49, 2  ;;  %v4642_v62 = vadd.f32 %v4641_v50, %v4640_v40  ;;  %v4611_v63 = vrot.slane %v4610_v53, 2  ;;  %v4658_v2 = vadd.f32 %v4657_v54, %v4656_v42 }
 0x328   :  { %v4588_v3 = vadd.f32 %v4587_v55, %v4586_v43  ;;  %v4635_v4 = vrot.slane %v4634_v56, 2  ;;  %v4604_v5 = vadd.f32 %v4603_v57, %v4602_v45  ;;  %v4651_v6 = vrot.slane %v4650_v60, 2 }
 0x329   :  { %v4596_v7 = vadd.f32 %v4595_v61, %v4594_v49  ;;  %v4643_v8 = vrot.slane %v4642_v62, 2  ;;  %v4612_v9 = vadd.f32 %v4611_v63, %v4610_v53  ;;  %v4659_v10 = vrot.slane %v4658_v2, 2 }
 0x32a   :  { %v4589_v11 = vrot.slane %v4588_v3, 1  ;;  %v4636_v12 = vadd.f32 %v4635_v4, %v4634_v56  ;;  %v4605_v13 = vrot.slane %v4604_v5, 1  ;;  %v4652_v14 = vadd.f32 %v4651_v6, %v4650_v60  ;;  %v4683_v4 = vld [vmem:[%s8468_s2] sm:$0xf] }
 0x32b   :  { %v4597_v15 = vrot.slane %v4596_v7, 1  ;;  %v4644_v18 = vadd.f32 %v4643_v8, %v4642_v62  ;;  %v4613_v19 = vrot.slane %v4612_v9, 1  ;;  %v4660_v23 = vadd.f32 %v4659_v10, %v4658_v2  ;;  %v4749_v8 = vld [vmem:[%s8469_s3] sm:$0xf] }
 0x32c   :  { %v4590_v24 = vadd.f32 %v4589_v11, %v4588_v3  ;;  %v4637_v25 = vrot.slane %v4636_v12, 1  ;;  %v4606_v26 = vadd.f32 %v4605_v13, %v4604_v5  ;;  %v4653_v27 = vrot.slane %v4652_v14, 1 }
 0x32d   :  { %v4598_v28 = vadd.f32 %v4597_v15, %v4596_v7  ;;  %v4645_v29 = vrot.slane %v4644_v18, 1  ;;  %v4614_v30 = vadd.f32 %v4613_v19, %v4612_v9  ;;  %v4661_v31 = vrot.slane %v4660_v23, 1 }
 0x32e   :  { %v8398_v32 = vmul.f32 0.055555556, %v4590_v24  ;;  %v4638_v33 = vadd.f32 %v4637_v25, %v4636_v12  ;;  %v8400_v34 = vmul.f32 0.055555556, %v4606_v26  ;;  %v4654_v35 = vadd.f32 %v4653_v27, %v4652_v14 }
 0x32f   :  { %v8402_v36 = vmul.f32 0.055555556, %v4598_v28  ;;  %v4646_v37 = vadd.f32 %v4645_v29, %v4644_v18  ;;  %v8404_v38 = vmul.f32 0.055555556, %v4614_v30  ;;  %v4662_v39 = vadd.f32 %v4661_v31, %v4660_v23 }
 0x330   :  { %v4663_v40 = vmul.f32 0.055555556, %v4638_v33  ;;  %v4667_v41 = vmul.f32 %v8398_v32, %v8398_v32  ;;  %v4709_v42 = vsub.f32 %v8336_v47, %v8398_v32  ;;  %v4713_v43 = vsub.f32 %v8348_v58, %v8398_v32 }
 0x331   :  { %v4717_v44 = vsub.f32 %v8376_v16, %v8398_v32  ;;  %v4665_v45 = vmul.f32 0.055555556, %v4654_v35  ;;  %v4669_v46 = vmul.f32 %v8400_v34, %v8400_v34  ;;  %v4711_v49 = vsub.f32 %v8338_v48, %v8400_v34 }
 0x332   :  { %v4671_v50 = vsub.f32 %v4663_v40, %v4667_v41  ;;  %v4715_v53 = vsub.f32 %v8350_v59, %v8400_v34  ;;  %v4719_v47 = vsub.f32 %v8378_v17, %v8400_v34  ;;  %v4664_v54 = vmul.f32 0.055555556, %v4646_v37 }
 0x333   :  { %v4673_v55 = vsub.f32 %v4665_v45, %v4669_v46  ;;  %v4668_v58 = vmul.f32 %v8402_v36, %v8402_v36  ;;  %v4710_v16 = vsub.f32 %v8340_v51, %v8402_v36  ;;  %v4714_v56 = vsub.f32 %v8356_v0, %v8402_v36 }
 0x334   :  { %v4675_v57 = vadd.f32 1e-05, %v4671_v50  ;;  %v4718_v48 = vsub.f32 %v8382_v21, %v8402_v36  ;;  %v4666_v60 = vmul.f32 0.055555556, %v4662_v39  ;;  %v4670_v59 = vmul.f32 %v8404_v38, %v8404_v38 }
 0x335   :  { %v4677_v17 = vadd.f32 1e-05, %v4673_v55  ;;  %v4672_v61 = vsub.f32 %v4664_v54, %v4668_v58  ;;  %v4712_v62 = vsub.f32 %v8342_v52, %v8404_v38  ;;  %v4716_v63 = vsub.f32 %v8358_v1, %v8404_v38 }
 0x336   :  { %6494 = vrsqrt.f32 %v4675_v57  ;;  %v4674_v51 = vsub.f32 %v4666_v60, %v4670_v59  ;;  %v4720_v0 = vsub.f32 %v8384_v22, %v8404_v38  ;;  %v4687_v3 = vsub.s32 0, %v8380_v20 }
 0x337   :  { %6496 = vrsqrt.f32 %v4677_v17  ;;  %v4676_v2 = vadd.f32 1e-05, %v4672_v61  ;;  %v4695_v52 = vsub.s32 2, %v8380_v20  ;;  %v4691_v1 = vsub.s32 1, %v8380_v20 }
 0x338   :  { %v4678_v21 = vadd.f32 1e-05, %v4674_v51  ;;  %v4688_v5 = vrot.slane %v4683_v4, %v4687_v3  ;;  %v4699_v6 = vsub.s32 3, %v8380_v20  ;;  %v4754_v18 = vrot.slane %v4749_v8, %v4687_v3 }
 0x339   :  { %6498 = vrsqrt.f32 %v4676_v2  ;;  %v4696_v7 = vrot.slane %v4683_v4, %v4695_v52  ;;  %v4692_v9 = vrot.slane %v4683_v4, %v4691_v1  ;;  %v4762_v24 = vrot.slane %v4749_v8, %v4695_v52 }
 0x33a   :  { %6500 = vrsqrt.f32 %v4678_v21  ;;  %v4700_v12 = vrot.slane %v4683_v4, %v4699_v6  ;;  %v4758_v26 = vrot.slane %v4749_v8, %v4691_v1  ;;  %v4766_v37 = vrot.slane %v4749_v8, %v4699_v6 }
 0x340   :  { %v6495_v22 = vpop.eup %6494 }
 0x341   :  { %v6497_v10 = vpop.eup %6496  ;;  %v4705_v11 = vmul.f32 %v6495_v22, %v4688_v5 }
 0x342   :  { %v4707_v13 = vmul.f32 %v6497_v10, %v4696_v7 }
 0x343   :  { %v6499_v14 = vpop.eup %6498  ;;  %v4724_v15 = vrot.slane %v4705_v11, %v4687_v3 }
 0x344   :  { %v6501_v19 = vpop.eup %6500  ;;  %v4732_v23 = vrot.slane %v4707_v13, %v4687_v3  ;;  %v4706_v25 = vmul.f32 %v6499_v14, %v4692_v9 }
 0x345   :  { %v4737_v20 = vmul.f32 %v4724_v15, %v4709_v42  ;;  %v4741_v27 = vmul.f32 %v4724_v15, %v4713_v43  ;;  %v4745_v28 = vmul.f32 %v4724_v15, %v4717_v44  ;;  %v4708_v29 = vmul.f32 %v6501_v19, %v4700_v12 }
 0x346   :  { %v4739_v30 = vmul.f32 %v4732_v23, %v4711_v49  ;;  %v4743_v31 = vmul.f32 %v4732_v23, %v4715_v53  ;;  %v4747_v32 = vmul.f32 %v4732_v23, %v4719_v47  ;;  %v4728_v33 = vrot.slane %v4706_v25, %v4687_v3 }
 0x347   :  { %v4771_v34 = vadd.f32 %v4754_v18, %v4737_v20  ;;  %v4775_v35 = vadd.f32 %v4754_v18, %v4741_v27  ;;  %v4736_v36 = vrot.slane %v4708_v29, %v4687_v3  ;;  %v4779_v38 = vadd.f32 %v4754_v18, %v4745_v28 }
 0x348   :  { %v4773_v39 = vadd.f32 %v4762_v24, %v4739_v30  ;;  %v4777_v40 = vadd.f32 %v4762_v24, %v4743_v31  ;;  %v4738_v41 = vmul.f32 %v4728_v33, %v4710_v16  ;;  %v4742_v45 = vmul.f32 %v4728_v33, %v4714_v56 }
 0x349   :  { %v4746_v46 = vmul.f32 %v4728_v33, %v4718_v48  ;;  %v4740_v50 = vmul.f32 %v4736_v36, %v4712_v62  ;;  %v4744_v54 = vmul.f32 %v4736_v36, %v4716_v63  ;;  %v4781_v42 = vadd.f32 %v4762_v24, %v4747_v32 }
 0x34a   :  { %v4772_v43 = vadd.f32 %v4758_v26, %v4738_v41  ;;  %v4748_v44 = vmul.f32 %v4736_v36, %v4720_v0  ;;  %v4776_v55 = vadd.f32 %v4758_v26, %v4742_v45 }
 0x34b   :  { %v4780_v49 = vadd.f32 %v4758_v26, %v4746_v46  ;;  %v4774_v53 = vadd.f32 %v4766_v37, %v4740_v50  ;;  %v4778_v47 = vadd.f32 %v4766_v37, %v4744_v54 }
 0x34c   :  { %v5451_v58 = vpack.c.bf16 %v4772_v43, %v4771_v34  ;;  %v4782_v57 = vadd.f32 %v4766_v37, %v4748_v44  ;;  %v5453_v60 = vpack.c.bf16 %v4776_v55, %v4775_v35 }
 0x34d   :  { %v5455_v59 = vpack.c.bf16 %v4780_v49, %v4779_v38  ;;  %v5452_v17 = vpack.c.bf16 %v4774_v53, %v4773_v39  ;;  %v5454_v61 = vpack.c.bf16 %v4778_v47, %v4777_v40 }
 0x34e   :  { %4823 = vst [vmem:[%s8470_s4] sm:$0xff] %v5451_v58  ;;  %v5456_v16 = vpack.c.bf16 %v4782_v57, %v4781_v42  ;;  %4825 = vst [vmem:[%s8470_s4 + $0x10] sm:$0xff] %v5453_v60 }
 0x34f   :  { %4827 = vst [vmem:[%s8470_s4 + $0x20] sm:$0xff] %v5455_v59  ;;  %4824 = vst [vmem:[%s8470_s4 + $0x8] sm:$0xff] %v5452_v17 }
 0x350   :  { %4826 = vst [vmem:[%s8470_s4 + $0x18] sm:$0xff] %v5454_v61  ;;  %4828 = vst [vmem:[%s8470_s4 + $0x28] sm:$0xff] %v5456_v16 }

// kernel: discriminator_forward.9
= control target key start
LH: loop header
LB: loop body
LE: loop exit
PB: predicated region body
PF: predicated region fallthrough
CT: control target
= control target key end

     0   :  { %s5179_s1 = inlined_call_operand.vmem [shape: bf16[4608,128], index: 1, kind: input, shape index: {}]   ;;  %s5180_s0 = inlined_call_operand.vmem [shape: bf16[8,4608], index: 0, kind: input, shape index: {}]   ;;  %s5181_s2 = inlined_call_operand.vmem [shape: f32[8,128], index: 2, kind: output, shape index: {}]  }
   0x1   :  { %v3912_v0 = vld [vmem:[%s5179_s1 + $0x40] sm:$0xff]   ;;  %v3916_v4 = vld [vmem:[%s5179_s1 + $0x48] sm:$0xff]   ;;  %v3920_v8 = vld [vmem:[%s5179_s1 + $0x50] sm:$0xff]  }
   0x2   :  { %v3913_v1 = vld [vmem:[%s5179_s1 + $0xc0] sm:$0xff]   ;;  %3516 = vmatprep.subr.bf16.mxu0 %v3912_v0  ;;  %v3917_v5 = vld [vmem:[%s5179_s1 + $0xc8] sm:$0xff]   ;;  %v3921_v9 = vld [vmem:[%s5179_s1 + $0xd0] sm:$0xff]  }
   0x3   :  { %v3914_v2 = vld [vmem:[%s5179_s1] sm:$0xff]   ;;  %3538 = vmatprep.subr.bf16.mxu1 %v3913_v1  ;;  %v3918_v6 = vld [vmem:[%s5179_s1 + $0x8] sm:$0xff]   ;;  %v3922_v10 = vld [vmem:[%s5179_s1 + $0x10] sm:$0xff]  }
   0x4   :  { %v3915_v3 = vld [vmem:[%s5179_s1 + $0x80] sm:$0xff]   ;;  %3517 = vmatpush3.bf16.msra.mxu0 %v3914_v2  ;;  %v3919_v7 = vld [vmem:[%s5179_s1 + $0x88] sm:$0xff]   ;;  %v3923_v11 = vld [vmem:[%s5179_s1 + $0x90] sm:$0xff]  }
   0x5   :  { %3539 = vmatpush3.bf16.msra.mxu1 %v3915_v3  ;;  %3518 = vmatprep.subr.bf16.mxu0 %v3916_v4  ;;  %v3924_v12 = vld [vmem:[%s5179_s1 + $0x58] sm:$0xff]   ;;  %v3928_v16 = vld [vmem:[%s5179_s1 + $0x60] sm:$0xff]   ;;  %v3932_v20 = vld [vmem:[%s5179_s1 + $0x68] sm:$0xff]  }
   0x6   :  { %3540 = vmatprep.subr.bf16.mxu1 %v3917_v5  ;;  %v3925_v13 = vld [vmem:[%s5179_s1 + $0xd8] sm:$0xff]   ;;  %v3929_v17 = vld [vmem:[%s5179_s1 + $0xe0] sm:$0xff]   ;;  %v3933_v21 = vld [vmem:[%s5179_s1 + $0xe8] sm:$0xff]  }
   0x7   :  { %v3926_v14 = vld [vmem:[%s5179_s1 + $0x18] sm:$0xff]   ;;  %v3930_v18 = vld [vmem:[%s5179_s1 + $0x20] sm:$0xff]   ;;  %v3934_v22 = vld [vmem:[%s5179_s1 + $0x28] sm:$0xff]  }
   0x8   :  { %3519 = vmatpush3.bf16.msra.mxu0 %v3918_v6  ;;  %v3927_v15 = vld [vmem:[%s5179_s1 + $0x98] sm:$0xff]   ;;  %v3931_v19 = vld [vmem:[%s5179_s1 + $0xa0] sm:$0xff]   ;;  %v3935_v23 = vld [vmem:[%s5179_s1 + $0xa8] sm:$0xff]  }
   0x9   :  { %3541 = vmatpush3.bf16.msra.mxu1 %v3919_v7  ;;  %3520 = vmatprep.subr.bf16.mxu0 %v3920_v8  ;;  %v3936_v24 = vld [vmem:[%s5179_s1 + $0x70] sm:$0xff]   ;;  %v3940_v28 = vld [vmem:[%s5179_s1 + $0x78] sm:$0xff]   ;;  %v12_v32 = vld [vmem:[%s5180_s0] sm:$0xff] }
   0xa   :  { %3542 = vmatprep.subr.bf16.mxu1 %v3921_v9  ;;  %v3937_v25 = vld [vmem:[%s5179_s1 + $0xf0] sm:$0xff]   ;;  %v3941_v29 = vld [vmem:[%s5179_s1 + $0xf8] sm:$0xff]   ;;  %v13_v33 = vld [vmem:[%s5180_s0 + $0x8] sm:$0xff]  ;;  %v3191_v34 = vcombine.low %v12_v32, %v12_v32  ;;  %v3192_v35 = vcombine.high %v12_v32, %v12_v32 }
   0xb   :  { %v3938_v26 = vld [vmem:[%s5179_s1 + $0x30] sm:$0xff]   ;;  %v3942_v30 = vld [vmem:[%s5179_s1 + $0x38] sm:$0xff]   ;;  %v3193_v36 = vcombine.low %v13_v33, %v13_v33  ;;  %v3194_v37 = vcombine.high %v13_v33, %v13_v33  ;;  %v3948_v38 = vld [vmem:[%s5179_s1 + $0x140] sm:$0xff]  }
   0xc   :  { %3521 = vmatpush3.bf16.msra.mxu0 %v3922_v10  ;;  %v3939_v27 = vld [vmem:[%s5179_s1 + $0xb0] sm:$0xff]   ;;  %v3943_v31 = vld [vmem:[%s5179_s1 + $0xb8] sm:$0xff]   ;;  %v3949_v39 = vld [vmem:[%s5179_s1 + $0x1c0] sm:$0xff]   ;;  %2492 = vmatprep.mubr.bf16.mxu0 %v3192_v35 }
   0xd   :  { %3543 = vmatpush3.bf16.msra.mxu1 %v3923_v11  ;;  %3522 = vmatprep.subr.bf16.mxu0 %v3924_v12  ;;  %v3950_v40 = vld [vmem:[%s5179_s1 + $0x100] sm:$0xff]   ;;  %v3952_v42 = vld [vmem:[%s5179_s1 + $0x148] sm:$0xff]   ;;  %v3956_v46 = vld [vmem:[%s5179_s1 + $0x150] sm:$0xff]  }
   0xe   :  { %3544 = vmatprep.subr.bf16.mxu1 %v3925_v13  ;;  %2532 = vmatprep.mubr.bf16.mxu1 %v3194_v37  ;;  %v3951_v41 = vld [vmem:[%s5179_s1 + $0x180] sm:$0xff]   ;;  %v3953_v43 = vld [vmem:[%s5179_s1 + $0x1c8] sm:$0xff]   ;;  %v3957_v47 = vld [vmem:[%s5179_s1 + $0x1d0] sm:$0xff]  }
   0xf   :  { %v3954_v44 = vld [vmem:[%s5179_s1 + $0x108] sm:$0xff]   ;;  %v3958_v48 = vld [vmem:[%s5179_s1 + $0x110] sm:$0xff]   ;;  %v3960_v50 = vld [vmem:[%s5179_s1 + $0x158] sm:$0xff]  }
  0x10   :  { %3523 = vmatpush3.bf16.msra.mxu0 %v3926_v14  ;;  %v3955_v45 = vld [vmem:[%s5179_s1 + $0x188] sm:$0xff]   ;;  %v3959_v49 = vld [vmem:[%s5179_s1 + $0x190] sm:$0xff]   ;;  %v3961_v51 = vld [vmem:[%s5179_s1 + $0x1d8] sm:$0xff]  }
  0x11   :  { %3545 = vmatpush3.bf16.msra.mxu1 %v3927_v15  ;;  %3524 = vmatprep.subr.bf16.mxu0 %v3928_v16  ;;  %v3962_v52 = vld [vmem:[%s5179_s1 + $0x118] sm:$0xff]   ;;  %v3964_v54 = vld [vmem:[%s5179_s1 + $0x160] sm:$0xff]   ;;  %v3968_v58 = vld [vmem:[%s5179_s1 + $0x168] sm:$0xff]  }
  0x12   :  { %3546 = vmatprep.subr.bf16.mxu1 %v3929_v17  ;;  %v3963_v53 = vld [vmem:[%s5179_s1 + $0x198] sm:$0xff]   ;;  %v3965_v55 = vld [vmem:[%s5179_s1 + $0x1e0] sm:$0xff]   ;;  %v3969_v59 = vld [vmem:[%s5179_s1 + $0x1e8] sm:$0xff]  }
  0x13   :  { %v3966_v56 = vld [vmem:[%s5179_s1 + $0x120] sm:$0xff]   ;;  %v3970_v60 = vld [vmem:[%s5179_s1 + $0x128] sm:$0xff]   ;;  %v3972_v62 = vld [vmem:[%s5179_s1 + $0x170] sm:$0xff]  }
  0x14   :  { %3525 = vmatpush3.bf16.msra.mxu0 %v3930_v18  ;;  %v3967_v57 = vld [vmem:[%s5179_s1 + $0x1a0] sm:$0xff]   ;;  %v3971_v61 = vld [vmem:[%s5179_s1 + $0x1a8] sm:$0xff]   ;;  %v3973_v63 = vld [vmem:[%s5179_s1 + $0x1f0] sm:$0xff]  }
  0x15   :  { %3547 = vmatpush3.bf16.msra.mxu1 %v3931_v19  ;;  %3526 = vmatprep.subr.bf16.mxu0 %v3932_v20  ;;  %v3974_v0 = vld [vmem:[%s5179_s1 + $0x130] sm:$0xff]   ;;  %v3976_v2 = vld [vmem:[%s5179_s1 + $0x178] sm:$0xff]   ;;  %v3984_v12 = vld [vmem:[%s5179_s1 + $0x240] sm:$0xff]  }
  0x16   :  { %3548 = vmatprep.subr.bf16.mxu1 %v3933_v21  ;;  %v3975_v1 = vld [vmem:[%s5179_s1 + $0x1b0] sm:$0xff]   ;;  %v3977_v3 = vld [vmem:[%s5179_s1 + $0x1f8] sm:$0xff]   ;;  %v3985_v13 = vld [vmem:[%s5179_s1 + $0x2c0] sm:$0xff]  }
  0x17   :  { %v3978_v4 = vld [vmem:[%s5179_s1 + $0x138] sm:$0xff]   ;;  %v14_v6 = vld [vmem:[%s5180_s0 + $0x10] sm:$0xff]  ;;  %v3986_v14 = vld [vmem:[%s5179_s1 + $0x200] sm:$0xff]  }
  0x18   :  { %3527 = vmatpush3.bf16.msra.mxu0 %v3934_v22  ;;  %v3979_v5 = vld [vmem:[%s5179_s1 + $0x1b8] sm:$0xff]   ;;  %v3195_v7 = vcombine.low %v14_v6, %v14_v6  ;;  %v3196_v8 = vcombine.high %v14_v6, %v14_v6  ;;  %v3987_v15 = vld [vmem:[%s5179_s1 + $0x280] sm:$0xff]   ;;  %v3988_v16 = vld [vmem:[%s5179_s1 + $0x248] sm:$0xff]  }
  0x19   :  { %3549 = vmatpush3.bf16.msra.mxu1 %v3935_v23  ;;  %3528 = vmatprep.subr.bf16.mxu0 %v3936_v24  ;;  %v15_v9 = vld [vmem:[%s5180_s0 + $0x18] sm:$0xff]  ;;  %v3989_v17 = vld [vmem:[%s5179_s1 + $0x2c8] sm:$0xff]   ;;  %v3992_v20 = vld [vmem:[%s5179_s1 + $0x250] sm:$0xff]  }
  0x1a   :  { %3550 = vmatprep.subr.bf16.mxu1 %v3937_v25  ;;  %v3197_v10 = vcombine.low %v15_v9, %v15_v9  ;;  %v3198_v11 = vcombine.high %v15_v9, %v15_v9  ;;  %v3990_v18 = vld [vmem:[%s5179_s1 + $0x208] sm:$0xff]   ;;  %v3993_v21 = vld [vmem:[%s5179_s1 + $0x2d0] sm:$0xff]   ;;  %v3996_v24 = vld [vmem:[%s5179_s1 + $0x258] sm:$0xff]  }
  0x1b   :  { %v3991_v19 = vld [vmem:[%s5179_s1 + $0x288] sm:$0xff]   ;;  %v3994_v22 = vld [vmem:[%s5179_s1 + $0x210] sm:$0xff]   ;;  %v3997_v25 = vld [vmem:[%s5179_s1 + $0x2d8] sm:$0xff]  }
  0x1c   :  { %3529 = vmatpush3.bf16.msra.mxu0 %v3938_v26  ;;  %v3995_v23 = vld [vmem:[%s5179_s1 + $0x290] sm:$0xff]   ;;  %v3998_v26 = vld [vmem:[%s5179_s1 + $0x218] sm:$0xff]   ;;  %v4004_v32 = vld [vmem:[%s5179_s1 + $0x268] sm:$0xff]  }
  0x1d   :  { %3551 = vmatpush3.bf16.msra.mxu1 %v3939_v27  ;;  %3530 = vmatprep.subr.bf16.mxu0 %v3940_v28  ;;  %v3999_v27 = vld [vmem:[%s5179_s1 + $0x298] sm:$0xff]   ;;  %v4000_v28 = vld [vmem:[%s5179_s1 + $0x260] sm:$0xff]   ;;  %v4005_v33 = vld [vmem:[%s5179_s1 + $0x2e8] sm:$0xff]  }
  0x1e   :  { %3552 = vmatprep.subr.bf16.mxu1 %v3941_v29  ;;  %v4001_v29 = vld [vmem:[%s5179_s1 + $0x2e0] sm:$0xff]   ;;  %v4007_v35 = vld [vmem:[%s5179_s1 + $0x2a8] sm:$0xff]   ;;  %v4009_v37 = vld [vmem:[%s5179_s1 + $0x2f0] sm:$0xff]  }
  0x1f   :  { %v4040_v6 = vld [vmem:[%s5179_s1 + $0x368] sm:$0xff]  }
  0x20   :  { %3531 = vmatpush3.bf16.msra.mxu0 %v3942_v30  ;;  %v4002_v30 = vld [vmem:[%s5179_s1 + $0x220] sm:$0xff]   ;;  %v4043_v9 = vld [vmem:[%s5179_s1 + $0x3a8] sm:$0xff]  }
  0x21   :  { %3553 = vmatpush3.bf16.msra.mxu1 %v3943_v31  ;;  %3560 = vmatprep.subr.bf16.mxu0 %v3948_v38  ;;  %v4003_v31 = vld [vmem:[%s5179_s1 + $0x2a0] sm:$0xff]   ;;  %v4010_v38 = vld [vmem:[%s5179_s1 + $0x230] sm:$0xff]  }
  0x22   :  { %3582 = vmatprep.subr.bf16.mxu1 %v3949_v39  ;;  %v4011_v39 = vld [vmem:[%s5179_s1 + $0x2b0] sm:$0xff]  }
  0x23   :  { %2493 = vmatmul.mubr.bf16.vlgmr.msra.gmra.mrb[0].mxu0 %v3191_v34  ;;  %v4006_v34 = vld [vmem:[%s5179_s1 + $0x228] sm:$0xff]  }
  0x24   :  { %2533 = vmatmul.mubr.bf16.vlgmr.msra.gmra.mrb[0].mxu1 %v3193_v36  ;;  %3561 = vmatpush3.bf16.msra.mxu0 %v3950_v40  ;;  %v4008_v36 = vld [vmem:[%s5179_s1 + $0x270] sm:$0xff]   ;;  %v4012_v40 = vld [vmem:[%s5179_s1 + $0x278] sm:$0xff]  }
  0x25   :  { %3583 = vmatpush3.bf16.msra.mxu1 %v3951_v41  ;;  %3562 = vmatprep.subr.bf16.mxu0 %v3952_v42  ;;  %v4013_v41 = vld [vmem:[%s5179_s1 + $0x2f8] sm:$0xff]  }
  0x26   :  { %3584 = vmatprep.subr.bf16.mxu1 %v3953_v43  ;;  %2572 = vmatprep.mubr.bf16.mxu0 %v3196_v8  ;;  %v4014_v42 = vld [vmem:[%s5179_s1 + $0x238] sm:$0xff]   ;;  %v4042_v8 = vld [vmem:[%s5179_s1 + $0x328] sm:$0xff]  }
  0x27   :  { %2612 = vmatprep.mubr.bf16.mxu1 %v3198_v11  ;;  %v4015_v43 = vld [vmem:[%s5179_s1 + $0x2b8] sm:$0xff]   ;;  %v4045_v11 = vld [vmem:[%s5179_s1 + $0x3f0] sm:$0xff]  }
  0x28   :  { %3563 = vmatpush3.bf16.msra.mxu0 %v3954_v44  ;;  %v16_v44 = vld [vmem:[%s5180_s0 + $0x20] sm:$0xff] }
  0x29   :  { %3585 = vmatpush3.bf16.msra.mxu1 %v3955_v45  ;;  %3564 = vmatprep.subr.bf16.mxu0 %v3956_v46  ;;  %v17_v45 = vld [vmem:[%s5180_s0 + $0x28] sm:$0xff]  ;;  %v3199_v46 = vcombine.low %v16_v44, %v16_v44 }
  0x2a   :  { %3586 = vmatprep.subr.bf16.mxu1 %v3957_v47  ;;  %v3200_v47 = vcombine.high %v16_v44, %v16_v44  ;;  %v4076_v44 = vld [vmem:[%s5179_s1 + $0x468] sm:$0xff]  }
  0x2c   :  { %3565 = vmatpush3.bf16.msra.mxu0 %v3958_v48  ;;  %v3201_v48 = vcombine.low %v17_v45, %v17_v45 }
  0x2d   :  { %3587 = vmatpush3.bf16.msra.mxu1 %v3959_v49  ;;  %3566 = vmatprep.subr.bf16.mxu0 %v3960_v50  ;;  %v3202_v49 = vcombine.high %v17_v45, %v17_v45  ;;  %v4020_v50 = vld [vmem:[%s5179_s1 + $0x340] sm:$0xff]   ;;  %v4077_v45 = vld [vmem:[%s5179_s1 + $0x4e8] sm:$0xff]  }
  0x2e   :  { %3588 = vmatprep.subr.bf16.mxu1 %v3961_v51  ;;  %v4021_v51 = vld [vmem:[%s5179_s1 + $0x3c0] sm:$0xff]  }
  0x30   :  { %3567 = vmatpush3.bf16.msra.mxu0 %v3962_v52  ;;  %v4022_v52 = vld [vmem:[%s5179_s1 + $0x300] sm:$0xff]  }
  0x31   :  { %3589 = vmatpush3.bf16.msra.mxu1 %v3963_v53  ;;  %3568 = vmatprep.subr.bf16.mxu0 %v3964_v54  ;;  %v4023_v53 = vld [vmem:[%s5179_s1 + $0x380] sm:$0xff]   ;;  %v4024_v54 = vld [vmem:[%s5179_s1 + $0x348] sm:$0xff]  }
  0x32   :  { %3590 = vmatprep.subr.bf16.mxu1 %v3965_v55  ;;  %v4025_v55 = vld [vmem:[%s5179_s1 + $0x3c8] sm:$0xff]  }
  0x34   :  { %3569 = vmatpush3.bf16.msra.mxu0 %v3966_v56  ;;  %v4026_v56 = vld [vmem:[%s5179_s1 + $0x308] sm:$0xff]  }
  0x35   :  { %3591 = vmatpush3.bf16.msra.mxu1 %v3967_v57  ;;  %3570 = vmatprep.subr.bf16.mxu0 %v3968_v58  ;;  %v4027_v57 = vld [vmem:[%s5179_s1 + $0x388] sm:$0xff]   ;;  %v4028_v58 = vld [vmem:[%s5179_s1 + $0x350] sm:$0xff]  }
  0x36   :  { %3592 = vmatprep.subr.bf16.mxu1 %v3969_v59  ;;  %v4029_v59 = vld [vmem:[%s5179_s1 + $0x3d0] sm:$0xff]  }
  0x38   :  { %3571 = vmatpush3.bf16.msra.mxu0 %v3970_v60  ;;  %v4030_v60 = vld [vmem:[%s5179_s1 + $0x310] sm:$0xff]  }
  0x39   :  { %3593 = vmatpush3.bf16.msra.mxu1 %v3971_v61  ;;  %3572 = vmatprep.subr.bf16.mxu0 %v3972_v62  ;;  %v4031_v61 = vld [vmem:[%s5179_s1 + $0x390] sm:$0xff]   ;;  %v4032_v62 = vld [vmem:[%s5179_s1 + $0x358] sm:$0xff]  }
  0x3a   :  { %3594 = vmatprep.subr.bf16.mxu1 %v3973_v63  ;;  %v4033_v63 = vld [vmem:[%s5179_s1 + $0x3d8] sm:$0xff]  }
  0x3c   :  { %3573 = vmatpush3.bf16.msra.mxu0 %v3974_v0  ;;  %v4034_v0 = vld [vmem:[%s5179_s1 + $0x318] sm:$0xff]  }
  0x3d   :  { %3595 = vmatpush3.bf16.msra.mxu1 %v3975_v1  ;;  %3574 = vmatprep.subr.bf16.mxu0 %v3976_v2  ;;  %v4035_v1 = vld [vmem:[%s5179_s1 + $0x398] sm:$0xff]   ;;  %v4036_v2 = vld [vmem:[%s5179_s1 + $0x360] sm:$0xff]  }
  0x3e   :  { %3596 = vmatprep.subr.bf16.mxu1 %v3977_v3  ;;  %v4037_v3 = vld [vmem:[%s5179_s1 + $0x3e0] sm:$0xff]  }
  0x40   :  { %3575 = vmatpush3.bf16.msra.mxu0 %v3978_v4  ;;  %v4038_v4 = vld [vmem:[%s5179_s1 + $0x320] sm:$0xff]  }
  0x41   :  { %3597 = vmatpush3.bf16.msra.mxu1 %v3979_v5  ;;  %3604 = vmatprep.subr.bf16.mxu0 %v3984_v12  ;;  %v4039_v5 = vld [vmem:[%s5179_s1 + $0x3a0] sm:$0xff]   ;;  %v4046_v12 = vld [vmem:[%s5179_s1 + $0x330] sm:$0xff]  }
  0x42   :  { %3626 = vmatprep.subr.bf16.mxu1 %v3985_v13  ;;  %v4047_v13 = vld [vmem:[%s5179_s1 + $0x3b0] sm:$0xff]  }
  0x43   :  { %2573 = vmatmul.mubr.bf16.vlgmr.msra.gmra.mrb[4].mxu0 %v3195_v7  ;;  %v4041_v7 = vld [vmem:[%s5179_s1 + $0x3e8] sm:$0xff]  }
  0x44   :  { %2613 = vmatmul.mubr.bf16.vlgmr.msra.gmra.mrb[4].mxu1 %v3197_v10  ;;  %3605 = vmatpush3.bf16.msra.mxu0 %v3986_v14  ;;  %v4044_v10 = vld [vmem:[%s5179_s1 + $0x370] sm:$0xff]   ;;  %v4048_v14 = vld [vmem:[%s5179_s1 + $0x378] sm:$0xff]  }
  0x45   :  { %3627 = vmatpush3.bf16.msra.mxu1 %v3987_v15  ;;  %3606 = vmatprep.subr.bf16.mxu0 %v3988_v16  ;;  %v4049_v15 = vld [vmem:[%s5179_s1 + $0x3f8] sm:$0xff]  }
  0x46   :  { %3628 = vmatprep.subr.bf16.mxu1 %v3989_v17  ;;  %2652 = vmatprep.mubr.bf16.mxu0 %v3200_v47  ;;  %v4050_v16 = vld [vmem:[%s5179_s1 + $0x338] sm:$0xff]   ;;  %v4079_v47 = vld [vmem:[%s5179_s1 + $0x4a8] sm:$0xff]  }
  0x47   :  { %2692 = vmatprep.mubr.bf16.mxu1 %v3202_v49  ;;  %v4051_v17 = vld [vmem:[%s5179_s1 + $0x3b8] sm:$0xff]   ;;  %v4081_v49 = vld [vmem:[%s5179_s1 + $0x4f0] sm:$0xff]  }
  0x48   :  { %3607 = vmatpush3.bf16.msra.mxu0 %v3990_v18  ;;  %v18_v18 = vld [vmem:[%s5180_s0 + $0x30] sm:$0xff] }
  0x49   :  { %3629 = vmatpush3.bf16.msra.mxu1 %v3991_v19  ;;  %3608 = vmatprep.subr.bf16.mxu0 %v3992_v20  ;;  %v19_v19 = vld [vmem:[%s5180_s0 + $0x38] sm:$0xff]  ;;  %v3203_v20 = vcombine.low %v18_v18, %v18_v18 }
  0x4a   :  { %3630 = vmatprep.subr.bf16.mxu1 %v3993_v21  ;;  %v3204_v21 = vcombine.high %v18_v18, %v18_v18  ;;  %v4112_v18 = vld [vmem:[%s5179_s1 + $0x568] sm:$0xff]  }
  0x4c   :  { %3609 = vmatpush3.bf16.msra.mxu0 %v3994_v22  ;;  %v3205_v22 = vcombine.low %v19_v19, %v19_v19 }
  0x4d   :  { %3631 = vmatpush3.bf16.msra.mxu1 %v3995_v23  ;;  %3610 = vmatprep.subr.bf16.mxu0 %v3996_v24  ;;  %v4056_v23 = vld [vmem:[%s5179_s1 + $0x440] sm:$0xff]   ;;  %v3206_v24 = vcombine.high %v19_v19, %v19_v19  ;;  %v4113_v19 = vld [vmem:[%s5179_s1 + $0x5e8] sm:$0xff]  }
  0x4e   :  { %3632 = vmatprep.subr.bf16.mxu1 %v3997_v25  ;;  %v4057_v25 = vld [vmem:[%s5179_s1 + $0x4c0] sm:$0xff]  }
  0x50   :  { %3611 = vmatpush3.bf16.msra.mxu0 %v3998_v26  ;;  %v4058_v26 = vld [vmem:[%s5179_s1 + $0x400] sm:$0xff]  }
  0x51   :  { %3633 = vmatpush3.bf16.msra.mxu1 %v3999_v27  ;;  %3612 = vmatprep.subr.bf16.mxu0 %v4000_v28  ;;  %v4059_v27 = vld [vmem:[%s5179_s1 + $0x480] sm:$0xff]   ;;  %v4060_v28 = vld [vmem:[%s5179_s1 + $0x448] sm:$0xff]  }
  0x52   :  { %3634 = vmatprep.subr.bf16.mxu1 %v4001_v29  ;;  %v4061_v29 = vld [vmem:[%s5179_s1 + $0x4c8] sm:$0xff]  }
  0x54   :  { %3613 = vmatpush3.bf16.msra.mxu0 %v4002_v30  ;;  %v4062_v30 = vld [vmem:[%s5179_s1 + $0x408] sm:$0xff]  }
  0x55   :  { %3635 = vmatpush3.bf16.msra.mxu1 %v4003_v31  ;;  %3614 = vmatprep.subr.bf16.mxu0 %v4004_v32  ;;  %v4063_v31 = vld [vmem:[%s5179_s1 + $0x488] sm:$0xff]   ;;  %v4064_v32 = vld [vmem:[%s5179_s1 + $0x450] sm:$0xff]  }
  0x56   :  { %3636 = vmatprep.subr.bf16.mxu1 %v4005_v33  ;;  %v4065_v33 = vld [vmem:[%s5179_s1 + $0x4d0] sm:$0xff]  }
  0x58   :  { %3615 = vmatpush3.bf16.msra.mxu0 %v4006_v34  ;;  %v4066_v34 = vld [vmem:[%s5179_s1 + $0x410] sm:$0xff]  }
  0x59   :  { %3637 = vmatpush3.bf16.msra.mxu1 %v4007_v35  ;;  %3616 = vmatprep.subr.bf16.mxu0 %v4008_v36  ;;  %v4067_v35 = vld [vmem:[%s5179_s1 + $0x490] sm:$0xff]   ;;  %v4068_v36 = vld [vmem:[%s5179_s1 + $0x458] sm:$0xff]  }
  0x5a   :  { %3638 = vmatprep.subr.bf16.mxu1 %v4009_v37  ;;  %v4069_v37 = vld [vmem:[%s5179_s1 + $0x4d8] sm:$0xff]  }
  0x5c   :  { %3617 = vmatpush3.bf16.msra.mxu0 %v4010_v38  ;;  %v4070_v38 = vld [vmem:[%s5179_s1 + $0x418] sm:$0xff]  }
  0x5d   :  { %3639 = vmatpush3.bf16.msra.mxu1 %v4011_v39  ;;  %3618 = vmatprep.subr.bf16.mxu0 %v4012_v40  ;;  %v4071_v39 = vld [vmem:[%s5179_s1 + $0x498] sm:$0xff]   ;;  %v4072_v40 = vld [vmem:[%s5179_s1 + $0x460] sm:$0xff]  }
  0x5e   :  { %3640 = vmatprep.subr.bf16.mxu1 %v4013_v41  ;;  %v4073_v41 = vld [vmem:[%s5179_s1 + $0x4e0] sm:$0xff]  }
  0x60   :  { %3619 = vmatpush3.bf16.msra.mxu0 %v4014_v42  ;;  %v4074_v42 = vld [vmem:[%s5179_s1 + $0x420] sm:$0xff]  }
  0x61   :  { %3641 = vmatpush3.bf16.msra.mxu1 %v4015_v43  ;;  %3648 = vmatprep.subr.bf16.mxu0 %v4020_v50  ;;  %v4075_v43 = vld [vmem:[%s5179_s1 + $0x4a0] sm:$0xff]   ;;  %v4082_v50 = vld [vmem:[%s5179_s1 + $0x430] sm:$0xff]  }
  0x62   :  { %3670 = vmatprep.subr.bf16.mxu1 %v4021_v51  ;;  %v4083_v51 = vld [vmem:[%s5179_s1 + $0x4b0] sm:$0xff]  }
  0x63   :  { %2653 = vmatmul.mubr.bf16.vlgmr.msra.gmra.mrb[8].mxu0 %v3199_v46  ;;  %v4078_v46 = vld [vmem:[%s5179_s1 + $0x428] sm:$0xff]  }
  0x64   :  { %2693 = vmatmul.mubr.bf16.vlgmr.msra.gmra.mrb[8].mxu1 %v3201_v48  ;;  %3649 = vmatpush3.bf16.msra.mxu0 %v4022_v52  ;;  %v4080_v48 = vld [vmem:[%s5179_s1 + $0x470] sm:$0xff]   ;;  %v4084_v52 = vld [vmem:[%s5179_s1 + $0x478] sm:$0xff]  }
  0x65   :  { %3671 = vmatpush3.bf16.msra.mxu1 %v4023_v53  ;;  %3650 = vmatprep.subr.bf16.mxu0 %v4024_v54  ;;  %v4085_v53 = vld [vmem:[%s5179_s1 + $0x4f8] sm:$0xff]  }
  0x66   :  { %3672 = vmatprep.subr.bf16.mxu1 %v4025_v55  ;;  %2732 = vmatprep.mubr.bf16.mxu0 %v3204_v21  ;;  %v4086_v54 = vld [vmem:[%s5179_s1 + $0x438] sm:$0xff]   ;;  %v4115_v21 = vld [vmem:[%s5179_s1 + $0x5a8] sm:$0xff]  }
  0x67   :  { %2772 = vmatprep.mubr.bf16.mxu1 %v3206_v24  ;;  %v4087_v55 = vld [vmem:[%s5179_s1 + $0x4b8] sm:$0xff]   ;;  %v4118_v24 = vld [vmem:[%s5179_s1 + $0x530] sm:$0xff]  }
  0x68   :  { %3651 = vmatpush3.bf16.msra.mxu0 %v4026_v56  ;;  %v20_v56 = vld [vmem:[%s5180_s0 + $0x40] sm:$0xff] }
  0x69   :  { %3673 = vmatpush3.bf16.msra.mxu1 %v4027_v57  ;;  %3652 = vmatprep.subr.bf16.mxu0 %v4028_v58  ;;  %v3207_v57 = vcombine.low %v20_v56, %v20_v56  ;;  %v3208_v58 = vcombine.high %v20_v56, %v20_v56  ;;  %v4148_v56 = vld [vmem:[%s5179_s1 + $0x668] sm:$0xff]  }
  0x6a   :  { %3674 = vmatprep.subr.bf16.mxu1 %v4029_v59  ;;  %v21_v59 = vld [vmem:[%s5180_s0 + $0x48] sm:$0xff] }
  0x6c   :  { %3653 = vmatpush3.bf16.msra.mxu0 %v4030_v60  ;;  %v3209_v60 = vcombine.low %v21_v59, %v21_v59 }
  0x6d   :  { %3675 = vmatpush3.bf16.msra.mxu1 %v4031_v61  ;;  %3654 = vmatprep.subr.bf16.mxu0 %v4032_v62  ;;  %v3210_v61 = vcombine.high %v21_v59, %v21_v59  ;;  %v4092_v62 = vld [vmem:[%s5179_s1 + $0x540] sm:$0xff]   ;;  %v4151_v59 = vld [vmem:[%s5179_s1 + $0x6a8] sm:$0xff]  }
  0x6e   :  { %3676 = vmatprep.subr.bf16.mxu1 %v4033_v63  ;;  %v4093_v63 = vld [vmem:[%s5179_s1 + $0x5c0] sm:$0xff]  }
  0x70   :  { %3655 = vmatpush3.bf16.msra.mxu0 %v4034_v0  ;;  %v4094_v0 = vld [vmem:[%s5179_s1 + $0x500] sm:$0xff]  }
  0x71   :  { %3677 = vmatpush3.bf16.msra.mxu1 %v4035_v1  ;;  %3656 = vmatprep.subr.bf16.mxu0 %v4036_v2  ;;  %v4095_v1 = vld [vmem:[%s5179_s1 + $0x580] sm:$0xff]   ;;  %v4096_v2 = vld [vmem:[%s5179_s1 + $0x548] sm:$0xff]  }
  0x72   :  { %3678 = vmatprep.subr.bf16.mxu1 %v4037_v3  ;;  %v4097_v3 = vld [vmem:[%s5179_s1 + $0x5c8] sm:$0xff]  }
  0x74   :  { %3657 = vmatpush3.bf16.msra.mxu0 %v4038_v4  ;;  %v4098_v4 = vld [vmem:[%s5179_s1 + $0x508] sm:$0xff]  }
  0x75   :  { %3679 = vmatpush3.bf16.msra.mxu1 %v4039_v5  ;;  %3658 = vmatprep.subr.bf16.mxu0 %v4040_v6  ;;  %v4099_v5 = vld [vmem:[%s5179_s1 + $0x588] sm:$0xff]   ;;  %v4100_v6 = vld [vmem:[%s5179_s1 + $0x550] sm:$0xff]  }
  0x76   :  { %3680 = vmatprep.subr.bf16.mxu1 %v4041_v7  ;;  %v4101_v7 = vld [vmem:[%s5179_s1 + $0x5d0] sm:$0xff]  }
  0x78   :  { %3659 = vmatpush3.bf16.msra.mxu0 %v4042_v8  ;;  %v4102_v8 = vld [vmem:[%s5179_s1 + $0x510] sm:$0xff]  }
  0x79   :  { %3681 = vmatpush3.bf16.msra.mxu1 %v4043_v9  ;;  %3660 = vmatprep.subr.bf16.mxu0 %v4044_v10  ;;  %v4103_v9 = vld [vmem:[%s5179_s1 + $0x590] sm:$0xff]   ;;  %v4104_v10 = vld [vmem:[%s5179_s1 + $0x558] sm:$0xff]  }
  0x7a   :  { %3682 = vmatprep.subr.bf16.mxu1 %v4045_v11  ;;  %v4105_v11 = vld [vmem:[%s5179_s1 + $0x5d8] sm:$0xff]  }
  0x7c   :  { %3661 = vmatpush3.bf16.msra.mxu0 %v4046_v12  ;;  %v4106_v12 = vld [vmem:[%s5179_s1 + $0x518] sm:$0xff]  }
  0x7d   :  { %3683 = vmatpush3.bf16.msra.mxu1 %v4047_v13  ;;  %3662 = vmatprep.subr.bf16.mxu0 %v4048_v14  ;;  %v4107_v13 = vld [vmem:[%s5179_s1 + $0x598] sm:$0xff]   ;;  %v4108_v14 = vld [vmem:[%s5179_s1 + $0x560] sm:$0xff]  }
  0x7e   :  { %3684 = vmatprep.subr.bf16.mxu1 %v4049_v15  ;;  %v4109_v15 = vld [vmem:[%s5179_s1 + $0x5e0] sm:$0xff]  }
  0x80   :  { %3663 = vmatpush3.bf16.msra.mxu0 %v4050_v16  ;;  %v4110_v16 = vld [vmem:[%s5179_s1 + $0x520] sm:$0xff]  }
  0x81   :  { %3685 = vmatpush3.bf16.msra.mxu1 %v4051_v17  ;;  %3692 = vmatprep.subr.bf16.mxu0 %v4056_v23  ;;  %v4111_v17 = vld [vmem:[%s5179_s1 + $0x5a0] sm:$0xff]   ;;  %v4117_v23 = vld [vmem:[%s5179_s1 + $0x5f0] sm:$0xff]  }
  0x82   :  { %3714 = vmatprep.subr.bf16.mxu1 %v4057_v25  ;;  %v4119_v25 = vld [vmem:[%s5179_s1 + $0x5b0] sm:$0xff]  }
  0x83   :  { %2733 = vmatmul.mubr.bf16.vlgmr.msra.gmra.mrb[12].mxu0 %v3203_v20  ;;  %v4114_v20 = vld [vmem:[%s5179_s1 + $0x528] sm:$0xff]  }
  0x84   :  { %2773 = vmatmul.mubr.bf16.vlgmr.msra.gmra.mrb[12].mxu1 %v3205_v22  ;;  %3693 = vmatpush3.bf16.msra.mxu0 %v4058_v26  ;;  %v4116_v22 = vld [vmem:[%s5179_s1 + $0x570] sm:$0xff]   ;;  %v4120_v26 = vld [vmem:[%s5179_s1 + $0x578] sm:$0xff]  }
  0x85   :  { %3715 = vmatpush3.bf16.msra.mxu1 %v4059_v27  ;;  %3694 = vmatprep.subr.bf16.mxu0 %v4060_v28  ;;  %v4121_v27 = vld [vmem:[%s5179_s1 + $0x5f8] sm:$0xff]  }
  0x86   :  { %3716 = vmatprep.subr.bf16.mxu1 %v4061_v29  ;;  %2812 = vmatprep.mubr.bf16.mxu0 %v3208_v58  ;;  %v4122_v28 = vld [vmem:[%s5179_s1 + $0x538] sm:$0xff]   ;;  %v4150_v58 = vld [vmem:[%s5179_s1 + $0x628] sm:$0xff]  }
  0x87   :  { %2852 = vmatprep.mubr.bf16.mxu1 %v3210_v61  ;;  %v4123_v29 = vld [vmem:[%s5179_s1 + $0x5b8] sm:$0xff]   ;;  %v4153_v61 = vld [vmem:[%s5179_s1 + $0x6f0] sm:$0xff]  }
  0x88   :  { %3695 = vmatpush3.bf16.msra.mxu0 %v4062_v30  ;;  %v22_v30 = vld [vmem:[%s5180_s0 + $0x50] sm:$0xff] }
  0x89   :  { %3717 = vmatpush3.bf16.msra.mxu1 %v4063_v31  ;;  %3696 = vmatprep.subr.bf16.mxu0 %v4064_v32  ;;  %v23_v31 = vld [vmem:[%s5180_s0 + $0x58] sm:$0xff]  ;;  %v3211_v32 = vcombine.low %v22_v30, %v22_v30 }
  0x8a   :  { %3718 = vmatprep.subr.bf16.mxu1 %v4065_v33  ;;  %v3212_v33 = vcombine.high %v22_v30, %v22_v30  ;;  %v4183_v30 = vld [vmem:[%s5179_s1 + $0x7a0] sm:$0xff]  }
  0x8c   :  { %3697 = vmatpush3.bf16.msra.mxu0 %v4066_v34  ;;  %v3213_v34 = vcombine.low %v23_v31, %v23_v31 }
  0x8d   :  { %3719 = vmatpush3.bf16.msra.mxu1 %v4067_v35  ;;  %3698 = vmatprep.subr.bf16.mxu0 %v4068_v36  ;;  %v3214_v35 = vcombine.high %v23_v31, %v23_v31  ;;  %v4128_v36 = vld [vmem:[%s5179_s1 + $0x640] sm:$0xff]  }
  0x8e   :  { %3720 = vmatprep.subr.bf16.mxu1 %v4069_v37  ;;  %v4129_v37 = vld [vmem:[%s5179_s1 + $0x6c0] sm:$0xff]  }
  0x90   :  { %3699 = vmatpush3.bf16.msra.mxu0 %v4070_v38  ;;  %v4130_v38 = vld [vmem:[%s5179_s1 + $0x600] sm:$0xff]  }
  0x91   :  { %3721 = vmatpush3.bf16.msra.mxu1 %v4071_v39  ;;  %3700 = vmatprep.subr.bf16.mxu0 %v4072_v40  ;;  %v4131_v39 = vld [vmem:[%s5179_s1 + $0x680] sm:$0xff]   ;;  %v4132_v40 = vld [vmem:[%s5179_s1 + $0x648] sm:$0xff]  }
  0x92   :  { %3722 = vmatprep.subr.bf16.mxu1 %v4073_v41  ;;  %v4133_v41 = vld [vmem:[%s5179_s1 + $0x6c8] sm:$0xff]  }
  0x94   :  { %3701 = vmatpush3.bf16.msra.mxu0 %v4074_v42  ;;  %v4134_v42 = vld [vmem:[%s5179_s1 + $0x608] sm:$0xff]  }
  0x95   :  { %3723 = vmatpush3.bf16.msra.mxu1 %v4075_v43  ;;  %3702 = vmatprep.subr.bf16.mxu0 %v4076_v44  ;;  %v4135_v43 = vld [vmem:[%s5179_s1 + $0x688] sm:$0xff]   ;;  %v4136_v44 = vld [vmem:[%s5179_s1 + $0x650] sm:$0xff]  }
  0x96   :  { %3724 = vmatprep.subr.bf16.mxu1 %v4077_v45  ;;  %v4137_v45 = vld [vmem:[%s5179_s1 + $0x6d0] sm:$0xff]  }
  0x98   :  { %3703 = vmatpush3.bf16.msra.mxu0 %v4078_v46  ;;  %v4138_v46 = vld [vmem:[%s5179_s1 + $0x610] sm:$0xff]  }
  0x99   :  { %3725 = vmatpush3.bf16.msra.mxu1 %v4079_v47  ;;  %3704 = vmatprep.subr.bf16.mxu0 %v4080_v48  ;;  %v4139_v47 = vld [vmem:[%s5179_s1 + $0x690] sm:$0xff]   ;;  %v4140_v48 = vld [vmem:[%s5179_s1 + $0x658] sm:$0xff]  }
  0x9a   :  { %3726 = vmatprep.subr.bf16.mxu1 %v4081_v49  ;;  %v4141_v49 = vld [vmem:[%s5179_s1 + $0x6d8] sm:$0xff]  }
  0x9c   :  { %3705 = vmatpush3.bf16.msra.mxu0 %v4082_v50  ;;  %v4142_v50 = vld [vmem:[%s5179_s1 + $0x618] sm:$0xff]  }
  0x9d   :  { %3727 = vmatpush3.bf16.msra.mxu1 %v4083_v51  ;;  %3706 = vmatprep.subr.bf16.mxu0 %v4084_v52  ;;  %v4143_v51 = vld [vmem:[%s5179_s1 + $0x698] sm:$0xff]   ;;  %v4144_v52 = vld [vmem:[%s5179_s1 + $0x660] sm:$0xff]  }
  0x9e   :  { %3728 = vmatprep.subr.bf16.mxu1 %v4085_v53  ;;  %v4145_v53 = vld [vmem:[%s5179_s1 + $0x6e0] sm:$0xff]  }
  0xa0   :  { %3707 = vmatpush3.bf16.msra.mxu0 %v4086_v54  ;;  %v4146_v54 = vld [vmem:[%s5179_s1 + $0x620] sm:$0xff]  }
  0xa1   :  { %3729 = vmatpush3.bf16.msra.mxu1 %v4087_v55  ;;  %3736 = vmatprep.subr.bf16.mxu0 %v4092_v62  ;;  %v4147_v55 = vld [vmem:[%s5179_s1 + $0x6a0] sm:$0xff]   ;;  %v4154_v62 = vld [vmem:[%s5179_s1 + $0x630] sm:$0xff]  }
  0xa2   :  { %3758 = vmatprep.subr.bf16.mxu1 %v4093_v63  ;;  %v4155_v63 = vld [vmem:[%s5179_s1 + $0x6b0] sm:$0xff]  }
  0xa3   :  { %2813 = vmatmul.mubr.bf16.vlgmr.msra.gmra.mrb[16].mxu0 %v3207_v57  ;;  %v4149_v57 = vld [vmem:[%s5179_s1 + $0x6e8] sm:$0xff]  }
  0xa4   :  { %2853 = vmatmul.mubr.bf16.vlgmr.msra.gmra.mrb[16].mxu1 %v3209_v60  ;;  %3737 = vmatpush3.bf16.msra.mxu0 %v4094_v0  ;;  %v4152_v60 = vld [vmem:[%s5179_s1 + $0x670] sm:$0xff]   ;;  %v4156_v0 = vld [vmem:[%s5179_s1 + $0x678] sm:$0xff]  }
  0xa5   :  { %3759 = vmatpush3.bf16.msra.mxu1 %v4095_v1  ;;  %3738 = vmatprep.subr.bf16.mxu0 %v4096_v2  ;;  %v4157_v1 = vld [vmem:[%s5179_s1 + $0x6f8] sm:$0xff]  }
  0xa6   :  { %3760 = vmatprep.subr.bf16.mxu1 %v4097_v3  ;;  %2892 = vmatprep.mubr.bf16.mxu0 %v3212_v33  ;;  %v4158_v2 = vld [vmem:[%s5179_s1 + $0x638] sm:$0xff]   ;;  %v4184_v33 = vld [vmem:[%s5179_s1 + $0x768] sm:$0xff]  }
  0xa7   :  { %2932 = vmatprep.mubr.bf16.mxu1 %v3214_v35  ;;  %v4159_v3 = vld [vmem:[%s5179_s1 + $0x6b8] sm:$0xff]  }
  0xa8   :  { %3739 = vmatpush3.bf16.msra.mxu0 %v4098_v4  ;;  %v24_v4 = vld [vmem:[%s5180_s0 + $0x60] sm:$0xff] }
  0xa9   :  { %3761 = vmatpush3.bf16.msra.mxu1 %v4099_v5  ;;  %3740 = vmatprep.subr.bf16.mxu0 %v4100_v6  ;;  %v25_v5 = vld [vmem:[%s5180_s0 + $0x68] sm:$0xff]  ;;  %v3215_v6 = vcombine.low %v24_v4, %v24_v4 }
  0xaa   :  { %3762 = vmatprep.subr.bf16.mxu1 %v4101_v7  ;;  %v3216_v7 = vcombine.high %v24_v4, %v24_v4  ;;  %v4209_v4 = vld [vmem:[%s5179_s1 + $0x8d0] sm:$0xff]  }
  0xac   :  { %3741 = vmatpush3.bf16.msra.mxu0 %v4102_v8  ;;  %v3217_v8 = vcombine.low %v25_v5, %v25_v5 }
  0xad   :  { %3763 = vmatpush3.bf16.msra.mxu1 %v4103_v9  ;;  %3742 = vmatprep.subr.bf16.mxu0 %v4104_v10  ;;  %v4164_v9 = vld [vmem:[%s5179_s1 + $0x740] sm:$0xff]   ;;  %v3218_v10 = vcombine.high %v25_v5, %v25_v5  ;;  %v4210_v5 = vld [vmem:[%s5179_s1 + $0x810] sm:$0xff]  }
  0xae   :  { %3764 = vmatprep.subr.bf16.mxu1 %v4105_v11  ;;  %v4165_v11 = vld [vmem:[%s5179_s1 + $0x7c0] sm:$0xff]  }
  0xb0   :  { %3743 = vmatpush3.bf16.msra.mxu0 %v4106_v12  ;;  %v4166_v12 = vld [vmem:[%s5179_s1 + $0x700] sm:$0xff]  }
  0xb1   :  { %3765 = vmatpush3.bf16.msra.mxu1 %v4107_v13  ;;  %3744 = vmatprep.subr.bf16.mxu0 %v4108_v14  ;;  %v4167_v13 = vld [vmem:[%s5179_s1 + $0x780] sm:$0xff]   ;;  %v4168_v14 = vld [vmem:[%s5179_s1 + $0x748] sm:$0xff]  }
  0xb2   :  { %3766 = vmatprep.subr.bf16.mxu1 %v4109_v15  ;;  %v4169_v15 = vld [vmem:[%s5179_s1 + $0x7c8] sm:$0xff]  }
  0xb4   :  { %3745 = vmatpush3.bf16.msra.mxu0 %v4110_v16  ;;  %v4170_v16 = vld [vmem:[%s5179_s1 + $0x708] sm:$0xff]  }
  0xb5   :  { %3767 = vmatpush3.bf16.msra.mxu1 %v4111_v17  ;;  %3746 = vmatprep.subr.bf16.mxu0 %v4112_v18  ;;  %v4171_v17 = vld [vmem:[%s5179_s1 + $0x788] sm:$0xff]   ;;  %v4172_v18 = vld [vmem:[%s5179_s1 + $0x750] sm:$0xff]  }
  0xb6   :  { %3768 = vmatprep.subr.bf16.mxu1 %v4113_v19  ;;  %v4173_v19 = vld [vmem:[%s5179_s1 + $0x7d0] sm:$0xff]  }
  0xb8   :  { %3747 = vmatpush3.bf16.msra.mxu0 %v4114_v20  ;;  %v4174_v20 = vld [vmem:[%s5179_s1 + $0x710] sm:$0xff]  }
  0xb9   :  { %3769 = vmatpush3.bf16.msra.mxu1 %v4115_v21  ;;  %3748 = vmatprep.subr.bf16.mxu0 %v4116_v22  ;;  %v4175_v21 = vld [vmem:[%s5179_s1 + $0x790] sm:$0xff]   ;;  %v4176_v22 = vld [vmem:[%s5179_s1 + $0x758] sm:$0xff]  }
  0xba   :  { %3770 = vmatprep.subr.bf16.mxu1 %v4117_v23  ;;  %v4177_v23 = vld [vmem:[%s5179_s1 + $0x7d8] sm:$0xff]  }
  0xbc   :  { %3749 = vmatpush3.bf16.msra.mxu0 %v4118_v24  ;;  %v4178_v24 = vld [vmem:[%s5179_s1 + $0x718] sm:$0xff]  }
  0xbd   :  { %3771 = vmatpush3.bf16.msra.mxu1 %v4119_v25  ;;  %3750 = vmatprep.subr.bf16.mxu0 %v4120_v26  ;;  %v4179_v25 = vld [vmem:[%s5179_s1 + $0x798] sm:$0xff]   ;;  %v4180_v26 = vld [vmem:[%s5179_s1 + $0x760] sm:$0xff]  }
  0xbe   :  { %3772 = vmatprep.subr.bf16.mxu1 %v4121_v27  ;;  %v4181_v27 = vld [vmem:[%s5179_s1 + $0x7e0] sm:$0xff]  }
  0xc0   :  { %3751 = vmatpush3.bf16.msra.mxu0 %v4122_v28  ;;  %v4182_v28 = vld [vmem:[%s5179_s1 + $0x720] sm:$0xff]  }
  0xc1   :  { %3773 = vmatpush3.bf16.msra.mxu1 %v4123_v29  ;;  %3780 = vmatprep.subr.bf16.mxu0 %v4128_v36  ;;  %v4185_v36 = vld [vmem:[%s5179_s1 + $0x7e8] sm:$0xff]  }
  0xc2   :  { %3802 = vmatprep.subr.bf16.mxu1 %v4129_v37 }
  0xc3   :  { %2893 = vmatmul.mubr.bf16.vlgmr.msra.gmra.mrb[20].mxu0 %v3211_v32 }
  0xc4   :  { %2933 = vmatmul.mubr.bf16.vlgmr.msra.gmra.mrb[20].mxu1 %v3213_v34  ;;  %3781 = vmatpush3.bf16.msra.mxu0 %v4130_v38 }
  0xc5   :  { %3803 = vmatpush3.bf16.msra.mxu1 %v4131_v39  ;;  %3782 = vmatprep.subr.bf16.mxu0 %v4132_v40  ;;  %v4186_v40 = vld [vmem:[%s5179_s1 + $0x728] sm:$0xff]  }
  0xc6   :  { %3804 = vmatprep.subr.bf16.mxu1 %v4133_v41  ;;  %2972 = vmatprep.mubr.bf16.mxu0 %v3216_v7  ;;  %v4212_v7 = vld [vmem:[%s5179_s1 + $0x858] sm:$0xff]  }
  0xc7   :  { %3012 = vmatprep.mubr.bf16.mxu1 %v3218_v10  ;;  %v4215_v10 = vld [vmem:[%s5179_s1 + $0x898] sm:$0xff]  }
  0xc8   :  { %3783 = vmatpush3.bf16.msra.mxu0 %v4134_v42 }
  0xc9   :  { %3805 = vmatpush3.bf16.msra.mxu1 %v4135_v43  ;;  %3784 = vmatprep.subr.bf16.mxu0 %v4136_v44  ;;  %v4187_v43 = vld [vmem:[%s5179_s1 + $0x7a8] sm:$0xff]  }
  0xca   :  { %3806 = vmatprep.subr.bf16.mxu1 %v4137_v45  ;;  %v4188_v45 = vld [vmem:[%s5179_s1 + $0x770] sm:$0xff]  }
  0xcc   :  { %3785 = vmatpush3.bf16.msra.mxu0 %v4138_v46  ;;  %v4189_v46 = vld [vmem:[%s5179_s1 + $0x7f0] sm:$0xff]  }
  0xcd   :  { %3807 = vmatpush3.bf16.msra.mxu1 %v4139_v47  ;;  %3786 = vmatprep.subr.bf16.mxu0 %v4140_v48  ;;  %v4190_v47 = vld [vmem:[%s5179_s1 + $0x730] sm:$0xff]  }
  0xce   :  { %3808 = vmatprep.subr.bf16.mxu1 %v4141_v49  ;;  %v4191_v48 = vld [vmem:[%s5179_s1 + $0x7b0] sm:$0xff]   ;;  %v4192_v49 = vld [vmem:[%s5179_s1 + $0x778] sm:$0xff]  }
  0xd0   :  { %3787 = vmatpush3.bf16.msra.mxu0 %v4142_v50  ;;  %v4193_v50 = vld [vmem:[%s5179_s1 + $0x7f8] sm:$0xff]  }
  0xd1   :  { %3809 = vmatpush3.bf16.msra.mxu1 %v4143_v51  ;;  %3788 = vmatprep.subr.bf16.mxu0 %v4144_v52  ;;  %v4194_v51 = vld [vmem:[%s5179_s1 + $0x738] sm:$0xff]  }
  0xd2   :  { %3810 = vmatprep.subr.bf16.mxu1 %v4145_v53  ;;  %v4195_v52 = vld [vmem:[%s5179_s1 + $0x7b8] sm:$0xff]   ;;  %v26_v53 = vld [vmem:[%s5180_s0 + $0x70] sm:$0xff] }
  0xd4   :  { %3789 = vmatpush3.bf16.msra.mxu0 %v4146_v54  ;;  %v27_v54 = vld [vmem:[%s5180_s0 + $0x78] sm:$0xff] }
  0xd5   :  { %3811 = vmatpush3.bf16.msra.mxu1 %v4147_v55  ;;  %3790 = vmatprep.subr.bf16.mxu0 %v4148_v56  ;;  %v3219_v55 = vcombine.low %v26_v53, %v26_v53  ;;  %v3220_v56 = vcombine.high %v26_v53, %v26_v53 }
  0xd6   :  { %3812 = vmatprep.subr.bf16.mxu1 %v4149_v57  ;;  %v3221_v57 = vcombine.low %v27_v54, %v27_v54 }
  0xd8   :  { %3791 = vmatpush3.bf16.msra.mxu0 %v4150_v58  ;;  %v4200_v58 = vld [vmem:[%s5179_s1 + $0x840] sm:$0xff]  }
  0xd9   :  { %3813 = vmatpush3.bf16.msra.mxu1 %v4151_v59  ;;  %3792 = vmatprep.subr.bf16.mxu0 %v4152_v60  ;;  %v3222_v59 = vcombine.high %v27_v54, %v27_v54  ;;  %v4201_v60 = vld [vmem:[%s5179_s1 + $0x8c0] sm:$0xff]  }
  0xda   :  { %3814 = vmatprep.subr.bf16.mxu1 %v4153_v61  ;;  %v4202_v61 = vld [vmem:[%s5179_s1 + $0x800] sm:$0xff]  }
  0xdc   :  { %3793 = vmatpush3.bf16.msra.mxu0 %v4154_v62  ;;  %v4203_v62 = vld [vmem:[%s5179_s1 + $0x880] sm:$0xff]  }
  0xdd   :  { %3815 = vmatpush3.bf16.msra.mxu1 %v4155_v63  ;;  %3794 = vmatprep.subr.bf16.mxu0 %v4156_v0  ;;  %v4204_v63 = vld [vmem:[%s5179_s1 + $0x848] sm:$0xff]  }
  0xde   :  { %3816 = vmatprep.subr.bf16.mxu1 %v4157_v1  ;;  %v4205_v0 = vld [vmem:[%s5179_s1 + $0x8c8] sm:$0xff]  }
  0xdf   :  { %v4206_v1 = vld [vmem:[%s5179_s1 + $0x808] sm:$0xff]  }
  0xe0   :  { %3795 = vmatpush3.bf16.msra.mxu0 %v4158_v2  ;;  %v4207_v2 = vld [vmem:[%s5179_s1 + $0x888] sm:$0xff]  }
  0xe1   :  { %3817 = vmatpush3.bf16.msra.mxu1 %v4159_v3  ;;  %3824 = vmatprep.subr.bf16.mxu0 %v4164_v9  ;;  %v4208_v3 = vld [vmem:[%s5179_s1 + $0x850] sm:$0xff]   ;;  %v4214_v9 = vld [vmem:[%s5179_s1 + $0x818] sm:$0xff]  }
  0xe2   :  { %3846 = vmatprep.subr.bf16.mxu1 %v4165_v11  ;;  %v4216_v11 = vld [vmem:[%s5179_s1 + $0x860] sm:$0xff]  }
  0xe3   :  { %2973 = vmatmul.mubr.bf16.vlgmr.msra.gmra.mrb[24].mxu0 %v3215_v6  ;;  %v4211_v6 = vld [vmem:[%s5179_s1 + $0x890] sm:$0xff]  }
  0xe4   :  { %3013 = vmatmul.mubr.bf16.vlgmr.msra.gmra.mrb[24].mxu1 %v3217_v8  ;;  %3825 = vmatpush3.bf16.msra.mxu0 %v4166_v12  ;;  %v4213_v8 = vld [vmem:[%s5179_s1 + $0x8d8] sm:$0xff]   ;;  %v4217_v12 = vld [vmem:[%s5179_s1 + $0x8e0] sm:$0xff]  }
  0xe5   :  { %3847 = vmatpush3.bf16.msra.mxu1 %v4167_v13  ;;  %3826 = vmatprep.subr.bf16.mxu0 %v4168_v14  ;;  %v4218_v13 = vld [vmem:[%s5179_s1 + $0x820] sm:$0xff]  }
  0xe6   :  { %3848 = vmatprep.subr.bf16.mxu1 %v4169_v15  ;;  %3052 = vmatprep.mubr.bf16.mxu0 %v3220_v56  ;;  %v4219_v15 = vld [vmem:[%s5179_s1 + $0x8a0] sm:$0xff]  }
  0xe7   :  { %3092 = vmatprep.mubr.bf16.mxu1 %v3222_v59 }
  0xe8   :  { %3827 = vmatpush3.bf16.msra.mxu0 %v4170_v16 }
  0xe9   :  { %3849 = vmatpush3.bf16.msra.mxu1 %v4171_v17  ;;  %3828 = vmatprep.subr.bf16.mxu0 %v4172_v18  ;;  %v4220_v18 = vld [vmem:[%s5179_s1 + $0x868] sm:$0xff]  }
  0xea   :  { %3850 = vmatprep.subr.bf16.mxu1 %v4173_v19 }
  0xec   :  { %3829 = vmatpush3.bf16.msra.mxu0 %v4174_v20 }
  0xed   :  { %3851 = vmatpush3.bf16.msra.mxu1 %v4175_v21  ;;  %3830 = vmatprep.subr.bf16.mxu0 %v4176_v22  ;;  %v4221_v21 = vld [vmem:[%s5179_s1 + $0x8e8] sm:$0xff]  }
  0xee   :  { %3852 = vmatprep.subr.bf16.mxu1 %v4177_v23 }
  0xf0   :  { %3831 = vmatpush3.bf16.msra.mxu0 %v4178_v24 }
  0xf1   :  { %3853 = vmatpush3.bf16.msra.mxu1 %v4179_v25  ;;  %3832 = vmatprep.subr.bf16.mxu0 %v4180_v26  ;;  %v4222_v26 = vld [vmem:[%s5179_s1 + $0x828] sm:$0xff]  }
  0xf2   :  { %3854 = vmatprep.subr.bf16.mxu1 %v4181_v27 }
  0xf4   :  { %3833 = vmatpush3.bf16.msra.mxu0 %v4182_v28  ;;  %v4223_v28 = vld [vmem:[%s5179_s1 + $0x8a8] sm:$0xff]  }
  0xf5   :  { %3855 = vmatpush3.bf16.msra.mxu1 %v4183_v30  ;;  %3834 = vmatprep.subr.bf16.mxu0 %v4184_v33  ;;  %v4226_v33 = vld [vmem:[%s5179_s1 + $0x830] sm:$0xff]  }
  0xf6   :  { %v3532_v29 = vpop.f32.mrb[0].mxu0  ;;  %3856 = vmatprep.subr.bf16.mxu1 %v4185_v36  ;;  %v4229_v36 = vld [vmem:[%s5179_s1 + $0x8f8] sm:$0xff]  }
  0xf7   :  { %v3554_v31 = vpop.f32.mrb[0].mxu1  ;;  %v3533_v32 = vpop.f32.mrb[1].mxu0 }
  0xf8   :  { %v3534_v34 = vadd.f32 %v3533_v32, %v3532_v29  ;;  %v3555_v35 = vpop.f32.mrb[1].mxu1  ;;  %v3535_v38 = vpop.f32.mrb[2].mxu0  ;;  %3835 = vmatpush3.bf16.msra.mxu0 %v4186_v40  ;;  %v4225_v32 = vld [vmem:[%s5179_s1 + $0x8f0] sm:$0xff]   ;;  %v29_v40 = vld [vmem:[%s5180_s0 + $0x88] sm:$0xff] }
  0xf9   :  { %v3556_v37 = vadd.f32 %v3555_v35, %v3554_v31  ;;  %v3557_v39 = vpop.f32.mrb[2].mxu1  ;;  %v3536_v41 = vpop.f32.mrb[3].mxu0  ;;  %3857 = vmatpush3.bf16.msra.mxu1 %v4187_v43  ;;  %3836 = vmatprep.subr.bf16.mxu0 %v4188_v45  ;;  %v4224_v31 = vld [vmem:[%s5179_s1 + $0x870] sm:$0xff]   ;;  %v4228_v35 = vld [vmem:[%s5179_s1 + $0x878] sm:$0xff]   ;;  %v3225_v43 = vcombine.low %v29_v40, %v29_v40 }
  0xfa   :  { %v3558_v44 = vpop.f32.mrb[3].mxu1  ;;  %3858 = vmatprep.subr.bf16.mxu1 %v4189_v46  ;;  %v4231_v38 = vld [vmem:[%s5179_s1 + $0x8b8] sm:$0xff]   ;;  %v28_v39 = vld [vmem:[%s5180_s0 + $0x80] sm:$0xff] }
  0xfb   :  { %v5038_v42 = vadd.f32 %v3556_v37, %v3534_v34  ;;  %v4227_v34 = vld [vmem:[%s5179_s1 + $0x8b0] sm:$0xff]   ;;  %v4230_v37 = vld [vmem:[%s5179_s1 + $0x838] sm:$0xff]   ;;  %v3223_v41 = vcombine.low %v28_v39, %v28_v39  ;;  %v3226_v44 = vcombine.high %v29_v40, %v29_v40 }
  0xfc   :  { %3837 = vmatpush3.bf16.msra.mxu0 %v4190_v47 }
  0xfd   :  { %3859 = vmatpush3.bf16.msra.mxu1 %v4191_v48  ;;  %3838 = vmatprep.subr.bf16.mxu0 %v4192_v49 }
  0xfe   :  { %3860 = vmatprep.subr.bf16.mxu1 %v4193_v50 }
 0x100   :  { %3839 = vmatpush3.bf16.msra.mxu0 %v4194_v51 }
 0x101   :  { %3861 = vmatpush3.bf16.msra.mxu1 %v4195_v52  ;;  %3868 = vmatprep.subr.bf16.mxu0 %v4200_v58 }
 0x102   :  { %3890 = vmatprep.subr.bf16.mxu1 %v4201_v60 }
 0x103   :  { %3053 = vmatmul.mubr.bf16.vlgmr.msra.gmra.mrb[28].mxu0 %v3219_v55 }
 0x104   :  { %3093 = vmatmul.mubr.bf16.vlgmr.msra.gmra.mrb[28].mxu1 %v3221_v57  ;;  %3869 = vmatpush3.bf16.msra.mxu0 %v4202_v61 }
 0x105   :  { %3891 = vmatpush3.bf16.msra.mxu1 %v4203_v62  ;;  %3870 = vmatprep.subr.bf16.mxu0 %v4204_v63 }
 0x106   :  { %3892 = vmatprep.subr.bf16.mxu1 %v4205_v0  ;;  %3172 = vmatprep.mubr.bf16.mxu1 %v3226_v44 }
 0x108   :  { %3871 = vmatpush3.bf16.msra.mxu0 %v4206_v1 }
 0x109   :  { %3893 = vmatpush3.bf16.msra.mxu1 %v4207_v2  ;;  %3872 = vmatprep.subr.bf16.mxu0 %v4208_v3 }
 0x10a   :  { %3894 = vmatprep.subr.bf16.mxu1 %v4209_v4 }
 0x10c   :  { %3873 = vmatpush3.bf16.msra.mxu0 %v4210_v5 }
 0x10d   :  { %3895 = vmatpush3.bf16.msra.mxu1 %v4211_v6  ;;  %3874 = vmatprep.subr.bf16.mxu0 %v4212_v7 }
 0x10e   :  { %3896 = vmatprep.subr.bf16.mxu1 %v4213_v8 }
 0x110   :  { %3875 = vmatpush3.bf16.msra.mxu0 %v4214_v9 }
 0x111   :  { %3897 = vmatpush3.bf16.msra.mxu1 %v4215_v10  ;;  %3876 = vmatprep.subr.bf16.mxu0 %v4216_v11 }
 0x112   :  { %3898 = vmatprep.subr.bf16.mxu1 %v4217_v12 }
 0x114   :  { %3877 = vmatpush3.bf16.msra.mxu0 %v4218_v13 }
 0x115   :  { %3899 = vmatpush3.bf16.msra.mxu1 %v4219_v15  ;;  %3878 = vmatprep.subr.bf16.mxu0 %v4220_v18 }
 0x116   :  { %v3576_v14 = vpop.f32.mrb[4].mxu0  ;;  %3900 = vmatprep.subr.bf16.mxu1 %v4221_v21 }
 0x117   :  { %v3598_v16 = vpop.f32.mrb[4].mxu1  ;;  %v3577_v17 = vpop.f32.mrb[5].mxu0 }
 0x118   :  { %v3578_v19 = vadd.f32 %v3577_v17, %v3576_v14  ;;  %v3599_v20 = vpop.f32.mrb[5].mxu1  ;;  %v3579_v23 = vpop.f32.mrb[6].mxu0  ;;  %3879 = vmatpush3.bf16.msra.mxu0 %v4222_v26 }
 0x119   :  { %v3600_v22 = vadd.f32 %v3599_v20, %v3598_v16  ;;  %v3601_v24 = vpop.f32.mrb[6].mxu1  ;;  %v3580_v27 = vpop.f32.mrb[7].mxu0  ;;  %3901 = vmatpush3.bf16.msra.mxu1 %v4223_v28  ;;  %3880 = vmatprep.subr.bf16.mxu0 %v4224_v31 }
 0x11a   :  { %v2575_v25 = vadd.f32 %v3578_v19, %v5038_v42  ;;  %v3602_v29 = vpop.f32.mrb[7].mxu1  ;;  %3902 = vmatprep.subr.bf16.mxu1 %v4225_v32  ;;  %v3224_v42 = vcombine.high %v28_v39, %v28_v39 }
 0x11c   :  { %v2615_v30 = vadd.f32 %v3600_v22, %v2575_v25  ;;  %3881 = vmatpush3.bf16.msra.mxu0 %v4226_v33  ;;  %3132 = vmatprep.mubr.bf16.mxu0 %v3224_v42 }
 0x11d   :  { %3903 = vmatpush3.bf16.msra.mxu1 %v4227_v34  ;;  %3882 = vmatprep.subr.bf16.mxu0 %v4228_v35 }
 0x11e   :  { %3904 = vmatprep.subr.bf16.mxu1 %v4229_v36 }
 0x120   :  { %3883 = vmatpush3.bf16.msra.mxu0 %v4230_v37 }
 0x121   :  { %3905 = vmatpush3.bf16.msra.mxu1 %v4231_v38 }
 0x123   :  { %3133 = vmatmul.mubr.bf16.vlgmr.msra.gmra.mrb[32].mxu0 %v3223_v41 }
 0x124   :  { %3173 = vmatmul.mubr.bf16.vlgmr.msra.gmra.mrb[32].mxu1 %v3225_v43 }
 0x136   :  { %v3620_v45 = vpop.f32.mrb[8].mxu0 }
 0x137   :  { %v3642_v46 = vpop.f32.mrb[8].mxu1  ;;  %v3621_v47 = vpop.f32.mrb[9].mxu0 }
 0x138   :  { %v3622_v48 = vadd.f32 %v3621_v47, %v3620_v45  ;;  %v3643_v49 = vpop.f32.mrb[9].mxu1  ;;  %v3623_v50 = vpop.f32.mrb[10].mxu0 }
 0x139   :  { %v3644_v51 = vadd.f32 %v3643_v49, %v3642_v46  ;;  %v3645_v52 = vpop.f32.mrb[10].mxu1  ;;  %v3624_v53 = vpop.f32.mrb[11].mxu0 }
 0x13a   :  { %v2655_v54 = vadd.f32 %v3622_v48, %v2615_v30  ;;  %v3646_v55 = vpop.f32.mrb[11].mxu1 }
 0x13c   :  { %v2695_v56 = vadd.f32 %v3644_v51, %v2655_v54 }
 0x156   :  { %v3664_v57 = vpop.f32.mrb[12].mxu0 }
 0x157   :  { %v3686_v58 = vpop.f32.mrb[12].mxu1  ;;  %v3665_v59 = vpop.f32.mrb[13].mxu0 }
 0x158   :  { %v3666_v60 = vadd.f32 %v3665_v59, %v3664_v57  ;;  %v3687_v61 = vpop.f32.mrb[13].mxu1  ;;  %v3667_v62 = vpop.f32.mrb[14].mxu0 }
 0x159   :  { %v3688_v63 = vadd.f32 %v3687_v61, %v3686_v58  ;;  %v3689_v0 = vpop.f32.mrb[14].mxu1  ;;  %v3668_v1 = vpop.f32.mrb[15].mxu0 }
 0x15a   :  { %v2735_v2 = vadd.f32 %v3666_v60, %v2695_v56  ;;  %v3690_v3 = vpop.f32.mrb[15].mxu1 }
 0x15c   :  { %v2775_v4 = vadd.f32 %v3688_v63, %v2735_v2 }
 0x176   :  { %v3708_v5 = vpop.f32.mrb[16].mxu0 }
 0x177   :  { %v3730_v6 = vpop.f32.mrb[16].mxu1  ;;  %v3709_v7 = vpop.f32.mrb[17].mxu0 }
 0x178   :  { %v3731_v8 = vpop.f32.mrb[17].mxu1  ;;  %v3710_v9 = vadd.f32 %v3709_v7, %v3708_v5  ;;  %v3711_v11 = vpop.f32.mrb[18].mxu0 }
 0x179   :  { %v3732_v10 = vadd.f32 %v3731_v8, %v3730_v6  ;;  %v3733_v12 = vpop.f32.mrb[18].mxu1  ;;  %v3712_v13 = vpop.f32.mrb[19].mxu0 }
 0x17a   :  { %v3734_v14 = vpop.f32.mrb[19].mxu1  ;;  %v2815_v15 = vadd.f32 %v3710_v9, %v2775_v4 }
 0x17c   :  { %v2855_v16 = vadd.f32 %v3732_v10, %v2815_v15 }
 0x196   :  { %v3752_v17 = vpop.f32.mrb[20].mxu0 }
 0x197   :  { %v3774_v18 = vpop.f32.mrb[20].mxu1  ;;  %v3753_v19 = vpop.f32.mrb[21].mxu0 }
 0x198   :  { %v3754_v20 = vadd.f32 %v3753_v19, %v3752_v17  ;;  %v3775_v21 = vpop.f32.mrb[21].mxu1  ;;  %v3755_v22 = vpop.f32.mrb[22].mxu0 }
 0x199   :  { %v3776_v23 = vadd.f32 %v3775_v21, %v3774_v18  ;;  %v3777_v24 = vpop.f32.mrb[22].mxu1  ;;  %v3756_v25 = vpop.f32.mrb[23].mxu0 }
 0x19a   :  { %v2895_v26 = vadd.f32 %v3754_v20, %v2855_v16  ;;  %v3778_v27 = vpop.f32.mrb[23].mxu1 }
 0x19c   :  { %v2935_v28 = vadd.f32 %v3776_v23, %v2895_v26 }
 0x1b6   :  { %v3796_v29 = vpop.f32.mrb[24].mxu0 }
 0x1b7   :  { %v3818_v30 = vpop.f32.mrb[24].mxu1  ;;  %v3797_v31 = vpop.f32.mrb[25].mxu0 }
 0x1b8   :  { %v3798_v32 = vadd.f32 %v3797_v31, %v3796_v29  ;;  %v3819_v33 = vpop.f32.mrb[25].mxu1  ;;  %v3799_v34 = vpop.f32.mrb[26].mxu0 }
 0x1b9   :  { %v3820_v35 = vadd.f32 %v3819_v33, %v3818_v30  ;;  %v3821_v36 = vpop.f32.mrb[26].mxu1  ;;  %v3800_v37 = vpop.f32.mrb[27].mxu0 }
 0x1ba   :  { %v2975_v38 = vadd.f32 %v3798_v32, %v2935_v28  ;;  %v3822_v39 = vpop.f32.mrb[27].mxu1 }
 0x1bc   :  { %v3015_v40 = vadd.f32 %v3820_v35, %v2975_v38 }
 0x1d6   :  { %v3840_v41 = vpop.f32.mrb[28].mxu0 }
 0x1d7   :  { %v3862_v42 = vpop.f32.mrb[28].mxu1  ;;  %v3841_v43 = vpop.f32.mrb[29].mxu0 }
 0x1d8   :  { %v3842_v44 = vadd.f32 %v3841_v43, %v3840_v41  ;;  %v3863_v45 = vpop.f32.mrb[29].mxu1  ;;  %v3843_v46 = vpop.f32.mrb[30].mxu0 }
 0x1d9   :  { %v3864_v47 = vadd.f32 %v3863_v45, %v3862_v42  ;;  %v3865_v48 = vpop.f32.mrb[30].mxu1  ;;  %v3844_v49 = vpop.f32.mrb[31].mxu0 }
 0x1da   :  { %v3055_v50 = vadd.f32 %v3842_v44, %v3015_v40  ;;  %v3866_v51 = vpop.f32.mrb[31].mxu1 }
 0x1dc   :  { %v3095_v52 = vadd.f32 %v3864_v47, %v3055_v50 }
 0x1f6   :  { %v3884_v53 = vpop.f32.mrb[32].mxu0 }
 0x1f7   :  { %v3906_v54 = vpop.f32.mrb[32].mxu1  ;;  %v3885_v55 = vpop.f32.mrb[33].mxu0 }
 0x1f8   :  { %v3886_v56 = vadd.f32 %v3885_v55, %v3884_v53  ;;  %v3907_v57 = vpop.f32.mrb[33].mxu1  ;;  %v3887_v58 = vpop.f32.mrb[34].mxu0 }
 0x1f9   :  { %v3908_v59 = vadd.f32 %v3907_v57, %v3906_v54  ;;  %v3909_v60 = vpop.f32.mrb[34].mxu1  ;;  %v3888_v61 = vpop.f32.mrb[35].mxu0 }
 0x1fa   :  { %v3135_v62 = vadd.f32 %v3886_v56, %v3095_v52  ;;  %v3910_v63 = vpop.f32.mrb[35].mxu1 }
 0x1fc   :  { %v3175_v0 = vadd.f32 %v3908_v59, %v3135_v62 }
 0x1fe   :  { %v3515_v1 = vmul.f32 -1.442695, %v3175_v0 }
 0x200   :  { %4236 = vpow2.f32 %v3515_v1 }
 0x20a   :  { %v4237_v2 = vpop.eup %4236 }
 0x20b   :  { %v3183_v3 = vadd.f32 1.0, %v4237_v2 }
 0x20d   :  { %4238 = vrcp.f32 %v3183_v3 }
 0x217   :  { %v4239_v4 = vpop.eup %4238 }
 0x218   :  { %3186 = vst [vmem:[%s5181_s2] sm:$0xff] %v4239_v4 }

</bundles_post_ra>
